<compile_context>
chip_gen: v7x
topology: tpu7x:2x2x1
jax: 0.10.0
libtpu: 0.0.40
codegen_flags: <defaults>
</compile_context>

<pallas_src>
import jax
import jax.numpy as jnp
from jax.experimental import pallas as pl
from jax.experimental.pallas import tpu as pltpu

TM_CAP = 1024                          # review #4: 512-1024 tiles hit ~85% of HBM roofline
VMEM_TILE_BUDGET = 24 * 1024 * 1024    # streamed (double-buffered) working-set cap
VMEM_LIMIT = 64 * 1024 * 1024


def _round_up(x, m):
    return ((x + m - 1) // m) * m


# ----------------------------------------------------------------------------
# Pallas kernels
# ----------------------------------------------------------------------------

def _make_matmul_bias_kernel(has_residual: bool, apply_relu: bool):
    """bf16 matmul (BN scale pre-folded into W) + bias (+ residual) (+ ReLU)."""
    if has_residual:
        def kernel(x_ref, w_ref, b_ref, r_ref, o_ref):
            y = jnp.dot(x_ref[...], w_ref[...],
                        preferred_element_type=jnp.float32)
            y = y + b_ref[...] + r_ref[...].astype(jnp.float32)
            if apply_relu:
                y = jnp.maximum(y, 0.0)
            o_ref[...] = y.astype(o_ref.dtype)
    else:
        def kernel(x_ref, w_ref, b_ref, o_ref):
            y = jnp.dot(x_ref[...], w_ref[...],
                        preferred_element_type=jnp.float32)
            y = y + b_ref[...]
            if apply_relu:
                y = jnp.maximum(y, 0.0)
            o_ref[...] = y.astype(o_ref.dtype)
    return kernel


def _maxpool9_kernel(e00_ref, e01_ref, e10_ref, e11_ref, o_ref):
    """3x3 stride-2 max pool; the 9 windows are formed in-kernel from the four
    2x2 polyphase components of the padded activation (static slices only)."""
    oh, ow, _ = o_ref.shape
    comps = ((e00_ref[...], e01_ref[...]), (e10_ref[...], e11_ref[...]))
    vals = []
    for ky in range(3):
        for kx in range(3):
            v = comps[ky % 2][kx % 2]
            dy, dx = ky // 2, kx // 2
            vals.append(v[dy:dy + oh, dx:dx + ow, :])
    # pairwise tree reduction (no long serial VALU dependency chain)
    while len(vals) > 1:
        nxt = [jnp.maximum(vals[i], vals[i + 1])
               for i in range(0, len(vals) - 1, 2)]
        if len(vals) % 2:
            nxt.append(vals[-1])
        vals = nxt
    o_ref[...] = vals[0]


def _conv_res_gap_fc_kernel(x_ref, w_ref, b_ref, r_ref, pool_ref,
                            fcw_ref, fcb_ref, logits_ref, feat_ref):
    """Final conv2 (+BN bias, +residual, +ReLU) fused with global-average-pool
    (as a pooling-matrix matmul -> no in-kernel reshapes) and the FC layer."""
    y = jnp.dot(x_ref[...], w_ref[...], preferred_element_type=jnp.float32)
    y = y + b_ref[...] + r_ref[...].astype(jnp.float32)
    y = jnp.maximum(y, 0.0)
    h = jnp.dot(pool_ref[...], y, preferred_element_type=jnp.float32)   # (N, C)
    feat_ref[...] = h
    logits_ref[...] = (jnp.dot(h, fcw_ref[...],
                               preferred_element_type=jnp.float32)
                       + fcb_ref[...])


# ----------------------------------------------------------------------------
# Pallas wrappers
# ----------------------------------------------------------------------------

def _pick_tm(M, K, N, has_residual, out_bytes=2):
    """Largest M-tile (multiple of 8, <= TM_CAP) whose *streamed*,
    double-buffered working set fits the budget.  The weight / bias blocks have
    a constant index_map (resident across the grid) so they are counted once
    (review #4)."""
    TM = min(TM_CAP, _round_up(M, 8))

    def working_set(tm):
        streamed = tm * K * 2 + tm * N * out_bytes        # bf16 patches + out
        if has_residual:
            streamed += tm * N * 2
        resident = K * N * 2 + N * 4                      # bf16 weight + f32 bias
        return 2 * streamed + resident                    # x2: double buffering

    while TM > 8 and working_set(TM) > VMEM_TILE_BUDGET:
        TM = _round_up(max(TM // 2, 8), 8)

    # v7x has 2 TensorCores; dimension_semantics=("parallel",) only shards the
    # M grid if it has >= 2 steps (review #5).  Harmless elsewhere.
    if M >= 16 and _round_up(M, TM) // TM < 2:
        TM = _round_up(pl.cdiv(M, 2), 8)
    return TM


def matmul_bias_act(x2d, w2d, bias, residual=None, relu=True,
                    out_dtype=jnp.bfloat16):
    """y = act((x2d @ w2d) + bias [+ residual]), tiled & pipelined over M."""
    M, K = x2d.shape
    Kw, N = w2d.shape
    assert Kw == K, (Kw, K)
    TM = _pick_tm(M, K, N, residual is not None)
    Mp = _round_up(M, TM)
    if Mp != M:
        # NOTE: padded rows evaluate to relu(bias); they are sliced off below.
        x2d = jnp.pad(x2d, ((0, Mp - M), (0, 0)))
        if residual is not None:
            residual = jnp.pad(residual, ((0, Mp - M), (0, 0)))

    inputs = [x2d, w2d, bias]
    in_specs = [
        pl.BlockSpec((TM, K), lambda i: (i, 0)),      # patches: streamed over M
        pl.BlockSpec((K, N), lambda i: (0, 0)),       # weight: resident
        pl.BlockSpec((1, N), lambda i: (0, 0)),       # bias:   resident
    ]
    if residual is not None:
        inputs.append(residual)
        in_specs.append(pl.BlockSpec((TM, N), lambda i: (i, 0)))

    out = pl.pallas_call(
        _make_matmul_bias_kernel(residual is not None, relu),
        out_shape=jax.ShapeDtypeStruct((Mp, N), out_dtype),
        grid=(Mp // TM,),
        in_specs=in_specs,
        out_specs=pl.BlockSpec((TM, N), lambda i: (i, 0)),
        compiler_params=pltpu.CompilerParams(
            dimension_semantics=("parallel",),
            vmem_limit_bytes=VMEM_LIMIT),
    )(*inputs)
    return out[:M] if Mp != M else out


def _im2col(x, kh, kw, stride, pad, k_pad_to=None):
    """x: (N, H, W, C) bf16 -> (N*OH*OW, KH*KW*C) with (ky, kx, c) inner order.

    TODO(synk): fold this patch extraction into the conv kernel (per-tap
    in-kernel accumulation) to remove the remaining KH*KW HBM read
    amplification; kept in plain JAX here because with un-padded channels the
    per-tap K (= Cin) would badly under-fill the MXU / vregs at these widths.
    """
    if pad > 0:
        x = jnp.pad(x, ((0, 0), (pad, pad), (pad, pad), (0, 0)))
    n, h, w, c = x.shape
    oh = (h - kh) // stride + 1
    ow = (w - kw) // stride + 1
    views = [x[:, i:i + stride * oh:stride, j:j + stride * ow:stride, :]
             for i in range(kh) for j in range(kw)]
    k = kh * kw * c
    if k_pad_to is not None and k_pad_to > k:
        views.append(jnp.zeros((n, oh, ow, k_pad_to - k), x.dtype))
        k = k_pad_to
    patches = views[0] if len(views) == 1 else jnp.concatenate(views, axis=-1)
    return patches.reshape(n * oh * ow, k), (n, oh, ow)


def conv_bn(x, conv, stride, pad, relu=True, residual=None):
    """x: NHWC bf16 (real channel counts); conv holds the scale-folded weight."""
    w2d, bias, kh, kw = conv["w2d"], conv["bias"], conv["kh"], conv["kw"]
    patches, (n, oh, ow) = _im2col(x, kh, kw, stride, pad,
                                   k_pad_to=conv["k_pad"])
    cout = w2d.shape[1]
    res2d = residual.reshape(n * oh * ow, cout) if residual is not None else None
    y = matmul_bias_act(patches, w2d, bias, res2d, relu)
    return y.reshape(n, oh, ow, cout)


def maxpool_3x3_s2_p1(x):
    n, h, w, c = x.shape
    pad = 1
    oh = (h + 2 * pad - 3) // 2 + 1
    ow = (w + 2 * pad - 3) // 2 + 1
    xp = jnp.pad(x, ((0, 0), (pad, pad), (pad, pad), (0, 0)),
                 constant_values=float("-inf"))
    # 2x2 polyphase split: 4 strided slices totalling ~1x the activation bytes
    # (instead of 9 materialised shifted windows, review #3).
    comps = [xp[:, a::2, b::2, :] for a in range(2) for b in range(2)]
    in_specs = [pl.BlockSpec((None,) + e.shape[1:], lambda b: (b, 0, 0, 0))
                for e in comps]
    out = pl.pallas_call(
        _maxpool9_kernel,
        out_shape=jax.ShapeDtypeStruct((n, oh, ow, c), x.dtype),
        grid=(n,),
        in_specs=in_specs,
        out_specs=pl.BlockSpec((None, oh, ow, c), lambda b: (b, 0, 0, 0)),
        compiler_params=pltpu.CompilerParams(
            dimension_semantics=("parallel",),
            vmem_limit_bytes=VMEM_LIMIT),
    )(*comps)
    return out


def conv_bn_res_relu_gap_fc(x, conv, residual, fc_w, fc_b):
    """Final conv2 + BN + residual + ReLU fused with avg-pool + FC (review #10).

    Requires the (tiny) final feature map to fit in one tile; falls back to the
    tiled conv kernel plus an XLA mean/matmul otherwise.
    """
    patches, (n, oh, ow) = _im2col(x, conv["kh"], conv["kw"], 1, 1,
                                   k_pad_to=conv["k_pad"])
    M, _ = patches.shape
    cout = conv["w2d"].shape[1]
    out_dim = fc_w.shape[1]
    res2d = residual.reshape(M, cout)
    if M > 1024:   # fallback for big final maps
        y = matmul_bias_act(patches, conv["w2d"], conv["bias"], res2d, relu=True)
        h = jnp.mean(y.reshape(n, oh * ow, cout).astype(jnp.float32), axis=1)
        return h @ fc_w + fc_b, h
    # pooling matrix: pool[i, r] = 1/(OH*OW) if row r belongs to image i
    pool = jnp.repeat(jnp.eye(n, dtype=jnp.float32), oh * ow, axis=1) / (oh * ow)
    logits, feat = pl.pallas_call(
        _conv_res_gap_fc_kernel,
        out_shape=(jax.ShapeDtypeStruct((n, out_dim), jnp.float32),
                   jax.ShapeDtypeStruct((n, cout), jnp.float32)),
    )(patches, conv["w2d"], conv["bias"], res2d, pool, fc_w, fc_b)
    return logits, feat


# ----------------------------------------------------------------------------
# Model: parameter init (faithful shapes) + TPU-friendly preparation
# ----------------------------------------------------------------------------

def init_params(key, channels=(8, 16, 32, 64), n_blocks=(1, 1, 1, 1),
                output_dim=16):
    keys = iter(jax.random.split(key, 512))

    def nk():
        return next(keys)

    def conv_w(cout, cin, kh, kw):
        fan_in = cin * kh * kw
        return (jax.random.normal(nk(), (cout, cin, kh, kw), jnp.float32)
                * ((2.0 / fan_in) ** 0.5))

    def bn(c, eps=1e-5):
        g = jax.random.uniform(nk(), (c,), jnp.float32, 0.5, 1.5)
        b = jax.random.normal(nk(), (c,), jnp.float32) * 0.1
        m = jax.random.normal(nk(), (c,), jnp.float32) * 0.1
        v = jax.random.uniform(nk(), (c,), jnp.float32, 0.5, 1.5)
        scale = g / jnp.sqrt(v + eps)
        bias = b - m * scale
        return scale, bias

    in_c = channels[0]
    params = {"conv1_w": conv_w(in_c, 3, 7, 7)}
    params["bn1_scale"], params["bn1_bias"] = bn(in_c)

    layers = []
    for li, (nb, ch) in enumerate(zip(n_blocks, channels)):
        layer_stride = 1 if li == 0 else 2
        blocks = []
        for bi in range(nb):
            s = layer_stride if bi == 0 else 1
            cin = in_c if bi == 0 else ch
            downsample = (bi == 0 and cin != ch)
            blk = {"stride": s, "conv1_w": conv_w(ch, cin, 3, 3)}
            blk["bn1_scale"], blk["bn1_bias"] = bn(ch)
            blk["conv2_w"] = conv_w(ch, ch, 3, 3)
            blk["bn2_scale"], blk["bn2_bias"] = bn(ch)
            if downsample:
                blk["down_w"] = conv_w(ch, cin, 1, 1)
                blk["down_scale"], blk["down_bias"] = bn(ch)
            else:
                blk["down_w"] = None
            blocks.append(blk)
        in_c = ch
        layers.append(blocks)
    params["layers"] = layers

    fc_w = (jax.random.normal(nk(), (output_dim, in_c), jnp.float32)
            * (1.0 / (in_c ** 0.5)))
    fc_b = jax.random.normal(nk(), (output_dim,), jnp.float32) * 0.01
    params["fc_w"] = jnp.transpose(fc_w)              # (in_c, out_dim)
    params["fc_b"] = fc_b.reshape(1, output_dim)
    return params


def _fold_conv_bn(w, scale, bias, k_pad_to=None):
    """Fold inference-mode BN scale into the reshaped conv weight (f32), cast
    to bf16 exactly once.  No channel padding (review #1)."""
    cout, cin, kh, kw = w.shape
    w2d = jnp.transpose(w, (2, 3, 1, 0)).reshape(kh * kw * cin, cout)
    w2d = w2d * scale[None, :]                         # fold in f32
    if k_pad_to is not None and k_pad_to > w2d.shape[0]:
        w2d = jnp.pad(w2d, ((0, k_pad_to - w2d.shape[0]), (0, 0)))
    return {"w2d": w2d.astype(jnp.bfloat16),           # single f32->bf16 cast
            "bias": bias.reshape(1, cout).astype(jnp.float32),
            "kh": kh, "kw": kw, "k_pad": k_pad_to}


def prepare_params(params):
    # Stem: pad K = 7*7*3 = 147 -> 160 (bf16 sublane multiple, review #9).
    prep = {"conv1": _fold_conv_bn(params["conv1_w"], params["bn1_scale"],
                                   params["bn1_bias"], k_pad_to=160)}
    layers = []
    for blocks in params["layers"]:
        pblocks = []
        for blk in blocks:
            pblk = {
                "stride": blk["stride"],
                "conv1": _fold_conv_bn(blk["conv1_w"], blk["bn1_scale"],
                                       blk["bn1_bias"]),
                "conv2": _fold_conv_bn(blk["conv2_w"], blk["bn2_scale"],
                                       blk["bn2_bias"]),
            }
            if blk["down_w"] is not None:
                pblk["down"] = _fold_conv_bn(blk["down_w"], blk["down_scale"],
                                             blk["down_bias"])
            else:
                pblk["down"] = None
            pblocks.append(pblk)
        layers.append(pblocks)
    prep["layers"] = layers
    prep["fc_w"] = params["fc_w"].astype(jnp.float32)   # (C_last, out_dim)
    prep["fc_b"] = params["fc_b"].astype(jnp.float32)   # (1, out_dim)
    return prep


# ----------------------------------------------------------------------------
# Forward
# ----------------------------------------------------------------------------

def basic_block(x, blk):
    identity = x
    s = blk["stride"]
    out = conv_bn(x, blk["conv1"], stride=s, pad=1, relu=True)
    if blk["down"] is not None:
        identity = conv_bn(x, blk["down"], stride=s, pad=0, relu=False)
    # conv2 + bn2 + residual add + relu fused in one Pallas kernel
    return conv_bn(out, blk["conv2"], stride=1, pad=1, relu=True,
                   residual=identity)


def basic_block_with_head(x, blk, fc_w, fc_b):
    identity = x
    s = blk["stride"]
    out = conv_bn(x, blk["conv1"], stride=s, pad=1, relu=True)
    if blk["down"] is not None:
        identity = conv_bn(x, blk["down"], stride=s, pad=0, relu=False)
    # last conv2 + residual + relu + global-avg-pool + FC in ONE kernel
    return conv_bn_res_relu_gap_fc(out, blk["conv2"], identity, fc_w, fc_b)


def resnet_forward(x_nchw, prep):
    x = jnp.transpose(x_nchw, (0, 2, 3, 1)).astype(jnp.bfloat16)  # NCHW -> NHWC
    x = conv_bn(x, prep["conv1"], stride=2, pad=3, relu=True)
    x = maxpool_3x3_s2_p1(x)
    all_blocks = [blk for blocks in prep["layers"] for blk in blocks]
    for blk in all_blocks[:-1]:
        x = basic_block(x, blk)
    logits, feat = basic_block_with_head(x, all_blocks[-1],
                                         prep["fc_w"], prep["fc_b"])
    return logits, feat


# ----------------------------------------------------------------------------
# Demo
# ----------------------------------------------------------------------------

if __name__ == "__main__":
    key = jax.random.PRNGKey(0)
    k_in, k_par = jax.random.split(key)

    channels = (8, 16, 32, 64)
    n_blocks = (1, 1, 1, 1)
    output_dim = 16

    raw_params = init_params(k_par, channels=channels, n_blocks=n_blocks,
                             output_dim=output_dim)
    prep = prepare_params(raw_params)

    # PyTorch-convention input: NCHW, 3-channel image
    x = jax.random.normal(k_in, (2, 3, 64, 64), jnp.float32)

    forward = jax.jit(lambda inp: resnet_forward(inp, prep))
    logits, feat = forward(x)
    jax.block_until_ready((logits, feat))

    assert logits.shape == (2, output_dim), logits.shape
    assert feat.shape == (2, channels[-1]), feat.shape
    assert logits.dtype == jnp.float32 and feat.dtype == jnp.float32
    assert bool(jnp.all(jnp.isfinite(logits))) and bool(jnp.all(jnp.isfinite(feat)))

    print("KERNEL_OK")
</pallas_src>

<mosaic_0001>
module attributes {stable_mosaic.version = 11 : i64} {
  func.func @kernel(%arg0: i32, %arg1: memref<1024x160xbf16, #tpu.memory_space<vmem>>, %arg2: memref<160x8xbf16, #tpu.memory_space<vmem>>, %arg3: memref<1x8xf32, #tpu.memory_space<vmem>>, %arg4: memref<1024x8xbf16, #tpu.memory_space<vmem>>) attributes {dimension_semantics = [#tpu.dimension_semantics<parallel>], iteration_bounds = array<i64: 2>, scalar_prefetch = 0 : i64, scratch_operands = 0 : i64, tpu.core_type = #tpu.core_type<tc>, window_params = [{transform_indices = @transform_0, window_bounds = array<i64: 1024, 160>}, {pipeline_mode = #tpu.pipeline_mode<synchronous>, transform_indices = @transform_1, window_bounds = array<i64: 160, 8>}, {pipeline_mode = #tpu.pipeline_mode<synchronous>, transform_indices = @transform_2, window_bounds = array<i64: 1, 8>}, {transform_indices = @transform_3, window_bounds = array<i64: 1024, 8>}]} {
    %c0 = arith.constant 0 : index
    %c0_0 = arith.constant 0 : index
    %0 = vector.load %arg1[%c0, %c0_0] : memref<1024x160xbf16, #tpu.memory_space<vmem>>, vector<1024x160xbf16>
    %c0_1 = arith.constant 0 : index
    %c0_2 = arith.constant 0 : index
    %1 = vector.load %arg2[%c0_1, %c0_2] : memref<160x8xbf16, #tpu.memory_space<vmem>>, vector<160x8xbf16>
    %cst = arith.constant dense<0.000000e+00> : vector<1024x8xf32>
    %2 = tpu.matmul %0, %1, %cst {dimension_numbers = #tpu.dot_dimension_numbers<[1], [0], [0], [1], [0, 0, 1, 1], [], []>} : vector<1024x160xbf16>, vector<160x8xbf16>, vector<1024x8xf32> -> vector<1024x8xf32>
    %c0_3 = arith.constant 0 : index
    %c0_4 = arith.constant 0 : index
    %3 = vector.load %arg3[%c0_3, %c0_4] : memref<1x8xf32, #tpu.memory_space<vmem>>, vector<1x8xf32>
    %4 = vector.broadcast %3 : vector<1x8xf32> to vector<1024x8xf32>
    %5 = arith.addf %2, %4 : vector<1024x8xf32>
    %cst_5 = arith.constant 0.000000e+00 : f32
    %6 = vector.broadcast %cst_5 : f32 to vector<1024x8xf32>
    %7 = arith.maximumf %5, %6 : vector<1024x8xf32>
    %8 = arith.truncf %7 : vector<1024x8xf32> to vector<1024x8xbf16>
    %c0_6 = arith.constant 0 : index
    %c0_7 = arith.constant 0 : index
    %9 = vector.load %arg4[%c0_6, %c0_7] : memref<1024x8xbf16, #tpu.memory_space<vmem>>, vector<1024x8xbf16>
    tpu.vector_store %arg4[%c0_6, %c0_7], %8 {strides = array<i32>} : memref<1024x8xbf16, #tpu.memory_space<vmem>>, vector<1024x8xbf16>,
    return
  }
  func.func @transform_0(%arg0: i32) -> (i32, i32) {
    %c0_i32 = arith.constant 0 : i32
    %c0_i32_0 = arith.constant 0 : i32
    return %arg0, %c0_i32 : i32, i32
  }
  func.func @transform_1(%arg0: i32) -> (i32, i32) {
    %c0_i32 = arith.constant 0 : i32
    %c0_i32_0 = arith.constant 0 : i32
    %c0_i32_1 = arith.constant 0 : i32
    return %c0_i32, %c0_i32_0 : i32, i32
  }
  func.func @transform_2(%arg0: i32) -> (i32, i32) {
    %c0_i32 = arith.constant 0 : i32
    %c0_i32_0 = arith.constant 0 : i32
    %c0_i32_1 = arith.constant 0 : i32
    return %c0_i32, %c0_i32_0 : i32, i32
  }
  func.func @transform_3(%arg0: i32) -> (i32, i32) {
    %c0_i32 = arith.constant 0 : i32
    %c0_i32_0 = arith.constant 0 : i32
    return %arg0, %c0_i32 : i32, i32
  }
}

module attributes {stable_mosaic.version = 11 : i64} {
  func.func @_maxpool9_kernel(%arg0: i32, %arg1: memref<1x17x17x8xbf16, #tpu.memory_space<vmem>>, %arg2: memref<1x17x17x8xbf16, #tpu.memory_space<vmem>>, %arg3: memref<1x17x17x8xbf16, #tpu.memory_space<vmem>>, %arg4: memref<1x17x17x8xbf16, #tpu.memory_space<vmem>>, %arg5: memref<1x16x16x8xbf16, #tpu.memory_space<vmem>>) attributes {dimension_semantics = [#tpu.dimension_semantics<parallel>], iteration_bounds = array<i64: 2>, scalar_prefetch = 0 : i64, scratch_operands = 0 : i64, tpu.core_type = #tpu.core_type<tc>, window_params = [{transform_indices = @transform_0, window_bounds = array<i64: 1, 17, 17, 8>}, {transform_indices = @transform_1, window_bounds = array<i64: 1, 17, 17, 8>}, {transform_indices = @transform_2, window_bounds = array<i64: 1, 17, 17, 8>}, {transform_indices = @transform_3, window_bounds = array<i64: 1, 17, 17, 8>}, {transform_indices = @transform_4, window_bounds = array<i64: 1, 16, 16, 8>}]} {
    %c0 = arith.constant 0 : index
    %c0_0 = arith.constant 0 : index
    %c0_1 = arith.constant 0 : index
    %c0_2 = arith.constant 0 : index
    %0 = vector.load %arg1[%c0, %c0_0, %c0_1, %c0_2] : memref<1x17x17x8xbf16, #tpu.memory_space<vmem>>, vector<1x17x17x8xbf16>
    %1 = vector.shape_cast %0 : vector<1x17x17x8xbf16> to vector<17x17x8xbf16>
    %c0_3 = arith.constant 0 : index
    %c0_4 = arith.constant 0 : index
    %c0_5 = arith.constant 0 : index
    %c0_6 = arith.constant 0 : index
    %2 = vector.load %arg2[%c0_3, %c0_4, %c0_5, %c0_6] : memref<1x17x17x8xbf16, #tpu.memory_space<vmem>>, vector<1x17x17x8xbf16>
    %3 = vector.shape_cast %2 : vector<1x17x17x8xbf16> to vector<17x17x8xbf16>
    %c0_7 = arith.constant 0 : index
    %c0_8 = arith.constant 0 : index
    %c0_9 = arith.constant 0 : index
    %c0_10 = arith.constant 0 : index
    %4 = vector.load %arg3[%c0_7, %c0_8, %c0_9, %c0_10] : memref<1x17x17x8xbf16, #tpu.memory_space<vmem>>, vector<1x17x17x8xbf16>
    %5 = vector.shape_cast %4 : vector<1x17x17x8xbf16> to vector<17x17x8xbf16>
    %c0_11 = arith.constant 0 : index
    %c0_12 = arith.constant 0 : index
    %c0_13 = arith.constant 0 : index
    %c0_14 = arith.constant 0 : index
    %6 = vector.load %arg4[%c0_11, %c0_12, %c0_13, %c0_14] : memref<1x17x17x8xbf16, #tpu.memory_space<vmem>>, vector<1x17x17x8xbf16>
    %7 = vector.shape_cast %6 : vector<1x17x17x8xbf16> to vector<17x17x8xbf16>
    %8 = vector.extract_strided_slice %1 {offsets = [0, 0, 0], sizes = [16, 16, 8], strides = [1, 1, 1]} : vector<17x17x8xbf16> to vector<16x16x8xbf16>
    %9 = vector.extract_strided_slice %3 {offsets = [0, 0, 0], sizes = [16, 16, 8], strides = [1, 1, 1]} : vector<17x17x8xbf16> to vector<16x16x8xbf16>
    %10 = vector.extract_strided_slice %1 {offsets = [0, 1, 0], sizes = [16, 16, 8], strides = [1, 1, 1]} : vector<17x17x8xbf16> to vector<16x16x8xbf16>
    %11 = vector.extract_strided_slice %5 {offsets = [0, 0, 0], sizes = [16, 16, 8], strides = [1, 1, 1]} : vector<17x17x8xbf16> to vector<16x16x8xbf16>
    %12 = vector.extract_strided_slice %7 {offsets = [0, 0, 0], sizes = [16, 16, 8], strides = [1, 1, 1]} : vector<17x17x8xbf16> to vector<16x16x8xbf16>
    %13 = vector.extract_strided_slice %5 {offsets = [0, 1, 0], sizes = [16, 16, 8], strides = [1, 1, 1]} : vector<17x17x8xbf16> to vector<16x16x8xbf16>
    %14 = vector.extract_strided_slice %1 {offsets = [1, 0, 0], sizes = [16, 16, 8], strides = [1, 1, 1]} : vector<17x17x8xbf16> to vector<16x16x8xbf16>
    %15 = vector.extract_strided_slice %3 {offsets = [1, 0, 0], sizes = [16, 16, 8], strides = [1, 1, 1]} : vector<17x17x8xbf16> to vector<16x16x8xbf16>
    %16 = vector.extract_strided_slice %1 {offsets = [1, 1, 0], sizes = [16, 16, 8], strides = [1, 1, 1]} : vector<17x17x8xbf16> to vector<16x16x8xbf16>
    %17 = arith.maximumf %8, %9 : vector<16x16x8xbf16>
    %18 = arith.maximumf %10, %11 : vector<16x16x8xbf16>
    %19 = arith.maximumf %12, %13 : vector<16x16x8xbf16>
    %20 = arith.maximumf %14, %15 : vector<16x16x8xbf16>
    %21 = arith.maximumf %17, %18 : vector<16x16x8xbf16>
    %22 = arith.maximumf %19, %20 : vector<16x16x8xbf16>
    %23 = arith.maximumf %21, %22 : vector<16x16x8xbf16>
    %24 = arith.maximumf %23, %16 : vector<16x16x8xbf16>
    %c0_15 = arith.constant 0 : index
    %c0_16 = arith.constant 0 : index
    %c0_17 = arith.constant 0 : index
    %c0_18 = arith.constant 0 : index
    %25 = vector.load %arg5[%c0_15, %c0_16, %c0_17, %c0_18] : memref<1x16x16x8xbf16, #tpu.memory_space<vmem>>, vector<1x16x16x8xbf16>
    %26 = vector.shape_cast %25 : vector<1x16x16x8xbf16> to vector<16x16x8xbf16>
    %27 = vector.shape_cast %24 : vector<16x16x8xbf16> to vector<1x16x16x8xbf16>
    tpu.vector_store %arg5[%c0_15, %c0_16, %c0_17, %c0_18], %27 {strides = array<i32>} : memref<1x16x16x8xbf16, #tpu.memory_space<vmem>>, vector<1x16x16x8xbf16>,
    return
  }
  func.func @transform_0(%arg0: i32) -> (i32, i32, i32, i32) {
    %c0_i32 = arith.constant 0 : i32
    %c0_i32_0 = arith.constant 0 : i32
    %c0_i32_1 = arith.constant 0 : i32
    %c0_i32_2 = arith.constant 0 : i32
    return %arg0, %c0_i32, %c0_i32_0, %c0_i32_1 : i32, i32, i32, i32
  }
  func.func @transform_1(%arg0: i32) -> (i32, i32, i32, i32) {
    %c0_i32 = arith.constant 0 : i32
    %c0_i32_0 = arith.constant 0 : i32
    %c0_i32_1 = arith.constant 0 : i32
    %c0_i32_2 = arith.constant 0 : i32
    return %arg0, %c0_i32, %c0_i32_0, %c0_i32_1 : i32, i32, i32, i32
  }
  func.func @transform_2(%arg0: i32) -> (i32, i32, i32, i32) {
    %c0_i32 = arith.constant 0 : i32
    %c0_i32_0 = arith.constant 0 : i32
    %c0_i32_1 = arith.constant 0 : i32
    %c0_i32_2 = arith.constant 0 : i32
    return %arg0, %c0_i32, %c0_i32_0, %c0_i32_1 : i32, i32, i32, i32
  }
  func.func @transform_3(%arg0: i32) -> (i32, i32, i32, i32) {
    %c0_i32 = arith.constant 0 : i32
    %c0_i32_0 = arith.constant 0 : i32
    %c0_i32_1 = arith.constant 0 : i32
    %c0_i32_2 = arith.constant 0 : i32
    return %arg0, %c0_i32, %c0_i32_0, %c0_i32_1 : i32, i32, i32, i32
  }
  func.func @transform_4(%arg0: i32) -> (i32, i32, i32, i32) {
    %c0_i32 = arith.constant 0 : i32
    %c0_i32_0 = arith.constant 0 : i32
    %c0_i32_1 = arith.constant 0 : i32
    %c0_i32_2 = arith.constant 0 : i32
    return %arg0, %c0_i32, %c0_i32_0, %c0_i32_1 : i32, i32, i32, i32
  }
}

module attributes {stable_mosaic.version = 11 : i64} {
  func.func @kernel(%arg0: i32, %arg1: memref<256x72xbf16, #tpu.memory_space<vmem>>, %arg2: memref<72x8xbf16, #tpu.memory_space<vmem>>, %arg3: memref<1x8xf32, #tpu.memory_space<vmem>>, %arg4: memref<256x8xbf16, #tpu.memory_space<vmem>>) attributes {dimension_semantics = [#tpu.dimension_semantics<parallel>], iteration_bounds = array<i64: 2>, scalar_prefetch = 0 : i64, scratch_operands = 0 : i64, tpu.core_type = #tpu.core_type<tc>, window_params = [{transform_indices = @transform_0, window_bounds = array<i64: 256, 72>}, {pipeline_mode = #tpu.pipeline_mode<synchronous>, transform_indices = @transform_1, window_bounds = array<i64: 72, 8>}, {pipeline_mode = #tpu.pipeline_mode<synchronous>, transform_indices = @transform_2, window_bounds = array<i64: 1, 8>}, {transform_indices = @transform_3, window_bounds = array<i64: 256, 8>}]} {
    %c0 = arith.constant 0 : index
    %c0_0 = arith.constant 0 : index
    %0 = vector.load %arg1[%c0, %c0_0] : memref<256x72xbf16, #tpu.memory_space<vmem>>, vector<256x72xbf16>
    %c0_1 = arith.constant 0 : index
    %c0_2 = arith.constant 0 : index
    %1 = vector.load %arg2[%c0_1, %c0_2] : memref<72x8xbf16, #tpu.memory_space<vmem>>, vector<72x8xbf16>
    %cst = arith.constant dense<0.000000e+00> : vector<256x8xf32>
    %2 = tpu.matmul %0, %1, %cst {dimension_numbers = #tpu.dot_dimension_numbers<[1], [0], [0], [1], [0, 0, 1, 1], [], []>} : vector<256x72xbf16>, vector<72x8xbf16>, vector<256x8xf32> -> vector<256x8xf32>
    %c0_3 = arith.constant 0 : index
    %c0_4 = arith.constant 0 : index
    %3 = vector.load %arg3[%c0_3, %c0_4] : memref<1x8xf32, #tpu.memory_space<vmem>>, vector<1x8xf32>
    %4 = vector.broadcast %3 : vector<1x8xf32> to vector<256x8xf32>
    %5 = arith.addf %2, %4 : vector<256x8xf32>
    %cst_5 = arith.constant 0.000000e+00 : f32
    %6 = vector.broadcast %cst_5 : f32 to vector<256x8xf32>
    %7 = arith.maximumf %5, %6 : vector<256x8xf32>
    %8 = arith.truncf %7 : vector<256x8xf32> to vector<256x8xbf16>
    %c0_6 = arith.constant 0 : index
    %c0_7 = arith.constant 0 : index
    %9 = vector.load %arg4[%c0_6, %c0_7] : memref<256x8xbf16, #tpu.memory_space<vmem>>, vector<256x8xbf16>
    tpu.vector_store %arg4[%c0_6, %c0_7], %8 {strides = array<i32>} : memref<256x8xbf16, #tpu.memory_space<vmem>>, vector<256x8xbf16>,
    return
  }
  func.func @transform_0(%arg0: i32) -> (i32, i32) {
    %c0_i32 = arith.constant 0 : i32
    %c0_i32_0 = arith.constant 0 : i32
    return %arg0, %c0_i32 : i32, i32
  }
  func.func @transform_1(%arg0: i32) -> (i32, i32) {
    %c0_i32 = arith.constant 0 : i32
    %c0_i32_0 = arith.constant 0 : i32
    %c0_i32_1 = arith.constant 0 : i32
    return %c0_i32, %c0_i32_0 : i32, i32
  }
  func.func @transform_2(%arg0: i32) -> (i32, i32) {
    %c0_i32 = arith.constant 0 : i32
    %c0_i32_0 = arith.constant 0 : i32
    %c0_i32_1 = arith.constant 0 : i32
    return %c0_i32, %c0_i32_0 : i32, i32
  }
  func.func @transform_3(%arg0: i32) -> (i32, i32) {
    %c0_i32 = arith.constant 0 : i32
    %c0_i32_0 = arith.constant 0 : i32
    return %arg0, %c0_i32 : i32, i32
  }
}

module attributes {stable_mosaic.version = 11 : i64} {
  func.func @kernel(%arg0: i32, %arg1: memref<256x72xbf16, #tpu.memory_space<vmem>>, %arg2: memref<72x8xbf16, #tpu.memory_space<vmem>>, %arg3: memref<1x8xf32, #tpu.memory_space<vmem>>, %arg4: memref<256x8xbf16, #tpu.memory_space<vmem>>, %arg5: memref<256x8xbf16, #tpu.memory_space<vmem>>) attributes {dimension_semantics = [#tpu.dimension_semantics<parallel>], iteration_bounds = array<i64: 2>, scalar_prefetch = 0 : i64, scratch_operands = 0 : i64, tpu.core_type = #tpu.core_type<tc>, window_params = [{transform_indices = @transform_0, window_bounds = array<i64: 256, 72>}, {pipeline_mode = #tpu.pipeline_mode<synchronous>, transform_indices = @transform_1, window_bounds = array<i64: 72, 8>}, {pipeline_mode = #tpu.pipeline_mode<synchronous>, transform_indices = @transform_2, window_bounds = array<i64: 1, 8>}, {transform_indices = @transform_3, window_bounds = array<i64: 256, 8>}, {transform_indices = @transform_4, window_bounds = array<i64: 256, 8>}]} {
    %c0 = arith.constant 0 : index
    %c0_0 = arith.constant 0 : index
    %0 = vector.load %arg1[%c0, %c0_0] : memref<256x72xbf16, #tpu.memory_space<vmem>>, vector<256x72xbf16>
    %c0_1 = arith.constant 0 : index
    %c0_2 = arith.constant 0 : index
    %1 = vector.load %arg2[%c0_1, %c0_2] : memref<72x8xbf16, #tpu.memory_space<vmem>>, vector<72x8xbf16>
    %cst = arith.constant dense<0.000000e+00> : vector<256x8xf32>
    %2 = tpu.matmul %0, %1, %cst {dimension_numbers = #tpu.dot_dimension_numbers<[1], [0], [0], [1], [0, 0, 1, 1], [], []>} : vector<256x72xbf16>, vector<72x8xbf16>, vector<256x8xf32> -> vector<256x8xf32>
    %c0_3 = arith.constant 0 : index
    %c0_4 = arith.constant 0 : index
    %3 = vector.load %arg3[%c0_3, %c0_4] : memref<1x8xf32, #tpu.memory_space<vmem>>, vector<1x8xf32>
    %4 = vector.broadcast %3 : vector<1x8xf32> to vector<256x8xf32>
    %5 = arith.addf %2, %4 : vector<256x8xf32>
    %c0_5 = arith.constant 0 : index
    %c0_6 = arith.constant 0 : index
    %6 = vector.load %arg4[%c0_5, %c0_6] : memref<256x8xbf16, #tpu.memory_space<vmem>>, vector<256x8xbf16>
    %7 = arith.extf %6 : vector<256x8xbf16> to vector<256x8xf32>
    %8 = arith.addf %5, %7 : vector<256x8xf32>
    %cst_7 = arith.constant 0.000000e+00 : f32
    %9 = vector.broadcast %cst_7 : f32 to vector<256x8xf32>
    %10 = arith.maximumf %8, %9 : vector<256x8xf32>
    %11 = arith.truncf %10 : vector<256x8xf32> to vector<256x8xbf16>
    %c0_8 = arith.constant 0 : index
    %c0_9 = arith.constant 0 : index
    %12 = vector.load %arg5[%c0_8, %c0_9] : memref<256x8xbf16, #tpu.memory_space<vmem>>, vector<256x8xbf16>
    tpu.vector_store %arg5[%c0_8, %c0_9], %11 {strides = array<i32>} : memref<256x8xbf16, #tpu.memory_space<vmem>>, vector<256x8xbf16>,
    return
  }
  func.func @transform_0(%arg0: i32) -> (i32, i32) {
    %c0_i32 = arith.constant 0 : i32
    %c0_i32_0 = arith.constant 0 : i32
    return %arg0, %c0_i32 : i32, i32
  }
  func.func @transform_1(%arg0: i32) -> (i32, i32) {
    %c0_i32 = arith.constant 0 : i32
    %c0_i32_0 = arith.constant 0 : i32
    %c0_i32_1 = arith.constant 0 : i32
    return %c0_i32, %c0_i32_0 : i32, i32
  }
  func.func @transform_2(%arg0: i32) -> (i32, i32) {
    %c0_i32 = arith.constant 0 : i32
    %c0_i32_0 = arith.constant 0 : i32
    %c0_i32_1 = arith.constant 0 : i32
    return %c0_i32, %c0_i32_0 : i32, i32
  }
  func.func @transform_3(%arg0: i32) -> (i32, i32) {
    %c0_i32 = arith.constant 0 : i32
    %c0_i32_0 = arith.constant 0 : i32
    return %arg0, %c0_i32 : i32, i32
  }
  func.func @transform_4(%arg0: i32) -> (i32, i32) {
    %c0_i32 = arith.constant 0 : i32
    %c0_i32_0 = arith.constant 0 : i32
    return %arg0, %c0_i32 : i32, i32
  }
}

module attributes {stable_mosaic.version = 11 : i64} {
  func.func @kernel(%arg0: i32, %arg1: memref<64x72xbf16, #tpu.memory_space<vmem>>, %arg2: memref<72x16xbf16, #tpu.memory_space<vmem>>, %arg3: memref<1x16xf32, #tpu.memory_space<vmem>>, %arg4: memref<64x16xbf16, #tpu.memory_space<vmem>>) attributes {dimension_semantics = [#tpu.dimension_semantics<parallel>], iteration_bounds = array<i64: 2>, scalar_prefetch = 0 : i64, scratch_operands = 0 : i64, tpu.core_type = #tpu.core_type<tc>, window_params = [{transform_indices = @transform_0, window_bounds = array<i64: 64, 72>}, {pipeline_mode = #tpu.pipeline_mode<synchronous>, transform_indices = @transform_1, window_bounds = array<i64: 72, 16>}, {pipeline_mode = #tpu.pipeline_mode<synchronous>, transform_indices = @transform_2, window_bounds = array<i64: 1, 16>}, {transform_indices = @transform_3, window_bounds = array<i64: 64, 16>}]} {
    %c0 = arith.constant 0 : index
    %c0_0 = arith.constant 0 : index
    %0 = vector.load %arg1[%c0, %c0_0] : memref<64x72xbf16, #tpu.memory_space<vmem>>, vector<64x72xbf16>
    %c0_1 = arith.constant 0 : index
    %c0_2 = arith.constant 0 : index
    %1 = vector.load %arg2[%c0_1, %c0_2] : memref<72x16xbf16, #tpu.memory_space<vmem>>, vector<72x16xbf16>
    %cst = arith.constant dense<0.000000e+00> : vector<64x16xf32>
    %2 = tpu.matmul %0, %1, %cst {dimension_numbers = #tpu.dot_dimension_numbers<[1], [0], [0], [1], [0, 0, 1, 1], [], []>} : vector<64x72xbf16>, vector<72x16xbf16>, vector<64x16xf32> -> vector<64x16xf32>
    %c0_3 = arith.constant 0 : index
    %c0_4 = arith.constant 0 : index
    %3 = vector.load %arg3[%c0_3, %c0_4] : memref<1x16xf32, #tpu.memory_space<vmem>>, vector<1x16xf32>
    %4 = vector.broadcast %3 : vector<1x16xf32> to vector<64x16xf32>
    %5 = arith.addf %2, %4 : vector<64x16xf32>
    %cst_5 = arith.constant 0.000000e+00 : f32
    %6 = vector.broadcast %cst_5 : f32 to vector<64x16xf32>
    %7 = arith.maximumf %5, %6 : vector<64x16xf32>
    %8 = arith.truncf %7 : vector<64x16xf32> to vector<64x16xbf16>
    %c0_6 = arith.constant 0 : index
    %c0_7 = arith.constant 0 : index
    %9 = vector.load %arg4[%c0_6, %c0_7] : memref<64x16xbf16, #tpu.memory_space<vmem>>, vector<64x16xbf16>
    tpu.vector_store %arg4[%c0_6, %c0_7], %8 {strides = array<i32>} : memref<64x16xbf16, #tpu.memory_space<vmem>>, vector<64x16xbf16>,
    return
  }
  func.func @transform_0(%arg0: i32) -> (i32, i32) {
    %c0_i32 = arith.constant 0 : i32
    %c0_i32_0 = arith.constant 0 : i32
    return %arg0, %c0_i32 : i32, i32
  }
  func.func @transform_1(%arg0: i32) -> (i32, i32) {
    %c0_i32 = arith.constant 0 : i32
    %c0_i32_0 = arith.constant 0 : i32
    %c0_i32_1 = arith.constant 0 : i32
    return %c0_i32, %c0_i32_0 : i32, i32
  }
  func.func @transform_2(%arg0: i32) -> (i32, i32) {
    %c0_i32 = arith.constant 0 : i32
    %c0_i32_0 = arith.constant 0 : i32
    %c0_i32_1 = arith.constant 0 : i32
    return %c0_i32, %c0_i32_0 : i32, i32
  }
  func.func @transform_3(%arg0: i32) -> (i32, i32) {
    %c0_i32 = arith.constant 0 : i32
    %c0_i32_0 = arith.constant 0 : i32
    return %arg0, %c0_i32 : i32, i32
  }
}

module attributes {stable_mosaic.version = 11 : i64} {
  func.func @kernel(%arg0: i32, %arg1: memref<64x8xbf16, #tpu.memory_space<vmem>>, %arg2: memref<8x16xbf16, #tpu.memory_space<vmem>>, %arg3: memref<1x16xf32, #tpu.memory_space<vmem>>, %arg4: memref<64x16xbf16, #tpu.memory_space<vmem>>) attributes {dimension_semantics = [#tpu.dimension_semantics<parallel>], iteration_bounds = array<i64: 2>, scalar_prefetch = 0 : i64, scratch_operands = 0 : i64, tpu.core_type = #tpu.core_type<tc>, window_params = [{transform_indices = @transform_0, window_bounds = array<i64: 64, 8>}, {pipeline_mode = #tpu.pipeline_mode<synchronous>, transform_indices = @transform_1, window_bounds = array<i64: 8, 16>}, {pipeline_mode = #tpu.pipeline_mode<synchronous>, transform_indices = @transform_2, window_bounds = array<i64: 1, 16>}, {transform_indices = @transform_3, window_bounds = array<i64: 64, 16>}]} {
    %c0 = arith.constant 0 : index
    %c0_0 = arith.constant 0 : index
    %0 = vector.load %arg1[%c0, %c0_0] : memref<64x8xbf16, #tpu.memory_space<vmem>>, vector<64x8xbf16>
    %c0_1 = arith.constant 0 : index
    %c0_2 = arith.constant 0 : index
    %1 = vector.load %arg2[%c0_1, %c0_2] : memref<8x16xbf16, #tpu.memory_space<vmem>>, vector<8x16xbf16>
    %cst = arith.constant dense<0.000000e+00> : vector<64x16xf32>
    %2 = tpu.matmul %0, %1, %cst {dimension_numbers = #tpu.dot_dimension_numbers<[1], [0], [0], [1], [0, 0, 1, 1], [], []>} : vector<64x8xbf16>, vector<8x16xbf16>, vector<64x16xf32> -> vector<64x16xf32>
    %c0_3 = arith.constant 0 : index
    %c0_4 = arith.constant 0 : index
    %3 = vector.load %arg3[%c0_3, %c0_4] : memref<1x16xf32, #tpu.memory_space<vmem>>, vector<1x16xf32>
    %4 = vector.broadcast %3 : vector<1x16xf32> to vector<64x16xf32>
    %5 = arith.addf %2, %4 : vector<64x16xf32>
    %6 = arith.truncf %5 : vector<64x16xf32> to vector<64x16xbf16>
    %c0_5 = arith.constant 0 : index
    %c0_6 = arith.constant 0 : index
    %7 = vector.load %arg4[%c0_5, %c0_6] : memref<64x16xbf16, #tpu.memory_space<vmem>>, vector<64x16xbf16>
    tpu.vector_store %arg4[%c0_5, %c0_6], %6 {strides = array<i32>} : memref<64x16xbf16, #tpu.memory_space<vmem>>, vector<64x16xbf16>,
    return
  }
  func.func @transform_0(%arg0: i32) -> (i32, i32) {
    %c0_i32 = arith.constant 0 : i32
    %c0_i32_0 = arith.constant 0 : i32
    return %arg0, %c0_i32 : i32, i32
  }
  func.func @transform_1(%arg0: i32) -> (i32, i32) {
    %c0_i32 = arith.constant 0 : i32
    %c0_i32_0 = arith.constant 0 : i32
    %c0_i32_1 = arith.constant 0 : i32
    return %c0_i32, %c0_i32_0 : i32, i32
  }
  func.func @transform_2(%arg0: i32) -> (i32, i32) {
    %c0_i32 = arith.constant 0 : i32
    %c0_i32_0 = arith.constant 0 : i32
    %c0_i32_1 = arith.constant 0 : i32
    return %c0_i32, %c0_i32_0 : i32, i32
  }
  func.func @transform_3(%arg0: i32) -> (i32, i32) {
    %c0_i32 = arith.constant 0 : i32
    %c0_i32_0 = arith.constant 0 : i32
    return %arg0, %c0_i32 : i32, i32
  }
}

module attributes {stable_mosaic.version = 11 : i64} {
  func.func @kernel(%arg0: i32, %arg1: memref<64x144xbf16, #tpu.memory_space<vmem>>, %arg2: memref<144x16xbf16, #tpu.memory_space<vmem>>, %arg3: memref<1x16xf32, #tpu.memory_space<vmem>>, %arg4: memref<64x16xbf16, #tpu.memory_space<vmem>>, %arg5: memref<64x16xbf16, #tpu.memory_space<vmem>>) attributes {dimension_semantics = [#tpu.dimension_semantics<parallel>], iteration_bounds = array<i64: 2>, scalar_prefetch = 0 : i64, scratch_operands = 0 : i64, tpu.core_type = #tpu.core_type<tc>, window_params = [{transform_indices = @transform_0, window_bounds = array<i64: 64, 144>}, {pipeline_mode = #tpu.pipeline_mode<synchronous>, transform_indices = @transform_1, window_bounds = array<i64: 144, 16>}, {pipeline_mode = #tpu.pipeline_mode<synchronous>, transform_indices = @transform_2, window_bounds = array<i64: 1, 16>}, {transform_indices = @transform_3, window_bounds = array<i64: 64, 16>}, {transform_indices = @transform_4, window_bounds = array<i64: 64, 16>}]} {
    %c0 = arith.constant 0 : index
    %c0_0 = arith.constant 0 : index
    %0 = vector.load %arg1[%c0, %c0_0] : memref<64x144xbf16, #tpu.memory_space<vmem>>, vector<64x144xbf16>
    %c0_1 = arith.constant 0 : index
    %c0_2 = arith.constant 0 : index
    %1 = vector.load %arg2[%c0_1, %c0_2] : memref<144x16xbf16, #tpu.memory_space<vmem>>, vector<144x16xbf16>
    %cst = arith.constant dense<0.000000e+00> : vector<64x16xf32>
    %2 = tpu.matmul %0, %1, %cst {dimension_numbers = #tpu.dot_dimension_numbers<[1], [0], [0], [1], [0, 0, 1, 1], [], []>} : vector<64x144xbf16>, vector<144x16xbf16>, vector<64x16xf32> -> vector<64x16xf32>
    %c0_3 = arith.constant 0 : index
    %c0_4 = arith.constant 0 : index
    %3 = vector.load %arg3[%c0_3, %c0_4] : memref<1x16xf32, #tpu.memory_space<vmem>>, vector<1x16xf32>
    %4 = vector.broadcast %3 : vector<1x16xf32> to vector<64x16xf32>
    %5 = arith.addf %2, %4 : vector<64x16xf32>
    %c0_5 = arith.constant 0 : index
    %c0_6 = arith.constant 0 : index
    %6 = vector.load %arg4[%c0_5, %c0_6] : memref<64x16xbf16, #tpu.memory_space<vmem>>, vector<64x16xbf16>
    %7 = arith.extf %6 : vector<64x16xbf16> to vector<64x16xf32>
    %8 = arith.addf %5, %7 : vector<64x16xf32>
    %cst_7 = arith.constant 0.000000e+00 : f32
    %9 = vector.broadcast %cst_7 : f32 to vector<64x16xf32>
    %10 = arith.maximumf %8, %9 : vector<64x16xf32>
    %11 = arith.truncf %10 : vector<64x16xf32> to vector<64x16xbf16>
    %c0_8 = arith.constant 0 : index
    %c0_9 = arith.constant 0 : index
    %12 = vector.load %arg5[%c0_8, %c0_9] : memref<64x16xbf16, #tpu.memory_space<vmem>>, vector<64x16xbf16>
    tpu.vector_store %arg5[%c0_8, %c0_9], %11 {strides = array<i32>} : memref<64x16xbf16, #tpu.memory_space<vmem>>, vector<64x16xbf16>,
    return
  }
  func.func @transform_0(%arg0: i32) -> (i32, i32) {
    %c0_i32 = arith.constant 0 : i32
    %c0_i32_0 = arith.constant 0 : i32
    return %arg0, %c0_i32 : i32, i32
  }
  func.func @transform_1(%arg0: i32) -> (i32, i32) {
    %c0_i32 = arith.constant 0 : i32
    %c0_i32_0 = arith.constant 0 : i32
    %c0_i32_1 = arith.constant 0 : i32
    return %c0_i32, %c0_i32_0 : i32, i32
  }
  func.func @transform_2(%arg0: i32) -> (i32, i32) {
    %c0_i32 = arith.constant 0 : i32
    %c0_i32_0 = arith.constant 0 : i32
    %c0_i32_1 = arith.constant 0 : i32
    return %c0_i32, %c0_i32_0 : i32, i32
  }
  func.func @transform_3(%arg0: i32) -> (i32, i32) {
    %c0_i32 = arith.constant 0 : i32
    %c0_i32_0 = arith.constant 0 : i32
    return %arg0, %c0_i32 : i32, i32
  }
  func.func @transform_4(%arg0: i32) -> (i32, i32) {
    %c0_i32 = arith.constant 0 : i32
    %c0_i32_0 = arith.constant 0 : i32
    return %arg0, %c0_i32 : i32, i32
  }
}

module attributes {stable_mosaic.version = 11 : i64} {
  func.func @kernel(%arg0: i32, %arg1: memref<16x144xbf16, #tpu.memory_space<vmem>>, %arg2: memref<144x32xbf16, #tpu.memory_space<vmem>>, %arg3: memref<1x32xf32, #tpu.memory_space<vmem>>, %arg4: memref<16x32xbf16, #tpu.memory_space<vmem>>) attributes {dimension_semantics = [#tpu.dimension_semantics<parallel>], iteration_bounds = array<i64: 2>, scalar_prefetch = 0 : i64, scratch_operands = 0 : i64, tpu.core_type = #tpu.core_type<tc>, window_params = [{transform_indices = @transform_0, window_bounds = array<i64: 16, 144>}, {pipeline_mode = #tpu.pipeline_mode<synchronous>, transform_indices = @transform_1, window_bounds = array<i64: 144, 32>}, {pipeline_mode = #tpu.pipeline_mode<synchronous>, transform_indices = @transform_2, window_bounds = array<i64: 1, 32>}, {transform_indices = @transform_3, window_bounds = array<i64: 16, 32>}]} {
    %c0 = arith.constant 0 : index
    %c0_0 = arith.constant 0 : index
    %0 = vector.load %arg1[%c0, %c0_0] : memref<16x144xbf16, #tpu.memory_space<vmem>>, vector<16x144xbf16>
    %c0_1 = arith.constant 0 : index
    %c0_2 = arith.constant 0 : index
    %1 = vector.load %arg2[%c0_1, %c0_2] : memref<144x32xbf16, #tpu.memory_space<vmem>>, vector<144x32xbf16>
    %cst = arith.constant dense<0.000000e+00> : vector<16x32xf32>
    %2 = tpu.matmul %0, %1, %cst {dimension_numbers = #tpu.dot_dimension_numbers<[1], [0], [0], [1], [0, 0, 1, 1], [], []>} : vector<16x144xbf16>, vector<144x32xbf16>, vector<16x32xf32> -> vector<16x32xf32>
    %c0_3 = arith.constant 0 : index
    %c0_4 = arith.constant 0 : index
    %3 = vector.load %arg3[%c0_3, %c0_4] : memref<1x32xf32, #tpu.memory_space<vmem>>, vector<1x32xf32>
    %4 = vector.broadcast %3 : vector<1x32xf32> to vector<16x32xf32>
    %5 = arith.addf %2, %4 : vector<16x32xf32>
    %cst_5 = arith.constant 0.000000e+00 : f32
    %6 = vector.broadcast %cst_5 : f32 to vector<16x32xf32>
    %7 = arith.maximumf %5, %6 : vector<16x32xf32>
    %8 = arith.truncf %7 : vector<16x32xf32> to vector<16x32xbf16>
    %c0_6 = arith.constant 0 : index
    %c0_7 = arith.constant 0 : index
    %9 = vector.load %arg4[%c0_6, %c0_7] : memref<16x32xbf16, #tpu.memory_space<vmem>>, vector<16x32xbf16>
    tpu.vector_store %arg4[%c0_6, %c0_7], %8 {strides = array<i32>} : memref<16x32xbf16, #tpu.memory_space<vmem>>, vector<16x32xbf16>,
    return
  }
  func.func @transform_0(%arg0: i32) -> (i32, i32) {
    %c0_i32 = arith.constant 0 : i32
    %c0_i32_0 = arith.constant 0 : i32
    return %arg0, %c0_i32 : i32, i32
  }
  func.func @transform_1(%arg0: i32) -> (i32, i32) {
    %c0_i32 = arith.constant 0 : i32
    %c0_i32_0 = arith.constant 0 : i32
    %c0_i32_1 = arith.constant 0 : i32
    return %c0_i32, %c0_i32_0 : i32, i32
  }
  func.func @transform_2(%arg0: i32) -> (i32, i32) {
    %c0_i32 = arith.constant 0 : i32
    %c0_i32_0 = arith.constant 0 : i32
    %c0_i32_1 = arith.constant 0 : i32
    return %c0_i32, %c0_i32_0 : i32, i32
  }
  func.func @transform_3(%arg0: i32) -> (i32, i32) {
    %c0_i32 = arith.constant 0 : i32
    %c0_i32_0 = arith.constant 0 : i32
    return %arg0, %c0_i32 : i32, i32
  }
}

module attributes {stable_mosaic.version = 11 : i64} {
  func.func @kernel(%arg0: i32, %arg1: memref<16x16xbf16, #tpu.memory_space<vmem>>, %arg2: memref<16x32xbf16, #tpu.memory_space<vmem>>, %arg3: memref<1x32xf32, #tpu.memory_space<vmem>>, %arg4: memref<16x32xbf16, #tpu.memory_space<vmem>>) attributes {dimension_semantics = [#tpu.dimension_semantics<parallel>], iteration_bounds = array<i64: 2>, scalar_prefetch = 0 : i64, scratch_operands = 0 : i64, tpu.core_type = #tpu.core_type<tc>, window_params = [{transform_indices = @transform_0, window_bounds = array<i64: 16, 16>}, {pipeline_mode = #tpu.pipeline_mode<synchronous>, transform_indices = @transform_1, window_bounds = array<i64: 16, 32>}, {pipeline_mode = #tpu.pipeline_mode<synchronous>, transform_indices = @transform_2, window_bounds = array<i64: 1, 32>}, {transform_indices = @transform_3, window_bounds = array<i64: 16, 32>}]} {
    %c0 = arith.constant 0 : index
    %c0_0 = arith.constant 0 : index
    %0 = vector.load %arg1[%c0, %c0_0] : memref<16x16xbf16, #tpu.memory_space<vmem>>, vector<16x16xbf16>
    %c0_1 = arith.constant 0 : index
    %c0_2 = arith.constant 0 : index
    %1 = vector.load %arg2[%c0_1, %c0_2] : memref<16x32xbf16, #tpu.memory_space<vmem>>, vector<16x32xbf16>
    %cst = arith.constant dense<0.000000e+00> : vector<16x32xf32>
    %2 = tpu.matmul %0, %1, %cst {dimension_numbers = #tpu.dot_dimension_numbers<[1], [0], [0], [1], [0, 0, 1, 1], [], []>} : vector<16x16xbf16>, vector<16x32xbf16>, vector<16x32xf32> -> vector<16x32xf32>
    %c0_3 = arith.constant 0 : index
    %c0_4 = arith.constant 0 : index
    %3 = vector.load %arg3[%c0_3, %c0_4] : memref<1x32xf32, #tpu.memory_space<vmem>>, vector<1x32xf32>
    %4 = vector.broadcast %3 : vector<1x32xf32> to vector<16x32xf32>
    %5 = arith.addf %2, %4 : vector<16x32xf32>
    %6 = arith.truncf %5 : vector<16x32xf32> to vector<16x32xbf16>
    %c0_5 = arith.constant 0 : index
    %c0_6 = arith.constant 0 : index
    %7 = vector.load %arg4[%c0_5, %c0_6] : memref<16x32xbf16, #tpu.memory_space<vmem>>, vector<16x32xbf16>
    tpu.vector_store %arg4[%c0_5, %c0_6], %6 {strides = array<i32>} : memref<16x32xbf16, #tpu.memory_space<vmem>>, vector<16x32xbf16>,
    return
  }
  func.func @transform_0(%arg0: i32) -> (i32, i32) {
    %c0_i32 = arith.constant 0 : i32
    %c0_i32_0 = arith.constant 0 : i32
    return %arg0, %c0_i32 : i32, i32
  }
  func.func @transform_1(%arg0: i32) -> (i32, i32) {
    %c0_i32 = arith.constant 0 : i32
    %c0_i32_0 = arith.constant 0 : i32
    %c0_i32_1 = arith.constant 0 : i32
    return %c0_i32, %c0_i32_0 : i32, i32
  }
  func.func @transform_2(%arg0: i32) -> (i32, i32) {
    %c0_i32 = arith.constant 0 : i32
    %c0_i32_0 = arith.constant 0 : i32
    %c0_i32_1 = arith.constant 0 : i32
    return %c0_i32, %c0_i32_0 : i32, i32
  }
  func.func @transform_3(%arg0: i32) -> (i32, i32) {
    %c0_i32 = arith.constant 0 : i32
    %c0_i32_0 = arith.constant 0 : i32
    return %arg0, %c0_i32 : i32, i32
  }
}

module attributes {stable_mosaic.version = 11 : i64} {
  func.func @kernel(%arg0: i32, %arg1: memref<16x288xbf16, #tpu.memory_space<vmem>>, %arg2: memref<288x32xbf16, #tpu.memory_space<vmem>>, %arg3: memref<1x32xf32, #tpu.memory_space<vmem>>, %arg4: memref<16x32xbf16, #tpu.memory_space<vmem>>, %arg5: memref<16x32xbf16, #tpu.memory_space<vmem>>) attributes {dimension_semantics = [#tpu.dimension_semantics<parallel>], iteration_bounds = array<i64: 2>, scalar_prefetch = 0 : i64, scratch_operands = 0 : i64, tpu.core_type = #tpu.core_type<tc>, window_params = [{transform_indices = @transform_0, window_bounds = array<i64: 16, 288>}, {pipeline_mode = #tpu.pipeline_mode<synchronous>, transform_indices = @transform_1, window_bounds = array<i64: 288, 32>}, {pipeline_mode = #tpu.pipeline_mode<synchronous>, transform_indices = @transform_2, window_bounds = array<i64: 1, 32>}, {transform_indices = @transform_3, window_bounds = array<i64: 16, 32>}, {transform_indices = @transform_4, window_bounds = array<i64: 16, 32>}]} {
    %c0 = arith.constant 0 : index
    %c0_0 = arith.constant 0 : index
    %0 = vector.load %arg1[%c0, %c0_0] : memref<16x288xbf16, #tpu.memory_space<vmem>>, vector<16x288xbf16>
    %c0_1 = arith.constant 0 : index
    %c0_2 = arith.constant 0 : index
    %1 = vector.load %arg2[%c0_1, %c0_2] : memref<288x32xbf16, #tpu.memory_space<vmem>>, vector<288x32xbf16>
    %cst = arith.constant dense<0.000000e+00> : vector<16x32xf32>
    %2 = tpu.matmul %0, %1, %cst {dimension_numbers = #tpu.dot_dimension_numbers<[1], [0], [0], [1], [0, 0, 1, 1], [], []>} : vector<16x288xbf16>, vector<288x32xbf16>, vector<16x32xf32> -> vector<16x32xf32>
    %c0_3 = arith.constant 0 : index
    %c0_4 = arith.constant 0 : index
    %3 = vector.load %arg3[%c0_3, %c0_4] : memref<1x32xf32, #tpu.memory_space<vmem>>, vector<1x32xf32>
    %4 = vector.broadcast %3 : vector<1x32xf32> to vector<16x32xf32>
    %5 = arith.addf %2, %4 : vector<16x32xf32>
    %c0_5 = arith.constant 0 : index
    %c0_6 = arith.constant 0 : index
    %6 = vector.load %arg4[%c0_5, %c0_6] : memref<16x32xbf16, #tpu.memory_space<vmem>>, vector<16x32xbf16>
    %7 = arith.extf %6 : vector<16x32xbf16> to vector<16x32xf32>
    %8 = arith.addf %5, %7 : vector<16x32xf32>
    %cst_7 = arith.constant 0.000000e+00 : f32
    %9 = vector.broadcast %cst_7 : f32 to vector<16x32xf32>
    %10 = arith.maximumf %8, %9 : vector<16x32xf32>
    %11 = arith.truncf %10 : vector<16x32xf32> to vector<16x32xbf16>
    %c0_8 = arith.constant 0 : index
    %c0_9 = arith.constant 0 : index
    %12 = vector.load %arg5[%c0_8, %c0_9] : memref<16x32xbf16, #tpu.memory_space<vmem>>, vector<16x32xbf16>
    tpu.vector_store %arg5[%c0_8, %c0_9], %11 {strides = array<i32>} : memref<16x32xbf16, #tpu.memory_space<vmem>>, vector<16x32xbf16>,
    return
  }
  func.func @transform_0(%arg0: i32) -> (i32, i32) {
    %c0_i32 = arith.constant 0 : i32
    %c0_i32_0 = arith.constant 0 : i32
    return %arg0, %c0_i32 : i32, i32
  }
  func.func @transform_1(%arg0: i32) -> (i32, i32) {
    %c0_i32 = arith.constant 0 : i32
    %c0_i32_0 = arith.constant 0 : i32
    %c0_i32_1 = arith.constant 0 : i32
    return %c0_i32, %c0_i32_0 : i32, i32
  }
  func.func @transform_2(%arg0: i32) -> (i32, i32) {
    %c0_i32 = arith.constant 0 : i32
    %c0_i32_0 = arith.constant 0 : i32
    %c0_i32_1 = arith.constant 0 : i32
    return %c0_i32, %c0_i32_0 : i32, i32
  }
  func.func @transform_3(%arg0: i32) -> (i32, i32) {
    %c0_i32 = arith.constant 0 : i32
    %c0_i32_0 = arith.constant 0 : i32
    return %arg0, %c0_i32 : i32, i32
  }
  func.func @transform_4(%arg0: i32) -> (i32, i32) {
    %c0_i32 = arith.constant 0 : i32
    %c0_i32_0 = arith.constant 0 : i32
    return %arg0, %c0_i32 : i32, i32
  }
}

module attributes {stable_mosaic.version = 11 : i64} {
  func.func @kernel(%arg0: i32, %arg1: memref<8x288xbf16, #tpu.memory_space<vmem>>, %arg2: memref<288x64xbf16, #tpu.memory_space<vmem>>, %arg3: memref<1x64xf32, #tpu.memory_space<vmem>>, %arg4: memref<8x64xbf16, #tpu.memory_space<vmem>>) attributes {dimension_semantics = [#tpu.dimension_semantics<parallel>], iteration_bounds = array<i64: 1>, scalar_prefetch = 0 : i64, scratch_operands = 0 : i64, tpu.core_type = #tpu.core_type<tc>, window_params = [{transform_indices = @transform_0, window_bounds = array<i64: 8, 288>}, {pipeline_mode = #tpu.pipeline_mode<synchronous>, transform_indices = @transform_1, window_bounds = array<i64: 288, 64>}, {pipeline_mode = #tpu.pipeline_mode<synchronous>, transform_indices = @transform_2, window_bounds = array<i64: 1, 64>}, {transform_indices = @transform_3, window_bounds = array<i64: 8, 64>}]} {
    %c0 = arith.constant 0 : index
    %c0_0 = arith.constant 0 : index
    %0 = vector.load %arg1[%c0, %c0_0] : memref<8x288xbf16, #tpu.memory_space<vmem>>, vector<8x288xbf16>
    %c0_1 = arith.constant 0 : index
    %c0_2 = arith.constant 0 : index
    %1 = vector.load %arg2[%c0_1, %c0_2] : memref<288x64xbf16, #tpu.memory_space<vmem>>, vector<288x64xbf16>
    %cst = arith.constant dense<0.000000e+00> : vector<8x64xf32>
    %2 = tpu.matmul %0, %1, %cst {dimension_numbers = #tpu.dot_dimension_numbers<[1], [0], [0], [1], [0, 0, 1, 1], [], []>} : vector<8x288xbf16>, vector<288x64xbf16>, vector<8x64xf32> -> vector<8x64xf32>
    %c0_3 = arith.constant 0 : index
    %c0_4 = arith.constant 0 : index
    %3 = vector.load %arg3[%c0_3, %c0_4] : memref<1x64xf32, #tpu.memory_space<vmem>>, vector<1x64xf32>
    %4 = vector.broadcast %3 : vector<1x64xf32> to vector<8x64xf32>
    %5 = arith.addf %2, %4 : vector<8x64xf32>
    %cst_5 = arith.constant 0.000000e+00 : f32
    %6 = vector.broadcast %cst_5 : f32 to vector<8x64xf32>
    %7 = arith.maximumf %5, %6 : vector<8x64xf32>
    %8 = arith.truncf %7 : vector<8x64xf32> to vector<8x64xbf16>
    %c0_6 = arith.constant 0 : index
    %c0_7 = arith.constant 0 : index
    %9 = vector.load %arg4[%c0_6, %c0_7] : memref<8x64xbf16, #tpu.memory_space<vmem>>, vector<8x64xbf16>
    tpu.vector_store %arg4[%c0_6, %c0_7], %8 {strides = array<i32>} : memref<8x64xbf16, #tpu.memory_space<vmem>>, vector<8x64xbf16>,
    return
  }
  func.func @transform_0(%arg0: i32) -> (i32, i32) {
    %c0_i32 = arith.constant 0 : i32
    %c0_i32_0 = arith.constant 0 : i32
    return %arg0, %c0_i32 : i32, i32
  }
  func.func @transform_1(%arg0: i32) -> (i32, i32) {
    %c0_i32 = arith.constant 0 : i32
    %c0_i32_0 = arith.constant 0 : i32
    %c0_i32_1 = arith.constant 0 : i32
    return %c0_i32, %c0_i32_0 : i32, i32
  }
  func.func @transform_2(%arg0: i32) -> (i32, i32) {
    %c0_i32 = arith.constant 0 : i32
    %c0_i32_0 = arith.constant 0 : i32
    %c0_i32_1 = arith.constant 0 : i32
    return %c0_i32, %c0_i32_0 : i32, i32
  }
  func.func @transform_3(%arg0: i32) -> (i32, i32) {
    %c0_i32 = arith.constant 0 : i32
    %c0_i32_0 = arith.constant 0 : i32
    return %arg0, %c0_i32 : i32, i32
  }
}

module attributes {stable_mosaic.version = 11 : i64} {
  func.func @kernel(%arg0: i32, %arg1: memref<8x32xbf16, #tpu.memory_space<vmem>>, %arg2: memref<32x64xbf16, #tpu.memory_space<vmem>>, %arg3: memref<1x64xf32, #tpu.memory_space<vmem>>, %arg4: memref<8x64xbf16, #tpu.memory_space<vmem>>) attributes {dimension_semantics = [#tpu.dimension_semantics<parallel>], iteration_bounds = array<i64: 1>, scalar_prefetch = 0 : i64, scratch_operands = 0 : i64, tpu.core_type = #tpu.core_type<tc>, window_params = [{transform_indices = @transform_0, window_bounds = array<i64: 8, 32>}, {pipeline_mode = #tpu.pipeline_mode<synchronous>, transform_indices = @transform_1, window_bounds = array<i64: 32, 64>}, {pipeline_mode = #tpu.pipeline_mode<synchronous>, transform_indices = @transform_2, window_bounds = array<i64: 1, 64>}, {transform_indices = @transform_3, window_bounds = array<i64: 8, 64>}]} {
    %c0 = arith.constant 0 : index
    %c0_0 = arith.constant 0 : index
    %0 = vector.load %arg1[%c0, %c0_0] : memref<8x32xbf16, #tpu.memory_space<vmem>>, vector<8x32xbf16>
    %c0_1 = arith.constant 0 : index
    %c0_2 = arith.constant 0 : index
    %1 = vector.load %arg2[%c0_1, %c0_2] : memref<32x64xbf16, #tpu.memory_space<vmem>>, vector<32x64xbf16>
    %cst = arith.constant dense<0.000000e+00> : vector<8x64xf32>
    %2 = tpu.matmul %0, %1, %cst {dimension_numbers = #tpu.dot_dimension_numbers<[1], [0], [0], [1], [0, 0, 1, 1], [], []>} : vector<8x32xbf16>, vector<32x64xbf16>, vector<8x64xf32> -> vector<8x64xf32>
    %c0_3 = arith.constant 0 : index
    %c0_4 = arith.constant 0 : index
    %3 = vector.load %arg3[%c0_3, %c0_4] : memref<1x64xf32, #tpu.memory_space<vmem>>, vector<1x64xf32>
    %4 = vector.broadcast %3 : vector<1x64xf32> to vector<8x64xf32>
    %5 = arith.addf %2, %4 : vector<8x64xf32>
    %6 = arith.truncf %5 : vector<8x64xf32> to vector<8x64xbf16>
    %c0_5 = arith.constant 0 : index
    %c0_6 = arith.constant 0 : index
    %7 = vector.load %arg4[%c0_5, %c0_6] : memref<8x64xbf16, #tpu.memory_space<vmem>>, vector<8x64xbf16>
    tpu.vector_store %arg4[%c0_5, %c0_6], %6 {strides = array<i32>} : memref<8x64xbf16, #tpu.memory_space<vmem>>, vector<8x64xbf16>,
    return
  }
  func.func @transform_0(%arg0: i32) -> (i32, i32) {
    %c0_i32 = arith.constant 0 : i32
    %c0_i32_0 = arith.constant 0 : i32
    return %arg0, %c0_i32 : i32, i32
  }
  func.func @transform_1(%arg0: i32) -> (i32, i32) {
    %c0_i32 = arith.constant 0 : i32
    %c0_i32_0 = arith.constant 0 : i32
    %c0_i32_1 = arith.constant 0 : i32
    return %c0_i32, %c0_i32_0 : i32, i32
  }
  func.func @transform_2(%arg0: i32) -> (i32, i32) {
    %c0_i32 = arith.constant 0 : i32
    %c0_i32_0 = arith.constant 0 : i32
    %c0_i32_1 = arith.constant 0 : i32
    return %c0_i32, %c0_i32_0 : i32, i32
  }
  func.func @transform_3(%arg0: i32) -> (i32, i32) {
    %c0_i32 = arith.constant 0 : i32
    %c0_i32_0 = arith.constant 0 : i32
    return %arg0, %c0_i32 : i32, i32
  }
}

module attributes {stable_mosaic.version = 11 : i64} {
  func.func @_conv_res_gap_fc_kernel(%arg0: memref<8x576xbf16, #tpu.memory_space<vmem>>, %arg1: memref<576x64xbf16, #tpu.memory_space<vmem>>, %arg2: memref<1x64xf32, #tpu.memory_space<vmem>>, %arg3: memref<8x64xbf16, #tpu.memory_space<vmem>>, %arg4: memref<2x8xf32, #tpu.memory_space<vmem>>, %arg5: memref<64x16xf32, #tpu.memory_space<vmem>>, %arg6: memref<1x16xf32, #tpu.memory_space<vmem>>, %arg7: memref<2x16xf32, #tpu.memory_space<vmem>>, %arg8: memref<2x64xf32, #tpu.memory_space<vmem>>) attributes {dimension_semantics = [], scalar_prefetch = 0 : i64, scratch_operands = 0 : i64, tpu.core_type = #tpu.core_type<tc>} {
    %c0 = arith.constant 0 : index
    %c0_0 = arith.constant 0 : index
    %0 = vector.load %arg0[%c0, %c0_0] : memref<8x576xbf16, #tpu.memory_space<vmem>>, vector<8x576xbf16>
    %c0_1 = arith.constant 0 : index
    %c0_2 = arith.constant 0 : index
    %1 = vector.load %arg1[%c0_1, %c0_2] : memref<576x64xbf16, #tpu.memory_space<vmem>>, vector<576x64xbf16>
    %cst = arith.constant dense<0.000000e+00> : vector<8x64xf32>
    %2 = tpu.matmul %0, %1, %cst {dimension_numbers = #tpu.dot_dimension_numbers<[1], [0], [0], [1], [0, 0, 1, 1], [], []>} : vector<8x576xbf16>, vector<576x64xbf16>, vector<8x64xf32> -> vector<8x64xf32>
    %c0_3 = arith.constant 0 : index
    %c0_4 = arith.constant 0 : index
    %3 = vector.load %arg2[%c0_3, %c0_4] : memref<1x64xf32, #tpu.memory_space<vmem>>, vector<1x64xf32>
    %4 = vector.broadcast %3 : vector<1x64xf32> to vector<8x64xf32>
    %5 = arith.addf %2, %4 : vector<8x64xf32>
    %c0_5 = arith.constant 0 : index
    %c0_6 = arith.constant 0 : index
    %6 = vector.load %arg3[%c0_5, %c0_6] : memref<8x64xbf16, #tpu.memory_space<vmem>>, vector<8x64xbf16>
    %7 = arith.extf %6 : vector<8x64xbf16> to vector<8x64xf32>
    %8 = arith.addf %5, %7 : vector<8x64xf32>
    %cst_7 = arith.constant 0.000000e+00 : f32
    %9 = vector.broadcast %cst_7 : f32 to vector<8x64xf32>
    %10 = arith.maximumf %8, %9 : vector<8x64xf32>
    %c0_8 = arith.constant 0 : index
    %c0_9 = arith.constant 0 : index
    %11 = vector.load %arg4[%c0_8, %c0_9] : memref<2x8xf32, #tpu.memory_space<vmem>>, vector<2x8xf32>
    %cst_10 = arith.constant dense<0.000000e+00> : vector<2x64xf32>
    %12 = tpu.matmul %11, %10, %cst_10 {dimension_numbers = #tpu.dot_dimension_numbers<[1], [0], [0], [1], [0, 0, 1, 1], [], []>} : vector<2x8xf32>, vector<8x64xf32>, vector<2x64xf32> -> vector<2x64xf32>
    %c0_11 = arith.constant 0 : index
    %c0_12 = arith.constant 0 : index
    %13 = vector.load %arg8[%c0_11, %c0_12] : memref<2x64xf32, #tpu.memory_space<vmem>>, vector<2x64xf32>
    tpu.vector_store %arg8[%c0_11, %c0_12], %12 {strides = array<i32>} : memref<2x64xf32, #tpu.memory_space<vmem>>, vector<2x64xf32>,
    %c0_13 = arith.constant 0 : index
    %c0_14 = arith.constant 0 : index
    %14 = vector.load %arg5[%c0_13, %c0_14] : memref<64x16xf32, #tpu.memory_space<vmem>>, vector<64x16xf32>
    %cst_15 = arith.constant dense<0.000000e+00> : vector<2x16xf32>
    %15 = tpu.matmul %12, %14, %cst_15 {dimension_numbers = #tpu.dot_dimension_numbers<[1], [0], [0], [1], [0, 0, 1, 1], [], []>} : vector<2x64xf32>, vector<64x16xf32>, vector<2x16xf32> -> vector<2x16xf32>
    %c0_16 = arith.constant 0 : index
    %c0_17 = arith.constant 0 : index
    %16 = vector.load %arg6[%c0_16, %c0_17] : memref<1x16xf32, #tpu.memory_space<vmem>>, vector<1x16xf32>
    %17 = vector.broadcast %16 : vector<1x16xf32> to vector<2x16xf32>
    %18 = arith.addf %15, %17 : vector<2x16xf32>
    %c0_18 = arith.constant 0 : index
    %c0_19 = arith.constant 0 : index
    %19 = vector.load %arg7[%c0_18, %c0_19] : memref<2x16xf32, #tpu.memory_space<vmem>>, vector<2x16xf32>
    tpu.vector_store %arg7[%c0_18, %c0_19], %18 {strides = array<i32>} : memref<2x16xf32, #tpu.memory_space<vmem>>, vector<2x16xf32>,
    return
  }
}

</mosaic_0001>

<bundles_post_ra>
// kernel: _lambda_.13
= control target key start
LH: loop header
LB: loop body
LE: loop exit
PB: predicated region body
PF: predicated region fallthrough
CT: control target
= control target key end

     0   :  { %8 = vsyncpa [#allocation3], 0  ;;  %s4412_s0 = inlined_call_operand.hbm [shape: bf16[2048,160], index: 0, kind: input, shape index: {}]   ;;  %s4413_s1 = inlined_call_operand.hbm [shape: bf16[160,8], index: 1, kind: input, shape index: {}]   ;;  %s4414_s2 = inlined_call_operand.hbm [shape: f32[1,8], index: 2, kind: input, shape index: {}]   ;;  %s4415_s3 = inlined_call_operand.hbm [shape: bf16[2048,8], index: 3, kind: output, shape index: {}]  }
   0x1   :  { %10 = vsyncpa [#allocation3 + $0x1], 0 }
   0x2   :  { %11 = vsyncpa [#allocation6], 0 }
   0x3   :  { %12 = vsyncpa [#allocation4], 0 }
   0x4   :  { %14 = vsyncpa [#allocation4 + $0x1], 0  ;;  %s3591_s12 = smov 0   ;;  %s3593_s13 = smov 0  }
   0x5   :  { %s3595_s14 = smov 0   ;;  %s3597_s15 = smov 0  }
   0x6 LB: > { %s3612_s16 = sadd.s32 4294967295, %s3558_s15   ;;  %s2624_s17 = sadd.s32 4294967294, %s3558_s15   ;;  %s3558_s15 = sphi %s3597_s15, %s4435_s15   ;;  %s3554_s14 = sphi %s3595_s14, %s4434_s14   ;;  %s3550_s13 = sphi %s3593_s13, %s4433_s13   ;;  %s3546_s12 = sphi %s3591_s12, %s4432_s12  }
   0x7   : > { %p40_p0 = scmp.ne.s32.totalorder %s3550_s13, %s3546_s12  ;;  %p4416_p1 = scmp.eq.s32.totalorder %s3612_s16, 0 }
   0x8   : > { %p112_p3 = scmp.eq.s32.totalorder %s2624_s17, 1  ;;  %p2625_p5 = scmp.ge.s32.totalorder %s3558_s15, 1 }
   0x9   : > { %p3621_p4 = por %p4416_p1, %p40_p0  ;;  %p119_p7 = scmp.lt.s32.totalorder %s3558_s15, 3 }
   0xa   : > { %p3626_p6 = por %p112_p3, %p40_p0  ;;  %s3560_s21 = smov [#allocation5]  }
   0xb   : > { %s4419_s18 = scalar_select %p3621_p4, 1, 0 }
   0xc   : > { %s4420_s19 = scalar_select %p3626_p6, 1, 0 }
   0xd   : > { %p3631_p8 = pnand %p2625_p5, %p119_p7  ;;  %s131_s22 = sshll.u32 %s3560_s21, 4  ;;  %s3635_s22 = int_to_ptr.vmem [resolvable:$true] %s131_s22 }
   0xe   : > { %s3561_s24 = smov [#allocation7]   ;;  %s3402_s28 = scalar_lea.hbm %s4413_s1, 1280 }
   0xf   : > { %p3137_p9 = pneg %p3631_p8  ;;  %s145_s25 = sshll.u32 %s3561_s24, 4  ;;  %s3646_s25 = int_to_ptr.vmem [resolvable:$true] %s145_s25 }
  0x10   : > { %p3403_p12 = scmp.ne.s32.totalorder %s4413_s1, %s3402_s28  ;;  %p3409_p5 = scmp.lt.u32.totalorder %s3402_s28, %s4413_s1 }
  0x11   : > { %p3642_p11 = pnand %p3137_p9, %p4416_p1 }
  0x13   : > { %p3404_p13 = pneg %p3642_p11 }
  0x15   : > { %p3405_p0 = pnand %p3404_p13, %p3403_p12 }
  0x17   : > { %p3406_p3 = pneg %p3405_p0 }
  0x19   : > { %p3411_p7 = pnand %p3409_p5, %p3406_p3 }
  0x1b   : > { %3414 = shalt.err (!%p3411_p7)
}
  0x1c   : > { %s3415_s6 = scalar_lea.vmem %s3635_s22, 1280  ;;  %p3423_p2 = scmp.lt.s32.totalorder %s3635_s22, %s3635_s22 }
  0x1d   : > { %p3416_p9 = scmp.ne.s32.totalorder %s3635_s22, %s3415_s6  ;;  %p3424_p12 = scmp.lt.s32.totalorder %s3415_s6, %s3415_s6 }
  0x1f   : > { %p3418_p10 = pnand %p3416_p9, %p3404_p13  ;;  %p3425_p0 = por %p3424_p12, %p3423_p2 }
  0x21   : > { %p3419_p1 = pneg %p3418_p10 }
  0x23   : > { %p3426_p6 = pnand %p3425_p0, %p3419_p1 }
  0x25   : > { %3429 = shalt.err (!%p3426_p6)
}
  0x26   : > { %s3562_s7 = smov 64   ;;  %s3563_s8 = smov 4  }
  0x27   : > { %3140 = dma.hbm_to_vmem [thread:$0]  (!%p3642_p11), %s4413_s1, 1280, %s3635_s22, [#allocation6], %s3562_s7, %s3562_s7, %s3563_s8  }
  0x28   : > { %s3430_s21 = scalar_lea.hbm %s4414_s2, 16 }
  0x29   : > { %p3431_p2 = scmp.ne.s32.totalorder %s4414_s2, %s3430_s21  ;;  %p3437_p10 = scmp.lt.u32.totalorder %s3430_s21, %s4414_s2 }
  0x2b   : > { %p3433_p1 = pnand %p3431_p2, %p3404_p13 }
  0x2d   : > { %p3434_p6 = pneg %p3433_p1 }
  0x2f   : > { %p3439_p3 = pnand %p3437_p10, %p3434_p6 }
  0x31   : > { %3442 = shalt.err (!%p3439_p3)
}
  0x32   : > { %s3443_s22 = scalar_lea.vmem %s3646_s25, 16  ;;  %s3450_s29 = scalar_lea.vmem %s3646_s25, 32 }
  0x33   : > { %p3444_p5 = scmp.ne.s32.totalorder %s3646_s25, %s3443_s22  ;;  %p3451_p12 = scmp.lt.s32.totalorder %s3646_s25, %s3646_s25 }
  0x34   : > { %p3452_p0 = scmp.lt.s32.totalorder %s3450_s29, %s3443_s22 }
  0x35   : > { %p3446_p7 = pnand %p3444_p5, %p3404_p13 }
  0x36   : > { %p3453_p2 = por %p3452_p0, %p3451_p12 }
  0x37   : > { %p3447_p9 = pneg %p3446_p7 }
  0x39   : > { %p3454_p1 = pnand %p3453_p2, %p3447_p9 }
  0x3b   : > { %3457 = shalt.err (!%p3454_p1)
}
  0x3c   : > { %3143 = dma.hbm_to_vmem [thread:$0]  (!%p3642_p11), %s4414_s2, 16, %s3646_s25, [#allocation6]  }
  0x3d   : > { %s3702_s5 = sadd.s32 1, %s3558_s15   ;;  %s27_s23 = sadd.s32 1, %s3554_s14 }
  0x3e   : > { %s24_s6 = ssub.s32 %s3558_s15, %s3702_s5  ;;  %p34_p13 = scmp.ne.s32.totalorder %s3554_s14, %s3550_s13 }
  0x3f   : > { %p25_p6 = scmp.eq.s32.totalorder %s24_s6, 0  ;;  %p35_p10 = scmp.eq.s32.totalorder %s3558_s15, 0 }
  0x40   : > { %p4423_p3 = scmp.eq.s32.totalorder %s3612_s16, 1  ;;  %p3154_p7 = scmp.lt.s32.totalorder %s3558_s15, 2 }
  0x41   : > { %s3718_s8 = scalar_select %p25_p6, %s3554_s14, %s27_s23  }
  0x42   : > { %p3712_p5 = por %p4423_p3, %p34_p13  ;;  %p36_p9 = por %p35_p10, %p34_p13 }
  0x43   : > { %s156_s9 = sand.u32 1, %s3554_s14   ;;  %s2975_s25 = sshll.u32 %s3558_s15, 14 }
  0x44   : > { %s4424_s7 = scalar_select %p3712_p5, 1, 0 }
  0x45   : > { %s2629_s10 = sshll.u32 %s156_s9, 10  ;;  %s3725_s21 = scalar_lea.hbm %s4412_s0, %s2975_s25 }
  0x46   : > { %s160_s24 = scalar_lea.vmem [#allocation2], %s2629_s10  ;;  %p3729_p11 = pnand %p3154_p7, %p36_p9 }
  0x47   : > { %s168_s26 = sshll.u32 %s160_s24, 4  ;;  %s3733_s28 = scalar_lea.sflag [#allocation3], %s156_s9  ;;  %s3727_s26 = int_to_ptr.vmem [resolvable:$true] %s168_s26 }
  0x48   : > { %s3458_s22 = scalar_lea.hbm %s3725_s21, 16384  ;;  %p3460_p0 = pneg %p3729_p11 }
  0x49   : > { %p3459_p12 = scmp.ne.s32.totalorder %s3725_s21, %s3458_s22  ;;  %s3463_s4 = scalar_lea.hbm %s4412_s0, 32768 }
  0x4a   : > { %p3464_p13 = scmp.lt.u32.totalorder %s3725_s21, %s4412_s0  ;;  %p3465_p6 = scmp.lt.u32.totalorder %s3463_s4, %s3458_s22 }
  0x4b   : > { %p3461_p2 = pnand %p3460_p0, %p3459_p12  ;;  %p3467_p3 = scmp.lt.u32.totalorder %s3458_s22, %s3725_s21 }
  0x4c   : > { %p3466_p10 = por %p3465_p6, %p3464_p13 }
  0x4d   : > { %p3462_p1 = pneg %p3461_p2 }
  0x4e   : > { %p3468_p7 = por %p3467_p3, %p3466_p10 }
  0x50   : > { %p3469_p9 = pnand %p3468_p7, %p3462_p1 }
  0x52   : > { %3472 = shalt.err (!%p3469_p9)
}
  0x53   : > { %s3473_s9 = scalar_lea.vmem %s3727_s26, 16384  ;;  %s3564_s10 = smov [#allocation2]  }
  0x54   : > { %p3474_p12 = scmp.ne.s32.totalorder %s3727_s26, %s3473_s9  ;;  %s3478_s25 = sshll.u32 %s3564_s10, 4  ;;  %s3479_s25 = int_to_ptr.vmem [resolvable:$false] %s3478_s25 }
  0x55   : > { %s3480_s11 = scalar_lea.vmem %s3479_s25, 32768  ;;  %p3481_p4 = scmp.lt.s32.totalorder %s3727_s26, %s3479_s25 }
  0x56   : > { %p3476_p2 = pnand %p3474_p12, %p3460_p0  ;;  %p3482_p13 = scmp.lt.s32.totalorder %s3480_s11, %s3473_s9 }
  0x58   : > { %p3477_p5 = pneg %p3476_p2  ;;  %p3483_p6 = por %p3482_p13, %p3481_p4 }
  0x5a   : > { %p3484_p10 = pnand %p3483_p6, %p3477_p5 }
  0x5c   : > { %3487 = shalt.err (!%p3484_p10)
}
  0x5d   : > { %s3565_s17 = smov 128   ;;  %s3566_s24 = smov 8  }
  0x5e   : > { %3147 = dma.hbm_to_vmem [thread:$0]  (!%p3729_p11), %s3725_s21, 16384, %s3727_s26, %s3733_s28, %s3565_s17, %s3565_s17, %s3566_s24  }
  0x5f   : > { %180 = sbr.rel (%p3631_p8) target bundleno = 630 (0x276), region = 32  ;;  %s3764_s22 = sand.u32 (!%p3631_p8), 1, %s3550_s13  }
  0x60   : > { %s2634_s29 = sshll.u32 (!%p3631_p8), %s3764_s22, 10  ;;  %s183_s30 = scalar_lea.sflag (!%p3631_p8), [#allocation3], %s3764_s22 }
  0x61   : > { %s3768_s4 = scalar_lea.vmem (!%p3631_p8), [#allocation2], %s2634_s29  ;;  %p4426_p4 = scmp.ne.s32.totalorder (!%p3631_p8), %s4419_s18, 0 }
  0x66   : > { %3533 = dma.done.wait (%p4426_p4), %s183_s30, 16384  }
  0x67   : > { %3535 = vsyncadd (%p4426_p4), %s183_s30, 4294950912  ;;  %p4427_p5 = scmp.eq.s32.totalorder %s3612_s16, 0 }
  0x69   : > { %3537 = dma.done.wait (%p4427_p5), [#allocation6], 1296   ;;  %p4428_p8 = pmov %p4427_p5 }
  0x6a   : > { %v3567_v0 = vmov 0   ;;  %v3199_v1 = vld [vmem:[#allocation5] sm:$0xff]   ;;  %v3200_v2 = vld [vmem:[#allocation5 + $0x8] sm:$0xff]   ;;  %v3201_v3 = vld [vmem:[#allocation5 + $0x10] sm:$0xff]   ;;  %vm1011_vm0 = vcmask 261120   ;;  %s2637_s18 = sshll.u32 %s3764_s22, 9 }
  0x6b   : > { %3539 = vsyncadd (%p4428_p8), [#allocation6], 4294966000  ;;  %1204 = vmatprep.subr.bf16.mxu0 %v3567_v0  ;;  %3105 = vmatprep.subr.bf16.mxu1 %v3567_v0  ;;  %v3202_v4 = vld [vmem:[#allocation5 + $0x18] sm:$0xff]   ;;  %v3211_v5 = vld [vmem:[%s3768_s4 + $0x4] ss:$8 sps:$4 sm:$0xff]   ;;  %vm2389_vm1 = vcmask 60416  }
  0x6c   : > { %1205 = vmatpush1.bf16.msra.mxu0 %v3199_v1  ;;  %3115 = vmatpush1.bf16.msra.mxu1 %v3199_v1  ;;  %v3214_v6 = vld [vmem:[%s3768_s4 + $0x204] ss:$8 sps:$4 sm:$0xff]   ;;  %v3205_v9 = vld [vmem:[#allocation5 + $0x30] sm:$0xff]   ;;  %v3206_v10 = vld [vmem:[#allocation5 + $0x38] sm:$0xff]   ;;  %s3957_s20 = scalar_lea.vmem [#allocation8], %s2637_s18  ;;  %s3104_s21 = sshll.u32 %s3612_s16, 13 }
  0x6d   : > { %1206 = vmatprep.subr.bf16.mxu0 %v3567_v0  ;;  %3106 = vmatprep.subr.bf16.mxu1 %v3567_v0  ;;  %v3203_v7 = vld [vmem:[#allocation5 + $0x20] sm:$0xff]   ;;  %v3204_v8 = vld [vmem:[#allocation5 + $0x28] sm:$0xff]   ;;  %v3215_v15 = vld [vmem:[%s3768_s4 + $0x14] ss:$8 sps:$4 sm:$0xff]   ;;  %s2532_s26 = sshll.u32 %s3957_s20, 4  ;;  %s4358_s23 = scalar_lea.hbm %s4415_s3, %s3104_s21  ;;  %s4360_s26 = int_to_ptr.vmem [resolvable:$true] %s2532_s26 }
  0x6e   : > { %2777 = vmatprep.mubr.msk.bf16.mxu0 %vm1011_vm0, %v3211_v5  ;;  %2809 = vmatprep.mubr.msk.bf16.mxu1 %vm1011_vm0, %v3214_v6  ;;  %v3207_v11 = vld [vmem:[#allocation5 + $0x40] sm:$0xff]   ;;  %v3208_v12 = vld [vmem:[#allocation5 + $0x48] sm:$0xff]   ;;  %v3217_v16 = vld [vmem:[%s3768_s4 + $0x214] ss:$8 sps:$4 sm:$0xff]   ;;  %s2519_s16 = scalar_lea.sflag [#allocation4], %s3764_s22  ;;  %s3488_s6 = scalar_lea.vmem %s4360_s26, 8192 }
  0x6f   : > { %v3209_v13 = vld [vmem:[%s3768_s4] ss:$8 sps:$4 sm:$0xff]   ;;  %v3219_v17 = vld [vmem:[%s3768_s4 + $0x10] ss:$8 sps:$4 sm:$0xff]   ;;  %v3221_v19 = vld [vmem:[%s3768_s4 + $0x24] ss:$8 sps:$4 sm:$0xff]   ;;  %p3489_p11 = scmp.ne.s32.totalorder %s4360_s26, %s3488_s6 }
  0x70   : > { %1207 = vmatpush1.bf16.msra.mxu0 %v3200_v2  ;;  %3116 = vmatpush1.bf16.msra.mxu1 %v3200_v2  ;;  %v3212_v14 = vld [vmem:[%s3768_s4 + $0x200] ss:$8 sps:$4 sm:$0xff]   ;;  %v3220_v18 = vld [vmem:[%s3768_s4 + $0x210] ss:$8 sps:$4 sm:$0xff]   ;;  %v3223_v20 = vld [vmem:[%s3768_s4 + $0x224] ss:$8 sps:$4 sm:$0xff]  }
  0x71   : > { %1208 = vmatprep.subr.bf16.mxu0 %v3567_v0  ;;  %3107 = vmatprep.subr.bf16.mxu1 %v3567_v0  ;;  %v3225_v21 = vld [vmem:[%s3768_s4 + $0x20] ss:$8 sps:$4 sm:$0xff]   ;;  %v3227_v23 = vld [vmem:[%s3768_s4 + $0x34] ss:$8 sps:$4 sm:$0xff]   ;;  %v3231_v25 = vld [vmem:[%s3768_s4 + $0x30] ss:$8 sps:$4 sm:$0xff]  }
  0x72   : > { %v3226_v22 = vld [vmem:[%s3768_s4 + $0x220] ss:$8 sps:$4 sm:$0xff]   ;;  %v3229_v24 = vld [vmem:[%s3768_s4 + $0x234] ss:$8 sps:$4 sm:$0xff]   ;;  %v3232_v26 = vld [vmem:[%s3768_s4 + $0x230] ss:$8 sps:$4 sm:$0xff]  }
  0x73   : > { %v3233_v27 = vld [vmem:[%s3768_s4 + $0x44] ss:$8 sps:$4 sm:$0xff]   ;;  %v3237_v29 = vld [vmem:[%s3768_s4 + $0x40] ss:$8 sps:$4 sm:$0xff]   ;;  %v3239_v31 = vld [vmem:[%s3768_s4 + $0x54] ss:$8 sps:$4 sm:$0xff]  }
  0x74   : > { %1209 = vmatpush1.bf16.msra.mxu0 %v3201_v3  ;;  %3117 = vmatpush1.bf16.msra.mxu1 %v3201_v3  ;;  %v3235_v28 = vld [vmem:[%s3768_s4 + $0x244] ss:$8 sps:$4 sm:$0xff]   ;;  %v3238_v30 = vld [vmem:[%s3768_s4 + $0x240] ss:$8 sps:$4 sm:$0xff]   ;;  %v3241_v32 = vld [vmem:[%s3768_s4 + $0x254] ss:$8 sps:$4 sm:$0xff]  }
  0x75   : > { %1210 = vmatprep.subr.bf16.mxu0 %v3567_v0  ;;  %3108 = vmatprep.subr.bf16.mxu1 %v3567_v0  ;;  %v3243_v33 = vld [vmem:[%s3768_s4 + $0x50] ss:$8 sps:$4 sm:$0xff]   ;;  %v3245_v35 = vld [vmem:[%s3768_s4 + $0x64] ss:$8 sps:$4 sm:$0xff]   ;;  %v3249_v37 = vld [vmem:[%s3768_s4 + $0x60] ss:$8 sps:$4 sm:$0xff]  }
  0x76   : > { %v3244_v34 = vld [vmem:[%s3768_s4 + $0x250] ss:$8 sps:$4 sm:$0xff]   ;;  %v3247_v36 = vld [vmem:[%s3768_s4 + $0x264] ss:$8 sps:$4 sm:$0xff]   ;;  %v3250_v38 = vld [vmem:[%s3768_s4 + $0x260] ss:$8 sps:$4 sm:$0xff]  }
  0x77   : > { %v3251_v39 = vld [vmem:[%s3768_s4 + $0x74] ss:$8 sps:$4 sm:$0xff]   ;;  %v3255_v41 = vld [vmem:[%s3768_s4 + $0x70] ss:$8 sps:$4 sm:$0xff]   ;;  %v3257_v43 = vld [vmem:[%s3768_s4 + $0x84] ss:$8 sps:$4 sm:$0xff]  }
  0x78   : > { %1211 = vmatpush1.bf16.msra.mxu0 %v3202_v4  ;;  %3118 = vmatpush1.bf16.msra.mxu1 %v3202_v4  ;;  %v3253_v40 = vld [vmem:[%s3768_s4 + $0x274] ss:$8 sps:$4 sm:$0xff]   ;;  %v3256_v42 = vld [vmem:[%s3768_s4 + $0x270] ss:$8 sps:$4 sm:$0xff]   ;;  %v3259_v44 = vld [vmem:[%s3768_s4 + $0x284] ss:$8 sps:$4 sm:$0xff]  }
  0x79   : > { %1212 = vmatprep.subr.bf16.mxu0 %v3567_v0  ;;  %3109 = vmatprep.subr.bf16.mxu1 %v3567_v0  ;;  %v3261_v45 = vld [vmem:[%s3768_s4 + $0x80] ss:$8 sps:$4 sm:$0xff]   ;;  %v3263_v47 = vld [vmem:[%s3768_s4 + $0x94] ss:$8 sps:$4 sm:$0xff]   ;;  %v3267_v49 = vld [vmem:[%s3768_s4 + $0x90] ss:$8 sps:$4 sm:$0xff]  }
  0x7a   : > { %v3262_v46 = vld [vmem:[%s3768_s4 + $0x280] ss:$8 sps:$4 sm:$0xff]   ;;  %v3265_v48 = vld [vmem:[%s3768_s4 + $0x294] ss:$8 sps:$4 sm:$0xff]   ;;  %v3268_v50 = vld [vmem:[%s3768_s4 + $0x290] ss:$8 sps:$4 sm:$0xff]  }
  0x7b   : > { %v3269_v51 = vld [vmem:[%s3768_s4 + $0xa4] ss:$8 sps:$4 sm:$0xff]   ;;  %v3273_v53 = vld [vmem:[%s3768_s4 + $0xa0] ss:$8 sps:$4 sm:$0xff]   ;;  %v3275_v55 = vld [vmem:[%s3768_s4 + $0xb4] ss:$8 sps:$4 sm:$0xff]  }
  0x7c   : > { %1213 = vmatpush1.bf16.msra.mxu0 %v3203_v7  ;;  %3119 = vmatpush1.bf16.msra.mxu1 %v3203_v7  ;;  %v3271_v52 = vld [vmem:[%s3768_s4 + $0x2a4] ss:$8 sps:$4 sm:$0xff]   ;;  %v3274_v54 = vld [vmem:[%s3768_s4 + $0x2a0] ss:$8 sps:$4 sm:$0xff]   ;;  %v3277_v56 = vld [vmem:[%s3768_s4 + $0x2b4] ss:$8 sps:$4 sm:$0xff]  }
  0x7d   : > { %1214 = vmatprep.subr.bf16.mxu0 %v3567_v0  ;;  %3110 = vmatprep.subr.bf16.mxu1 %v3567_v0  ;;  %v3279_v57 = vld [vmem:[%s3768_s4 + $0xb0] ss:$8 sps:$4 sm:$0xff]   ;;  %v3281_v59 = vld [vmem:[%s3768_s4 + $0xc4] ss:$8 sps:$4 sm:$0xff]   ;;  %v3285_v61 = vld [vmem:[%s3768_s4 + $0xc0] ss:$8 sps:$4 sm:$0xff]  }
  0x7e   : > { %v3280_v58 = vld [vmem:[%s3768_s4 + $0x2b0] ss:$8 sps:$4 sm:$0xff]   ;;  %v3283_v60 = vld [vmem:[%s3768_s4 + $0x2c4] ss:$8 sps:$4 sm:$0xff]   ;;  %v3286_v62 = vld [vmem:[%s3768_s4 + $0x2c0] ss:$8 sps:$4 sm:$0xff]  }
  0x7f   : > { %v3287_v63 = vld [vmem:[%s3768_s4 + $0xd4] ss:$8 sps:$4 sm:$0xff]   ;;  %v3291_v1 = vld [vmem:[%s3768_s4 + $0xd0] ss:$8 sps:$4 sm:$0xff]   ;;  %v3293_v3 = vld [vmem:[%s3768_s4 + $0xe4] ss:$8 sps:$4 sm:$0xff]  }
  0x80   : > { %1215 = vmatpush1.bf16.msra.mxu0 %v3204_v8  ;;  %3120 = vmatpush1.bf16.msra.mxu1 %v3204_v8  ;;  %v3292_v2 = vld [vmem:[%s3768_s4 + $0x2d0] ss:$8 sps:$4 sm:$0xff]   ;;  %v3295_v4 = vld [vmem:[%s3768_s4 + $0x2e4] ss:$8 sps:$4 sm:$0xff]   ;;  %v3297_v5 = vld [vmem:[%s3768_s4 + $0xe0] ss:$8 sps:$4 sm:$0xff]  }
  0x81   : > { %1216 = vmatprep.subr.bf16.mxu0 %v3567_v0  ;;  %3111 = vmatprep.subr.bf16.mxu1 %v3567_v0  ;;  %v3298_v6 = vld [vmem:[%s3768_s4 + $0x2e0] ss:$8 sps:$4 sm:$0xff]   ;;  %v3299_v7 = vld [vmem:[%s3768_s4 + $0xf4] ss:$8 sps:$4 sm:$0xff]   ;;  %p4429_p0 = scmp.ne.s32.totalorder %s4424_s7, 0  ;;  %s3568_s9 = smov [#allocation8]  }
  0x82   : > { %v3301_v8 = vld [vmem:[%s3768_s4 + $0x2f4] ss:$8 sps:$4 sm:$0xff]   ;;  %s3492_s10 = sshll.u32 %s3568_s9, 4  ;;  %s3493_s10 = int_to_ptr.vmem [resolvable:$false] %s3492_s10 }
  0x83   : > { %p3490_p1 = pnand %p3489_p11, %p4429_p0  ;;  %s3494_s25 = scalar_lea.vmem %s3493_s10, 16384 }
  0x84   : > { %1217 = vmatpush1.bf16.msra.mxu0 %v3205_v9  ;;  %3121 = vmatpush1.bf16.msra.mxu1 %v3205_v9  ;;  %v3303_v9 = vld [vmem:[%s3768_s4 + $0xf0] ss:$8 sps:$4 sm:$0xff]   ;;  %p3495_p7 = scmp.lt.s32.totalorder %s4360_s26, %s3493_s10  ;;  %p3496_p9 = scmp.lt.s32.totalorder %s3494_s25, %s3488_s6 }
  0x85   : > { %1218 = vmatprep.subr.bf16.mxu0 %v3567_v0  ;;  %3112 = vmatprep.subr.bf16.mxu1 %v3567_v0  ;;  %p3491_p3 = pneg %p3490_p1 }
  0x86   : > { %p3497_p12 = por %p3496_p9, %p3495_p7 }
  0x88   : > { %1219 = vmatpush1.bf16.msra.mxu0 %v3206_v10  ;;  %3122 = vmatpush1.bf16.msra.mxu1 %v3206_v10  ;;  %v3304_v10 = vld [vmem:[%s3768_s4 + $0x2f0] ss:$8 sps:$4 sm:$0xff]   ;;  %p3498_p2 = pnand %p3497_p12, %p3491_p3 }
  0x89   : > { %1220 = vmatprep.subr.bf16.mxu0 %v3567_v0  ;;  %3113 = vmatprep.subr.bf16.mxu1 %v3567_v0 }
  0x8c   : > { %1221 = vmatpush1.bf16.msra.mxu0 %v3207_v11  ;;  %3123 = vmatpush1.bf16.msra.mxu1 %v3207_v11  ;;  %v3305_v11 = vld [vmem:[%s3768_s4 + $0x104] ss:$8 sps:$4 sm:$0xff]  }
  0x8d   : > { %1222 = vmatprep.subr.bf16.mxu0 %v3567_v0  ;;  %3114 = vmatprep.subr.bf16.mxu1 %v3567_v0  ;;  %v3289_v0 = vld [vmem:[%s3768_s4 + $0x2d4] ss:$8 sps:$4 sm:$0xff]  }
  0x90   : > { %1223 = vmatpush1.bf16.msra.mxu0 %v3208_v12  ;;  %3124 = vmatpush1.bf16.msra.mxu1 %v3208_v12  ;;  %v3307_v12 = vld [vmem:[%s3768_s4 + $0x304] ss:$8 sps:$4 sm:$0xff]  }
  0x93   : > { %1237 = vmatmul.mubr.bf16.vlgmr.msra.gmra.mrb[0].mxu0 %v3209_v13  ;;  %1493 = vmatmul.mubr.bf16.vlgmr.msra.gmra.mrb[0].mxu1 %v3212_v14  ;;  %v3309_v13 = vld [vmem:[%s3768_s4 + $0x100] ss:$8 sps:$4 sm:$0xff]  }
  0x94   : > { %2778 = vmatprep.mubr.msk.bf16.mxu0 %vm1011_vm0, %v3215_v15  ;;  %2810 = vmatprep.mubr.msk.bf16.mxu1 %vm1011_vm0, %v3217_v16  ;;  %v3310_v14 = vld [vmem:[%s3768_s4 + $0x300] ss:$8 sps:$4 sm:$0xff]   ;;  %v3311_v15 = vld [vmem:[%s3768_s4 + $0x114] ss:$8 sps:$4 sm:$0xff]  }
  0x95   : > { %v3313_v16 = vld [vmem:[%s3768_s4 + $0x314] ss:$8 sps:$4 sm:$0xff]  }
  0x9b   : > { %1245 = vmatmul.mubr.bf16.gmra.mrb[4].mxu0 %v3219_v17  ;;  %1501 = vmatmul.mubr.bf16.gmra.mrb[4].mxu1 %v3220_v18  ;;  %v3315_v17 = vld [vmem:[%s3768_s4 + $0x110] ss:$8 sps:$4 sm:$0xff]  }
  0x9c   : > { %2779 = vmatprep.mubr.msk.bf16.mxu0 %vm1011_vm0, %v3221_v19  ;;  %2811 = vmatprep.mubr.msk.bf16.mxu1 %vm1011_vm0, %v3223_v20  ;;  %v3316_v18 = vld [vmem:[%s3768_s4 + $0x310] ss:$8 sps:$4 sm:$0xff]   ;;  %v3317_v19 = vld [vmem:[%s3768_s4 + $0x124] ss:$8 sps:$4 sm:$0xff]  }
  0x9d   : > { %v3319_v20 = vld [vmem:[%s3768_s4 + $0x324] ss:$8 sps:$4 sm:$0xff]  }
  0xa3   : > { %1253 = vmatmul.mubr.bf16.gmra.mrb[8].mxu0 %v3225_v21  ;;  %1509 = vmatmul.mubr.bf16.gmra.mrb[8].mxu1 %v3226_v22  ;;  %v3321_v21 = vld [vmem:[%s3768_s4 + $0x120] ss:$8 sps:$4 sm:$0xff]  }
  0xa4   : > { %2780 = vmatprep.mubr.msk.bf16.mxu0 %vm1011_vm0, %v3227_v23  ;;  %2812 = vmatprep.mubr.msk.bf16.mxu1 %vm1011_vm0, %v3229_v24  ;;  %v3322_v22 = vld [vmem:[%s3768_s4 + $0x320] ss:$8 sps:$4 sm:$0xff]   ;;  %v3323_v23 = vld [vmem:[%s3768_s4 + $0x134] ss:$8 sps:$4 sm:$0xff]  }
  0xa5   : > { %v3325_v24 = vld [vmem:[%s3768_s4 + $0x334] ss:$8 sps:$4 sm:$0xff]  }
  0xab   : > { %1261 = vmatmul.mubr.bf16.gmra.mrb[12].mxu0 %v3231_v25  ;;  %1517 = vmatmul.mubr.bf16.gmra.mrb[12].mxu1 %v3232_v26  ;;  %v3327_v25 = vld [vmem:[%s3768_s4 + $0x130] ss:$8 sps:$4 sm:$0xff]  }
  0xac   : > { %2781 = vmatprep.mubr.msk.bf16.mxu0 %vm1011_vm0, %v3233_v27  ;;  %2813 = vmatprep.mubr.msk.bf16.mxu1 %vm1011_vm0, %v3235_v28  ;;  %v3328_v26 = vld [vmem:[%s3768_s4 + $0x330] ss:$8 sps:$4 sm:$0xff]   ;;  %v3329_v27 = vld [vmem:[%s3768_s4 + $0x144] ss:$8 sps:$4 sm:$0xff]  }
  0xad   : > { %v3331_v28 = vld [vmem:[%s3768_s4 + $0x344] ss:$8 sps:$4 sm:$0xff]  }
  0xb3   : > { %1269 = vmatmul.mubr.bf16.gmra.mrb[16].mxu0 %v3237_v29  ;;  %1525 = vmatmul.mubr.bf16.gmra.mrb[16].mxu1 %v3238_v30  ;;  %v3333_v29 = vld [vmem:[%s3768_s4 + $0x140] ss:$8 sps:$4 sm:$0xff]  }
  0xb4   : > { %2782 = vmatprep.mubr.msk.bf16.mxu0 %vm1011_vm0, %v3239_v31  ;;  %2814 = vmatprep.mubr.msk.bf16.mxu1 %vm1011_vm0, %v3241_v32  ;;  %v3334_v30 = vld [vmem:[%s3768_s4 + $0x340] ss:$8 sps:$4 sm:$0xff]   ;;  %v3335_v31 = vld [vmem:[%s3768_s4 + $0x154] ss:$8 sps:$4 sm:$0xff]  }
  0xb5   : > { %v3337_v32 = vld [vmem:[%s3768_s4 + $0x354] ss:$8 sps:$4 sm:$0xff]  }
  0xbb   : > { %1277 = vmatmul.mubr.bf16.gmra.mrb[20].mxu0 %v3243_v33  ;;  %1533 = vmatmul.mubr.bf16.gmra.mrb[20].mxu1 %v3244_v34  ;;  %v3339_v33 = vld [vmem:[%s3768_s4 + $0x150] ss:$8 sps:$4 sm:$0xff]  }
  0xbc   : > { %2783 = vmatprep.mubr.msk.bf16.mxu0 %vm1011_vm0, %v3245_v35  ;;  %2815 = vmatprep.mubr.msk.bf16.mxu1 %vm1011_vm0, %v3247_v36  ;;  %v3340_v34 = vld [vmem:[%s3768_s4 + $0x350] ss:$8 sps:$4 sm:$0xff]   ;;  %v3341_v35 = vld [vmem:[%s3768_s4 + $0x164] ss:$8 sps:$4 sm:$0xff]  }
  0xbd   : > { %v3343_v36 = vld [vmem:[%s3768_s4 + $0x364] ss:$8 sps:$4 sm:$0xff]  }
  0xc3   : > { %1285 = vmatmul.mubr.bf16.gmra.mrb[24].mxu0 %v3249_v37  ;;  %1541 = vmatmul.mubr.bf16.gmra.mrb[24].mxu1 %v3250_v38  ;;  %v3345_v37 = vld [vmem:[%s3768_s4 + $0x160] ss:$8 sps:$4 sm:$0xff]  }
  0xc4   : > { %2784 = vmatprep.mubr.msk.bf16.mxu0 %vm1011_vm0, %v3251_v39  ;;  %2816 = vmatprep.mubr.msk.bf16.mxu1 %vm1011_vm0, %v3253_v40  ;;  %v3346_v38 = vld [vmem:[%s3768_s4 + $0x360] ss:$8 sps:$4 sm:$0xff]   ;;  %v3347_v39 = vld [vmem:[%s3768_s4 + $0x174] ss:$8 sps:$4 sm:$0xff]  }
  0xc5   : > { %v3349_v40 = vld [vmem:[%s3768_s4 + $0x374] ss:$8 sps:$4 sm:$0xff]  }
  0xcb   : > { %1293 = vmatmul.mubr.bf16.gmra.mrb[28].mxu0 %v3255_v41  ;;  %1549 = vmatmul.mubr.bf16.gmra.mrb[28].mxu1 %v3256_v42  ;;  %v3351_v41 = vld [vmem:[%s3768_s4 + $0x170] ss:$8 sps:$4 sm:$0xff]  }
  0xcc   : > { %2785 = vmatprep.mubr.msk.bf16.mxu0 %vm1011_vm0, %v3257_v43  ;;  %2817 = vmatprep.mubr.msk.bf16.mxu1 %vm1011_vm0, %v3259_v44  ;;  %v3352_v42 = vld [vmem:[%s3768_s4 + $0x370] ss:$8 sps:$4 sm:$0xff]   ;;  %v3353_v43 = vld [vmem:[%s3768_s4 + $0x184] ss:$8 sps:$4 sm:$0xff]  }
  0xcd   : > { %v3355_v44 = vld [vmem:[%s3768_s4 + $0x384] ss:$8 sps:$4 sm:$0xff]  }
  0xd3   : > { %1301 = vmatmul.mubr.bf16.gmra.mrb[32].mxu0 %v3261_v45  ;;  %1557 = vmatmul.mubr.bf16.gmra.mrb[32].mxu1 %v3262_v46  ;;  %v3357_v45 = vld [vmem:[%s3768_s4 + $0x180] ss:$8 sps:$4 sm:$0xff]  }
  0xd4   : > { %2786 = vmatprep.mubr.msk.bf16.mxu0 %vm1011_vm0, %v3263_v47  ;;  %2818 = vmatprep.mubr.msk.bf16.mxu1 %vm1011_vm0, %v3265_v48  ;;  %v3358_v46 = vld [vmem:[%s3768_s4 + $0x380] ss:$8 sps:$4 sm:$0xff]   ;;  %v3359_v47 = vld [vmem:[%s3768_s4 + $0x194] ss:$8 sps:$4 sm:$0xff]  }
  0xd5   : > { %v3361_v48 = vld [vmem:[%s3768_s4 + $0x394] ss:$8 sps:$4 sm:$0xff]  }
  0xdb   : > { %1309 = vmatmul.mubr.bf16.gmra.mrb[36].mxu0 %v3267_v49  ;;  %1565 = vmatmul.mubr.bf16.gmra.mrb[36].mxu1 %v3268_v50  ;;  %v3363_v49 = vld [vmem:[%s3768_s4 + $0x190] ss:$8 sps:$4 sm:$0xff]  }
  0xdc   : > { %2787 = vmatprep.mubr.msk.bf16.mxu0 %vm1011_vm0, %v3269_v51  ;;  %2819 = vmatprep.mubr.msk.bf16.mxu1 %vm1011_vm0, %v3271_v52  ;;  %v3364_v50 = vld [vmem:[%s3768_s4 + $0x390] ss:$8 sps:$4 sm:$0xff]   ;;  %v3365_v51 = vld [vmem:[%s3768_s4 + $0x1a4] ss:$8 sps:$4 sm:$0xff]  }
  0xdd   : > { %v3367_v52 = vld [vmem:[%s3768_s4 + $0x3a4] ss:$8 sps:$4 sm:$0xff]  }
  0xe3   : > { %1317 = vmatmul.mubr.bf16.gmra.mrb[40].mxu0 %v3273_v53  ;;  %1573 = vmatmul.mubr.bf16.gmra.mrb[40].mxu1 %v3274_v54  ;;  %v3369_v53 = vld [vmem:[%s3768_s4 + $0x1a0] ss:$8 sps:$4 sm:$0xff]  }
  0xe4   : > { %2788 = vmatprep.mubr.msk.bf16.mxu0 %vm1011_vm0, %v3275_v55  ;;  %2820 = vmatprep.mubr.msk.bf16.mxu1 %vm1011_vm0, %v3277_v56  ;;  %v3370_v54 = vld [vmem:[%s3768_s4 + $0x3a0] ss:$8 sps:$4 sm:$0xff]   ;;  %v3371_v55 = vld [vmem:[%s3768_s4 + $0x1b4] ss:$8 sps:$4 sm:$0xff]  }
  0xe5   : > { %v3373_v56 = vld [vmem:[%s3768_s4 + $0x3b4] ss:$8 sps:$4 sm:$0xff]  }
  0xeb   : > { %1325 = vmatmul.mubr.bf16.gmra.mrb[44].mxu0 %v3279_v57  ;;  %1581 = vmatmul.mubr.bf16.gmra.mrb[44].mxu1 %v3280_v58  ;;  %v3942_v57 = vld [vmem:[#allocation7] ss:$0 sm:$0xff] }
  0xec   : > { %2789 = vmatprep.mubr.msk.bf16.mxu0 %vm1011_vm0, %v3281_v59  ;;  %2821 = vmatprep.mubr.msk.bf16.mxu1 %vm1011_vm0, %v3283_v60 }
  0xf3   : > { %1333 = vmatmul.mubr.bf16.gmra.mrb[48].mxu0 %v3285_v61  ;;  %1589 = vmatmul.mubr.bf16.gmra.mrb[48].mxu1 %v3286_v62 }
  0xf4   : > { %2790 = vmatprep.mubr.msk.bf16.mxu0 %vm1011_vm0, %v3287_v63  ;;  %2822 = vmatprep.mubr.msk.bf16.mxu1 %vm1011_vm0, %v3289_v0  ;;  %v3375_v0 = vld [vmem:[%s3768_s4 + $0x1b0] ss:$8 sps:$4 sm:$0xff]  }
  0xfb   : > { %1341 = vmatmul.mubr.bf16.gmra.mrb[52].mxu0 %v3291_v1  ;;  %1597 = vmatmul.mubr.bf16.gmra.mrb[52].mxu1 %v3292_v2  ;;  %v3376_v1 = vld [vmem:[%s3768_s4 + $0x3b0] ss:$8 sps:$4 sm:$0xff]  }
  0xfc   : > { %2791 = vmatprep.mubr.msk.bf16.mxu0 %vm1011_vm0, %v3293_v3  ;;  %2823 = vmatprep.mubr.msk.bf16.mxu1 %vm1011_vm0, %v3295_v4  ;;  %v3377_v4 = vld [vmem:[%s3768_s4 + $0x1c4] ss:$8 sps:$4 sm:$0xff]  }
 0x103   : > { %1349 = vmatmul.mubr.bf16.gmra.mrb[56].mxu0 %v3297_v5  ;;  %1605 = vmatmul.mubr.bf16.gmra.mrb[56].mxu1 %v3298_v6  ;;  %v3379_v5 = vld [vmem:[%s3768_s4 + $0x3c4] ss:$8 sps:$4 sm:$0xff]  }
 0x104   : > { %2792 = vmatprep.mubr.msk.bf16.mxu0 %vm1011_vm0, %v3299_v7  ;;  %2824 = vmatprep.mubr.msk.bf16.mxu1 %vm1011_vm0, %v3301_v8 }
 0x10b   : > { %1357 = vmatmul.mubr.bf16.gmra.mrb[60].mxu0 %v3303_v9  ;;  %1613 = vmatmul.mubr.bf16.gmra.mrb[60].mxu1 %v3304_v10 }
 0x10c   : > { %2793 = vmatprep.mubr.msk.bf16.mxu0 %vm1011_vm0, %v3305_v11  ;;  %2825 = vmatprep.mubr.msk.bf16.mxu1 %vm1011_vm0, %v3307_v12 }
 0x113   : > { %1365 = vmatmul.mubr.bf16.gmra.mrb[64].mxu0 %v3309_v13  ;;  %1621 = vmatmul.mubr.bf16.gmra.mrb[64].mxu1 %v3310_v14 }
 0x114   : > { %2794 = vmatprep.mubr.msk.bf16.mxu0 %vm1011_vm0, %v3311_v15  ;;  %2826 = vmatprep.mubr.msk.bf16.mxu1 %vm1011_vm0, %v3313_v16 }
 0x11b   : > { %1373 = vmatmul.mubr.bf16.gmra.mrb[68].mxu0 %v3315_v17  ;;  %1629 = vmatmul.mubr.bf16.gmra.mrb[68].mxu1 %v3316_v18 }
 0x11c   : > { %2795 = vmatprep.mubr.msk.bf16.mxu0 %vm1011_vm0, %v3317_v19  ;;  %2827 = vmatprep.mubr.msk.bf16.mxu1 %vm1011_vm0, %v3319_v20 }
 0x123   : > { %1381 = vmatmul.mubr.bf16.gmra.mrb[72].mxu0 %v3321_v21  ;;  %1637 = vmatmul.mubr.bf16.gmra.mrb[72].mxu1 %v3322_v22 }
 0x124   : > { %2796 = vmatprep.mubr.msk.bf16.mxu0 %vm1011_vm0, %v3323_v23  ;;  %2828 = vmatprep.mubr.msk.bf16.mxu1 %vm1011_vm0, %v3325_v24  ;;  %v3381_v24 = vld [vmem:[%s3768_s4 + $0x1c0] ss:$8 sps:$4 sm:$0xff]  }
 0x12b   : > { %1389 = vmatmul.mubr.bf16.gmra.mrb[76].mxu0 %v3327_v25  ;;  %1645 = vmatmul.mubr.bf16.gmra.mrb[76].mxu1 %v3328_v26  ;;  %v3382_v25 = vld [vmem:[%s3768_s4 + $0x3c0] ss:$8 sps:$4 sm:$0xff]  }
 0x12c   : > { %2797 = vmatprep.mubr.msk.bf16.mxu0 %vm1011_vm0, %v3329_v27  ;;  %2829 = vmatprep.mubr.msk.bf16.mxu1 %vm1011_vm0, %v3331_v28  ;;  %v3383_v28 = vld [vmem:[%s3768_s4 + $0x1d4] ss:$8 sps:$4 sm:$0xff]  }
 0x133   : > { %1397 = vmatmul.mubr.bf16.gmra.mrb[80].mxu0 %v3333_v29  ;;  %1653 = vmatmul.mubr.bf16.gmra.mrb[80].mxu1 %v3334_v30  ;;  %v3385_v29 = vld [vmem:[%s3768_s4 + $0x3d4] ss:$8 sps:$4 sm:$0xff]  }
 0x134   : > { %2798 = vmatprep.mubr.msk.bf16.mxu0 %vm1011_vm0, %v3335_v31  ;;  %2830 = vmatprep.mubr.msk.bf16.mxu1 %vm1011_vm0, %v3337_v32 }
 0x13b   : > { %1405 = vmatmul.mubr.bf16.gmra.mrb[84].mxu0 %v3339_v33  ;;  %1661 = vmatmul.mubr.bf16.gmra.mrb[84].mxu1 %v3340_v34 }
 0x13c   : > { %2799 = vmatprep.mubr.msk.bf16.mxu0 %vm1011_vm0, %v3341_v35  ;;  %2831 = vmatprep.mubr.msk.bf16.mxu1 %vm1011_vm0, %v3343_v36 }
 0x143   : > { %1413 = vmatmul.mubr.bf16.gmra.mrb[88].mxu0 %v3345_v37  ;;  %1669 = vmatmul.mubr.bf16.gmra.mrb[88].mxu1 %v3346_v38 }
 0x144   : > { %2800 = vmatprep.mubr.msk.bf16.mxu0 %vm1011_vm0, %v3347_v39  ;;  %2832 = vmatprep.mubr.msk.bf16.mxu1 %vm1011_vm0, %v3349_v40 }
 0x14b   : > { %1421 = vmatmul.mubr.bf16.gmra.mrb[92].mxu0 %v3351_v41  ;;  %1677 = vmatmul.mubr.bf16.gmra.mrb[92].mxu1 %v3352_v42 }
 0x14c   : > { %2801 = vmatprep.mubr.msk.bf16.mxu0 %vm1011_vm0, %v3353_v43  ;;  %2833 = vmatprep.mubr.msk.bf16.mxu1 %vm1011_vm0, %v3355_v44 }
 0x153   : > { %1429 = vmatmul.mubr.bf16.gmra.mrb[96].mxu0 %v3357_v45  ;;  %1685 = vmatmul.mubr.bf16.gmra.mrb[96].mxu1 %v3358_v46 }
 0x154   : > { %2802 = vmatprep.mubr.msk.bf16.mxu0 %vm1011_vm0, %v3359_v47  ;;  %2834 = vmatprep.mubr.msk.bf16.mxu1 %vm1011_vm0, %v3361_v48  ;;  %v3387_v48 = vld [vmem:[%s3768_s4 + $0x1d0] ss:$8 sps:$4 sm:$0xff]  }
 0x15b   : > { %1437 = vmatmul.mubr.bf16.gmra.mrb[100].mxu0 %v3363_v49  ;;  %1693 = vmatmul.mubr.bf16.gmra.mrb[100].mxu1 %v3364_v50  ;;  %v3388_v49 = vld [vmem:[%s3768_s4 + $0x3d0] ss:$8 sps:$4 sm:$0xff]  }
 0x15c   : > { %2803 = vmatprep.mubr.msk.bf16.mxu0 %vm1011_vm0, %v3365_v51  ;;  %2835 = vmatprep.mubr.msk.bf16.mxu1 %vm1011_vm0, %v3367_v52  ;;  %v3389_v52 = vld [vmem:[%s3768_s4 + $0x1e4] ss:$8 sps:$4 sm:$0xff]  }
 0x163   : > { %1445 = vmatmul.mubr.bf16.gmra.mrb[104].mxu0 %v3369_v53  ;;  %1701 = vmatmul.mubr.bf16.gmra.mrb[104].mxu1 %v3370_v54  ;;  %v3391_v53 = vld [vmem:[%s3768_s4 + $0x3e4] ss:$8 sps:$4 sm:$0xff]  }
 0x164   : > { %2804 = vmatprep.mubr.msk.bf16.mxu0 %vm1011_vm0, %v3371_v55  ;;  %2836 = vmatprep.mubr.msk.bf16.mxu1 %vm1011_vm0, %v3373_v56 }
 0x166   : > { %v1238_v58 = vpop.f32.mrb[0].mxu0  ;;  %v1494_v59 = vpop.f32.mrb[0].mxu1 }
 0x167   : > { %v1239_v60 = vadd.f32 %v3942_v57, %v1238_v58  ;;  %v1495_v61 = vadd.f32 %v3942_v57, %v1494_v59  ;;  %v1240_v62 = vpop.f32.mrb[1].mxu0  ;;  %v1496_v63 = vpop.f32.mrb[1].mxu1 }
 0x168   : > { %v1241_v2 = vpop.f32.mrb[2].mxu0  ;;  %v1497_v3 = vpop.f32.mrb[2].mxu1 }
 0x169   : > { %v1749_v6 = vmax.f32 %v1239_v60, 0.0  ;;  %v1813_v7 = vmax.f32 %v1495_v61, 0.0  ;;  %v1242_v8 = vadd.f32 %v3942_v57, %v1241_v2  ;;  %v1498_v9 = vadd.f32 %v3942_v57, %v1497_v3  ;;  %v1243_v10 = vpop.f32.mrb[3].mxu0  ;;  %v1499_v11 = vpop.f32.mrb[3].mxu1 }
 0x16a   : > { %v3394_v10 = vld [vmem:[%s3768_s4 + $0x3e0] ss:$8 sps:$4 sm:$0xff]  }
 0x16b   : > { %v2976_v12 = vpack.c.bf16 %v1749_v6, %v1749_v6  ;;  %v3040_v13 = vpack.c.bf16 %v1813_v7, %v1813_v7  ;;  %v1750_v14 = vmax.f32 %v1242_v8, 0.0  ;;  %v1814_v15 = vmax.f32 %v1498_v9, 0.0  ;;  %1453 = vmatmul.mubr.bf16.gmra.mrb[108].mxu0 %v3375_v0  ;;  %1709 = vmatmul.mubr.bf16.gmra.mrb[108].mxu1 %v3376_v1  ;;  %v3393_v9 = vld [vmem:[%s3768_s4 + $0x1e0] ss:$8 sps:$4 sm:$0xff]  }
 0x16c   : > { %2805 = vmatprep.mubr.msk.bf16.mxu0 %vm1011_vm0, %v3377_v4  ;;  %2837 = vmatprep.mubr.msk.bf16.mxu1 %vm1011_vm0, %v3379_v5 }
 0x16d   : > { %2390 = vst.msk [vmem:[%s3957_s20] sm:$0xf] %vm2389_vm1, %v2976_v12  ;;  %2454 = vst.msk [vmem:[%s3957_s20 + $0x100] sm:$0xf] %vm2389_vm1, %v3040_v13  ;;  %v2977_v16 = vpack.c.bf16 %v1750_v14, %v1750_v14  ;;  %v3041_v17 = vpack.c.bf16 %v1814_v15, %v1814_v15  ;;  %v3395_v13 = vld [vmem:[%s3768_s4 + $0x1f4] ss:$8 sps:$4 sm:$0xff]  }
 0x16e   : > { %v1246_v18 = vpop.f32.mrb[4].mxu0  ;;  %v1502_v19 = vpop.f32.mrb[4].mxu1  ;;  %v3397_v14 = vld [vmem:[%s3768_s4 + $0x3f4] ss:$8 sps:$4 sm:$0xff]  }
 0x16f   : > { %2391 = vst.msk [vmem:[%s3957_s20 + $0x4] sm:$0xf] %vm2389_vm1, %v2977_v16  ;;  %2455 = vst.msk [vmem:[%s3957_s20 + $0x104] sm:$0xf] %vm2389_vm1, %v3041_v17  ;;  %v1247_v20 = vadd.f32 %v3942_v57, %v1246_v18  ;;  %v1503_v21 = vadd.f32 %v3942_v57, %v1502_v19  ;;  %v1248_v22 = vpop.f32.mrb[5].mxu0  ;;  %v1504_v23 = vpop.f32.mrb[5].mxu1 }
 0x170   : > { %v1249_v26 = vpop.f32.mrb[6].mxu0  ;;  %v1505_v27 = vpop.f32.mrb[6].mxu1 }
 0x171   : > { %v1751_v30 = vmax.f32 %v1247_v20, 0.0  ;;  %v1815_v31 = vmax.f32 %v1503_v21, 0.0  ;;  %v1250_v32 = vadd.f32 %v3942_v57, %v1249_v26  ;;  %v1506_v33 = vadd.f32 %v3942_v57, %v1505_v27  ;;  %v1251_v34 = vpop.f32.mrb[7].mxu0  ;;  %v1507_v35 = vpop.f32.mrb[7].mxu1 }
 0x172   : > { %v3400_v34 = vld [vmem:[%s3768_s4 + $0x3f0] ss:$8 sps:$4 sm:$0xff]  }
 0x173   : > { %v2978_v36 = vpack.c.bf16 %v1751_v30, %v1751_v30  ;;  %v3042_v37 = vpack.c.bf16 %v1815_v31, %v1815_v31  ;;  %v1752_v38 = vmax.f32 %v1250_v32, 0.0  ;;  %v1816_v39 = vmax.f32 %v1506_v33, 0.0  ;;  %1461 = vmatmul.mubr.bf16.gmra.mrb[112].mxu0 %v3381_v24  ;;  %1717 = vmatmul.mubr.bf16.gmra.mrb[112].mxu1 %v3382_v25  ;;  %v3399_v33 = vld [vmem:[%s3768_s4 + $0x1f0] ss:$8 sps:$4 sm:$0xff]  }
 0x174   : > { %2806 = vmatprep.mubr.msk.bf16.mxu0 %vm1011_vm0, %v3383_v28  ;;  %2838 = vmatprep.mubr.msk.bf16.mxu1 %vm1011_vm0, %v3385_v29 }
 0x175   : > { %2392 = vst.msk [vmem:[%s3957_s20 + $0x8] sm:$0xf] %vm2389_vm1, %v2978_v36  ;;  %2456 = vst.msk [vmem:[%s3957_s20 + $0x108] sm:$0xf] %vm2389_vm1, %v3042_v37  ;;  %v2979_v40 = vpack.c.bf16 %v1752_v38, %v1752_v38  ;;  %v3043_v41 = vpack.c.bf16 %v1816_v39, %v1816_v39 }
 0x176   : > { %v1254_v42 = vpop.f32.mrb[8].mxu0  ;;  %v1510_v43 = vpop.f32.mrb[8].mxu1 }
 0x177   : > { %2393 = vst.msk [vmem:[%s3957_s20 + $0xc] sm:$0xf] %vm2389_vm1, %v2979_v40  ;;  %2457 = vst.msk [vmem:[%s3957_s20 + $0x10c] sm:$0xf] %vm2389_vm1, %v3043_v41  ;;  %v1255_v44 = vadd.f32 %v3942_v57, %v1254_v42  ;;  %v1511_v45 = vadd.f32 %v3942_v57, %v1510_v43  ;;  %v1256_v46 = vpop.f32.mrb[9].mxu0  ;;  %v1512_v47 = vpop.f32.mrb[9].mxu1 }
 0x178   : > { %v1257_v50 = vpop.f32.mrb[10].mxu0  ;;  %v1513_v51 = vpop.f32.mrb[10].mxu1 }
 0x179   : > { %v1753_v54 = vmax.f32 %v1255_v44, 0.0  ;;  %v1817_v55 = vmax.f32 %v1511_v45, 0.0  ;;  %v1258_v56 = vadd.f32 %v3942_v57, %v1257_v50  ;;  %v1514_v58 = vadd.f32 %v3942_v57, %v1513_v51  ;;  %v1259_v59 = vpop.f32.mrb[11].mxu0  ;;  %v1515_v60 = vpop.f32.mrb[11].mxu1 }
 0x17b   : > { %v2980_v61 = vpack.c.bf16 %v1753_v54, %v1753_v54  ;;  %v3044_v62 = vpack.c.bf16 %v1817_v55, %v1817_v55  ;;  %v1754_v63 = vmax.f32 %v1258_v56, 0.0  ;;  %v1818_v0 = vmax.f32 %v1514_v58, 0.0  ;;  %1469 = vmatmul.mubr.bf16.gmra.mrb[116].mxu0 %v3387_v48  ;;  %1725 = vmatmul.mubr.bf16.gmra.mrb[116].mxu1 %v3388_v49 }
 0x17c   : > { %2807 = vmatprep.mubr.msk.bf16.mxu0 %vm1011_vm0, %v3389_v52  ;;  %2839 = vmatprep.mubr.msk.bf16.mxu1 %vm1011_vm0, %v3391_v53 }
 0x17d   : > { %2394 = vst.msk [vmem:[%s3957_s20 + $0x10] sm:$0xf] %vm2389_vm1, %v2980_v61  ;;  %2458 = vst.msk [vmem:[%s3957_s20 + $0x110] sm:$0xf] %vm2389_vm1, %v3044_v62  ;;  %v2981_v1 = vpack.c.bf16 %v1754_v63, %v1754_v63  ;;  %v3045_v2 = vpack.c.bf16 %v1818_v0, %v1818_v0 }
 0x17e   : > { %v1262_v3 = vpop.f32.mrb[12].mxu0  ;;  %v1518_v4 = vpop.f32.mrb[12].mxu1 }
 0x17f   : > { %2395 = vst.msk [vmem:[%s3957_s20 + $0x14] sm:$0xf] %vm2389_vm1, %v2981_v1  ;;  %2459 = vst.msk [vmem:[%s3957_s20 + $0x114] sm:$0xf] %vm2389_vm1, %v3045_v2  ;;  %v1263_v5 = vadd.f32 %v3942_v57, %v1262_v3  ;;  %v1519_v6 = vadd.f32 %v3942_v57, %v1518_v4  ;;  %v1264_v7 = vpop.f32.mrb[13].mxu0  ;;  %v1520_v8 = vpop.f32.mrb[13].mxu1 }
 0x180   : > { %v1265_v11 = vpop.f32.mrb[14].mxu0  ;;  %v1521_v12 = vpop.f32.mrb[14].mxu1 }
 0x181   : > { %v1755_v15 = vmax.f32 %v1263_v5, 0.0  ;;  %v1819_v16 = vmax.f32 %v1519_v6, 0.0  ;;  %v1266_v17 = vadd.f32 %v3942_v57, %v1265_v11  ;;  %v1522_v18 = vadd.f32 %v3942_v57, %v1521_v12  ;;  %v1267_v19 = vpop.f32.mrb[15].mxu0  ;;  %v1523_v20 = vpop.f32.mrb[15].mxu1 }
 0x183   : > { %v2982_v21 = vpack.c.bf16 %v1755_v15, %v1755_v15  ;;  %v3046_v22 = vpack.c.bf16 %v1819_v16, %v1819_v16  ;;  %v1756_v23 = vmax.f32 %v1266_v17, 0.0  ;;  %v1820_v24 = vmax.f32 %v1522_v18, 0.0  ;;  %1477 = vmatmul.mubr.bf16.gmra.mrb[120].mxu0 %v3393_v9  ;;  %1733 = vmatmul.mubr.bf16.gmra.mrb[120].mxu1 %v3394_v10 }
 0x184   : > { %2808 = vmatprep.mubr.msk.bf16.mxu0 %vm1011_vm0, %v3395_v13  ;;  %2840 = vmatprep.mubr.msk.bf16.mxu1 %vm1011_vm0, %v3397_v14 }
 0x185   : > { %2396 = vst.msk [vmem:[%s3957_s20 + $0x18] sm:$0xf] %vm2389_vm1, %v2982_v21  ;;  %2460 = vst.msk [vmem:[%s3957_s20 + $0x118] sm:$0xf] %vm2389_vm1, %v3046_v22  ;;  %v2983_v25 = vpack.c.bf16 %v1756_v23, %v1756_v23  ;;  %v3047_v26 = vpack.c.bf16 %v1820_v24, %v1820_v24 }
 0x186   : > { %v1270_v27 = vpop.f32.mrb[16].mxu0  ;;  %v1526_v28 = vpop.f32.mrb[16].mxu1 }
 0x187   : > { %2397 = vst.msk [vmem:[%s3957_s20 + $0x1c] sm:$0xf] %vm2389_vm1, %v2983_v25  ;;  %2461 = vst.msk [vmem:[%s3957_s20 + $0x11c] sm:$0xf] %vm2389_vm1, %v3047_v26  ;;  %v1271_v29 = vadd.f32 %v3942_v57, %v1270_v27  ;;  %v1527_v30 = vadd.f32 %v3942_v57, %v1526_v28  ;;  %v1272_v31 = vpop.f32.mrb[17].mxu0  ;;  %v1528_v32 = vpop.f32.mrb[17].mxu1 }
 0x188   : > { %v1273_v35 = vpop.f32.mrb[18].mxu0  ;;  %v1529_v36 = vpop.f32.mrb[18].mxu1 }
 0x189   : > { %v1757_v37 = vmax.f32 %v1271_v29, 0.0  ;;  %v1821_v38 = vmax.f32 %v1527_v30, 0.0  ;;  %v1274_v39 = vadd.f32 %v3942_v57, %v1273_v35  ;;  %v1530_v40 = vadd.f32 %v3942_v57, %v1529_v36  ;;  %v1275_v41 = vpop.f32.mrb[19].mxu0  ;;  %v1531_v42 = vpop.f32.mrb[19].mxu1 }
 0x18b   : > { %v2984_v43 = vpack.c.bf16 %v1757_v37, %v1757_v37  ;;  %v3048_v44 = vpack.c.bf16 %v1821_v38, %v1821_v38  ;;  %v1758_v45 = vmax.f32 %v1274_v39, 0.0  ;;  %v1822_v46 = vmax.f32 %v1530_v40, 0.0  ;;  %1485 = vmatmul.mubr.bf16.gmra.mrb[124].mxu0 %v3399_v33  ;;  %1741 = vmatmul.mubr.bf16.gmra.mrb[124].mxu1 %v3400_v34 }
 0x18d   : > { %2398 = vst.msk [vmem:[%s3957_s20 + $0x20] sm:$0xf] %vm2389_vm1, %v2984_v43  ;;  %2462 = vst.msk [vmem:[%s3957_s20 + $0x120] sm:$0xf] %vm2389_vm1, %v3048_v44  ;;  %v2985_v47 = vpack.c.bf16 %v1758_v45, %v1758_v45  ;;  %v3049_v48 = vpack.c.bf16 %v1822_v46, %v1822_v46 }
 0x18e   : > { %v1278_v49 = vpop.f32.mrb[20].mxu0  ;;  %v1534_v50 = vpop.f32.mrb[20].mxu1 }
 0x18f   : > { %2399 = vst.msk [vmem:[%s3957_s20 + $0x24] sm:$0xf] %vm2389_vm1, %v2985_v47  ;;  %2463 = vst.msk [vmem:[%s3957_s20 + $0x124] sm:$0xf] %vm2389_vm1, %v3049_v48  ;;  %v1279_v51 = vadd.f32 %v3942_v57, %v1278_v49  ;;  %v1535_v52 = vadd.f32 %v3942_v57, %v1534_v50  ;;  %v1280_v53 = vpop.f32.mrb[21].mxu0  ;;  %v1536_v54 = vpop.f32.mrb[21].mxu1 }
 0x190   : > { %v1281_v55 = vpop.f32.mrb[22].mxu0  ;;  %v1537_v56 = vpop.f32.mrb[22].mxu1 }
 0x191   : > { %v1759_v58 = vmax.f32 %v1279_v51, 0.0  ;;  %v1823_v59 = vmax.f32 %v1535_v52, 0.0  ;;  %v1282_v60 = vadd.f32 %v3942_v57, %v1281_v55  ;;  %v1538_v61 = vadd.f32 %v3942_v57, %v1537_v56  ;;  %v1283_v62 = vpop.f32.mrb[23].mxu0  ;;  %v1539_v63 = vpop.f32.mrb[23].mxu1 }
 0x193   : > { %v2986_v0 = vpack.c.bf16 %v1759_v58, %v1759_v58  ;;  %v3050_v1 = vpack.c.bf16 %v1823_v59, %v1823_v59  ;;  %v1760_v2 = vmax.f32 %v1282_v60, 0.0  ;;  %v1824_v3 = vmax.f32 %v1538_v61, 0.0 }
 0x195   : > { %2400 = vst.msk [vmem:[%s3957_s20 + $0x28] sm:$0xf] %vm2389_vm1, %v2986_v0  ;;  %2464 = vst.msk [vmem:[%s3957_s20 + $0x128] sm:$0xf] %vm2389_vm1, %v3050_v1  ;;  %v2987_v4 = vpack.c.bf16 %v1760_v2, %v1760_v2  ;;  %v3051_v5 = vpack.c.bf16 %v1824_v3, %v1824_v3 }
 0x196   : > { %v1286_v6 = vpop.f32.mrb[24].mxu0  ;;  %v1542_v7 = vpop.f32.mrb[24].mxu1 }
 0x197   : > { %2401 = vst.msk [vmem:[%s3957_s20 + $0x2c] sm:$0xf] %vm2389_vm1, %v2987_v4  ;;  %2465 = vst.msk [vmem:[%s3957_s20 + $0x12c] sm:$0xf] %vm2389_vm1, %v3051_v5  ;;  %v1287_v8 = vadd.f32 %v3942_v57, %v1286_v6  ;;  %v1543_v9 = vadd.f32 %v3942_v57, %v1542_v7  ;;  %v1288_v10 = vpop.f32.mrb[25].mxu0  ;;  %v1544_v11 = vpop.f32.mrb[25].mxu1 }
 0x198   : > { %v1289_v12 = vpop.f32.mrb[26].mxu0  ;;  %v1545_v13 = vpop.f32.mrb[26].mxu1 }
 0x199   : > { %v1761_v14 = vmax.f32 %v1287_v8, 0.0  ;;  %v1825_v15 = vmax.f32 %v1543_v9, 0.0  ;;  %v1290_v16 = vadd.f32 %v3942_v57, %v1289_v12  ;;  %v1546_v17 = vadd.f32 %v3942_v57, %v1545_v13  ;;  %v1291_v18 = vpop.f32.mrb[27].mxu0  ;;  %v1547_v19 = vpop.f32.mrb[27].mxu1 }
 0x19b   : > { %v2988_v20 = vpack.c.bf16 %v1761_v14, %v1761_v14  ;;  %v3052_v21 = vpack.c.bf16 %v1825_v15, %v1825_v15  ;;  %v1762_v22 = vmax.f32 %v1290_v16, 0.0  ;;  %v1826_v23 = vmax.f32 %v1546_v17, 0.0 }
 0x19d   : > { %2402 = vst.msk [vmem:[%s3957_s20 + $0x30] sm:$0xf] %vm2389_vm1, %v2988_v20  ;;  %2466 = vst.msk [vmem:[%s3957_s20 + $0x130] sm:$0xf] %vm2389_vm1, %v3052_v21  ;;  %v2989_v24 = vpack.c.bf16 %v1762_v22, %v1762_v22  ;;  %v3053_v25 = vpack.c.bf16 %v1826_v23, %v1826_v23 }
 0x19e   : > { %v1294_v26 = vpop.f32.mrb[28].mxu0  ;;  %v1550_v27 = vpop.f32.mrb[28].mxu1 }
 0x19f   : > { %2403 = vst.msk [vmem:[%s3957_s20 + $0x34] sm:$0xf] %vm2389_vm1, %v2989_v24  ;;  %2467 = vst.msk [vmem:[%s3957_s20 + $0x134] sm:$0xf] %vm2389_vm1, %v3053_v25  ;;  %v1295_v28 = vadd.f32 %v3942_v57, %v1294_v26  ;;  %v1551_v29 = vadd.f32 %v3942_v57, %v1550_v27  ;;  %v1296_v30 = vpop.f32.mrb[29].mxu0  ;;  %v1552_v31 = vpop.f32.mrb[29].mxu1 }
 0x1a0   : > { %v1297_v32 = vpop.f32.mrb[30].mxu0  ;;  %v1553_v33 = vpop.f32.mrb[30].mxu1 }
 0x1a1   : > { %v1763_v34 = vmax.f32 %v1295_v28, 0.0  ;;  %v1827_v35 = vmax.f32 %v1551_v29, 0.0  ;;  %v1298_v36 = vadd.f32 %v3942_v57, %v1297_v32  ;;  %v1554_v37 = vadd.f32 %v3942_v57, %v1553_v33  ;;  %v1299_v38 = vpop.f32.mrb[31].mxu0  ;;  %v1555_v39 = vpop.f32.mrb[31].mxu1 }
 0x1a3   : > { %v2990_v40 = vpack.c.bf16 %v1763_v34, %v1763_v34  ;;  %v3054_v41 = vpack.c.bf16 %v1827_v35, %v1827_v35  ;;  %v1764_v42 = vmax.f32 %v1298_v36, 0.0  ;;  %v1828_v43 = vmax.f32 %v1554_v37, 0.0 }
 0x1a5   : > { %2404 = vst.msk [vmem:[%s3957_s20 + $0x38] sm:$0xf] %vm2389_vm1, %v2990_v40  ;;  %2468 = vst.msk [vmem:[%s3957_s20 + $0x138] sm:$0xf] %vm2389_vm1, %v3054_v41  ;;  %v2991_v44 = vpack.c.bf16 %v1764_v42, %v1764_v42  ;;  %v3055_v45 = vpack.c.bf16 %v1828_v43, %v1828_v43 }
 0x1a6   : > { %v1302_v46 = vpop.f32.mrb[32].mxu0  ;;  %v1558_v47 = vpop.f32.mrb[32].mxu1 }
 0x1a7   : > { %2405 = vst.msk [vmem:[%s3957_s20 + $0x3c] sm:$0xf] %vm2389_vm1, %v2991_v44  ;;  %2469 = vst.msk [vmem:[%s3957_s20 + $0x13c] sm:$0xf] %vm2389_vm1, %v3055_v45  ;;  %v1303_v48 = vadd.f32 %v3942_v57, %v1302_v46  ;;  %v1559_v49 = vadd.f32 %v3942_v57, %v1558_v47  ;;  %v1304_v50 = vpop.f32.mrb[33].mxu0  ;;  %v1560_v51 = vpop.f32.mrb[33].mxu1 }
 0x1a8   : > { %v1305_v52 = vpop.f32.mrb[34].mxu0  ;;  %v1561_v53 = vpop.f32.mrb[34].mxu1 }
 0x1a9   : > { %v1765_v54 = vmax.f32 %v1303_v48, 0.0  ;;  %v1829_v55 = vmax.f32 %v1559_v49, 0.0  ;;  %v1306_v56 = vadd.f32 %v3942_v57, %v1305_v52  ;;  %v1562_v58 = vadd.f32 %v3942_v57, %v1561_v53  ;;  %v1307_v59 = vpop.f32.mrb[35].mxu0  ;;  %v1563_v60 = vpop.f32.mrb[35].mxu1 }
 0x1ab   : > { %v2992_v61 = vpack.c.bf16 %v1765_v54, %v1765_v54  ;;  %v3056_v62 = vpack.c.bf16 %v1829_v55, %v1829_v55  ;;  %v1766_v63 = vmax.f32 %v1306_v56, 0.0  ;;  %v1830_v0 = vmax.f32 %v1562_v58, 0.0 }
 0x1ad   : > { %2406 = vst.msk [vmem:[%s3957_s20 + $0x40] sm:$0xf] %vm2389_vm1, %v2992_v61  ;;  %2470 = vst.msk [vmem:[%s3957_s20 + $0x140] sm:$0xf] %vm2389_vm1, %v3056_v62  ;;  %v2993_v1 = vpack.c.bf16 %v1766_v63, %v1766_v63  ;;  %v3057_v2 = vpack.c.bf16 %v1830_v0, %v1830_v0 }
 0x1ae   : > { %v1310_v3 = vpop.f32.mrb[36].mxu0  ;;  %v1566_v4 = vpop.f32.mrb[36].mxu1 }
 0x1af   : > { %2407 = vst.msk [vmem:[%s3957_s20 + $0x44] sm:$0xf] %vm2389_vm1, %v2993_v1  ;;  %2471 = vst.msk [vmem:[%s3957_s20 + $0x144] sm:$0xf] %vm2389_vm1, %v3057_v2  ;;  %v1311_v5 = vadd.f32 %v3942_v57, %v1310_v3  ;;  %v1567_v6 = vadd.f32 %v3942_v57, %v1566_v4  ;;  %v1312_v7 = vpop.f32.mrb[37].mxu0  ;;  %v1568_v8 = vpop.f32.mrb[37].mxu1 }
 0x1b0   : > { %v1313_v9 = vpop.f32.mrb[38].mxu0  ;;  %v1569_v10 = vpop.f32.mrb[38].mxu1 }
 0x1b1   : > { %v1767_v11 = vmax.f32 %v1311_v5, 0.0  ;;  %v1831_v12 = vmax.f32 %v1567_v6, 0.0  ;;  %v1314_v13 = vadd.f32 %v3942_v57, %v1313_v9  ;;  %v1570_v14 = vadd.f32 %v3942_v57, %v1569_v10  ;;  %v1315_v15 = vpop.f32.mrb[39].mxu0  ;;  %v1571_v16 = vpop.f32.mrb[39].mxu1 }
 0x1b3   : > { %v2994_v17 = vpack.c.bf16 %v1767_v11, %v1767_v11  ;;  %v3058_v18 = vpack.c.bf16 %v1831_v12, %v1831_v12  ;;  %v1768_v19 = vmax.f32 %v1314_v13, 0.0  ;;  %v1832_v20 = vmax.f32 %v1570_v14, 0.0 }
 0x1b5   : > { %2408 = vst.msk [vmem:[%s3957_s20 + $0x48] sm:$0xf] %vm2389_vm1, %v2994_v17  ;;  %2472 = vst.msk [vmem:[%s3957_s20 + $0x148] sm:$0xf] %vm2389_vm1, %v3058_v18  ;;  %v2995_v21 = vpack.c.bf16 %v1768_v19, %v1768_v19  ;;  %v3059_v22 = vpack.c.bf16 %v1832_v20, %v1832_v20 }
 0x1b6   : > { %v1318_v23 = vpop.f32.mrb[40].mxu0  ;;  %v1574_v24 = vpop.f32.mrb[40].mxu1 }
 0x1b7   : > { %2409 = vst.msk [vmem:[%s3957_s20 + $0x4c] sm:$0xf] %vm2389_vm1, %v2995_v21  ;;  %2473 = vst.msk [vmem:[%s3957_s20 + $0x14c] sm:$0xf] %vm2389_vm1, %v3059_v22  ;;  %v1319_v25 = vadd.f32 %v3942_v57, %v1318_v23  ;;  %v1575_v26 = vadd.f32 %v3942_v57, %v1574_v24  ;;  %v1320_v27 = vpop.f32.mrb[41].mxu0  ;;  %v1576_v28 = vpop.f32.mrb[41].mxu1 }
 0x1b8   : > { %v1321_v29 = vpop.f32.mrb[42].mxu0  ;;  %v1577_v30 = vpop.f32.mrb[42].mxu1 }
 0x1b9   : > { %v1769_v31 = vmax.f32 %v1319_v25, 0.0  ;;  %v1833_v32 = vmax.f32 %v1575_v26, 0.0  ;;  %v1322_v33 = vadd.f32 %v3942_v57, %v1321_v29  ;;  %v1578_v34 = vadd.f32 %v3942_v57, %v1577_v30  ;;  %v1323_v35 = vpop.f32.mrb[43].mxu0  ;;  %v1579_v36 = vpop.f32.mrb[43].mxu1 }
 0x1bb   : > { %v2996_v37 = vpack.c.bf16 %v1769_v31, %v1769_v31  ;;  %v3060_v38 = vpack.c.bf16 %v1833_v32, %v1833_v32  ;;  %v1770_v39 = vmax.f32 %v1322_v33, 0.0  ;;  %v1834_v40 = vmax.f32 %v1578_v34, 0.0 }
 0x1bd   : > { %2410 = vst.msk [vmem:[%s3957_s20 + $0x50] sm:$0xf] %vm2389_vm1, %v2996_v37  ;;  %2474 = vst.msk [vmem:[%s3957_s20 + $0x150] sm:$0xf] %vm2389_vm1, %v3060_v38  ;;  %v2997_v41 = vpack.c.bf16 %v1770_v39, %v1770_v39  ;;  %v3061_v42 = vpack.c.bf16 %v1834_v40, %v1834_v40 }
 0x1be   : > { %v1326_v43 = vpop.f32.mrb[44].mxu0  ;;  %v1582_v44 = vpop.f32.mrb[44].mxu1 }
 0x1bf   : > { %2411 = vst.msk [vmem:[%s3957_s20 + $0x54] sm:$0xf] %vm2389_vm1, %v2997_v41  ;;  %2475 = vst.msk [vmem:[%s3957_s20 + $0x154] sm:$0xf] %vm2389_vm1, %v3061_v42  ;;  %v1327_v45 = vadd.f32 %v3942_v57, %v1326_v43  ;;  %v1583_v46 = vadd.f32 %v3942_v57, %v1582_v44  ;;  %v1328_v47 = vpop.f32.mrb[45].mxu0  ;;  %v1584_v48 = vpop.f32.mrb[45].mxu1 }
 0x1c0   : > { %v1329_v49 = vpop.f32.mrb[46].mxu0  ;;  %v1585_v50 = vpop.f32.mrb[46].mxu1 }
 0x1c1   : > { %v1771_v51 = vmax.f32 %v1327_v45, 0.0  ;;  %v1835_v52 = vmax.f32 %v1583_v46, 0.0  ;;  %v1330_v53 = vadd.f32 %v3942_v57, %v1329_v49  ;;  %v1586_v54 = vadd.f32 %v3942_v57, %v1585_v50  ;;  %v1331_v55 = vpop.f32.mrb[47].mxu0  ;;  %v1587_v56 = vpop.f32.mrb[47].mxu1 }
 0x1c3   : > { %v2998_v58 = vpack.c.bf16 %v1771_v51, %v1771_v51  ;;  %v3062_v59 = vpack.c.bf16 %v1835_v52, %v1835_v52  ;;  %v1772_v60 = vmax.f32 %v1330_v53, 0.0  ;;  %v1836_v61 = vmax.f32 %v1586_v54, 0.0 }
 0x1c5   : > { %2412 = vst.msk [vmem:[%s3957_s20 + $0x58] sm:$0xf] %vm2389_vm1, %v2998_v58  ;;  %2476 = vst.msk [vmem:[%s3957_s20 + $0x158] sm:$0xf] %vm2389_vm1, %v3062_v59  ;;  %v2999_v62 = vpack.c.bf16 %v1772_v60, %v1772_v60  ;;  %v3063_v63 = vpack.c.bf16 %v1836_v61, %v1836_v61 }
 0x1c6   : > { %v1334_v0 = vpop.f32.mrb[48].mxu0  ;;  %v1590_v1 = vpop.f32.mrb[48].mxu1 }
 0x1c7   : > { %2413 = vst.msk [vmem:[%s3957_s20 + $0x5c] sm:$0xf] %vm2389_vm1, %v2999_v62  ;;  %2477 = vst.msk [vmem:[%s3957_s20 + $0x15c] sm:$0xf] %vm2389_vm1, %v3063_v63  ;;  %v1335_v2 = vadd.f32 %v3942_v57, %v1334_v0  ;;  %v1591_v3 = vadd.f32 %v3942_v57, %v1590_v1  ;;  %v1336_v4 = vpop.f32.mrb[49].mxu0  ;;  %v1592_v5 = vpop.f32.mrb[49].mxu1 }
 0x1c8   : > { %v1337_v6 = vpop.f32.mrb[50].mxu0  ;;  %v1593_v7 = vpop.f32.mrb[50].mxu1 }
 0x1c9   : > { %v1773_v8 = vmax.f32 %v1335_v2, 0.0  ;;  %v1837_v9 = vmax.f32 %v1591_v3, 0.0  ;;  %v1338_v10 = vadd.f32 %v3942_v57, %v1337_v6  ;;  %v1594_v11 = vadd.f32 %v3942_v57, %v1593_v7  ;;  %v1339_v12 = vpop.f32.mrb[51].mxu0  ;;  %v1595_v13 = vpop.f32.mrb[51].mxu1 }
 0x1cb   : > { %v3000_v14 = vpack.c.bf16 %v1773_v8, %v1773_v8  ;;  %v3064_v15 = vpack.c.bf16 %v1837_v9, %v1837_v9  ;;  %v1774_v16 = vmax.f32 %v1338_v10, 0.0  ;;  %v1838_v17 = vmax.f32 %v1594_v11, 0.0 }
 0x1cd   : > { %2414 = vst.msk [vmem:[%s3957_s20 + $0x60] sm:$0xf] %vm2389_vm1, %v3000_v14  ;;  %2478 = vst.msk [vmem:[%s3957_s20 + $0x160] sm:$0xf] %vm2389_vm1, %v3064_v15  ;;  %v3001_v18 = vpack.c.bf16 %v1774_v16, %v1774_v16  ;;  %v3065_v19 = vpack.c.bf16 %v1838_v17, %v1838_v17 }
 0x1ce   : > { %v1342_v20 = vpop.f32.mrb[52].mxu0  ;;  %v1598_v21 = vpop.f32.mrb[52].mxu1 }
 0x1cf   : > { %2415 = vst.msk [vmem:[%s3957_s20 + $0x64] sm:$0xf] %vm2389_vm1, %v3001_v18  ;;  %2479 = vst.msk [vmem:[%s3957_s20 + $0x164] sm:$0xf] %vm2389_vm1, %v3065_v19  ;;  %v1343_v22 = vadd.f32 %v3942_v57, %v1342_v20  ;;  %v1599_v23 = vadd.f32 %v3942_v57, %v1598_v21  ;;  %v1344_v24 = vpop.f32.mrb[53].mxu0  ;;  %v1600_v25 = vpop.f32.mrb[53].mxu1 }
 0x1d0   : > { %v1345_v26 = vpop.f32.mrb[54].mxu0  ;;  %v1601_v27 = vpop.f32.mrb[54].mxu1 }
 0x1d1   : > { %v1775_v28 = vmax.f32 %v1343_v22, 0.0  ;;  %v1839_v29 = vmax.f32 %v1599_v23, 0.0  ;;  %v1346_v30 = vadd.f32 %v3942_v57, %v1345_v26  ;;  %v1602_v31 = vadd.f32 %v3942_v57, %v1601_v27  ;;  %v1347_v32 = vpop.f32.mrb[55].mxu0  ;;  %v1603_v33 = vpop.f32.mrb[55].mxu1 }
 0x1d3   : > { %v3002_v34 = vpack.c.bf16 %v1775_v28, %v1775_v28  ;;  %v3066_v35 = vpack.c.bf16 %v1839_v29, %v1839_v29  ;;  %v1776_v36 = vmax.f32 %v1346_v30, 0.0  ;;  %v1840_v37 = vmax.f32 %v1602_v31, 0.0 }
 0x1d5   : > { %2416 = vst.msk [vmem:[%s3957_s20 + $0x68] sm:$0xf] %vm2389_vm1, %v3002_v34  ;;  %2480 = vst.msk [vmem:[%s3957_s20 + $0x168] sm:$0xf] %vm2389_vm1, %v3066_v35  ;;  %v3003_v38 = vpack.c.bf16 %v1776_v36, %v1776_v36  ;;  %v3067_v39 = vpack.c.bf16 %v1840_v37, %v1840_v37 }
 0x1d6   : > { %v1350_v40 = vpop.f32.mrb[56].mxu0  ;;  %v1606_v41 = vpop.f32.mrb[56].mxu1 }
 0x1d7   : > { %2417 = vst.msk [vmem:[%s3957_s20 + $0x6c] sm:$0xf] %vm2389_vm1, %v3003_v38  ;;  %2481 = vst.msk [vmem:[%s3957_s20 + $0x16c] sm:$0xf] %vm2389_vm1, %v3067_v39  ;;  %v1351_v42 = vadd.f32 %v3942_v57, %v1350_v40  ;;  %v1607_v43 = vadd.f32 %v3942_v57, %v1606_v41  ;;  %v1352_v44 = vpop.f32.mrb[57].mxu0  ;;  %v1608_v45 = vpop.f32.mrb[57].mxu1 }
 0x1d8   : > { %v1353_v46 = vpop.f32.mrb[58].mxu0  ;;  %v1609_v47 = vpop.f32.mrb[58].mxu1 }
 0x1d9   : > { %v1777_v48 = vmax.f32 %v1351_v42, 0.0  ;;  %v1841_v49 = vmax.f32 %v1607_v43, 0.0  ;;  %v1354_v50 = vadd.f32 %v3942_v57, %v1353_v46  ;;  %v1610_v51 = vadd.f32 %v3942_v57, %v1609_v47  ;;  %v1355_v52 = vpop.f32.mrb[59].mxu0  ;;  %v1611_v53 = vpop.f32.mrb[59].mxu1 }
 0x1db   : > { %v3004_v54 = vpack.c.bf16 %v1777_v48, %v1777_v48  ;;  %v3068_v55 = vpack.c.bf16 %v1841_v49, %v1841_v49  ;;  %v1778_v56 = vmax.f32 %v1354_v50, 0.0  ;;  %v1842_v58 = vmax.f32 %v1610_v51, 0.0 }
 0x1dd   : > { %2418 = vst.msk [vmem:[%s3957_s20 + $0x70] sm:$0xf] %vm2389_vm1, %v3004_v54  ;;  %2482 = vst.msk [vmem:[%s3957_s20 + $0x170] sm:$0xf] %vm2389_vm1, %v3068_v55  ;;  %v3005_v59 = vpack.c.bf16 %v1778_v56, %v1778_v56  ;;  %v3069_v60 = vpack.c.bf16 %v1842_v58, %v1842_v58 }
 0x1de   : > { %v1358_v61 = vpop.f32.mrb[60].mxu0  ;;  %v1614_v62 = vpop.f32.mrb[60].mxu1 }
 0x1df   : > { %2419 = vst.msk [vmem:[%s3957_s20 + $0x74] sm:$0xf] %vm2389_vm1, %v3005_v59  ;;  %2483 = vst.msk [vmem:[%s3957_s20 + $0x174] sm:$0xf] %vm2389_vm1, %v3069_v60  ;;  %v1359_v63 = vadd.f32 %v3942_v57, %v1358_v61  ;;  %v1615_v0 = vadd.f32 %v3942_v57, %v1614_v62  ;;  %v1360_v1 = vpop.f32.mrb[61].mxu0  ;;  %v1616_v2 = vpop.f32.mrb[61].mxu1 }
 0x1e0   : > { %v1361_v3 = vpop.f32.mrb[62].mxu0  ;;  %v1617_v4 = vpop.f32.mrb[62].mxu1 }
 0x1e1   : > { %v1779_v5 = vmax.f32 %v1359_v63, 0.0  ;;  %v1843_v6 = vmax.f32 %v1615_v0, 0.0  ;;  %v1362_v7 = vadd.f32 %v3942_v57, %v1361_v3  ;;  %v1618_v8 = vadd.f32 %v3942_v57, %v1617_v4  ;;  %v1363_v9 = vpop.f32.mrb[63].mxu0  ;;  %v1619_v10 = vpop.f32.mrb[63].mxu1 }
 0x1e3   : > { %v3006_v11 = vpack.c.bf16 %v1779_v5, %v1779_v5  ;;  %v3070_v12 = vpack.c.bf16 %v1843_v6, %v1843_v6  ;;  %v1780_v13 = vmax.f32 %v1362_v7, 0.0  ;;  %v1844_v14 = vmax.f32 %v1618_v8, 0.0 }
 0x1e5   : > { %2420 = vst.msk [vmem:[%s3957_s20 + $0x78] sm:$0xf] %vm2389_vm1, %v3006_v11  ;;  %2484 = vst.msk [vmem:[%s3957_s20 + $0x178] sm:$0xf] %vm2389_vm1, %v3070_v12  ;;  %v3007_v15 = vpack.c.bf16 %v1780_v13, %v1780_v13  ;;  %v3071_v16 = vpack.c.bf16 %v1844_v14, %v1844_v14 }
 0x1e6   : > { %v1366_v17 = vpop.f32.mrb[64].mxu0  ;;  %v1622_v18 = vpop.f32.mrb[64].mxu1 }
 0x1e7   : > { %2421 = vst.msk [vmem:[%s3957_s20 + $0x7c] sm:$0xf] %vm2389_vm1, %v3007_v15  ;;  %2485 = vst.msk [vmem:[%s3957_s20 + $0x17c] sm:$0xf] %vm2389_vm1, %v3071_v16  ;;  %v1367_v19 = vadd.f32 %v3942_v57, %v1366_v17  ;;  %v1623_v20 = vadd.f32 %v3942_v57, %v1622_v18  ;;  %v1368_v21 = vpop.f32.mrb[65].mxu0  ;;  %v1624_v22 = vpop.f32.mrb[65].mxu1 }
 0x1e8   : > { %v1369_v23 = vpop.f32.mrb[66].mxu0  ;;  %v1625_v24 = vpop.f32.mrb[66].mxu1 }
 0x1e9   : > { %v1781_v25 = vmax.f32 %v1367_v19, 0.0  ;;  %v1845_v26 = vmax.f32 %v1623_v20, 0.0  ;;  %v1370_v27 = vadd.f32 %v3942_v57, %v1369_v23  ;;  %v1626_v28 = vadd.f32 %v3942_v57, %v1625_v24  ;;  %v1371_v29 = vpop.f32.mrb[67].mxu0  ;;  %v1627_v30 = vpop.f32.mrb[67].mxu1 }
 0x1eb   : > { %v3008_v31 = vpack.c.bf16 %v1781_v25, %v1781_v25  ;;  %v3072_v32 = vpack.c.bf16 %v1845_v26, %v1845_v26  ;;  %v1782_v33 = vmax.f32 %v1370_v27, 0.0  ;;  %v1846_v34 = vmax.f32 %v1626_v28, 0.0 }
 0x1ed   : > { %2422 = vst.msk [vmem:[%s3957_s20 + $0x80] sm:$0xf] %vm2389_vm1, %v3008_v31  ;;  %2486 = vst.msk [vmem:[%s3957_s20 + $0x180] sm:$0xf] %vm2389_vm1, %v3072_v32  ;;  %v3009_v35 = vpack.c.bf16 %v1782_v33, %v1782_v33  ;;  %v3073_v36 = vpack.c.bf16 %v1846_v34, %v1846_v34 }
 0x1ee   : > { %v1374_v37 = vpop.f32.mrb[68].mxu0  ;;  %v1630_v38 = vpop.f32.mrb[68].mxu1 }
 0x1ef   : > { %2423 = vst.msk [vmem:[%s3957_s20 + $0x84] sm:$0xf] %vm2389_vm1, %v3009_v35  ;;  %2487 = vst.msk [vmem:[%s3957_s20 + $0x184] sm:$0xf] %vm2389_vm1, %v3073_v36  ;;  %v1375_v39 = vadd.f32 %v3942_v57, %v1374_v37  ;;  %v1631_v40 = vadd.f32 %v3942_v57, %v1630_v38  ;;  %v1376_v41 = vpop.f32.mrb[69].mxu0  ;;  %v1632_v42 = vpop.f32.mrb[69].mxu1 }
 0x1f0   : > { %v1377_v43 = vpop.f32.mrb[70].mxu0  ;;  %v1633_v44 = vpop.f32.mrb[70].mxu1  ;;  %v4215_v36 = vld [vmem:[#allocation7] ss:$0 sm:$0xff] }
 0x1f1   : > { %v1783_v45 = vmax.f32 %v1375_v39, 0.0  ;;  %v1847_v46 = vmax.f32 %v1631_v40, 0.0  ;;  %v1378_v47 = vadd.f32 %v3942_v57, %v1377_v43  ;;  %v1634_v48 = vadd.f32 %v3942_v57, %v1633_v44  ;;  %v1379_v49 = vpop.f32.mrb[71].mxu0  ;;  %v1635_v50 = vpop.f32.mrb[71].mxu1 }
 0x1f3   : > { %v3010_v51 = vpack.c.bf16 %v1783_v45, %v1783_v45  ;;  %v3074_v52 = vpack.c.bf16 %v1847_v46, %v1847_v46  ;;  %v1784_v53 = vmax.f32 %v1378_v47, 0.0  ;;  %v1848_v54 = vmax.f32 %v1634_v48, 0.0 }
 0x1f5   : > { %2424 = vst.msk [vmem:[%s3957_s20 + $0x88] sm:$0xf] %vm2389_vm1, %v3010_v51  ;;  %2488 = vst.msk [vmem:[%s3957_s20 + $0x188] sm:$0xf] %vm2389_vm1, %v3074_v52  ;;  %v3011_v55 = vpack.c.bf16 %v1784_v53, %v1784_v53  ;;  %v3075_v56 = vpack.c.bf16 %v1848_v54, %v1848_v54 }
 0x1f6   : > { %v1382_v58 = vpop.f32.mrb[72].mxu0  ;;  %v1638_v59 = vpop.f32.mrb[72].mxu1 }
 0x1f7   : > { %2425 = vst.msk [vmem:[%s3957_s20 + $0x8c] sm:$0xf] %vm2389_vm1, %v3011_v55  ;;  %2489 = vst.msk [vmem:[%s3957_s20 + $0x18c] sm:$0xf] %vm2389_vm1, %v3075_v56  ;;  %v1383_v60 = vadd.f32 %v3942_v57, %v1382_v58  ;;  %v1639_v61 = vadd.f32 %v3942_v57, %v1638_v59  ;;  %v1384_v62 = vpop.f32.mrb[73].mxu0  ;;  %v1640_v63 = vpop.f32.mrb[73].mxu1 }
 0x1f8   : > { %v1385_v0 = vpop.f32.mrb[74].mxu0  ;;  %v1641_v1 = vpop.f32.mrb[74].mxu1 }
 0x1f9   : > { %v1785_v2 = vmax.f32 %v1383_v60, 0.0  ;;  %v1849_v3 = vmax.f32 %v1639_v61, 0.0  ;;  %v1386_v4 = vadd.f32 %v3942_v57, %v1385_v0  ;;  %v1642_v5 = vadd.f32 %v3942_v57, %v1641_v1  ;;  %v1387_v6 = vpop.f32.mrb[75].mxu0  ;;  %v1643_v7 = vpop.f32.mrb[75].mxu1 }
 0x1fb   : > { %v3012_v8 = vpack.c.bf16 %v1785_v2, %v1785_v2  ;;  %v3076_v9 = vpack.c.bf16 %v1849_v3, %v1849_v3  ;;  %v1786_v10 = vmax.f32 %v1386_v4, 0.0  ;;  %v1850_v11 = vmax.f32 %v1642_v5, 0.0 }
 0x1fd   : > { %2426 = vst.msk [vmem:[%s3957_s20 + $0x90] sm:$0xf] %vm2389_vm1, %v3012_v8  ;;  %2490 = vst.msk [vmem:[%s3957_s20 + $0x190] sm:$0xf] %vm2389_vm1, %v3076_v9  ;;  %v3013_v12 = vpack.c.bf16 %v1786_v10, %v1786_v10  ;;  %v3077_v13 = vpack.c.bf16 %v1850_v11, %v1850_v11 }
 0x1fe   : > { %v1390_v14 = vpop.f32.mrb[76].mxu0  ;;  %v1646_v15 = vpop.f32.mrb[76].mxu1 }
 0x1ff   : > { %2427 = vst.msk [vmem:[%s3957_s20 + $0x94] sm:$0xf] %vm2389_vm1, %v3013_v12  ;;  %2491 = vst.msk [vmem:[%s3957_s20 + $0x194] sm:$0xf] %vm2389_vm1, %v3077_v13  ;;  %v1391_v16 = vadd.f32 %v3942_v57, %v1390_v14  ;;  %v1647_v17 = vadd.f32 %v3942_v57, %v1646_v15  ;;  %v1392_v18 = vpop.f32.mrb[77].mxu0  ;;  %v1648_v19 = vpop.f32.mrb[77].mxu1 }
 0x200   : > { %v1393_v20 = vpop.f32.mrb[78].mxu0  ;;  %v1649_v21 = vpop.f32.mrb[78].mxu1 }
 0x201   : > { %v1787_v22 = vmax.f32 %v1391_v16, 0.0  ;;  %v1851_v23 = vmax.f32 %v1647_v17, 0.0  ;;  %v1394_v24 = vadd.f32 %v3942_v57, %v1393_v20  ;;  %v1650_v25 = vadd.f32 %v3942_v57, %v1649_v21  ;;  %v1395_v26 = vpop.f32.mrb[79].mxu0  ;;  %v1651_v27 = vpop.f32.mrb[79].mxu1 }
 0x203   : > { %v3014_v28 = vpack.c.bf16 %v1787_v22, %v1787_v22  ;;  %v3078_v29 = vpack.c.bf16 %v1851_v23, %v1851_v23  ;;  %v1788_v30 = vmax.f32 %v1394_v24, 0.0  ;;  %v1852_v31 = vmax.f32 %v1650_v25, 0.0 }
 0x205   : > { %2428 = vst.msk [vmem:[%s3957_s20 + $0x98] sm:$0xf] %vm2389_vm1, %v3014_v28  ;;  %2492 = vst.msk [vmem:[%s3957_s20 + $0x198] sm:$0xf] %vm2389_vm1, %v3078_v29  ;;  %v3015_v32 = vpack.c.bf16 %v1788_v30, %v1788_v30  ;;  %v3079_v33 = vpack.c.bf16 %v1852_v31, %v1852_v31 }
 0x206   : > { %v1398_v34 = vpop.f32.mrb[80].mxu0  ;;  %v1654_v35 = vpop.f32.mrb[80].mxu1 }
 0x207   : > { %2429 = vst.msk [vmem:[%s3957_s20 + $0x9c] sm:$0xf] %vm2389_vm1, %v3015_v32  ;;  %2493 = vst.msk [vmem:[%s3957_s20 + $0x19c] sm:$0xf] %vm2389_vm1, %v3079_v33  ;;  %v1399_v57 = vadd.f32 %v4215_v36, %v1398_v34  ;;  %v1655_v37 = vadd.f32 %v4215_v36, %v1654_v35  ;;  %v1400_v38 = vpop.f32.mrb[81].mxu0  ;;  %v1656_v39 = vpop.f32.mrb[81].mxu1 }
 0x208   : > { %v1401_v40 = vpop.f32.mrb[82].mxu0  ;;  %v1657_v41 = vpop.f32.mrb[82].mxu1 }
 0x209   : > { %v1789_v42 = vmax.f32 %v1399_v57, 0.0  ;;  %v1853_v43 = vmax.f32 %v1655_v37, 0.0  ;;  %v1402_v44 = vadd.f32 %v4215_v36, %v1401_v40  ;;  %v1658_v45 = vadd.f32 %v4215_v36, %v1657_v41  ;;  %v1403_v46 = vpop.f32.mrb[83].mxu0  ;;  %v1659_v47 = vpop.f32.mrb[83].mxu1 }
 0x20b   : > { %v3016_v48 = vpack.c.bf16 %v1789_v42, %v1789_v42  ;;  %v3080_v49 = vpack.c.bf16 %v1853_v43, %v1853_v43  ;;  %v1790_v50 = vmax.f32 %v1402_v44, 0.0  ;;  %v1854_v51 = vmax.f32 %v1658_v45, 0.0 }
 0x20d   : > { %2430 = vst.msk [vmem:[%s3957_s20 + $0xa0] sm:$0xf] %vm2389_vm1, %v3016_v48  ;;  %2494 = vst.msk [vmem:[%s3957_s20 + $0x1a0] sm:$0xf] %vm2389_vm1, %v3080_v49  ;;  %v3017_v52 = vpack.c.bf16 %v1790_v50, %v1790_v50  ;;  %v3081_v53 = vpack.c.bf16 %v1854_v51, %v1854_v51 }
 0x20e   : > { %v1406_v54 = vpop.f32.mrb[84].mxu0  ;;  %v1662_v55 = vpop.f32.mrb[84].mxu1 }
 0x20f   : > { %2431 = vst.msk [vmem:[%s3957_s20 + $0xa4] sm:$0xf] %vm2389_vm1, %v3017_v52  ;;  %2495 = vst.msk [vmem:[%s3957_s20 + $0x1a4] sm:$0xf] %vm2389_vm1, %v3081_v53  ;;  %v1407_v56 = vadd.f32 %v4215_v36, %v1406_v54  ;;  %v1663_v58 = vadd.f32 %v4215_v36, %v1662_v55  ;;  %v1408_v59 = vpop.f32.mrb[85].mxu0  ;;  %v1664_v60 = vpop.f32.mrb[85].mxu1 }
 0x210   : > { %v1409_v61 = vpop.f32.mrb[86].mxu0  ;;  %v1665_v62 = vpop.f32.mrb[86].mxu1 }
 0x211   : > { %v1791_v63 = vmax.f32 %v1407_v56, 0.0  ;;  %v1855_v0 = vmax.f32 %v1663_v58, 0.0  ;;  %v1410_v1 = vadd.f32 %v4215_v36, %v1409_v61  ;;  %v1666_v2 = vadd.f32 %v4215_v36, %v1665_v62  ;;  %v1411_v3 = vpop.f32.mrb[87].mxu0  ;;  %v1667_v4 = vpop.f32.mrb[87].mxu1 }
 0x213   : > { %v3018_v5 = vpack.c.bf16 %v1791_v63, %v1791_v63  ;;  %v3082_v6 = vpack.c.bf16 %v1855_v0, %v1855_v0  ;;  %v1792_v7 = vmax.f32 %v1410_v1, 0.0  ;;  %v1856_v8 = vmax.f32 %v1666_v2, 0.0 }
 0x215   : > { %2432 = vst.msk [vmem:[%s3957_s20 + $0xa8] sm:$0xf] %vm2389_vm1, %v3018_v5  ;;  %2496 = vst.msk [vmem:[%s3957_s20 + $0x1a8] sm:$0xf] %vm2389_vm1, %v3082_v6  ;;  %v3019_v9 = vpack.c.bf16 %v1792_v7, %v1792_v7  ;;  %v3083_v10 = vpack.c.bf16 %v1856_v8, %v1856_v8 }
 0x216   : > { %v1414_v11 = vpop.f32.mrb[88].mxu0  ;;  %v1670_v12 = vpop.f32.mrb[88].mxu1 }
 0x217   : > { %2433 = vst.msk [vmem:[%s3957_s20 + $0xac] sm:$0xf] %vm2389_vm1, %v3019_v9  ;;  %2497 = vst.msk [vmem:[%s3957_s20 + $0x1ac] sm:$0xf] %vm2389_vm1, %v3083_v10  ;;  %v1415_v13 = vadd.f32 %v4215_v36, %v1414_v11  ;;  %v1671_v14 = vadd.f32 %v4215_v36, %v1670_v12  ;;  %v1416_v15 = vpop.f32.mrb[89].mxu0  ;;  %v1672_v16 = vpop.f32.mrb[89].mxu1 }
 0x218   : > { %v1417_v17 = vpop.f32.mrb[90].mxu0  ;;  %v1673_v18 = vpop.f32.mrb[90].mxu1 }
 0x219   : > { %v1793_v19 = vmax.f32 %v1415_v13, 0.0  ;;  %v1857_v20 = vmax.f32 %v1671_v14, 0.0  ;;  %v1418_v21 = vadd.f32 %v4215_v36, %v1417_v17  ;;  %v1674_v22 = vadd.f32 %v4215_v36, %v1673_v18  ;;  %v1419_v23 = vpop.f32.mrb[91].mxu0  ;;  %v1675_v24 = vpop.f32.mrb[91].mxu1 }
 0x21b   : > { %v3020_v25 = vpack.c.bf16 %v1793_v19, %v1793_v19  ;;  %v3084_v26 = vpack.c.bf16 %v1857_v20, %v1857_v20  ;;  %v1794_v27 = vmax.f32 %v1418_v21, 0.0  ;;  %v1858_v28 = vmax.f32 %v1674_v22, 0.0 }
 0x21d   : > { %2434 = vst.msk [vmem:[%s3957_s20 + $0xb0] sm:$0xf] %vm2389_vm1, %v3020_v25  ;;  %2498 = vst.msk [vmem:[%s3957_s20 + $0x1b0] sm:$0xf] %vm2389_vm1, %v3084_v26  ;;  %v3021_v29 = vpack.c.bf16 %v1794_v27, %v1794_v27  ;;  %v3085_v30 = vpack.c.bf16 %v1858_v28, %v1858_v28 }
 0x21e   : > { %v1422_v31 = vpop.f32.mrb[92].mxu0  ;;  %v1678_v32 = vpop.f32.mrb[92].mxu1 }
 0x21f   : > { %2435 = vst.msk [vmem:[%s3957_s20 + $0xb4] sm:$0xf] %vm2389_vm1, %v3021_v29  ;;  %2499 = vst.msk [vmem:[%s3957_s20 + $0x1b4] sm:$0xf] %vm2389_vm1, %v3085_v30  ;;  %v1423_v33 = vadd.f32 %v4215_v36, %v1422_v31  ;;  %v1679_v34 = vadd.f32 %v4215_v36, %v1678_v32  ;;  %v1424_v35 = vpop.f32.mrb[93].mxu0  ;;  %v1680_v57 = vpop.f32.mrb[93].mxu1 }
 0x220   : > { %v1425_v37 = vpop.f32.mrb[94].mxu0  ;;  %v1681_v38 = vpop.f32.mrb[94].mxu1 }
 0x221   : > { %v1795_v39 = vmax.f32 %v1423_v33, 0.0  ;;  %v1859_v40 = vmax.f32 %v1679_v34, 0.0  ;;  %v1426_v41 = vadd.f32 %v4215_v36, %v1425_v37  ;;  %v1682_v42 = vadd.f32 %v4215_v36, %v1681_v38  ;;  %v1427_v43 = vpop.f32.mrb[95].mxu0  ;;  %v1683_v44 = vpop.f32.mrb[95].mxu1 }
 0x223   : > { %v3022_v45 = vpack.c.bf16 %v1795_v39, %v1795_v39  ;;  %v3086_v46 = vpack.c.bf16 %v1859_v40, %v1859_v40  ;;  %v1796_v47 = vmax.f32 %v1426_v41, 0.0  ;;  %v1860_v48 = vmax.f32 %v1682_v42, 0.0 }
 0x225   : > { %2436 = vst.msk [vmem:[%s3957_s20 + $0xb8] sm:$0xf] %vm2389_vm1, %v3022_v45  ;;  %2500 = vst.msk [vmem:[%s3957_s20 + $0x1b8] sm:$0xf] %vm2389_vm1, %v3086_v46  ;;  %v3023_v49 = vpack.c.bf16 %v1796_v47, %v1796_v47  ;;  %v3087_v50 = vpack.c.bf16 %v1860_v48, %v1860_v48 }
 0x226   : > { %v1430_v51 = vpop.f32.mrb[96].mxu0  ;;  %v1686_v52 = vpop.f32.mrb[96].mxu1 }
 0x227   : > { %2437 = vst.msk [vmem:[%s3957_s20 + $0xbc] sm:$0xf] %vm2389_vm1, %v3023_v49  ;;  %2501 = vst.msk [vmem:[%s3957_s20 + $0x1bc] sm:$0xf] %vm2389_vm1, %v3087_v50  ;;  %v1431_v53 = vadd.f32 %v4215_v36, %v1430_v51  ;;  %v1687_v54 = vadd.f32 %v4215_v36, %v1686_v52  ;;  %v1432_v55 = vpop.f32.mrb[97].mxu0  ;;  %v1688_v56 = vpop.f32.mrb[97].mxu1 }
 0x228   : > { %v1433_v58 = vpop.f32.mrb[98].mxu0  ;;  %v1689_v59 = vpop.f32.mrb[98].mxu1 }
 0x229   : > { %v1797_v60 = vmax.f32 %v1431_v53, 0.0  ;;  %v1861_v61 = vmax.f32 %v1687_v54, 0.0  ;;  %v1434_v62 = vadd.f32 %v4215_v36, %v1433_v58  ;;  %v1690_v63 = vadd.f32 %v4215_v36, %v1689_v59  ;;  %v1435_v0 = vpop.f32.mrb[99].mxu0  ;;  %v1691_v1 = vpop.f32.mrb[99].mxu1 }
 0x22b   : > { %v3024_v2 = vpack.c.bf16 %v1797_v60, %v1797_v60  ;;  %v3088_v3 = vpack.c.bf16 %v1861_v61, %v1861_v61  ;;  %v1798_v4 = vmax.f32 %v1434_v62, 0.0  ;;  %v1862_v5 = vmax.f32 %v1690_v63, 0.0 }
 0x22d   : > { %2438 = vst.msk [vmem:[%s3957_s20 + $0xc0] sm:$0xf] %vm2389_vm1, %v3024_v2  ;;  %2502 = vst.msk [vmem:[%s3957_s20 + $0x1c0] sm:$0xf] %vm2389_vm1, %v3088_v3  ;;  %v3025_v6 = vpack.c.bf16 %v1798_v4, %v1798_v4  ;;  %v3089_v7 = vpack.c.bf16 %v1862_v5, %v1862_v5 }
 0x22e   : > { %v1438_v8 = vpop.f32.mrb[100].mxu0  ;;  %v1694_v9 = vpop.f32.mrb[100].mxu1 }
 0x22f   : > { %2439 = vst.msk [vmem:[%s3957_s20 + $0xc4] sm:$0xf] %vm2389_vm1, %v3025_v6  ;;  %2503 = vst.msk [vmem:[%s3957_s20 + $0x1c4] sm:$0xf] %vm2389_vm1, %v3089_v7  ;;  %v1439_v10 = vadd.f32 %v4215_v36, %v1438_v8  ;;  %v1695_v11 = vadd.f32 %v4215_v36, %v1694_v9  ;;  %v1440_v12 = vpop.f32.mrb[101].mxu0  ;;  %v1696_v13 = vpop.f32.mrb[101].mxu1 }
 0x230   : > { %v1441_v14 = vpop.f32.mrb[102].mxu0  ;;  %v1697_v15 = vpop.f32.mrb[102].mxu1 }
 0x231   : > { %v1799_v16 = vmax.f32 %v1439_v10, 0.0  ;;  %v1863_v17 = vmax.f32 %v1695_v11, 0.0  ;;  %v1442_v18 = vadd.f32 %v4215_v36, %v1441_v14  ;;  %v1698_v19 = vadd.f32 %v4215_v36, %v1697_v15  ;;  %v1443_v20 = vpop.f32.mrb[103].mxu0  ;;  %v1699_v21 = vpop.f32.mrb[103].mxu1 }
 0x233   : > { %v3026_v22 = vpack.c.bf16 %v1799_v16, %v1799_v16  ;;  %v3090_v23 = vpack.c.bf16 %v1863_v17, %v1863_v17  ;;  %v1800_v24 = vmax.f32 %v1442_v18, 0.0  ;;  %v1864_v25 = vmax.f32 %v1698_v19, 0.0 }
 0x235   : > { %2440 = vst.msk [vmem:[%s3957_s20 + $0xc8] sm:$0xf] %vm2389_vm1, %v3026_v22  ;;  %2504 = vst.msk [vmem:[%s3957_s20 + $0x1c8] sm:$0xf] %vm2389_vm1, %v3090_v23  ;;  %v3027_v26 = vpack.c.bf16 %v1800_v24, %v1800_v24  ;;  %v3091_v27 = vpack.c.bf16 %v1864_v25, %v1864_v25 }
 0x236   : > { %v1446_v28 = vpop.f32.mrb[104].mxu0  ;;  %v1702_v29 = vpop.f32.mrb[104].mxu1 }
 0x237   : > { %2441 = vst.msk [vmem:[%s3957_s20 + $0xcc] sm:$0xf] %vm2389_vm1, %v3027_v26  ;;  %2505 = vst.msk [vmem:[%s3957_s20 + $0x1cc] sm:$0xf] %vm2389_vm1, %v3091_v27  ;;  %v1447_v30 = vadd.f32 %v4215_v36, %v1446_v28  ;;  %v1703_v31 = vadd.f32 %v4215_v36, %v1702_v29  ;;  %v1448_v32 = vpop.f32.mrb[105].mxu0  ;;  %v1704_v33 = vpop.f32.mrb[105].mxu1 }
 0x238   : > { %v1449_v34 = vpop.f32.mrb[106].mxu0  ;;  %v1705_v35 = vpop.f32.mrb[106].mxu1 }
 0x239   : > { %v1801_v57 = vmax.f32 %v1447_v30, 0.0  ;;  %v1865_v37 = vmax.f32 %v1703_v31, 0.0  ;;  %v1450_v38 = vadd.f32 %v4215_v36, %v1449_v34  ;;  %v1706_v39 = vadd.f32 %v4215_v36, %v1705_v35  ;;  %v1451_v40 = vpop.f32.mrb[107].mxu0  ;;  %v1707_v41 = vpop.f32.mrb[107].mxu1 }
 0x23b   : > { %v3028_v42 = vpack.c.bf16 %v1801_v57, %v1801_v57  ;;  %v3092_v43 = vpack.c.bf16 %v1865_v37, %v1865_v37  ;;  %v1802_v44 = vmax.f32 %v1450_v38, 0.0  ;;  %v1866_v45 = vmax.f32 %v1706_v39, 0.0 }
 0x23d   : > { %2442 = vst.msk [vmem:[%s3957_s20 + $0xd0] sm:$0xf] %vm2389_vm1, %v3028_v42  ;;  %2506 = vst.msk [vmem:[%s3957_s20 + $0x1d0] sm:$0xf] %vm2389_vm1, %v3092_v43  ;;  %v3029_v46 = vpack.c.bf16 %v1802_v44, %v1802_v44  ;;  %v3093_v47 = vpack.c.bf16 %v1866_v45, %v1866_v45 }
 0x23e   : > { %v1454_v48 = vpop.f32.mrb[108].mxu0  ;;  %v1710_v49 = vpop.f32.mrb[108].mxu1 }
 0x23f   : > { %2443 = vst.msk [vmem:[%s3957_s20 + $0xd4] sm:$0xf] %vm2389_vm1, %v3029_v46  ;;  %2507 = vst.msk [vmem:[%s3957_s20 + $0x1d4] sm:$0xf] %vm2389_vm1, %v3093_v47  ;;  %v1455_v50 = vadd.f32 %v4215_v36, %v1454_v48  ;;  %v1711_v51 = vadd.f32 %v4215_v36, %v1710_v49  ;;  %v1456_v52 = vpop.f32.mrb[109].mxu0  ;;  %v1712_v53 = vpop.f32.mrb[109].mxu1 }
 0x240   : > { %v1457_v54 = vpop.f32.mrb[110].mxu0  ;;  %v1713_v55 = vpop.f32.mrb[110].mxu1 }
 0x241   : > { %v1803_v56 = vmax.f32 %v1455_v50, 0.0  ;;  %v1867_v58 = vmax.f32 %v1711_v51, 0.0  ;;  %v1458_v59 = vadd.f32 %v4215_v36, %v1457_v54  ;;  %v1714_v60 = vadd.f32 %v4215_v36, %v1713_v55  ;;  %v1459_v61 = vpop.f32.mrb[111].mxu0  ;;  %v1715_v62 = vpop.f32.mrb[111].mxu1 }
 0x243   : > { %v3030_v63 = vpack.c.bf16 %v1803_v56, %v1803_v56  ;;  %v3094_v0 = vpack.c.bf16 %v1867_v58, %v1867_v58  ;;  %v1804_v1 = vmax.f32 %v1458_v59, 0.0  ;;  %v1868_v2 = vmax.f32 %v1714_v60, 0.0 }
 0x245   : > { %2444 = vst.msk [vmem:[%s3957_s20 + $0xd8] sm:$0xf] %vm2389_vm1, %v3030_v63  ;;  %2508 = vst.msk [vmem:[%s3957_s20 + $0x1d8] sm:$0xf] %vm2389_vm1, %v3094_v0  ;;  %v3031_v3 = vpack.c.bf16 %v1804_v1, %v1804_v1  ;;  %v3095_v4 = vpack.c.bf16 %v1868_v2, %v1868_v2 }
 0x246   : > { %v1462_v5 = vpop.f32.mrb[112].mxu0  ;;  %v1718_v6 = vpop.f32.mrb[112].mxu1 }
 0x247   : > { %2445 = vst.msk [vmem:[%s3957_s20 + $0xdc] sm:$0xf] %vm2389_vm1, %v3031_v3  ;;  %2509 = vst.msk [vmem:[%s3957_s20 + $0x1dc] sm:$0xf] %vm2389_vm1, %v3095_v4  ;;  %v1463_v7 = vadd.f32 %v4215_v36, %v1462_v5  ;;  %v1719_v8 = vadd.f32 %v4215_v36, %v1718_v6  ;;  %v1464_v9 = vpop.f32.mrb[113].mxu0  ;;  %v1720_v10 = vpop.f32.mrb[113].mxu1 }
 0x248   : > { %v1465_v11 = vpop.f32.mrb[114].mxu0  ;;  %v1721_v12 = vpop.f32.mrb[114].mxu1 }
 0x249   : > { %v1805_v13 = vmax.f32 %v1463_v7, 0.0  ;;  %v1869_v14 = vmax.f32 %v1719_v8, 0.0  ;;  %v1466_v15 = vadd.f32 %v4215_v36, %v1465_v11  ;;  %v1722_v16 = vadd.f32 %v4215_v36, %v1721_v12  ;;  %v1467_v17 = vpop.f32.mrb[115].mxu0  ;;  %v1723_v18 = vpop.f32.mrb[115].mxu1 }
 0x24b   : > { %v3032_v19 = vpack.c.bf16 %v1805_v13, %v1805_v13  ;;  %v3096_v20 = vpack.c.bf16 %v1869_v14, %v1869_v14  ;;  %v1806_v21 = vmax.f32 %v1466_v15, 0.0  ;;  %v1870_v22 = vmax.f32 %v1722_v16, 0.0 }
 0x24d   : > { %2446 = vst.msk [vmem:[%s3957_s20 + $0xe0] sm:$0xf] %vm2389_vm1, %v3032_v19  ;;  %2510 = vst.msk [vmem:[%s3957_s20 + $0x1e0] sm:$0xf] %vm2389_vm1, %v3096_v20  ;;  %v3033_v23 = vpack.c.bf16 %v1806_v21, %v1806_v21  ;;  %v3097_v24 = vpack.c.bf16 %v1870_v22, %v1870_v22 }
 0x24e   : > { %v1470_v25 = vpop.f32.mrb[116].mxu0  ;;  %v1726_v26 = vpop.f32.mrb[116].mxu1 }
 0x24f   : > { %2447 = vst.msk [vmem:[%s3957_s20 + $0xe4] sm:$0xf] %vm2389_vm1, %v3033_v23  ;;  %2511 = vst.msk [vmem:[%s3957_s20 + $0x1e4] sm:$0xf] %vm2389_vm1, %v3097_v24  ;;  %v1471_v27 = vadd.f32 %v4215_v36, %v1470_v25  ;;  %v1727_v28 = vadd.f32 %v4215_v36, %v1726_v26  ;;  %v1472_v29 = vpop.f32.mrb[117].mxu0  ;;  %v1728_v30 = vpop.f32.mrb[117].mxu1 }
 0x250   : > { %v1473_v31 = vpop.f32.mrb[118].mxu0  ;;  %v1729_v32 = vpop.f32.mrb[118].mxu1 }
 0x251   : > { %v1807_v33 = vmax.f32 %v1471_v27, 0.0  ;;  %v1871_v34 = vmax.f32 %v1727_v28, 0.0  ;;  %v1474_v35 = vadd.f32 %v4215_v36, %v1473_v31  ;;  %v1730_v57 = vadd.f32 %v4215_v36, %v1729_v32  ;;  %v1475_v37 = vpop.f32.mrb[119].mxu0  ;;  %v1731_v38 = vpop.f32.mrb[119].mxu1 }
 0x253   : > { %v3034_v39 = vpack.c.bf16 %v1807_v33, %v1807_v33  ;;  %v3098_v40 = vpack.c.bf16 %v1871_v34, %v1871_v34  ;;  %v1808_v41 = vmax.f32 %v1474_v35, 0.0  ;;  %v1872_v42 = vmax.f32 %v1730_v57, 0.0 }
 0x255   : > { %2448 = vst.msk [vmem:[%s3957_s20 + $0xe8] sm:$0xf] %vm2389_vm1, %v3034_v39  ;;  %2512 = vst.msk [vmem:[%s3957_s20 + $0x1e8] sm:$0xf] %vm2389_vm1, %v3098_v40  ;;  %v3035_v43 = vpack.c.bf16 %v1808_v41, %v1808_v41  ;;  %v3099_v44 = vpack.c.bf16 %v1872_v42, %v1872_v42 }
 0x256   : > { %v1478_v45 = vpop.f32.mrb[120].mxu0  ;;  %v1734_v46 = vpop.f32.mrb[120].mxu1 }
 0x257   : > { %2449 = vst.msk [vmem:[%s3957_s20 + $0xec] sm:$0xf] %vm2389_vm1, %v3035_v43  ;;  %2513 = vst.msk [vmem:[%s3957_s20 + $0x1ec] sm:$0xf] %vm2389_vm1, %v3099_v44  ;;  %v1479_v47 = vadd.f32 %v4215_v36, %v1478_v45  ;;  %v1735_v48 = vadd.f32 %v4215_v36, %v1734_v46  ;;  %v1480_v49 = vpop.f32.mrb[121].mxu0  ;;  %v1736_v50 = vpop.f32.mrb[121].mxu1 }
 0x258   : > { %v1481_v51 = vpop.f32.mrb[122].mxu0  ;;  %v1737_v52 = vpop.f32.mrb[122].mxu1 }
 0x259   : > { %v1809_v53 = vmax.f32 %v1479_v47, 0.0  ;;  %v1873_v54 = vmax.f32 %v1735_v48, 0.0  ;;  %v1482_v55 = vadd.f32 %v4215_v36, %v1481_v51  ;;  %v1738_v56 = vadd.f32 %v4215_v36, %v1737_v52  ;;  %v1483_v58 = vpop.f32.mrb[123].mxu0  ;;  %v1739_v59 = vpop.f32.mrb[123].mxu1 }
 0x25b   : > { %v3036_v60 = vpack.c.bf16 %v1809_v53, %v1809_v53  ;;  %v3100_v61 = vpack.c.bf16 %v1873_v54, %v1873_v54  ;;  %v1810_v62 = vmax.f32 %v1482_v55, 0.0  ;;  %v1874_v63 = vmax.f32 %v1738_v56, 0.0 }
 0x25d   : > { %2450 = vst.msk [vmem:[%s3957_s20 + $0xf0] sm:$0xf] %vm2389_vm1, %v3036_v60  ;;  %2514 = vst.msk [vmem:[%s3957_s20 + $0x1f0] sm:$0xf] %vm2389_vm1, %v3100_v61  ;;  %v3037_v0 = vpack.c.bf16 %v1810_v62, %v1810_v62  ;;  %v3101_v1 = vpack.c.bf16 %v1874_v63, %v1874_v63 }
 0x25e   : > { %v1486_v2 = vpop.f32.mrb[124].mxu0  ;;  %v1742_v3 = vpop.f32.mrb[124].mxu1 }
 0x25f   : > { %2451 = vst.msk [vmem:[%s3957_s20 + $0xf4] sm:$0xf] %vm2389_vm1, %v3037_v0  ;;  %2515 = vst.msk [vmem:[%s3957_s20 + $0x1f4] sm:$0xf] %vm2389_vm1, %v3101_v1  ;;  %v1487_v4 = vadd.f32 %v4215_v36, %v1486_v2  ;;  %v1743_v5 = vadd.f32 %v4215_v36, %v1742_v3  ;;  %v1488_v6 = vpop.f32.mrb[125].mxu0  ;;  %v1744_v7 = vpop.f32.mrb[125].mxu1 }
 0x260   : > { %v1489_v8 = vpop.f32.mrb[126].mxu0  ;;  %v1745_v9 = vpop.f32.mrb[126].mxu1 }
 0x261   : > { %v1811_v10 = vmax.f32 %v1487_v4, 0.0  ;;  %v1875_v11 = vmax.f32 %v1743_v5, 0.0  ;;  %v1490_v12 = vadd.f32 %v4215_v36, %v1489_v8  ;;  %v1746_v13 = vadd.f32 %v4215_v36, %v1745_v9  ;;  %v1491_v14 = vpop.f32.mrb[127].mxu0  ;;  %v1747_v15 = vpop.f32.mrb[127].mxu1 }
 0x263   : > { %v3038_v16 = vpack.c.bf16 %v1811_v10, %v1811_v10  ;;  %v3102_v17 = vpack.c.bf16 %v1875_v11, %v1875_v11  ;;  %v1812_v18 = vmax.f32 %v1490_v12, 0.0  ;;  %v1876_v19 = vmax.f32 %v1746_v13, 0.0 }
 0x265   : > { %2452 = vst.msk [vmem:[%s3957_s20 + $0xf8] sm:$0xf] %vm2389_vm1, %v3038_v16  ;;  %2516 = vst.msk [vmem:[%s3957_s20 + $0x1f8] sm:$0xf] %vm2389_vm1, %v3102_v17  ;;  %v3039_v36 = vpack.c.bf16 %v1812_v18, %v1812_v18  ;;  %v3103_v20 = vpack.c.bf16 %v1876_v19, %v1876_v19 }
 0x267   : > { %2453 = vst.msk [vmem:[%s3957_s20 + $0xfc] sm:$0xf] %vm2389_vm1, %v3039_v36  ;;  %2517 = vst.msk [vmem:[%s3957_s20 + $0x1fc] sm:$0xf] %vm2389_vm1, %v3103_v20 }
 0x268   : > { %3501 = shalt.err (!%p3498_p2)
}
 0x269   : > { %s3502_s11 = scalar_lea.hbm %s4358_s23, 8192  ;;  %s3506_s29 = scalar_lea.hbm %s4415_s3, 16384 }
 0x26a   : > { %p3503_p13 = scmp.ne.s32.totalorder %s4358_s23, %s3502_s11  ;;  %p3507_p4 = scmp.lt.u32.totalorder %s4358_s23, %s4415_s3 }
 0x26b   : > { %p3508_p5 = scmp.lt.u32.totalorder %s3506_s29, %s3502_s11  ;;  %p3510_p11 = scmp.lt.u32.totalorder %s3502_s11, %s4358_s23 }
 0x26c   : > { %p3504_p6 = pnand %p3503_p13, %p4429_p0 }
 0x26d   : > { %p3509_p8 = por %p3508_p5, %p3507_p4 }
 0x26e   : > { %p3505_p10 = pneg %p3504_p6 }
 0x26f   : > { %p3511_p1 = por %p3510_p11, %p3509_p8 }
 0x271   : > { %p3512_p3 = pnand %p3511_p1, %p3505_p10 }
 0x273   : > { %3515 = shalt.err (!%p3512_p3)
}
 0x274   : > { %s3569_s18 = smov 64   ;;  %s3570_s20 = smov 4  }
 0x275   : > { %3135 = dma.vmem_to_hbm [thread:$0]  (%p4429_p0), %s4360_s26, 8192, %s4358_s23, %s2519_s16, %s3569_s18, %s3569_s18, %s3570_s20  }
 0x276 PF: > { %s2547_s21 = sand.u32 1, %s3546_s12   ;;  %p4430_p7 = scmp.ne.s32.totalorder %s4420_s19, 0 }
 0x277   : > { %p4431_p9 = scmp.ge.s32.totalorder %s3558_s15, 2  ;;  %s2548_s27 = scalar_lea.sflag [#allocation4], %s2547_s21 }
 0x279   : > { %p3149_p12 = pnand %p4431_p9, %p4430_p7 }
 0x27b   : > { %3541 = dma.done.wait (!%p3149_p12), %s2548_s27, 8192  }
 0x27c   : > { %3543 = vsyncadd (!%p3149_p12), %s2548_s27, 4294959104  ;;  %p17_p2 = scmp.ge.s32.totalorder %s3702_s5, 4   ;;  %s4432_s12 = smov %s3550_s13 }
 0x27d   : > { %s4433_s13 = smov %s3554_s14  ;;  %s4434_s14 = smov %s3718_s8 }
 0x27e   : > { %s4435_s15 = smov %s3702_s5  ;;  %19 = sbr.rel (!%p17_p2) target bundleno = 6 (0x6), region = 85 }
 0x285   :  { %2553 = vsyncpa [#allocation3], 1 }
 0x286   :  { %2555 = vsyncpa [#allocation3 + $0x1], 1 }
 0x287   :  { %2556 = vsyncpa [#allocation6], 1 }
 0x288   :  { %2557 = vsyncpa [#allocation4], 1 }
 0x289   :  { %2559 = vsyncpa [#allocation4 + $0x1], 1 }

// kernel: _lambda_.14
= control target key start
LH: loop header
LB: loop body
LE: loop exit
PB: predicated region body
PF: predicated region fallthrough
CT: control target
= control target key end

     0   :  { %s4134_s0 = inlined_call_operand.hbm [shape: bf16[2,17,17,8], index: 0, kind: input, shape index: {}]   ;;  %s4135_s1 = inlined_call_operand.hbm [shape: bf16[2,17,17,8], index: 1, kind: input, shape index: {}]   ;;  %s4136_s2 = inlined_call_operand.hbm [shape: bf16[2,17,17,8], index: 2, kind: input, shape index: {}]   ;;  %s4137_s3 = inlined_call_operand.hbm [shape: bf16[2,17,17,8], index: 3, kind: input, shape index: {}]   ;;  %s4138_s4 = inlined_call_operand.hbm [shape: bf16[2,16,16,8], index: 4, kind: output, shape index: {}]  }
   0x1   :  { %4145 = sst [smem:[#allocation16_spill]] %s4134_s0 }
   0x2   :  { %4146 = sst [smem:[#allocation17_spill]] %s4135_s1 }
   0x3   :  { %9 = vsyncpa [#allocation3], 0 }
   0x4   :  { %11 = vsyncpa [#allocation3 + $0x1], 0 }
   0x5   :  { %12 = vsyncpa [#allocation6], 0 }
   0x6   :  { %14 = vsyncpa [#allocation6 + $0x1], 0 }
   0x7   :  { %15 = vsyncpa [#allocation9], 0 }
   0x8   :  { %17 = vsyncpa [#allocation9 + $0x1], 0 }
   0x9   :  { %18 = vsyncpa [#allocation4], 0 }
   0xa   :  { %20 = vsyncpa [#allocation4 + $0x1], 0  ;;  %s2659_s15 = smov 0   ;;  %s2661_s16 = smov 0  }
   0xb   :  { %s2663_s17 = smov 0   ;;  %s2665_s18 = smov 0  }
   0xc LB: > { %s2680_s19 = sadd.s32 4294967295, %s2623_s18   ;;  %s2340_s20 = sadd.s32 4294967294, %s2623_s18   ;;  %s2623_s18 = sphi %s2665_s18, %s4172_s18   ;;  %s2619_s17 = sphi %s2663_s17, %s4171_s17   ;;  %s2615_s16 = sphi %s2661_s16, %s4170_s16   ;;  %s2611_s15 = sphi %s2659_s15, %s4169_s15  }
   0xd   : > { %s2684_s21 = sadd.s32 1, %s2623_s18   ;;  %s33_s22 = sadd.s32 1, %s2619_s17 }
   0xe   : > { %s30_s23 = ssub.s32 %s2623_s18, %s2684_s21  ;;  %p40_p0 = scmp.ne.s32.totalorder %s2619_s17, %s2615_s16 }
   0xf   : > { %p31_p1 = scmp.eq.s32.totalorder %s30_s23, 0  ;;  %p41_p2 = scmp.eq.s32.totalorder %s2623_s18, 0 }
  0x10   : > { %p46_p3 = scmp.ne.s32.totalorder %s2615_s16, %s2611_s15  ;;  %p47_p4 = scmp.eq.s32.totalorder %s2680_s19, 0 }
  0x11   : > { %s2696_s24 = scalar_select %p31_p1, %s2619_s17, %s33_s22  }
  0x12   : > { %p42_p5 = por %p41_p2, %p40_p0  ;;  %p2698_p6 = por %p47_p4, %p46_p3 }
  0x13   : > { %4147 = sst [smem:[#allocation15_spill]] %s2696_s24  ;;  %p148_p7 = scmp.eq.s32.totalorder %s2680_s19, 1 }
  0x14   : > { %s4148_s25 = scalar_select %p2698_p6, 1, 0 }
  0x15   : > { %p154_p8 = scmp.eq.s32.totalorder %s2340_s20, 1  ;;  %p2391_p10 = scmp.lt.s32.totalorder %s2623_s18, 2 }
  0x16   : > { %p2705_p11 = por %p148_p7, %p40_p0  ;;  %s2714_s28 = sand.u32 1, %s2619_s17  }
  0x17   : > { %p2709_p12 = por %p154_p8, %p46_p3  ;;  %s2717_s29 = smul.u32 3264, %s2623_s18 }
  0x18   : > { %s4149_s26 = scalar_select %p2705_p11, 1, 0 }
  0x19   : > { %s4150_s27 = scalar_select %p2709_p12, 1, 0 }
  0x1a   : > { %s2720_s30 = smul.u32 204, %s2714_s28  ;;  %p2722_p13 = pnand %p2391_p10, %p42_p5 }
  0x1b   : > { %s195_s6 = sand.u32 1, %s2623_s18   ;;  %s4152_s1 = sld [smem:[#allocation17_spill]] }
  0x1c   : > { %s199_s10 = scalar_lea.vmem [#allocation5], %s2720_s30  ;;  %s2737_s12 = scalar_lea.sflag [#allocation6], %s195_s6 }
  0x1d   : > { %s206_s11 = sshll.u32 %s199_s10, 4  ;;  %p2743_p2 = pneg %p2722_p13  ;;  %s2734_s11 = int_to_ptr.vmem [resolvable:$true] %s206_s11 }
  0x21   : > { %s2731_s9 = scalar_lea.hbm %s4152_s1, %s2717_s29  ;;  %s2434_s23 = scalar_lea.hbm %s4152_s1, 6528 }
  0x22   : > { %s2429_s13 = scalar_lea.hbm %s2731_s9, 3264  ;;  %p2435_p5 = scmp.lt.u32.totalorder %s2731_s9, %s4152_s1 }
  0x23   : > { %p2430_p1 = scmp.ne.s32.totalorder %s2731_s9, %s2429_s13  ;;  %p2436_p7 = scmp.lt.u32.totalorder %s2434_s23, %s2429_s13 }
  0x24   : > { %p2438_p10 = scmp.lt.u32.totalorder %s2429_s13, %s2731_s9 }
  0x25   : > { %p2432_p3 = pnand %p2743_p2, %p2430_p1  ;;  %p2437_p8 = por %p2436_p7, %p2435_p5 }
  0x27   : > { %p2433_p4 = pneg %p2432_p3  ;;  %p2439_p9 = por %p2438_p10, %p2437_p8 }
  0x29   : > { %p2440_p0 = pnand %p2439_p9, %p2433_p4 }
  0x2b   : > { %2443 = shalt.err (!%p2440_p0)
}
  0x2c   : > { %s2444_s6 = scalar_lea.vmem %s2734_s11, 3264  ;;  %s2625_s10 = smov [#allocation5]  }
  0x2d   : > { %p2445_p1 = scmp.ne.s32.totalorder %s2734_s11, %s2444_s6  ;;  %s2449_s20 = sshll.u32 %s2625_s10, 4  ;;  %s2450_s20 = int_to_ptr.vmem [resolvable:$false] %s2449_s20 }
  0x2e   : > { %s2451_s22 = scalar_lea.vmem %s2450_s20, 6528  ;;  %p2452_p11 = scmp.lt.s32.totalorder %s2734_s11, %s2450_s20 }
  0x2f   : > { %p2447_p3 = pnand %p2445_p1, %p2743_p2  ;;  %p2453_p6 = scmp.lt.s32.totalorder %s2451_s22, %s2444_s6 }
  0x31   : > { %p2448_p12 = pneg %p2447_p3  ;;  %p2454_p5 = por %p2453_p6, %p2452_p11 }
  0x33   : > { %p2455_p7 = pnand %p2454_p5, %p2448_p12 }
  0x35   : > { %2458 = shalt.err (!%p2455_p7)
}
  0x36   : > { %s4141_s13 = smov 64   ;;  %s4143_s23 = smov 4  }
  0x37   : > { %2380 = dma.hbm_to_vmem [thread:$0]  (!%p2722_p13), %s2731_s9, 3264, %s2734_s11, %s2737_s12, %s4141_s13, %s4141_s13, %s4143_s23  }
  0x38   : > { %p256_p6 = scmp.lt.s32.totalorder %s2623_s18, 3  ;;  %s4154_s0 = sld [smem:[#allocation16_spill]] }
  0x39   : > { %p4155_p9 = scmp.ge.s32.totalorder %s2623_s18, 1  ;;  %s178_s20 = scalar_lea.vmem [#allocation2], %s2720_s30 }
  0x3a   : > { %s185_s22 = sshll.u32 %s178_s20, 4  ;;  %s175_s9 = scalar_lea.sflag [#allocation3], %s2714_s28  ;;  %s2784_s22 = int_to_ptr.vmem [resolvable:$true] %s185_s22 }
  0x3b   : > { %p2779_p11 = pnand %p4155_p9, %p256_p6 }
  0x3d   : > { %s4156_s10 = scalar_select %p2779_p11, 1, 0 }
  0x3e   : > { %s2775_s6 = scalar_lea.hbm %s4154_s0, %s2717_s29  ;;  %s2464_s13 = scalar_lea.hbm %s4154_s0, 6528 }
  0x3f   : > { %s2459_s11 = scalar_lea.hbm %s2775_s6, 3264  ;;  %p2465_p8 = scmp.lt.u32.totalorder %s2775_s6, %s4154_s0 }
  0x40   : > { %p2460_p12 = scmp.ne.s32.totalorder %s2775_s6, %s2459_s11  ;;  %p2466_p10 = scmp.lt.u32.totalorder %s2464_s13, %s2459_s11 }
  0x41   : > { %p2468_p3 = scmp.lt.u32.totalorder %s2459_s11, %s2775_s6 }
  0x42   : > { %p2462_p0 = pnand %p2460_p12, %p2743_p2  ;;  %p2467_p1 = por %p2466_p10, %p2465_p8 }
  0x44   : > { %p2463_p4 = pneg %p2462_p0  ;;  %p2469_p5 = por %p2468_p3, %p2467_p1 }
  0x46   : > { %p2470_p7 = pnand %p2469_p5, %p2463_p4 }
  0x48   : > { %2473 = shalt.err (!%p2470_p7)
}
  0x49   : > { %s2474_s20 = scalar_lea.vmem %s2784_s22, 3264  ;;  %s2628_s7 = smov [#allocation2]  }
  0x4a   : > { %p2475_p6 = scmp.ne.s32.totalorder %s2784_s22, %s2474_s20  ;;  %s2479_s8 = sshll.u32 %s2628_s7, 4  ;;  %s2480_s8 = int_to_ptr.vmem [resolvable:$false] %s2479_s8 }
  0x4b   : > { %s2481_s1 = scalar_lea.vmem %s2480_s8, 6528  ;;  %p2482_p0 = scmp.lt.s32.totalorder %s2784_s22, %s2480_s8 }
  0x4c   : > { %p2477_p9 = pnand %p2475_p6, %p2743_p2  ;;  %p2483_p11 = scmp.lt.s32.totalorder %s2481_s1, %s2474_s20 }
  0x4e   : > { %p2478_p12 = pneg %p2477_p9  ;;  %p2484_p8 = por %p2483_p11, %p2482_p0 }
  0x50   : > { %p2485_p10 = pnand %p2484_p8, %p2478_p12 }
  0x52   : > { %2488 = shalt.err (!%p2485_p10)
}
  0x53   : > { %s4157_s13 = smov 4   ;;  %s4158_s23 = smov 64  }
  0x54   : > { %2377 = dma.hbm_to_vmem [thread:$0]  (!%p2722_p13), %s2775_s6, 3264, %s2784_s22, %s175_s9, %s4158_s23, %s4158_s23, %s4157_s13  }
  0x55   : > { %s2817_s20 = scalar_lea.hbm %s4136_s2, %s2717_s29  ;;  %s220_s8 = scalar_lea.vmem [#allocation7], %s2720_s30 }
  0x56   : > { %s227_s1 = sshll.u32 %s220_s8, 4  ;;  %s2489_s0 = scalar_lea.hbm %s2817_s20, 3264  ;;  %s2820_s1 = int_to_ptr.vmem [resolvable:$true] %s227_s1 }
  0x57   : > { %p2490_p11 = scmp.ne.s32.totalorder %s2817_s20, %s2489_s0  ;;  %s2494_s22 = scalar_lea.hbm %s4136_s2, 6528 }
  0x58   : > { %p2495_p3 = scmp.lt.u32.totalorder %s2817_s20, %s4136_s2  ;;  %p2496_p5 = scmp.lt.u32.totalorder %s2494_s22, %s2489_s0 }
  0x59   : > { %p2492_p4 = pnand %p2490_p11, %p2743_p2  ;;  %p2498_p6 = scmp.lt.u32.totalorder %s2489_s0, %s2817_s20 }
  0x5a   : > { %p2497_p7 = por %p2496_p5, %p2495_p3 }
  0x5b   : > { %p2493_p1 = pneg %p2492_p4 }
  0x5c   : > { %p2499_p9 = por %p2498_p6, %p2497_p7 }
  0x5e   : > { %p2500_p12 = pnand %p2499_p9, %p2493_p1 }
  0x60   : > { %2503 = shalt.err (!%p2500_p12)
}
  0x61   : > { %s2504_s7 = scalar_lea.vmem %s2820_s1, 3264  ;;  %s2629_s24 = smov [#allocation7]  }
  0x62   : > { %p2505_p0 = scmp.ne.s32.totalorder %s2820_s1, %s2504_s7  ;;  %s2509_s8 = sshll.u32 %s2629_s24, 4  ;;  %s2510_s8 = int_to_ptr.vmem [resolvable:$false] %s2509_s8 }
  0x63   : > { %s2511_s6 = scalar_lea.vmem %s2510_s8, 6528  ;;  %p2512_p11 = scmp.lt.s32.totalorder %s2820_s1, %s2510_s8 }
  0x64   : > { %p2507_p8 = pnand %p2505_p0, %p2743_p2  ;;  %p2513_p4 = scmp.lt.s32.totalorder %s2511_s6, %s2504_s7 }
  0x66   : > { %p2508_p10 = pneg %p2507_p8  ;;  %p2514_p3 = por %p2513_p4, %p2512_p11 }
  0x68   : > { %p2515_p5 = pnand %p2514_p3, %p2508_p10 }
  0x6a   : > { %2518 = shalt.err (!%p2515_p5)
}
  0x6b   : > { %2383 = dma.hbm_to_vmem [thread:$0]  (!%p2722_p13), %s2817_s20, 3264, %s2820_s1, %s2737_s12, %s4158_s23, %s4158_s23, %s4157_s13  }
  0x6c   : > { %s2851_s9 = scalar_lea.hbm %s4137_s3, %s2717_s29  ;;  %s241_s11 = scalar_lea.vmem [#allocation8], %s2720_s30 }
  0x6d   : > { %s248_s7 = sshll.u32 %s241_s11, 4  ;;  %s238_s24 = scalar_lea.sflag [#allocation9], %s2714_s28  ;;  %s2854_s7 = int_to_ptr.vmem [resolvable:$true] %s248_s7 }
  0x6e   : > { %s2519_s8 = scalar_lea.hbm %s2851_s9, 3264  ;;  %s2524_s1 = scalar_lea.hbm %s4137_s3, 6528 }
  0x6f   : > { %p2520_p1 = scmp.ne.s32.totalorder %s2851_s9, %s2519_s8  ;;  %p2525_p9 = scmp.lt.u32.totalorder %s2851_s9, %s4137_s3 }
  0x70   : > { %p2526_p12 = scmp.lt.u32.totalorder %s2524_s1, %s2519_s8  ;;  %p2528_p8 = scmp.lt.u32.totalorder %s2519_s8, %s2851_s9 }
  0x71   : > { %p2522_p7 = pnand %p2520_p1, %p2743_p2 }
  0x72   : > { %p2527_p0 = por %p2526_p12, %p2525_p9 }
  0x73   : > { %p2523_p6 = pneg %p2522_p7 }
  0x74   : > { %p2529_p10 = por %p2528_p8, %p2527_p0 }
  0x76   : > { %p2530_p11 = pnand %p2529_p10, %p2523_p6 }
  0x78   : > { %2533 = shalt.err (!%p2530_p11)
}
  0x79   : > { %s2534_s30 = scalar_lea.vmem %s2854_s7, 3264  ;;  %s2630_s0 = smov [#allocation8]  }
  0x7a   : > { %p2535_p4 = scmp.ne.s32.totalorder %s2854_s7, %s2534_s30  ;;  %s2539_s22 = sshll.u32 %s2630_s0, 4  ;;  %s2540_s22 = int_to_ptr.vmem [resolvable:$false] %s2539_s22 }
  0x7b   : > { %s2541_s11 = scalar_lea.vmem %s2540_s22, 6528  ;;  %p2542_p1 = scmp.lt.s32.totalorder %s2854_s7, %s2540_s22 }
  0x7c   : > { %p2537_p3 = pnand %p2535_p4, %p2743_p2  ;;  %p2543_p7 = scmp.lt.s32.totalorder %s2541_s11, %s2534_s30 }
  0x7e   : > { %p2538_p5 = pneg %p2537_p3  ;;  %p2544_p9 = por %p2543_p7, %p2542_p1 }
  0x80   : > { %p2545_p12 = pnand %p2544_p9, %p2538_p5 }
  0x82   : > { %2548 = shalt.err (!%p2545_p12)
}
  0x83   : > { %2386 = dma.hbm_to_vmem [thread:$0]  (!%p2722_p13), %s2851_s9, 3264, %s2854_s7, %s238_s24, %s4158_s23, %s4158_s23, %s4157_s13  }
  0x84   : > { %p4159_p2 = scmp.ne.s32.totalorder %s4156_s10, 0 }
  0x85   : > { %s2886_s14 = sand.u32 (!%p4159_p2), 1, %s2615_s16   ;;  %p4160_p6 = scmp.ne.s32.totalorder (!%p4159_p2), %s4148_s25, 0 }
  0x86   : > { %260 = sbr.rel (%p4159_p2) target bundleno = 454 (0x1c6), region = 36  ;;  %s263_s12 = scalar_lea.sflag (!%p4159_p2), [#allocation3], %s2886_s14 }
  0x87   : > { %s2363_s8 = smul.u32 (!%p4159_p2), 204, %s2886_s14 }
  0x89   : > { %s2890_s5 = scalar_lea.vmem (!%p4159_p2), [#allocation2], %s2363_s8 }
  0x8d   : > { %2594 = dma.done.wait (%p4160_p6), %s263_s12, 3264  }
  0x8e   : > { %2596 = vsyncadd (%p4160_p6), %s263_s12, 4294964032  ;;  %s271_s28 = sand.u32 1, %s2680_s19   ;;  %s2897_s13 = scalar_lea.vmem [#allocation5], %s2363_s8 }
  0x8f   : > { %s272_s10 = scalar_lea.sflag [#allocation6], %s271_s28 }
  0x90   : > { %2598 = dma.done.wait (%p4160_p6), %s272_s10, 6528  }
  0x91   : > { %2600 = vsyncadd (%p4160_p6), %s272_s10, 4294960768  ;;  %s2903_s23 = scalar_lea.vmem [#allocation7], %s2363_s8  ;;  %s290_s9 = scalar_lea.sflag [#allocation9], %s2886_s14 }
  0x92   : > { %s2906_s7 = scalar_lea.vmem [#allocation8], %s2363_s8 }
  0x93   : > { %2602 = dma.done.wait (%p4160_p6), %s290_s9, 3264  }
  0x94   : > { %2604 = vsyncadd (%p4160_p6), %s290_s9, 4294964032  ;;  %vm530_vm0 = vsmask.f32 256  ;;  %vm531_vm1 = vsmask.f32 4368  ;;  %vm2154_vm6 = vcmask 60416  }
  0x95   : > { %vm901_vm2 = vsmask.f32 3328  ;;  %vm902_vm3 = vsmask.f32 7440  ;;  %v2913_v0 = vld [vmem:[%s2890_s5] sm:$0xf]  ;;  %vm2936_vm4 = vmor %vm530_vm0, %vm531_vm1 }
  0x96   : > { %v336_v1 = vld [vmem:[%s2890_s5 + $0xc] sm:$0xf]  ;;  %v2917_v2 = vld [vmem:[%s2897_s13] sm:$0xf]  ;;  %v418_v3 = vld [vmem:[%s2903_s23] sm:$0xf] }
  0x97   : > { %v419_v4 = vld [vmem:[%s2903_s23 + $0x4] sm:$0xf]  ;;  %v2922_v5 = vld [vmem:[%s2903_s23 + $0xc] sm:$0xf]  ;;  %v498_v6 = vmax.bf16 %v2917_v2, %v2913_v0  ;;  %v386_v7 = vld [vmem:[%s2897_s13 + $0xc] sm:$0xf] }
  0x98   : > { %v534_v8 = vshrl.u32 %v418_v3, 16  ;;  %v537_v9 = vshll.u32 %v418_v3, 16  ;;  %v542_v10 = vshrl.u32 %v419_v4, 16  ;;  %v545_v11 = vshll.u32 %v419_v4, 16  ;;  %v2930_v16 = vld [vmem:[%s2890_s5 + $0x4] sm:$0xf]  ;;  %vm2956_vm5 = vmor %vm901_vm2, %vm902_vm3 }
  0x99   : > { %v551_v12 = vshrl.u32 %v2922_v5, 16  ;;  %v554_v13 = vshll.u32 %v2922_v5, 16  ;;  %v1707_v14 = vshrl.u32 %v336_v1, 16  ;;  %v1710_v15 = vshll.u32 %v336_v1, 16  ;;  %v2945_v26 = vld [vmem:[%s2897_s13 + $0x4] sm:$0xf] }
  0x9a   : > { %v536_v17 = vrot.slane %v534_v8, 7  ;;  %v544_v18 = vrot.slane %v542_v10, 7  ;;  %v904_v19 = vrot.slane %v534_v8, 4  ;;  %v905_v20 = vrot.slane %v537_v9, 5  ;;  %v2948_v27 = vld [vmem:[%s2890_s5 + $0x10] sm:$0xf] }
  0x9b   : > { %v2932_v21 = vmax.bf16 %v386_v7, %v336_v1  ;;  %v2942_v23 = vrot.slane %v551_v12, 7  ;;  %v1709_v24 = vrot.slane %v1707_v14, 4  ;;  %v1712_v25 = vrot.slane %v1710_v15, 5  ;;  %v387_v32 = vld [vmem:[%s2897_s13 + $0x10] sm:$0xf]  ;;  %s2348_s25 = sshll.u32 %s2886_s14, 7 }
  0x9c   : > { %v539_v28 = vor.u32 %v537_v9, %v536_v17  ;;  %v540_v29 = vrot.slane %v536_v17, 4  ;;  %v547_v30 = vor.u32 %v545_v11, %v544_v18  ;;  %v906_v31 = vor.u32 %v905_v20, %v904_v19  ;;  %v466_v38 = vld [vmem:[%s2906_s7] sm:$0xf]  ;;  %v2966_v42 = vld [vmem:[%s2903_s23 + $0x10] sm:$0xf]  ;;  %s3035_s24 = scalar_lea.vmem [#allocation10], %s2348_s25 }
  0x9d   : > { %v556_v33 = vor.u32 %v554_v13, %v2942_v23  ;;  %v908_v35 = vrot.slane %v545_v11, 5  ;;  %v1713_v36 = vor.u32 %v1712_v25, %v1709_v24  ;;  %v1716_v37 = vshll.u32 %v2948_v27, 16  ;;  %v335_v47 = vld [vmem:[%s2890_s5 + $0x8] sm:$0x1]  ;;  %v420_v52 = vld [vmem:[%s2903_s23 + $0x8] sm:$0x1] }
  0x9e   : > { %v548_v39 = vsel %vm2936_vm4, %v540_v29, %v547_v30  ;;  %v853_v40 = vmax.bf16 %v539_v28, %v2913_v0  ;;  %v907_v41 = vrot.slane %v906_v31, 4  ;;  %v499_v43 = vmax.bf16 %v2945_v26, %v2930_v16  ;;  %v338_v7 = vld [vmem:[%s2890_s5 + $0x14] sm:$0x1]  ;;  %v467_v20 = vld [vmem:[%s2906_s7 + $0x4] sm:$0xf]  ;;  %s2354_s20 = sshll.u32 %s2680_s19, 11 }
  0x9f   : > { %v854_v44 = vmax.bf16 %v548_v39, %v2930_v16  ;;  %v2971_v45 = vmax.bf16 %v556_v33, %v336_v1  ;;  %v2973_v46 = vrot.slane %v1713_v36, 4  ;;  %v2977_v48 = vmax.bf16 %v387_v32, %v2948_v27  ;;  %v2993_v32 = vld [vmem:[%s2903_s23 + $0x18] sm:$0xf]  ;;  %s2201_s1 = sshll.u32 %s3035_s24, 4  ;;  %s4086_s30 = scalar_lea.hbm %s4138_s4, %s2354_s20  ;;  %s4088_s1 = int_to_ptr.vmem [resolvable:$true] %s2201_s1 }
  0xa0   : > { %v909_v49 = vsel %vm2956_vm5, %v907_v41, %v908_v35  ;;  %v1195_v50 = vshrl.u32 %v853_v40, 16  ;;  %v1198_v51 = vshll.u32 %v853_v40, 16  ;;  %v549_v53 = vrot.slane %v544_v18, 4  ;;  %s2188_s0 = scalar_lea.sflag [#allocation4], %s2886_s14  ;;  %s2549_s19 = scalar_lea.vmem %s4088_s1, 2048 }
  0xa1   : > { %v1160_v54 = vmax.bf16 %v909_v49, %v466_v38  ;;  %v1204_v55 = vshll.u32 %v854_v44, 16  ;;  %v1718_v56 = vrot.slane %v1716_v37, 5  ;;  %v559_v57 = vshrl.u32 %v2966_v42, 16  ;;  %v388_v37 = vld [vmem:[%s2897_s13 + $0x18] sm:$0xf]  ;;  %p2550_p13 = scmp.ne.s32.totalorder %s4088_s1, %s2549_s19  ;;  %p4165_p0 = scmp.ne.s32.totalorder %s4149_s26, 0 }
  0xa2   : > { %v1197_v58 = vrot.slane %v1195_v50, 4  ;;  %v1200_v59 = vrot.slane %v1198_v51, 5  ;;  %v855_v60 = vmax.bf16 %v549_v53, %v335_v47  ;;  %v910_v61 = vrot.slane %v542_v10, 4  ;;  %v339_v47 = vld [vmem:[%s2890_s5 + $0x18] sm:$0xf]  ;;  %s2631_s22 = smov [#allocation10]  }
  0xa3   : > { %v1206_v62 = vrot.slane %v1204_v55, 5  ;;  %v1719_v63 = vsel %vm2956_vm5, %v2973_v46, %v1718_v56  ;;  %v561_v1 = vrot.slane %v559_v57, 7  ;;  %v914_v3 = vshll.u32 %v420_v52, 16  ;;  %p2551_p8 = pnand %p2550_p13, %p4165_p0  ;;  %s2553_s11 = sshll.u32 %s2631_s22, 4  ;;  %s2554_s11 = int_to_ptr.vmem [resolvable:$false] %s2553_s11 }
  0xa4   : > { %v1201_v4 = vor.u32 %v1200_v59, %v1197_v58  ;;  %v911_v8 = vor.u32 %v910_v61, %v908_v35  ;;  %v1208_v9 = vshrl.u32 %v854_v44, 16  ;;  %v1214_v11 = vshll.u32 %v855_v60, 16  ;;  %s2555_s8 = scalar_lea.vmem %s2554_s11, 4096  ;;  %p2556_p11 = scmp.lt.s32.totalorder %s4088_s1, %s2554_s11 }
  0xa5   : > { %v566_v14 = vrot.slane %v561_v1, 4  ;;  %v916_v15 = vrot.slane %v914_v3, 5  ;;  %v1720_v10 = vshrl.u32 %v2948_v27, 16  ;;  %v1726_v17 = vshll.u32 %v338_v7, 16  ;;  %p2552_p10 = pneg %p2551_p8  ;;  %p2557_p4 = scmp.lt.s32.totalorder %s2555_s8, %s2549_s19 }
  0xa6   : > { %v1202_v18 = vrot.slane %v1201_v4, 4  ;;  %v1642_v19 = vmax.bf16 %v1160_v54, %v2932_v21  ;;  %v912_v24 = vrot.slane %v911_v8, 4  ;;  %v1210_v25 = vrot.slane %v1208_v9, 4  ;;  %v3045_v8 = vld [vmem:[%s2903_s23 + $0x1c] sm:$0xf] }
  0xa7   : > { %v858_v28 = vmax.bf16 %v566_v14, %v338_v7  ;;  %v1216_v29 = vrot.slane %v1214_v11, 5  ;;  %v1722_v30 = vrot.slane %v1720_v10, 4  ;;  %v1728_v31 = vrot.slane %v1726_v17, 5  ;;  %v468_v11 = vld [vmem:[%s2906_s7 + $0xc] sm:$0xf]  ;;  %p2558_p3 = por %p2557_p4, %p2556_p11 }
  0xa8   : > { %v1207_v33 = vsel %vm2956_vm5, %v1202_v18, %v1206_v62  ;;  %v917_v35 = vsel %vm2956_vm5, %v912_v24, %v916_v15  ;;  %v1211_v36 = vor.u32 %v1210_v25, %v1206_v62  ;;  %v557_v38 = vrot.slane %v2942_v23, 4 }
  0xa9   : > { %v1610_v39 = vmax.bf16 %v1207_v33, %v498_v6  ;;  %v1161_v40 = vmax.bf16 %v917_v35, %v467_v20  ;;  %v1238_v41 = vshll.u32 %v858_v28, 16  ;;  %v1723_v44 = vor.u32 %v1722_v30, %v1718_v56  ;;  %p2559_p5 = pnand %p2558_p3, %p2552_p10 }
  0xaa   : > { %v1212_v46 = vrot.slane %v1211_v36, 4  ;;  %v562_v49 = vshll.u32 %v2966_v42, 16  ;;  %v568_v50 = vshrl.u32 %v2993_v32, 16  ;;  %v571_v51 = vshll.u32 %v2993_v32, 16  ;;  %v389_v36 = vld [vmem:[%s2897_s13 + $0x1c] sm:$0xf] }
  0xab   : > { %v1674_v52 = vmax.bf16 %v1642_v19, %v1610_v39  ;;  %v1643_v53 = vmax.bf16 %v1161_v40, %v2977_v48  ;;  %v1724_v23 = vrot.slane %v1723_v44, 4  ;;  %v3010_v54 = vmax.bf16 %v388_v37, %v339_v47  ;;  %v341_v44 = vld [vmem:[%s2890_s5 + $0x20] sm:$0x1] }
  0xac   : > { %v1217_v0 = vsel %vm2956_vm5, %v1212_v46, %v1216_v29  ;;  %v564_v2 = vor.u32 %v562_v49, %v561_v1  ;;  %v3016_v6 = vrot.slane %v568_v50, 7  ;;  %v918_v55 = vrot.slane %v551_v12, 4  ;;  %v391_v32 = vld [vmem:[%s2897_s13 + $0x28] sm:$0xf] }
  0xad   : > { %v2122_v56 = vmax.bf16 %v1719_v63, %v1674_v52  ;;  %v3020_v58 = vrot.slane %v1238_v41, 5  ;;  %v1611_v59 = vmax.bf16 %v1217_v0, %v499_v43  ;;  %v919_v60 = vrot.slane %v554_v13, 5  ;;  %v3040_v13 = vld [vmem:[%s2890_s5 + $0x1c] sm:$0xf] }
  0xae   : > { %v1729_v61 = vsel %vm2956_vm5, %v1724_v23, %v1728_v31  ;;  %v565_v62 = vsel %vm2936_vm4, %v557_v38, %v564_v2  ;;  %v573_v12 = vor.u32 %v571_v51, %v3016_v6  ;;  %v1219_v63 = vshrl.u32 %v2971_v45, 16  ;;  %v469_v23 = vld [vmem:[%s2906_s7 + $0x10] sm:$0xf] }
  0xaf   : > { %2155 = vst.msk [vmem:[%s3035_s24] sm:$0xf] %vm2154_vm6, %v2122_v56  ;;  %v1675_v5 = vmax.bf16 %v1643_v53, %v1611_v59  ;;  %v857_v16 = vmax.bf16 %v565_v62, %v2948_v27  ;;  %v920_v26 = vor.u32 %v919_v60, %v918_v55  ;;  %v1222_v43 = vshll.u32 %v2971_v45, 16  ;;  %v423_v45 = vld [vmem:[%s2903_s23 + $0x14] sm:$0x1] }
  0xb0   : > { %v922_v1 = vrot.slane %v562_v49, 5  ;;  %v1221_v3 = vrot.slane %v1219_v63, 4  ;;  %v1731_v4 = vshrl.u32 %v339_v47, 16  ;;  %v1734_v7 = vshll.u32 %v339_v47, 16  ;;  %v3075_v62 = vld [vmem:[%s2903_s23 + $0x24] sm:$0xf] }
  0xb1   : > { %v2123_v9 = vmax.bf16 %v1729_v61, %v1675_v5  ;;  %v921_v14 = vrot.slane %v920_v26, 4  ;;  %v1224_v15 = vrot.slane %v1222_v43, 5  ;;  %v1228_v10 = vshll.u32 %v857_v16, 16  ;;  %v390_v5 = vld [vmem:[%s2897_s13 + $0x24] sm:$0xf] }
  0xb2   : > { %v3048_v17 = vmax.bf16 %v573_v12, %v339_v47  ;;  %v1733_v27 = vrot.slane %v1731_v4, 4  ;;  %v1736_v18 = vrot.slane %v1734_v7, 5  ;;  %v1740_v19 = vshll.u32 %v3040_v13, 16 }
  0xb3   : > { %2156 = vst.msk [vmem:[%s3035_s24 + $0x4] sm:$0xf] %vm2154_vm6, %v2123_v9  ;;  %v923_v20 = vsel %vm2956_vm5, %v921_v14, %v922_v1  ;;  %v1225_v24 = vor.u32 %v1224_v15, %v1221_v3  ;;  %v1230_v25 = vrot.slane %v1228_v10, 5  ;;  %v576_v28 = vshrl.u32 %v3045_v8, 16  ;;  %v3082_v9 = vld [vmem:[%s2890_s5 + $0x24] sm:$0xf] }
  0xb4   : > { %v1162_v29 = vmax.bf16 %v923_v20, %v468_v11  ;;  %v1737_v30 = vor.u32 %v1736_v18, %v1733_v27  ;;  %v1742_v31 = vrot.slane %v1740_v19, 5  ;;  %v924_v33 = vrot.slane %v559_v57, 4 }
  0xb5   : > { %v1226_v35 = vrot.slane %v1225_v24, 4  ;;  %v578_v37 = vrot.slane %v576_v28, 7  ;;  %v928_v38 = vshll.u32 %v423_v45, 16  ;;  %v1232_v39 = vshrl.u32 %v857_v16, 16 }
  0xb6   : > { %v1644_v40 = vmax.bf16 %v1162_v29, %v3010_v54  ;;  %v1738_v41 = vrot.slane %v1737_v30, 4  ;;  %v925_v46 = vor.u32 %v924_v33, %v922_v1  ;;  %v1744_v47 = vshrl.u32 %v3040_v13, 16 }
  0xb7   : > { %v1231_v42 = vsel %vm2956_vm5, %v1226_v35, %v1230_v25  ;;  %v583_v57 = vrot.slane %v578_v37, 4  ;;  %v930_v49 = vrot.slane %v928_v38, 5  ;;  %v1234_v52 = vrot.slane %v1232_v39, 4  ;;  %v3120_v39 = vld [vmem:[%s2890_s5 + $0x28] sm:$0xf] }
  0xb8   : > { %v1612_v53 = vmax.bf16 %v1231_v42, %v2932_v21  ;;  %v3070_v0 = vmax.bf16 %v389_v36, %v3040_v13  ;;  %v926_v2 = vrot.slane %v925_v46, 4  ;;  %v1746_v55 = vrot.slane %v1744_v47, 4 }
  0xb9   : > { %v1743_v56 = vsel %vm2956_vm5, %v1738_v41, %v1742_v31  ;;  %v861_v59 = vmax.bf16 %v583_v57, %v341_v44  ;;  %v1235_v60 = vor.u32 %v1234_v52, %v1230_v25  ;;  %v1750_v61 = vshll.u32 %v341_v44, 16  ;;  %v426_v52 = vld [vmem:[%s2903_s23 + $0x20] sm:$0x1] }
  0xba   : > { %v1676_v12 = vmax.bf16 %v1644_v40, %v1612_v53  ;;  %v931_v63 = vsel %vm2956_vm5, %v926_v2, %v930_v49  ;;  %v1747_v21 = vor.u32 %v1746_v55, %v1742_v31  ;;  %v574_v16 = vrot.slane %v3016_v6, 4 }
  0xbb   : > { %v1163_v26 = vmax.bf16 %v931_v63, %v469_v23  ;;  %v1236_v43 = vrot.slane %v1235_v60, 4  ;;  %v1262_v1 = vshll.u32 %v861_v59, 16  ;;  %v1752_v3 = vrot.slane %v1750_v61, 5 }
  0xbc   : > { %v2124_v4 = vmax.bf16 %v1743_v56, %v1676_v12  ;;  %v1748_v7 = vrot.slane %v1747_v21, 4  ;;  %v579_v11 = vshll.u32 %v3045_v8, 16  ;;  %v585_v14 = vshrl.u32 %v3075_v62, 16  ;;  %v344_v21 = vld [vmem:[%s2890_s5 + $0x2c] sm:$0x1] }
  0xbd   : > { %v1241_v15 = vsel %vm2956_vm5, %v1236_v43, %v3020_v58  ;;  %v3089_v10 = vrot.slane %v1262_v1, 5  ;;  %v1645_v6 = vmax.bf16 %v1163_v26, %v3070_v0  ;;  %v3093_v27 = vmax.bf16 %v390_v5, %v3082_v9 }
  0xbe   : > { %2157 = vst.msk [vmem:[%s3035_s24 + $0x8] sm:$0xf] %vm2154_vm6, %v2124_v4  ;;  %v1613_v18 = vmax.bf16 %v1241_v15, %v2977_v48  ;;  %v581_v19 = vor.u32 %v579_v11, %v578_v37  ;;  %v3100_v45 = vrot.slane %v585_v14, 7  ;;  %v588_v58 = vshll.u32 %v3075_v62, 16 }
  0xbf   : > { %v1753_v20 = vsel %vm2956_vm5, %v1748_v7, %v1752_v3  ;;  %v932_v24 = vrot.slane %v568_v50, 4  ;;  %v933_v25 = vrot.slane %v571_v51, 5  ;;  %v1243_v48 = vshrl.u32 %v3048_v17, 16  ;;  %v3117_v51 = vld [vmem:[%s2903_s23 + $0x28] sm:$0xf] }
  0xc0   : > { %v1677_v29 = vmax.bf16 %v1645_v6, %v1613_v18  ;;  %v582_v30 = vsel %vm2936_vm4, %v574_v16, %v581_v19  ;;  %v936_v31 = vrot.slane %v579_v11, 5  ;;  %v1246_v33 = vshll.u32 %v3048_v17, 16  ;;  %v471_v7 = vld [vmem:[%s2906_s7 + $0x1c] sm:$0xf] }
  0xc1   : > { %v860_v35 = vmax.bf16 %v582_v30, %v3040_v13  ;;  %v934_v36 = vor.u32 %v933_v25, %v932_v24  ;;  %v1245_v37 = vrot.slane %v1243_v48, 4  ;;  %v1755_v50 = vshrl.u32 %v3082_v9, 16  ;;  %v470_v13 = vld [vmem:[%s2906_s7 + $0x18] sm:$0xf] }
  0xc2   : > { %v2125_v38 = vmax.bf16 %v1753_v20, %v1677_v29  ;;  %v590_v40 = vor.u32 %v588_v58, %v3100_v45  ;;  %v1248_v41 = vrot.slane %v1246_v33, 5  ;;  %v1758_v17 = vshll.u32 %v3082_v9, 16 }
  0xc3   : > { %v935_v44 = vrot.slane %v934_v36, 4  ;;  %v1252_v46 = vshll.u32 %v860_v35, 16  ;;  %v1757_v47 = vrot.slane %v1755_v50, 4  ;;  %v1764_v42 = vshll.u32 %v3120_v39, 16 }
  0xc4   : > { %2158 = vst.msk [vmem:[%s3035_s24 + $0xc] sm:$0xf] %vm2154_vm6, %v2125_v38  ;;  %v1249_v57 = vor.u32 %v1248_v41, %v1245_v37  ;;  %v1760_v49 = vrot.slane %v1758_v17, 5  ;;  %v3132_v53 = vmax.bf16 %v391_v32, %v3120_v39  ;;  %v593_v23 = vshrl.u32 %v3117_v51, 16  ;;  %v345_v38 = vld [vmem:[%s2890_s5 + $0x30] sm:$0xf] }
  0xc5   : > { %v937_v2 = vsel %vm2956_vm5, %v935_v44, %v936_v31  ;;  %v1254_v55 = vrot.slane %v1252_v46, 5  ;;  %v1766_v56 = vrot.slane %v1764_v42, 5  ;;  %v938_v59 = vrot.slane %v576_v28, 4 }
  0xc6   : > { %v1164_v60 = vmax.bf16 %v937_v2, %v470_v13  ;;  %v1250_v61 = vrot.slane %v1249_v57, 4  ;;  %v1761_v12 = vor.u32 %v1760_v49, %v1757_v47  ;;  %v595_v63 = vrot.slane %v593_v23, 7 }
  0xc7   : > { %v939_v5 = vor.u32 %v938_v59, %v936_v31  ;;  %v942_v16 = vshll.u32 %v426_v52, 16  ;;  %v1256_v26 = vshrl.u32 %v860_v35, 16  ;;  %v1768_v43 = vshrl.u32 %v3120_v39, 16  ;;  %v3155_v31 = vld [vmem:[%s2903_s23 + $0x30] sm:$0xf] }
  0xc8   : > { %v1255_v1 = vsel %vm2956_vm5, %v1250_v61, %v1254_v55  ;;  %v1646_v3 = vmax.bf16 %v1164_v60, %v3093_v27  ;;  %v1762_v8 = vrot.slane %v1761_v12, 4  ;;  %v600_v28 = vrot.slane %v595_v63, 4  ;;  %v3186_v60 = vld [vmem:[%s2890_s5 + $0x34] sm:$0xf] }
  0xc9   : > { %v1614_v4 = vmax.bf16 %v1255_v1, %v3010_v54  ;;  %v940_v11 = vrot.slane %v939_v5, 4  ;;  %v944_v15 = vrot.slane %v942_v16, 5  ;;  %v1258_v6 = vrot.slane %v1256_v26, 4  ;;  %v392_v54 = vld [vmem:[%s2897_s13 + $0x30] sm:$0xf] }
  0xca   : > { %v1767_v18 = vsel %vm2956_vm5, %v1762_v8, %v1766_v56  ;;  %v864_v19 = vmax.bf16 %v600_v28, %v344_v21  ;;  %v1770_v20 = vrot.slane %v1768_v43, 4  ;;  %v1774_v24 = vshll.u32 %v344_v21, 16  ;;  %v3193_v5 = vld [vmem:[%s2903_s23 + $0x34] sm:$0xf]  ;;  %v472_v26 = vld [vmem:[%s2906_s7 + $0x24] sm:$0xf] }
  0xcb   : > { %v862_v25 = vmax.bf16 %v590_v40, %v3082_v9  ;;  %v1678_v48 = vmax.bf16 %v1646_v3, %v1614_v4  ;;  %v945_v29 = vsel %vm2956_vm5, %v940_v11, %v944_v15  ;;  %v1259_v30 = vor.u32 %v1258_v6, %v1254_v55 }
  0xcc   : > { %v1165_v33 = vmax.bf16 %v945_v29, %v471_v7  ;;  %v1286_v35 = vshll.u32 %v864_v19, 16  ;;  %v1771_v36 = vor.u32 %v1770_v20, %v1766_v56  ;;  %v1776_v37 = vrot.slane %v1774_v24, 5 }
  0xcd   : > { %v2126_v50 = vmax.bf16 %v1767_v18, %v1678_v48  ;;  %v1260_v32 = vrot.slane %v1259_v30, 4  ;;  %v591_v41 = vrot.slane %v3100_v45, 4  ;;  %v596_v9 = vshll.u32 %v3117_v51, 16 }
  0xce   : > { %v1647_v40 = vmax.bf16 %v1165_v33, %v3132_v53  ;;  %v1772_v17 = vrot.slane %v1771_v36, 4  ;;  %v3161_v13 = vmax.bf16 %v392_v54, %v345_v38  ;;  %v602_v44 = vshrl.u32 %v3155_v31, 16 }
  0xcf   : > { %2159 = vst.msk [vmem:[%s3035_s24 + $0x10] sm:$0xf] %vm2154_vm6, %v2126_v50  ;;  %v1265_v46 = vsel %vm2956_vm5, %v1260_v32, %v3089_v10  ;;  %v598_v47 = vor.u32 %v596_v9, %v595_v63  ;;  %v605_v42 = vshll.u32 %v3155_v31, 16  ;;  %v946_v45 = vrot.slane %v585_v14, 4  ;;  %v393_v50 = vld [vmem:[%s2897_s13 + $0x34] sm:$0xf] }
  0xd0   : > { %v3172_v57 = vrot.slane %v1286_v35, 5  ;;  %v1615_v49 = vmax.bf16 %v1265_v46, %v3070_v0  ;;  %v3177_v52 = vrot.slane %v602_v44, 7  ;;  %v947_v2 = vrot.slane %v588_v58, 5 }
  0xd1   : > { %v1777_v10 = vsel %vm2956_vm5, %v1772_v17, %v1776_v37  ;;  %v599_v55 = vsel %vm2936_vm4, %v591_v41, %v598_v47  ;;  %v1267_v14 = vshrl.u32 %v862_v25, 16  ;;  %v1270_v56 = vshll.u32 %v862_v25, 16  ;;  %v347_v37 = vld [vmem:[%s2890_s5 + $0x38] sm:$0x1] }
  0xd2   : > { %v1679_v59 = vmax.bf16 %v1647_v40, %v1615_v49  ;;  %v607_v0 = vor.u32 %v605_v42, %v3177_v52  ;;  %v863_v61 = vmax.bf16 %v599_v55, %v3120_v39  ;;  %v948_v62 = vor.u32 %v947_v2, %v946_v45  ;;  %v429_v39 = vld [vmem:[%s2903_s23 + $0x2c] sm:$0x1]  ;;  %v473_v45 = vld [vmem:[%s2906_s7 + $0x28] sm:$0xf] }
  0xd3   : > { %v1269_v58 = vrot.slane %v1267_v14, 4  ;;  %v1272_v12 = vrot.slane %v1270_v56, 5  ;;  %v1779_v63 = vshrl.u32 %v345_v38, 16  ;;  %v1782_v21 = vshll.u32 %v345_v38, 16 }
  0xd4   : > { %v2127_v16 = vmax.bf16 %v1777_v10, %v1679_v59  ;;  %v949_v43 = vrot.slane %v948_v62, 4  ;;  %v950_v1 = vrot.slane %v596_v9, 5  ;;  %v1276_v3 = vshll.u32 %v863_v61, 16  ;;  %v394_v59 = vld [vmem:[%s2897_s13 + $0x3c] sm:$0xf] }
  0xd5   : > { %v1273_v8 = vor.u32 %v1272_v12, %v1269_v58  ;;  %v1781_v28 = vrot.slane %v1779_v63, 4  ;;  %v1784_v4 = vrot.slane %v1782_v21, 5  ;;  %v1788_v7 = vshll.u32 %v3186_v60, 16 }
  0xd6   : > { %2160 = vst.msk [vmem:[%s3035_s24 + $0x14] sm:$0xf] %vm2154_vm6, %v2127_v16  ;;  %v3200_v11 = vmax.bf16 %v607_v0, %v345_v38  ;;  %v951_v15 = vsel %vm2956_vm5, %v949_v43, %v950_v1  ;;  %v1278_v6 = vrot.slane %v1276_v3, 5  ;;  %v610_v18 = vshrl.u32 %v3193_v5, 16 }
  0xd7   : > { %v1166_v19 = vmax.bf16 %v951_v15, %v472_v26  ;;  %v1274_v20 = vrot.slane %v1273_v8, 4  ;;  %v1785_v24 = vor.u32 %v1784_v4, %v1781_v28  ;;  %v1790_v25 = vrot.slane %v1788_v7, 5  ;;  %v348_v26 = vld [vmem:[%s2890_s5 + $0x3c] sm:$0xf] }
  0xd8   : > { %v612_v48 = vrot.slane %v610_v18, 7  ;;  %v952_v29 = vrot.slane %v593_v23, 4  ;;  %v956_v30 = vshll.u32 %v429_v39, 16  ;;  %v1280_v54 = vshrl.u32 %v863_v61, 16 }
  0xd9   : > { %v1279_v33 = vsel %vm2956_vm5, %v1274_v20, %v1278_v6  ;;  %v1648_v35 = vmax.bf16 %v1166_v19, %v3161_v13  ;;  %v1786_v36 = vrot.slane %v1785_v24, 4  ;;  %v1792_v32 = vshrl.u32 %v3186_v60, 16 }
  0xda   : > { %v1616_v38 = vmax.bf16 %v1279_v33, %v3093_v27  ;;  %v617_v41 = vrot.slane %v612_v48, 4  ;;  %v953_v51 = vor.u32 %v952_v29, %v950_v1  ;;  %v958_v23 = vrot.slane %v956_v30, 5  ;;  %v3223_v27 = vld [vmem:[%s2903_s23 + $0x3c] sm:$0xf]  ;;  %v474_v29 = vld [vmem:[%s2906_s7 + $0x30] sm:$0xf] }
  0xdb   : > { %v1791_v9 = vsel %vm2956_vm5, %v1786_v36, %v1790_v25  ;;  %v1282_v40 = vrot.slane %v1280_v54, 4  ;;  %v1794_v17 = vrot.slane %v1792_v32, 4  ;;  %v1798_v46 = vshll.u32 %v347_v37, 16 }
  0xdc   : > { %v1680_v47 = vmax.bf16 %v1648_v35, %v1616_v38  ;;  %v3220_v49 = vmax.bf16 %v393_v50, %v3186_v60  ;;  %v867_v2 = vmax.bf16 %v617_v41, %v347_v37  ;;  %v954_v10 = vrot.slane %v953_v51, 4  ;;  %v3267_v37 = vld [vmem:[%s2903_s23 + $0x40] sm:$0xf]  ;;  %v432_v38 = vld [vmem:[%s2903_s23 + $0x38] sm:$0x1] }
  0xdd   : > { %v1283_v55 = vor.u32 %v1282_v40, %v1278_v6  ;;  %v1795_v14 = vor.u32 %v1794_v17, %v1790_v25  ;;  %v1800_v56 = vrot.slane %v1798_v46, 5  ;;  %v608_v0 = vrot.slane %v3177_v52, 4 }
  0xde   : > { %v2128_v61 = vmax.bf16 %v1791_v9, %v1680_v47  ;;  %v959_v62 = vsel %vm2956_vm5, %v954_v10, %v958_v23  ;;  %v1310_v58 = vshll.u32 %v867_v2, 16  ;;  %v613_v12 = vshll.u32 %v3193_v5, 16  ;;  %v350_v5 = vld [vmem:[%s2890_s5 + $0x44] sm:$0x1] }
  0xdf   : > { %v1167_v63 = vmax.bf16 %v959_v62, %v473_v45  ;;  %v1284_v21 = vrot.slane %v1283_v55, 4  ;;  %v1796_v16 = vrot.slane %v1795_v14, 4  ;;  %v619_v43 = vshrl.u32 %v3223_v27, 16  ;;  %v395_v55 = vld [vmem:[%s2897_s13 + $0x40] sm:$0xf] }
  0xe0   : > { %2161 = vst.msk [vmem:[%s3035_s24 + $0x18] sm:$0xf] %vm2154_vm6, %v2128_v61  ;;  %v3234_v1 = vmax.bf16 %v394_v59, %v348_v26  ;;  %v615_v3 = vor.u32 %v613_v12, %v612_v48  ;;  %v622_v52 = vshll.u32 %v3223_v27, 16  ;;  %v960_v8 = vrot.slane %v602_v44, 4  ;;  %v3263_v48 = vld [vmem:[%s2890_s5 + $0x40] sm:$0xf] }
  0xe1   : > { %v1289_v28 = vsel %vm2956_vm5, %v1284_v21, %v3172_v57  ;;  %v3242_v4 = vrot.slane %v1310_v58, 5  ;;  %v1649_v7 = vmax.bf16 %v1167_v63, %v3220_v49  ;;  %v3247_v39 = vrot.slane %v619_v43, 7  ;;  %v475_v21 = vld [vmem:[%s2906_s7 + $0x34] sm:$0xf] }
  0xe2   : > { %v1617_v15 = vmax.bf16 %v1289_v28, %v3132_v53  ;;  %v1801_v6 = vsel %vm2956_vm5, %v1796_v16, %v1800_v56  ;;  %v616_v44 = vsel %vm2936_vm4, %v608_v0, %v615_v3  ;;  %v961_v57 = vrot.slane %v605_v42, 5 }
  0xe3   : > { %v624_v19 = vor.u32 %v622_v52, %v3247_v39  ;;  %v866_v20 = vmax.bf16 %v616_v44, %v3186_v60  ;;  %v1291_v24 = vshrl.u32 %v3200_v11, 16  ;;  %v1294_v53 = vshll.u32 %v3200_v11, 16 }
  0xe4   : > { %v1681_v25 = vmax.bf16 %v1649_v7, %v1617_v15  ;;  %v962_v30 = vor.u32 %v961_v57, %v960_v8  ;;  %v1803_v54 = vshrl.u32 %v348_v26, 16  ;;  %v1806_v31 = vshll.u32 %v348_v26, 16 }
  0xe5   : > { %v964_v42 = vrot.slane %v613_v12, 5  ;;  %v1293_v33 = vrot.slane %v1291_v24, 4  ;;  %v1296_v35 = vrot.slane %v1294_v53, 5  ;;  %v1300_v36 = vshll.u32 %v866_v20, 16 }
  0xe6   : > { %v2129_v60 = vmax.bf16 %v1801_v6, %v1681_v25  ;;  %v963_v50 = vrot.slane %v962_v30, 4  ;;  %v1805_v32 = vrot.slane %v1803_v54, 4  ;;  %v1808_v11 = vrot.slane %v1806_v31, 5  ;;  %v3296_v6 = vld [vmem:[%s2903_s23 + $0x48] sm:$0xf] }
  0xe7   : > { %v3270_v41 = vmax.bf16 %v624_v19, %v348_v26  ;;  %v1297_v51 = vor.u32 %v1296_v35, %v1293_v33  ;;  %v1302_v23 = vrot.slane %v1300_v36, 5  ;;  %v1812_v9 = vshll.u32 %v3263_v48, 16  ;;  %v396_v19 = vld [vmem:[%s2897_s13 + $0x48] sm:$0xf]  ;;  %v351_v31 = vld [vmem:[%s2890_s5 + $0x48] sm:$0xf] }
  0xe8   : > { %2162 = vst.msk [vmem:[%s3035_s24 + $0x1c] sm:$0xf] %vm2154_vm6, %v2129_v60  ;;  %v965_v40 = vsel %vm2956_vm5, %v963_v50, %v964_v42  ;;  %v1809_v17 = vor.u32 %v1808_v11, %v1805_v32  ;;  %v627_v46 = vshrl.u32 %v3267_v37, 16  ;;  %v966_v47 = vrot.slane %v610_v18, 4 }
  0xe9   : > { %v1168_v45 = vmax.bf16 %v965_v40, %v474_v29  ;;  %v1298_v2 = vrot.slane %v1297_v51, 4  ;;  %v1814_v10 = vrot.slane %v1812_v9, 5  ;;  %v970_v14 = vshll.u32 %v432_v38, 16 }
  0xea   : > { %v1810_v56 = vrot.slane %v1809_v17, 4  ;;  %v629_v59 = vrot.slane %v627_v46, 7  ;;  %v967_v0 = vor.u32 %v966_v47, %v964_v42  ;;  %v1304_v61 = vshrl.u32 %v866_v20, 16 }
  0xeb   : > { %v1303_v62 = vsel %vm2956_vm5, %v1298_v2, %v1302_v23  ;;  %v1650_v58 = vmax.bf16 %v1168_v45, %v3234_v1  ;;  %v972_v18 = vrot.slane %v970_v14, 5  ;;  %v1816_v12 = vshrl.u32 %v3263_v48, 16  ;;  %v3334_v45 = vld [vmem:[%s2890_s5 + $0x4c] sm:$0xf] }
  0xec   : > { %v1618_v63 = vmax.bf16 %v1303_v62, %v3161_v13  ;;  %v3291_v16 = vmax.bf16 %v395_v55, %v3263_v48  ;;  %v634_v26 = vrot.slane %v629_v59, 4  ;;  %v968_v3 = vrot.slane %v967_v0, 4  ;;  %v476_v0 = vld [vmem:[%s2906_s7 + $0x3c] sm:$0xf] }
  0xed   : > { %v1815_v8 = vsel %vm2956_vm5, %v1810_v56, %v1814_v10  ;;  %v1306_v28 = vrot.slane %v1304_v61, 4  ;;  %v1818_v7 = vrot.slane %v1816_v12, 4  ;;  %v1822_v15 = vshll.u32 %v350_v5, 16 }
  0xee   : > { %v1682_v44 = vmax.bf16 %v1650_v58, %v1618_v63  ;;  %v870_v57 = vmax.bf16 %v634_v26, %v350_v5  ;;  %v973_v13 = vsel %vm2956_vm5, %v968_v3, %v972_v18  ;;  %v625_v20 = vrot.slane %v3247_v39, 4  ;;  %v435_v63 = vld [vmem:[%s2903_s23 + $0x44] sm:$0x1] }
  0xef   : > { %v1169_v24 = vmax.bf16 %v973_v13, %v475_v21  ;;  %v1307_v53 = vor.u32 %v1306_v28, %v1302_v23  ;;  %v1819_v25 = vor.u32 %v1818_v7, %v1814_v10  ;;  %v1824_v29 = vrot.slane %v1822_v15, 5  ;;  %v397_v13 = vld [vmem:[%s2897_s13 + $0x4c] sm:$0xf] }
  0xf0   : > { %v2130_v30 = vmax.bf16 %v1815_v8, %v1682_v44  ;;  %v1334_v54 = vshll.u32 %v870_v57, 16  ;;  %v630_v42 = vshll.u32 %v3267_v37, 16  ;;  %v636_v33 = vshrl.u32 %v3296_v6, 16 }
  0xf1   : > { %v1308_v35 = vrot.slane %v1307_v53, 4  ;;  %v1820_v36 = vrot.slane %v1819_v25, 4  ;;  %v3305_v60 = vmax.bf16 %v396_v19, %v351_v31  ;;  %v639_v50 = vshll.u32 %v3296_v6, 16  ;;  %v399_v6 = vld [vmem:[%s2897_s13 + $0x58] sm:$0xf] }
  0xf2   : > { %2163 = vst.msk [vmem:[%s3035_s24 + $0x20] sm:$0xf] %vm2154_vm6, %v2130_v30  ;;  %v1651_v39 = vmax.bf16 %v1169_v24, %v3291_v16  ;;  %v632_v32 = vor.u32 %v630_v42, %v629_v59  ;;  %v3313_v11 = vrot.slane %v636_v33, 7  ;;  %v974_v38 = vrot.slane %v619_v43, 4  ;;  %v3339_v59 = vld [vmem:[%s2903_s23 + $0x4c] sm:$0xf] }
  0xf3   : > { %v1313_v51 = vsel %vm2956_vm5, %v1308_v35, %v3242_v4  ;;  %v3320_v23 = vrot.slane %v1334_v54, 5  ;;  %v1825_v9 = vsel %vm2956_vm5, %v1820_v36, %v1824_v29  ;;  %v975_v40 = vrot.slane %v622_v52, 5  ;;  %v353_v29 = vld [vmem:[%s2890_s5 + $0x50] sm:$0x1]  ;;  %v477_v36 = vld [vmem:[%s2906_s7 + $0x40] sm:$0xf] }
  0xf4   : > { %v1619_v17 = vmax.bf16 %v1313_v51, %v3220_v49  ;;  %v633_v47 = vsel %vm2936_vm4, %v625_v20, %v632_v32  ;;  %v641_v43 = vor.u32 %v639_v50, %v3313_v11  ;;  %v1315_v4 = vshrl.u32 %v3270_v41, 16 }
  0xf5   : > { %v869_v2 = vmax.bf16 %v633_v47, %v3263_v48  ;;  %v976_v10 = vor.u32 %v975_v40, %v974_v38  ;;  %v1318_v27 = vshll.u32 %v3270_v41, 16  ;;  %v1827_v52 = vshrl.u32 %v351_v31, 16  ;;  %v3369_v47 = vld [vmem:[%s2903_s23 + $0x54] sm:$0xf] }
  0xf6   : > { %v1683_v55 = vmax.bf16 %v1651_v39, %v1619_v17  ;;  %v978_v49 = vrot.slane %v630_v42, 5  ;;  %v1317_v14 = vrot.slane %v1315_v4, 4  ;;  %v1830_v56 = vshll.u32 %v351_v31, 16 }
  0xf7   : > { %v977_v61 = vrot.slane %v976_v10, 4  ;;  %v1320_v62 = vrot.slane %v1318_v27, 5  ;;  %v1324_v58 = vshll.u32 %v869_v2, 16  ;;  %v1829_v5 = vrot.slane %v1827_v52, 4 }
  0xf8   : > { %v2131_v18 = vmax.bf16 %v1825_v9, %v1683_v55  ;;  %v3342_v48 = vmax.bf16 %v641_v43, %v351_v31  ;;  %v1832_v12 = vrot.slane %v1830_v56, 5  ;;  %v1836_v41 = vshll.u32 %v3334_v45, 16 }
  0xf9   : > { %v979_v21 = vsel %vm2956_vm5, %v977_v61, %v978_v49  ;;  %v1321_v26 = vor.u32 %v1320_v62, %v1317_v14  ;;  %v1326_v3 = vrot.slane %v1324_v58, 5  ;;  %v644_v8 = vshrl.u32 %v3339_v59, 16 }
  0xfa   : > { %2164 = vst.msk [vmem:[%s3035_s24 + $0x24] sm:$0xf] %vm2154_vm6, %v2131_v18  ;;  %v1170_v28 = vmax.bf16 %v979_v21, %v476_v0  ;;  %v1833_v7 = vor.u32 %v1832_v12, %v1829_v5  ;;  %v1838_v15 = vrot.slane %v1836_v41, 5  ;;  %v980_v44 = vrot.slane %v627_v46, 4  ;;  %v3376_v0 = vld [vmem:[%s2890_s5 + $0x54] sm:$0xf] }
  0xfb   : > { %v1322_v57 = vrot.slane %v1321_v26, 4  ;;  %v646_v19 = vrot.slane %v644_v8, 7  ;;  %v984_v20 = vshll.u32 %v435_v63, 16  ;;  %v1328_v24 = vshrl.u32 %v869_v2, 16  ;;  %v398_v2 = vld [vmem:[%s2897_s13 + $0x54] sm:$0xf] }
  0xfc   : > { %v1652_v53 = vmax.bf16 %v1170_v28, %v3305_v60  ;;  %v1834_v25 = vrot.slane %v1833_v7, 4  ;;  %v981_v30 = vor.u32 %v980_v44, %v978_v49  ;;  %v1840_v54 = vshrl.u32 %v3334_v45, 16 }
  0xfd   : > { %v1327_v37 = vsel %vm2956_vm5, %v1322_v57, %v1326_v3  ;;  %v651_v46 = vrot.slane %v646_v19, 4  ;;  %v986_v31 = vrot.slane %v984_v20, 5  ;;  %v1330_v42 = vrot.slane %v1328_v24, 4  ;;  %v3414_v24 = vld [vmem:[%s2890_s5 + $0x58] sm:$0xf] }
  0xfe   : > { %v1620_v35 = vmax.bf16 %v1327_v37, %v3234_v1  ;;  %v3364_v39 = vmax.bf16 %v397_v13, %v3334_v45  ;;  %v982_v32 = vrot.slane %v981_v30, 4  ;;  %v1842_v38 = vrot.slane %v1840_v54, 4 }
  0xff   : > { %v1839_v51 = vsel %vm2956_vm5, %v1834_v25, %v1838_v15  ;;  %v873_v9 = vmax.bf16 %v651_v46, %v353_v29  ;;  %v1331_v40 = vor.u32 %v1330_v42, %v1326_v3  ;;  %v1846_v17 = vshll.u32 %v353_v29, 16  ;;  %v438_v42 = vld [vmem:[%s2903_s23 + $0x50] sm:$0x1] }
 0x100   : > { %v1684_v43 = vmax.bf16 %v1652_v53, %v1620_v35  ;;  %v987_v4 = vsel %vm2956_vm5, %v982_v32, %v986_v31  ;;  %v1843_v1 = vor.u32 %v1842_v38, %v1838_v15  ;;  %v642_v10 = vrot.slane %v3313_v11, 4 }
 0x101   : > { %v1171_v27 = vmax.bf16 %v987_v4, %v477_v36  ;;  %v1332_v52 = vrot.slane %v1331_v40, 4  ;;  %v1358_v55 = vshll.u32 %v873_v9, 16  ;;  %v1848_v49 = vrot.slane %v1846_v17, 5 }
 0x102   : > { %v2132_v14 = vmax.bf16 %v1839_v51, %v1684_v43  ;;  %v1844_v56 = vrot.slane %v1843_v1, 4  ;;  %v647_v61 = vshll.u32 %v3339_v59, 16  ;;  %v653_v62 = vshrl.u32 %v3369_v47, 16  ;;  %v356_v1 = vld [vmem:[%s2890_s5 + $0x5c] sm:$0x1] }
 0x103   : > { %v1337_v58 = vsel %vm2956_vm5, %v1332_v52, %v3320_v23  ;;  %v3383_v5 = vrot.slane %v1358_v55, 5  ;;  %v1653_v11 = vmax.bf16 %v1171_v27, %v3364_v39  ;;  %v3387_v18 = vmax.bf16 %v398_v2, %v3376_v0 }
 0x104   : > { %2165 = vst.msk [vmem:[%s3035_s24 + $0x28] sm:$0xf] %vm2154_vm6, %v2132_v14  ;;  %v1621_v12 = vmax.bf16 %v1337_v58, %v3291_v16  ;;  %v649_v41 = vor.u32 %v647_v61, %v646_v19  ;;  %v3394_v63 = vrot.slane %v653_v62, 7  ;;  %v656_v23 = vshll.u32 %v3369_v47, 16 }
 0x105   : > { %v1849_v21 = vsel %vm2956_vm5, %v1844_v56, %v1848_v49  ;;  %v988_v26 = vrot.slane %v636_v33, 4  ;;  %v989_v3 = vrot.slane %v639_v50, 5  ;;  %v1339_v16 = vshrl.u32 %v3342_v48, 16  ;;  %v3411_v50 = vld [vmem:[%s2903_s23 + $0x58] sm:$0xf] }
 0x106   : > { %v1685_v28 = vmax.bf16 %v1653_v11, %v1621_v12  ;;  %v650_v7 = vsel %vm2936_vm4, %v642_v10, %v649_v41  ;;  %v992_v15 = vrot.slane %v647_v61, 5  ;;  %v1342_v44 = vshll.u32 %v3342_v48, 16  ;;  %v479_v56 = vld [vmem:[%s2906_s7 + $0x4c] sm:$0xf] }
 0x107   : > { %v872_v57 = vmax.bf16 %v650_v7, %v3334_v45  ;;  %v990_v13 = vor.u32 %v989_v3, %v988_v26  ;;  %v1341_v19 = vrot.slane %v1339_v16, 4  ;;  %v1851_v33 = vshrl.u32 %v3376_v0, 16  ;;  %v478_v45 = vld [vmem:[%s2906_s7 + $0x48] sm:$0xf] }
 0x108   : > { %v2133_v20 = vmax.bf16 %v1849_v21, %v1685_v28  ;;  %v658_v53 = vor.u32 %v656_v23, %v3394_v63  ;;  %v1344_v25 = vrot.slane %v1342_v44, 5  ;;  %v1854_v48 = vshll.u32 %v3376_v0, 16 }
 0x109   : > { %v991_v29 = vrot.slane %v990_v13, 4  ;;  %v1348_v30 = vshll.u32 %v872_v57, 16  ;;  %v1853_v54 = vrot.slane %v1851_v33, 4  ;;  %v1860_v37 = vshll.u32 %v3414_v24, 16 }
 0x10a   : > { %2166 = vst.msk [vmem:[%s3035_s24 + $0x2c] sm:$0xf] %vm2154_vm6, %v2133_v20  ;;  %v1345_v46 = vor.u32 %v1344_v25, %v1341_v19  ;;  %v1856_v31 = vrot.slane %v1854_v48, 5  ;;  %v3426_v35 = vmax.bf16 %v399_v6, %v3414_v24  ;;  %v661_v36 = vshrl.u32 %v3411_v50, 16  ;;  %v357_v20 = vld [vmem:[%s2890_s5 + $0x60] sm:$0xf] }
 0x10b   : > { %v993_v32 = vsel %vm2956_vm5, %v991_v29, %v992_v15  ;;  %v1350_v38 = vrot.slane %v1348_v30, 5  ;;  %v1862_v51 = vrot.slane %v1860_v37, 5  ;;  %v994_v9 = vrot.slane %v644_v8, 4 }
 0x10c   : > { %v1172_v40 = vmax.bf16 %v993_v32, %v478_v45  ;;  %v1346_v17 = vrot.slane %v1345_v46, 4  ;;  %v1857_v43 = vor.u32 %v1856_v31, %v1853_v54  ;;  %v663_v4 = vrot.slane %v661_v36, 7 }
 0x10d   : > { %v995_v2 = vor.u32 %v994_v9, %v992_v15  ;;  %v998_v10 = vshll.u32 %v438_v42, 16  ;;  %v1352_v27 = vshrl.u32 %v872_v57, 16  ;;  %v1864_v52 = vshrl.u32 %v3414_v24, 16  ;;  %v3449_v15 = vld [vmem:[%s2903_s23 + $0x60] sm:$0xf] }
 0x10e   : > { %v1351_v55 = vsel %vm2956_vm5, %v1346_v17, %v1350_v38  ;;  %v1654_v49 = vmax.bf16 %v1172_v40, %v3387_v18  ;;  %v1858_v59 = vrot.slane %v1857_v43, 4  ;;  %v668_v8 = vrot.slane %v663_v4, 4  ;;  %v3480_v40 = vld [vmem:[%s2890_s5 + $0x64] sm:$0xf] }
 0x10f   : > { %v1622_v14 = vmax.bf16 %v1351_v55, %v3305_v60  ;;  %v996_v61 = vrot.slane %v995_v2, 4  ;;  %v1000_v58 = vrot.slane %v998_v10, 5  ;;  %v1354_v11 = vrot.slane %v1352_v27, 4  ;;  %v400_v60 = vld [vmem:[%s2897_s13 + $0x60] sm:$0xf] }
 0x110   : > { %v1863_v12 = vsel %vm2956_vm5, %v1858_v59, %v1862_v51  ;;  %v876_v41 = vmax.bf16 %v668_v8, %v356_v1  ;;  %v1866_v21 = vrot.slane %v1864_v52, 4  ;;  %v1870_v26 = vshll.u32 %v356_v1, 16  ;;  %v3487_v2 = vld [vmem:[%s2903_s23 + $0x64] sm:$0xf]  ;;  %v480_v27 = vld [vmem:[%s2906_s7 + $0x54] sm:$0xf] }
 0x111   : > { %v874_v3 = vmax.bf16 %v658_v53, %v3376_v0  ;;  %v1686_v16 = vmax.bf16 %v1654_v49, %v1622_v14  ;;  %v1001_v28 = vsel %vm2956_vm5, %v996_v61, %v1000_v58  ;;  %v1355_v7 = vor.u32 %v1354_v11, %v1350_v38 }
 0x112   : > { %v1173_v44 = vmax.bf16 %v1001_v28, %v479_v56  ;;  %v1382_v57 = vshll.u32 %v876_v41, 16  ;;  %v1867_v13 = vor.u32 %v1866_v21, %v1862_v51  ;;  %v1872_v19 = vrot.slane %v1870_v26, 5 }
 0x113   : > { %v2134_v33 = vmax.bf16 %v1863_v12, %v1686_v16  ;;  %v1356_v6 = vrot.slane %v1355_v7, 4  ;;  %v659_v25 = vrot.slane %v3394_v63, 4  ;;  %v664_v0 = vshll.u32 %v3411_v50, 16 }
 0x114   : > { %v1655_v53 = vmax.bf16 %v1173_v44, %v3426_v35  ;;  %v1868_v48 = vrot.slane %v1867_v13, 4  ;;  %v3455_v45 = vmax.bf16 %v400_v60, %v357_v20  ;;  %v670_v29 = vshrl.u32 %v3449_v15, 16 }
 0x115   : > { %2167 = vst.msk [vmem:[%s3035_s24 + $0x30] sm:$0xf] %vm2154_vm6, %v2134_v33  ;;  %v1361_v30 = vsel %vm2956_vm5, %v1356_v6, %v3383_v5  ;;  %v666_v54 = vor.u32 %v664_v0, %v663_v4  ;;  %v673_v37 = vshll.u32 %v3449_v15, 16  ;;  %v1002_v63 = vrot.slane %v653_v62, 4  ;;  %v401_v33 = vld [vmem:[%s2897_s13 + $0x64] sm:$0xf] }
 0x116   : > { %v3466_v46 = vrot.slane %v1382_v57, 5  ;;  %v1623_v31 = vmax.bf16 %v1361_v30, %v3364_v39  ;;  %v3471_v42 = vrot.slane %v670_v29, 7  ;;  %v1003_v32 = vrot.slane %v656_v23, 5 }
 0x117   : > { %v1873_v5 = vsel %vm2956_vm5, %v1868_v48, %v1872_v19  ;;  %v667_v38 = vsel %vm2936_vm4, %v659_v25, %v666_v54  ;;  %v1363_v62 = vshrl.u32 %v874_v3, 16  ;;  %v1366_v51 = vshll.u32 %v874_v3, 16  ;;  %v359_v19 = vld [vmem:[%s2890_s5 + $0x68] sm:$0x1] }
 0x118   : > { %v1687_v9 = vmax.bf16 %v1655_v53, %v1623_v31  ;;  %v675_v39 = vor.u32 %v673_v37, %v3471_v42  ;;  %v875_v17 = vmax.bf16 %v667_v38, %v3414_v24  ;;  %v1004_v47 = vor.u32 %v1003_v32, %v1002_v63  ;;  %v441_v24 = vld [vmem:[%s2903_s23 + $0x5c] sm:$0x1]  ;;  %v481_v63 = vld [vmem:[%s2906_s7 + $0x58] sm:$0xf] }
 0x119   : > { %v1365_v23 = vrot.slane %v1363_v62, 4  ;;  %v1368_v43 = vrot.slane %v1366_v51, 5  ;;  %v1875_v4 = vshrl.u32 %v357_v20, 16  ;;  %v1878_v1 = vshll.u32 %v357_v20, 16 }
 0x11a   : > { %v2135_v10 = vmax.bf16 %v1873_v5, %v1687_v9  ;;  %v1005_v52 = vrot.slane %v1004_v47, 4  ;;  %v1006_v55 = vrot.slane %v664_v0, 5  ;;  %v1372_v49 = vshll.u32 %v875_v17, 16  ;;  %v402_v9 = vld [vmem:[%s2897_s13 + $0x6c] sm:$0xf] }
 0x11b   : > { %v1369_v59 = vor.u32 %v1368_v43, %v1365_v23  ;;  %v1877_v8 = vrot.slane %v1875_v4, 4  ;;  %v1880_v14 = vrot.slane %v1878_v1, 5  ;;  %v1884_v56 = vshll.u32 %v3480_v40, 16 }
 0x11c   : > { %2168 = vst.msk [vmem:[%s3035_s24 + $0x34] sm:$0xf] %vm2154_vm6, %v2135_v10  ;;  %v3494_v61 = vmax.bf16 %v675_v39, %v357_v20  ;;  %v1007_v58 = vsel %vm2956_vm5, %v1005_v52, %v1006_v55  ;;  %v1374_v11 = vrot.slane %v1372_v49, 5  ;;  %v678_v12 = vshrl.u32 %v3487_v2, 16 }
 0x11d   : > { %v1174_v41 = vmax.bf16 %v1007_v58, %v480_v27  ;;  %v1370_v21 = vrot.slane %v1369_v59, 4  ;;  %v1881_v26 = vor.u32 %v1880_v14, %v1877_v8  ;;  %v1886_v3 = vrot.slane %v1884_v56, 5  ;;  %v360_v27 = vld [vmem:[%s2890_s5 + $0x6c] sm:$0xf] }
 0x11e   : > { %v680_v16 = vrot.slane %v678_v12, 7  ;;  %v1008_v28 = vrot.slane %v661_v36, 4  ;;  %v1012_v7 = vshll.u32 %v441_v24, 16  ;;  %v1376_v60 = vshrl.u32 %v875_v17, 16 }
 0x11f   : > { %v1375_v44 = vsel %vm2956_vm5, %v1370_v21, %v1374_v11  ;;  %v1656_v57 = vmax.bf16 %v1174_v41, %v3455_v45  ;;  %v1882_v13 = vrot.slane %v1881_v26, 4  ;;  %v1888_v6 = vshrl.u32 %v3480_v40, 16 }
 0x120   : > { %v1624_v20 = vmax.bf16 %v1375_v44, %v3387_v18  ;;  %v685_v25 = vrot.slane %v680_v16, 4  ;;  %v1009_v50 = vor.u32 %v1008_v28, %v1006_v55  ;;  %v1014_v36 = vrot.slane %v1012_v7, 5  ;;  %v3517_v18 = vld [vmem:[%s2903_s23 + $0x6c] sm:$0xf]  ;;  %v482_v28 = vld [vmem:[%s2906_s7 + $0x60] sm:$0xf] }
 0x121   : > { %v1887_v0 = vsel %vm2956_vm5, %v1882_v13, %v1886_v3  ;;  %v1378_v53 = vrot.slane %v1376_v60, 4  ;;  %v1890_v48 = vrot.slane %v1888_v6, 4  ;;  %v1894_v30 = vshll.u32 %v359_v19, 16 }
 0x122   : > { %v1688_v54 = vmax.bf16 %v1656_v57, %v1624_v20  ;;  %v3514_v31 = vmax.bf16 %v401_v33, %v3480_v40  ;;  %v879_v32 = vmax.bf16 %v685_v25, %v359_v19  ;;  %v1010_v5 = vrot.slane %v1009_v50, 4  ;;  %v3561_v19 = vld [vmem:[%s2903_s23 + $0x70] sm:$0xf]  ;;  %v444_v20 = vld [vmem:[%s2903_s23 + $0x68] sm:$0x1] }
 0x123   : > { %v1379_v38 = vor.u32 %v1378_v53, %v1374_v11  ;;  %v1891_v62 = vor.u32 %v1890_v48, %v1886_v3  ;;  %v1896_v51 = vrot.slane %v1894_v30, 5  ;;  %v676_v39 = vrot.slane %v3471_v42, 4 }
 0x124   : > { %v2136_v17 = vmax.bf16 %v1887_v0, %v1688_v54  ;;  %v1015_v47 = vsel %vm2956_vm5, %v1010_v5, %v1014_v36  ;;  %v1406_v23 = vshll.u32 %v879_v32, 16  ;;  %v681_v43 = vshll.u32 %v3487_v2, 16  ;;  %v362_v2 = vld [vmem:[%s2890_s5 + $0x74] sm:$0x1] }
 0x125   : > { %v1175_v4 = vmax.bf16 %v1015_v47, %v481_v63  ;;  %v1380_v1 = vrot.slane %v1379_v38, 4  ;;  %v1892_v10 = vrot.slane %v1891_v62, 4  ;;  %v687_v52 = vshrl.u32 %v3517_v18, 16  ;;  %v403_v38 = vld [vmem:[%s2897_s13 + $0x70] sm:$0xf] }
 0x126   : > { %2169 = vst.msk [vmem:[%s3035_s24 + $0x38] sm:$0xf] %vm2154_vm6, %v2136_v17  ;;  %v3528_v55 = vmax.bf16 %v402_v9, %v360_v27  ;;  %v683_v49 = vor.u32 %v681_v43, %v680_v16  ;;  %v690_v42 = vshll.u32 %v3517_v18, 16  ;;  %v1016_v59 = vrot.slane %v670_v29, 4  ;;  %v3557_v16 = vld [vmem:[%s2890_s5 + $0x70] sm:$0xf] }
 0x127   : > { %v1385_v8 = vsel %vm2956_vm5, %v1380_v1, %v3466_v46  ;;  %v3536_v14 = vrot.slane %v1406_v23, 5  ;;  %v1657_v56 = vmax.bf16 %v1175_v4, %v3514_v31  ;;  %v3541_v24 = vrot.slane %v687_v52, 7  ;;  %v483_v1 = vld [vmem:[%s2906_s7 + $0x64] sm:$0xf] }
 0x128   : > { %v1625_v58 = vmax.bf16 %v1385_v8, %v3426_v35  ;;  %v1897_v11 = vsel %vm2956_vm5, %v1892_v10, %v1896_v51  ;;  %v684_v29 = vsel %vm2936_vm4, %v676_v39, %v683_v49  ;;  %v1017_v46 = vrot.slane %v673_v37, 5 }
 0x129   : > { %v692_v41 = vor.u32 %v690_v42, %v3541_v24  ;;  %v878_v21 = vmax.bf16 %v684_v29, %v3480_v40  ;;  %v1387_v26 = vshrl.u32 %v3494_v61, 16  ;;  %v1390_v35 = vshll.u32 %v3494_v61, 16 }
 0x12a   : > { %v1689_v3 = vmax.bf16 %v1657_v56, %v1625_v58  ;;  %v1018_v7 = vor.u32 %v1017_v46, %v1016_v59  ;;  %v1899_v60 = vshrl.u32 %v360_v27, 16  ;;  %v1902_v15 = vshll.u32 %v360_v27, 16 }
 0x12b   : > { %v1020_v37 = vrot.slane %v681_v43, 5  ;;  %v1389_v44 = vrot.slane %v1387_v26, 4  ;;  %v1392_v57 = vrot.slane %v1390_v35, 5  ;;  %v1396_v13 = vshll.u32 %v878_v21, 16 }
 0x12c   : > { %v2137_v40 = vmax.bf16 %v1897_v11, %v1689_v3  ;;  %v1019_v33 = vrot.slane %v1018_v7, 4  ;;  %v1901_v6 = vrot.slane %v1899_v60, 4  ;;  %v1904_v61 = vrot.slane %v1902_v15, 5  ;;  %v3590_v11 = vld [vmem:[%s2903_s23 + $0x78] sm:$0xf] }
 0x12d   : > { %v3564_v25 = vmax.bf16 %v692_v41, %v360_v27  ;;  %v1393_v50 = vor.u32 %v1392_v57, %v1389_v44  ;;  %v1398_v36 = vrot.slane %v1396_v13, 5  ;;  %v1908_v0 = vshll.u32 %v3557_v16, 16  ;;  %v404_v41 = vld [vmem:[%s2897_s13 + $0x78] sm:$0xf]  ;;  %v363_v15 = vld [vmem:[%s2890_s5 + $0x78] sm:$0xf] }
 0x12e   : > { %2170 = vst.msk [vmem:[%s3035_s24 + $0x3c] sm:$0xf] %vm2154_vm6, %v2137_v40  ;;  %v1021_v53 = vsel %vm2956_vm5, %v1019_v33, %v1020_v37  ;;  %v1905_v48 = vor.u32 %v1904_v61, %v1901_v6  ;;  %v695_v30 = vshrl.u32 %v3561_v19, 16  ;;  %v1022_v54 = vrot.slane %v678_v12, 4 }
 0x12f   : > { %v1176_v63 = vmax.bf16 %v1021_v53, %v482_v28  ;;  %v1394_v32 = vrot.slane %v1393_v50, 4  ;;  %v1910_v5 = vrot.slane %v1908_v0, 5  ;;  %v1026_v62 = vshll.u32 %v444_v20, 16 }
 0x130   : > { %v1906_v51 = vrot.slane %v1905_v48, 4  ;;  %v697_v9 = vrot.slane %v695_v30, 7  ;;  %v1023_v39 = vor.u32 %v1022_v54, %v1020_v37  ;;  %v1400_v17 = vshrl.u32 %v878_v21, 16 }
 0x131   : > { %v1399_v47 = vsel %vm2956_vm5, %v1394_v32, %v1398_v36  ;;  %v1658_v23 = vmax.bf16 %v1176_v63, %v3528_v55  ;;  %v1028_v12 = vrot.slane %v1026_v62, 5  ;;  %v1912_v43 = vshrl.u32 %v3557_v16, 16  ;;  %v3628_v63 = vld [vmem:[%s2890_s5 + $0x7c] sm:$0xf] }
 0x132   : > { %v1626_v4 = vmax.bf16 %v1399_v47, %v3455_v45  ;;  %v3585_v10 = vmax.bf16 %v403_v38, %v3557_v16  ;;  %v702_v27 = vrot.slane %v697_v9, 4  ;;  %v1024_v49 = vrot.slane %v1023_v39, 4  ;;  %v484_v39 = vld [vmem:[%s2906_s7 + $0x6c] sm:$0xf] }
 0x133   : > { %v1911_v59 = vsel %vm2956_vm5, %v1906_v51, %v1910_v5  ;;  %v1402_v8 = vrot.slane %v1400_v17, 4  ;;  %v1914_v56 = vrot.slane %v1912_v43, 4  ;;  %v1918_v58 = vshll.u32 %v362_v2, 16 }
 0x134   : > { %v1690_v29 = vmax.bf16 %v1658_v23, %v1626_v4  ;;  %v882_v46 = vmax.bf16 %v702_v27, %v362_v2  ;;  %v1029_v45 = vsel %vm2956_vm5, %v1024_v49, %v1028_v12  ;;  %v693_v21 = vrot.slane %v3541_v24, 4  ;;  %v447_v4 = vld [vmem:[%s2903_s23 + $0x74] sm:$0x1] }
 0x135   : > { %v1177_v26 = vmax.bf16 %v1029_v45, %v483_v1  ;;  %v1403_v35 = vor.u32 %v1402_v8, %v1398_v36  ;;  %v1915_v3 = vor.u32 %v1914_v56, %v1910_v5  ;;  %v1920_v28 = vrot.slane %v1918_v58, 5  ;;  %v405_v45 = vld [vmem:[%s2897_s13 + $0x7c] sm:$0xf] }
 0x136   : > { %v2138_v7 = vmax.bf16 %v1911_v59, %v1690_v29  ;;  %v1430_v60 = vshll.u32 %v882_v46, 16  ;;  %v698_v37 = vshll.u32 %v3561_v19, 16  ;;  %v704_v44 = vshrl.u32 %v3590_v11, 16 }
 0x137   : > { %v1404_v57 = vrot.slane %v1403_v35, 4  ;;  %v1916_v13 = vrot.slane %v1915_v3, 4  ;;  %v3599_v40 = vmax.bf16 %v404_v41, %v363_v15  ;;  %v707_v33 = vshll.u32 %v3590_v11, 16  ;;  %v407_v11 = vld [vmem:[%s2897_s13 + $0x88] sm:$0xf] }
 0x138   : > { %2171 = vst.msk [vmem:[%s3035_s24 + $0x40] sm:$0xf] %vm2154_vm6, %v2138_v7  ;;  %v1659_v24 = vmax.bf16 %v1177_v26, %v3585_v10  ;;  %v700_v6 = vor.u32 %v698_v37, %v697_v9  ;;  %v3607_v61 = vrot.slane %v704_v44, 7  ;;  %v1030_v20 = vrot.slane %v687_v52, 4  ;;  %v3633_v9 = vld [vmem:[%s2903_s23 + $0x7c] sm:$0xf] }
 0x139   : > { %v1409_v50 = vsel %vm2956_vm5, %v1404_v57, %v3536_v14  ;;  %v3614_v36 = vrot.slane %v1430_v60, 5  ;;  %v1921_v0 = vsel %vm2956_vm5, %v1916_v13, %v1920_v28  ;;  %v1031_v53 = vrot.slane %v690_v42, 5  ;;  %v365_v28 = vld [vmem:[%s2890_s5 + $0x80] sm:$0x1]  ;;  %v485_v13 = vld [vmem:[%s2906_s7 + $0x70] sm:$0xf] }
 0x13a   : > { %v1627_v48 = vmax.bf16 %v1409_v50, %v3514_v31  ;;  %v701_v54 = vsel %vm2936_vm4, %v693_v21, %v700_v6  ;;  %v709_v52 = vor.u32 %v707_v33, %v3607_v61  ;;  %v1411_v14 = vshrl.u32 %v3564_v25, 16 }
 0x13b   : > { %v881_v32 = vmax.bf16 %v701_v54, %v3557_v16  ;;  %v1032_v5 = vor.u32 %v1031_v53, %v1030_v20  ;;  %v1414_v18 = vshll.u32 %v3564_v25, 16  ;;  %v1923_v42 = vshrl.u32 %v363_v15, 16  ;;  %v3663_v54 = vld [vmem:[%s2903_s23 + $0x84] sm:$0xf] }
 0x13c   : > { %v1691_v38 = vmax.bf16 %v1659_v24, %v1627_v48  ;;  %v1034_v31 = vrot.slane %v698_v37, 5  ;;  %v1413_v62 = vrot.slane %v1411_v14, 4  ;;  %v1926_v51 = vshll.u32 %v363_v15, 16 }
 0x13d   : > { %v1033_v17 = vrot.slane %v1032_v5, 4  ;;  %v1416_v47 = vrot.slane %v1414_v18, 5  ;;  %v1420_v23 = vshll.u32 %v881_v32, 16  ;;  %v1925_v2 = vrot.slane %v1923_v42, 4 }
 0x13e   : > { %v2139_v12 = vmax.bf16 %v1921_v0, %v1691_v38  ;;  %v3636_v16 = vmax.bf16 %v709_v52, %v363_v15  ;;  %v1928_v43 = vrot.slane %v1926_v51, 5  ;;  %v1932_v25 = vshll.u32 %v3628_v63, 16 }
 0x13f   : > { %v1035_v1 = vsel %vm2956_vm5, %v1033_v17, %v1034_v31  ;;  %v1417_v27 = vor.u32 %v1416_v47, %v1413_v62  ;;  %v1422_v49 = vrot.slane %v1420_v23, 5  ;;  %v712_v59 = vshrl.u32 %v3633_v9, 16 }
 0x140   : > { %2172 = vst.msk [vmem:[%s3035_s24 + $0x44] sm:$0xf] %vm2154_vm6, %v2139_v12  ;;  %v1178_v8 = vmax.bf16 %v1035_v1, %v484_v39  ;;  %v1929_v56 = vor.u32 %v1928_v43, %v1925_v2  ;;  %v1934_v58 = vrot.slane %v1932_v25, 5  ;;  %v1036_v29 = vrot.slane %v695_v30, 4  ;;  %v3670_v39 = vld [vmem:[%s2890_s5 + $0x84] sm:$0xf] }
 0x141   : > { %v1418_v46 = vrot.slane %v1417_v27, 4  ;;  %v714_v41 = vrot.slane %v712_v59, 7  ;;  %v1040_v21 = vshll.u32 %v447_v4, 16  ;;  %v1424_v26 = vshrl.u32 %v881_v32, 16  ;;  %v406_v32 = vld [vmem:[%s2897_s13 + $0x84] sm:$0xf] }
 0x142   : > { %v1660_v35 = vmax.bf16 %v1178_v8, %v3599_v40  ;;  %v1930_v3 = vrot.slane %v1929_v56, 4  ;;  %v1037_v7 = vor.u32 %v1036_v29, %v1034_v31  ;;  %v1936_v60 = vshrl.u32 %v3628_v63, 16 }
 0x143   : > { %v1423_v19 = vsel %vm2956_vm5, %v1418_v46, %v1422_v49  ;;  %v719_v30 = vrot.slane %v714_v41, 4  ;;  %v1042_v15 = vrot.slane %v1040_v21, 5  ;;  %v1426_v37 = vrot.slane %v1424_v26, 4  ;;  %v3708_v26 = vld [vmem:[%s2890_s5 + $0x88] sm:$0xf] }
 0x144   : > { %v1628_v57 = vmax.bf16 %v1423_v19, %v3528_v55  ;;  %v3658_v24 = vmax.bf16 %v405_v45, %v3628_v63  ;;  %v1038_v6 = vrot.slane %v1037_v7, 4  ;;  %v1938_v20 = vrot.slane %v1936_v60, 4 }
 0x145   : > { %v1935_v50 = vsel %vm2956_vm5, %v1930_v3, %v1934_v58  ;;  %v885_v0 = vmax.bf16 %v719_v30, %v365_v28  ;;  %v1427_v53 = vor.u32 %v1426_v37, %v1422_v49  ;;  %v1942_v48 = vshll.u32 %v365_v28, 16  ;;  %v450_v37 = vld [vmem:[%s2903_s23 + $0x80] sm:$0x1] }
 0x146   : > { %v1692_v52 = vmax.bf16 %v1660_v35, %v1628_v57  ;;  %v1043_v14 = vsel %vm2956_vm5, %v1038_v6, %v1042_v15  ;;  %v1939_v55 = vor.u32 %v1938_v20, %v1934_v58  ;;  %v710_v5 = vrot.slane %v3607_v61, 4 }
 0x147   : > { %v1179_v18 = vmax.bf16 %v1043_v14, %v485_v13  ;;  %v1428_v42 = vrot.slane %v1427_v53, 4  ;;  %v1454_v38 = vshll.u32 %v885_v0, 16  ;;  %v1944_v31 = vrot.slane %v1942_v48, 5 }
 0x148   : > { %v2140_v62 = vmax.bf16 %v1935_v50, %v1692_v52  ;;  %v1940_v51 = vrot.slane %v1939_v55, 4  ;;  %v715_v17 = vshll.u32 %v3633_v9, 16  ;;  %v721_v47 = vshrl.u32 %v3663_v54, 16  ;;  %v368_v55 = vld [vmem:[%s2890_s5 + $0x8c] sm:$0x1] }
 0x149   : > { %v1433_v23 = vsel %vm2956_vm5, %v1428_v42, %v3614_v36  ;;  %v3677_v2 = vrot.slane %v1454_v38, 5  ;;  %v1661_v61 = vmax.bf16 %v1179_v18, %v3658_v24  ;;  %v3681_v12 = vmax.bf16 %v406_v32, %v3670_v39 }
 0x14a   : > { %2173 = vst.msk [vmem:[%s3035_s24 + $0x48] sm:$0xf] %vm2154_vm6, %v2140_v62  ;;  %v1629_v43 = vmax.bf16 %v1433_v23, %v3585_v10  ;;  %v717_v25 = vor.u32 %v715_v17, %v714_v41  ;;  %v3688_v4 = vrot.slane %v721_v47, 7  ;;  %v724_v36 = vshll.u32 %v3663_v54, 16 }
 0x14b   : > { %v1945_v1 = vsel %vm2956_vm5, %v1940_v51, %v1944_v31  ;;  %v1044_v27 = vrot.slane %v704_v44, 4  ;;  %v1045_v49 = vrot.slane %v707_v33, 5  ;;  %v1435_v10 = vshrl.u32 %v3636_v16, 16  ;;  %v3705_v33 = vld [vmem:[%s2903_s23 + $0x88] sm:$0xf] }
 0x14c   : > { %v1693_v8 = vmax.bf16 %v1661_v61, %v1629_v43  ;;  %v718_v56 = vsel %vm2936_vm4, %v710_v5, %v717_v25  ;;  %v1048_v58 = vrot.slane %v715_v17, 5  ;;  %v1438_v29 = vshll.u32 %v3636_v16, 16  ;;  %v487_v51 = vld [vmem:[%s2906_s7 + $0x7c] sm:$0xf] }
 0x14d   : > { %v884_v46 = vmax.bf16 %v718_v56, %v3628_v63  ;;  %v1046_v45 = vor.u32 %v1045_v49, %v1044_v27  ;;  %v1437_v41 = vrot.slane %v1435_v10, 4  ;;  %v1947_v44 = vshrl.u32 %v3670_v39, 16  ;;  %v486_v63 = vld [vmem:[%s2906_s7 + $0x78] sm:$0xf] }
 0x14e   : > { %v2141_v21 = vmax.bf16 %v1945_v1, %v1693_v8  ;;  %v726_v35 = vor.u32 %v724_v36, %v3688_v4  ;;  %v1440_v3 = vrot.slane %v1438_v29, 5  ;;  %v1950_v16 = vshll.u32 %v3670_v39, 16 }
 0x14f   : > { %v1047_v28 = vrot.slane %v1046_v45, 4  ;;  %v1444_v7 = vshll.u32 %v884_v46, 16  ;;  %v1949_v60 = vrot.slane %v1947_v44, 4  ;;  %v1956_v19 = vshll.u32 %v3708_v26, 16 }
 0x150   : > { %2174 = vst.msk [vmem:[%s3035_s24 + $0x4c] sm:$0xf] %vm2154_vm6, %v2141_v21  ;;  %v1441_v30 = vor.u32 %v1440_v3, %v1437_v41  ;;  %v1952_v15 = vrot.slane %v1950_v16, 5  ;;  %v3720_v57 = vmax.bf16 %v407_v11, %v3708_v26  ;;  %v729_v13 = vshrl.u32 %v3705_v33, 16  ;;  %v369_v21 = vld [vmem:[%s2890_s5 + $0x90] sm:$0xf] }
 0x151   : > { %v1049_v6 = vsel %vm2956_vm5, %v1047_v28, %v1048_v58  ;;  %v1446_v20 = vrot.slane %v1444_v7, 5  ;;  %v1958_v50 = vrot.slane %v1956_v19, 5  ;;  %v1050_v0 = vrot.slane %v712_v59, 4 }
 0x152   : > { %v1180_v53 = vmax.bf16 %v1049_v6, %v486_v63  ;;  %v1442_v48 = vrot.slane %v1441_v30, 4  ;;  %v1953_v52 = vor.u32 %v1952_v15, %v1949_v60  ;;  %v731_v14 = vrot.slane %v729_v13, 7 }
 0x153   : > { %v1051_v32 = vor.u32 %v1050_v0, %v1048_v58  ;;  %v1054_v5 = vshll.u32 %v450_v37, 16  ;;  %v1448_v18 = vshrl.u32 %v884_v46, 16  ;;  %v1960_v42 = vshrl.u32 %v3708_v26, 16  ;;  %v3743_v58 = vld [vmem:[%s2903_s23 + $0x90] sm:$0xf] }
 0x154   : > { %v1447_v38 = vsel %vm2956_vm5, %v1442_v48, %v1446_v20  ;;  %v1662_v31 = vmax.bf16 %v1180_v53, %v3681_v12  ;;  %v1954_v9 = vrot.slane %v1953_v52, 4  ;;  %v736_v59 = vrot.slane %v731_v14, 4  ;;  %v3774_v53 = vld [vmem:[%s2890_s5 + $0x94] sm:$0xf] }
 0x155   : > { %v1630_v62 = vmax.bf16 %v1447_v38, %v3599_v40  ;;  %v1052_v17 = vrot.slane %v1051_v32, 4  ;;  %v1056_v23 = vrot.slane %v1054_v5, 5  ;;  %v1450_v61 = vrot.slane %v1448_v18, 4  ;;  %v408_v40 = vld [vmem:[%s2897_s13 + $0x90] sm:$0xf] }
 0x156   : > { %v1959_v43 = vsel %vm2956_vm5, %v1954_v9, %v1958_v50  ;;  %v888_v25 = vmax.bf16 %v736_v59, %v368_v55  ;;  %v1962_v1 = vrot.slane %v1960_v42, 4  ;;  %v1966_v27 = vshll.u32 %v368_v55, 16  ;;  %v3781_v32 = vld [vmem:[%s2903_s23 + $0x94] sm:$0xf]  ;;  %v488_v18 = vld [vmem:[%s2906_s7 + $0x84] sm:$0xf] }
 0x157   : > { %v886_v49 = vmax.bf16 %v726_v35, %v3670_v39  ;;  %v1694_v10 = vmax.bf16 %v1662_v31, %v1630_v62  ;;  %v1057_v8 = vsel %vm2956_vm5, %v1052_v17, %v1056_v23  ;;  %v1451_v56 = vor.u32 %v1450_v61, %v1446_v20 }
 0x158   : > { %v1181_v29 = vmax.bf16 %v1057_v8, %v487_v51  ;;  %v1478_v46 = vshll.u32 %v888_v25, 16  ;;  %v1963_v45 = vor.u32 %v1962_v1, %v1958_v50  ;;  %v1968_v41 = vrot.slane %v1966_v27, 5 }
 0x159   : > { %v2142_v44 = vmax.bf16 %v1959_v43, %v1694_v10  ;;  %v1452_v11 = vrot.slane %v1451_v56, 4  ;;  %v727_v3 = vrot.slane %v3688_v4, 4  ;;  %v732_v39 = vshll.u32 %v3705_v33, 16 }
 0x15a   : > { %v1663_v35 = vmax.bf16 %v1181_v29, %v3720_v57  ;;  %v1964_v16 = vrot.slane %v1963_v45, 4  ;;  %v3749_v63 = vmax.bf16 %v408_v40, %v369_v21  ;;  %v738_v28 = vshrl.u32 %v3743_v58, 16 }
 0x15b   : > { %2175 = vst.msk [vmem:[%s3035_s24 + $0x50] sm:$0xf] %vm2154_vm6, %v2142_v44  ;;  %v1457_v7 = vsel %vm2956_vm5, %v1452_v11, %v3677_v2  ;;  %v734_v60 = vor.u32 %v732_v39, %v731_v14  ;;  %v741_v19 = vshll.u32 %v3743_v58, 16  ;;  %v1058_v4 = vrot.slane %v721_v47, 4  ;;  %v409_v44 = vld [vmem:[%s2897_s13 + $0x94] sm:$0xf] }
 0x15c   : > { %v3760_v30 = vrot.slane %v1478_v46, 5  ;;  %v1631_v15 = vmax.bf16 %v1457_v7, %v3658_v24  ;;  %v3765_v37 = vrot.slane %v738_v28, 7  ;;  %v1059_v6 = vrot.slane %v724_v36, 5  ;;  %v3854_v58 = vld [vmem:[%s2903_s23 + $0xa0] sm:$0xf] }
 0x15d   : > { %v1969_v2 = vsel %vm2956_vm5, %v1964_v16, %v1968_v41  ;;  %v735_v20 = vsel %vm2936_vm4, %v727_v3, %v734_v60  ;;  %v1459_v47 = vshrl.u32 %v886_v49, 16  ;;  %v1462_v50 = vshll.u32 %v886_v49, 16  ;;  %v371_v41 = vld [vmem:[%s2890_s5 + $0x98] sm:$0x1] }
 0x15e   : > { %v1695_v0 = vmax.bf16 %v1663_v35, %v1631_v15  ;;  %v743_v24 = vor.u32 %v741_v19, %v3765_v37  ;;  %v887_v48 = vmax.bf16 %v735_v20, %v3708_v26  ;;  %v1060_v54 = vor.u32 %v1059_v6, %v1058_v4  ;;  %v453_v26 = vld [vmem:[%s2903_s23 + $0x8c] sm:$0x1]  ;;  %v489_v4 = vld [vmem:[%s2906_s7 + $0x88] sm:$0xf] }
 0x15f   : > { %v1461_v36 = vrot.slane %v1459_v47, 4  ;;  %v1464_v52 = vrot.slane %v1462_v50, 5  ;;  %v1971_v14 = vshrl.u32 %v369_v21, 16  ;;  %v1974_v55 = vshll.u32 %v369_v21, 16 }
 0x160   : > { %v2143_v5 = vmax.bf16 %v1969_v2, %v1695_v0  ;;  %v1061_v42 = vrot.slane %v1060_v54, 4  ;;  %v1062_v38 = vrot.slane %v732_v39, 5  ;;  %v1468_v31 = vshll.u32 %v887_v48, 16  ;;  %v410_v0 = vld [vmem:[%s2897_s13 + $0x9c] sm:$0xf] }
 0x161   : > { %v1465_v9 = vor.u32 %v1464_v52, %v1461_v36  ;;  %v1973_v59 = vrot.slane %v1971_v14, 4  ;;  %v1976_v62 = vrot.slane %v1974_v55, 5  ;;  %v1980_v51 = vshll.u32 %v3774_v53, 16 }
 0x162   : > { %2176 = vst.msk [vmem:[%s3035_s24 + $0x54] sm:$0xf] %vm2154_vm6, %v2143_v5  ;;  %v3788_v17 = vmax.bf16 %v743_v24, %v369_v21  ;;  %v1063_v23 = vsel %vm2956_vm5, %v1061_v42, %v1062_v38  ;;  %v1470_v61 = vrot.slane %v1468_v31, 5  ;;  %v746_v43 = vshrl.u32 %v3781_v32, 16 }
 0x163   : > { %v1182_v25 = vmax.bf16 %v1063_v23, %v488_v18  ;;  %v1466_v1 = vrot.slane %v1465_v9, 4  ;;  %v1977_v27 = vor.u32 %v1976_v62, %v1973_v59  ;;  %v1982_v49 = vrot.slane %v1980_v51, 5  ;;  %v372_v18 = vld [vmem:[%s2890_s5 + $0x9c] sm:$0xf] }
 0x164   : > { %v748_v10 = vrot.slane %v746_v43, 7  ;;  %v1064_v8 = vrot.slane %v729_v13, 4  ;;  %v1068_v56 = vshll.u32 %v453_v26, 16  ;;  %v1472_v40 = vshrl.u32 %v887_v48, 16 }
 0x165   : > { %v1471_v29 = vsel %vm2956_vm5, %v1466_v1, %v1470_v61  ;;  %v1664_v46 = vmax.bf16 %v1182_v25, %v3749_v63  ;;  %v1978_v45 = vrot.slane %v1977_v27, 4  ;;  %v1984_v11 = vshrl.u32 %v3774_v53, 16 }
 0x166   : > { %v1632_v21 = vmax.bf16 %v1471_v29, %v3681_v12  ;;  %v753_v3 = vrot.slane %v748_v10, 4  ;;  %v1065_v33 = vor.u32 %v1064_v8, %v1062_v38  ;;  %v1070_v13 = vrot.slane %v1068_v56, 5  ;;  %v3811_v12 = vld [vmem:[%s2903_s23 + $0x9c] sm:$0xf] }
 0x167   : > { %v1983_v39 = vsel %vm2956_vm5, %v1978_v45, %v1982_v49  ;;  %v1474_v35 = vrot.slane %v1472_v40, 4  ;;  %v1986_v16 = vrot.slane %v1984_v11, 4  ;;  %v1990_v7 = vshll.u32 %v371_v41, 16 }
 0x168   : > { %v1696_v60 = vmax.bf16 %v1664_v46, %v1632_v21  ;;  %v3808_v15 = vmax.bf16 %v409_v44, %v3774_v53  ;;  %v891_v6 = vmax.bf16 %v753_v3, %v371_v41  ;;  %v1066_v2 = vrot.slane %v1065_v33, 4  ;;  %v456_v21 = vld [vmem:[%s2903_s23 + $0x98] sm:$0x1] }
 0x169   : > { %v1475_v20 = vor.u32 %v1474_v35, %v1470_v61  ;;  %v1987_v47 = vor.u32 %v1986_v16, %v1982_v49  ;;  %v1992_v50 = vrot.slane %v1990_v7, 5  ;;  %v744_v24 = vrot.slane %v3765_v37, 4 }
 0x16a   : > { %v2144_v48 = vmax.bf16 %v1983_v39, %v1696_v60  ;;  %v1071_v54 = vsel %vm2956_vm5, %v1066_v2, %v1070_v13  ;;  %v1502_v36 = vshll.u32 %v891_v6, 16  ;;  %v749_v52 = vshll.u32 %v3781_v32, 16  ;;  %v374_v32 = vld [vmem:[%s2890_s5 + $0xa4] sm:$0x1] }
 0x16b   : > { %v1183_v14 = vmax.bf16 %v1071_v54, %v489_v4  ;;  %v1476_v55 = vrot.slane %v1475_v20, 4  ;;  %v1988_v5 = vrot.slane %v1987_v47, 4  ;;  %v755_v42 = vshrl.u32 %v3811_v12, 16  ;;  %v411_v20 = vld [vmem:[%s2897_s13 + $0xa0] sm:$0xf] }
 0x16c   : > { %2177 = vst.msk [vmem:[%s3035_s24 + $0x58] sm:$0xf] %vm2154_vm6, %v2144_v48  ;;  %v3822_v38 = vmax.bf16 %v410_v0, %v372_v18  ;;  %v751_v31 = vor.u32 %v749_v52, %v748_v10  ;;  %v758_v37 = vshll.u32 %v3811_v12, 16  ;;  %v1072_v9 = vrot.slane %v738_v28, 4  ;;  %v3851_v10 = vld [vmem:[%s2890_s5 + $0xa0] sm:$0xf] }
 0x16d   : > { %v1481_v59 = vsel %vm2956_vm5, %v1476_v55, %v3760_v30  ;;  %v3830_v62 = vrot.slane %v1502_v36, 5  ;;  %v1665_v51 = vmax.bf16 %v1183_v14, %v3808_v15  ;;  %v3835_v26 = vrot.slane %v755_v42, 7  ;;  %v491_v55 = vld [vmem:[%s2906_s7 + $0x94] sm:$0xf] }
 0x16e   : > { %v1633_v23 = vmax.bf16 %v1481_v59, %v3720_v57  ;;  %v1993_v61 = vsel %vm2956_vm5, %v1988_v5, %v1992_v50  ;;  %v752_v28 = vsel %vm2936_vm4, %v744_v24, %v751_v31  ;;  %v1073_v30 = vrot.slane %v741_v19, 5  ;;  %v490_v19 = vld [vmem:[%s2906_s7 + $0x90] sm:$0xf] }
 0x16f   : > { %v760_v25 = vor.u32 %v758_v37, %v3835_v26  ;;  %v890_v1 = vmax.bf16 %v752_v28, %v3774_v53  ;;  %v1483_v27 = vshrl.u32 %v3788_v17, 16  ;;  %v1486_v49 = vshll.u32 %v3788_v17, 16 }
 0x170   : > { %v1697_v57 = vmax.bf16 %v1665_v51, %v1633_v23  ;;  %v1074_v8 = vor.u32 %v1073_v30, %v1072_v9  ;;  %v1995_v56 = vshrl.u32 %v372_v18, 16  ;;  %v1998_v40 = vshll.u32 %v372_v18, 16 }
 0x171   : > { %v1076_v29 = vrot.slane %v749_v52, 5  ;;  %v1485_v46 = vrot.slane %v1483_v27, 4  ;;  %v1488_v45 = vrot.slane %v1486_v49, 5  ;;  %v1492_v41 = vshll.u32 %v890_v1, 16 }
 0x172   : > { %v2145_v53 = vmax.bf16 %v1993_v61, %v1697_v57  ;;  %v1075_v44 = vrot.slane %v1074_v8, 4  ;;  %v1997_v11 = vrot.slane %v1995_v56, 4  ;;  %v2000_v17 = vrot.slane %v1998_v40, 5  ;;  %v3884_v61 = vld [vmem:[%s2903_s23 + $0xa8] sm:$0xf] }
 0x173   : > { %v3858_v3 = vmax.bf16 %v760_v25, %v372_v18  ;;  %v1489_v33 = vor.u32 %v1488_v45, %v1485_v46  ;;  %v1494_v13 = vrot.slane %v1492_v41, 5  ;;  %v2004_v39 = vshll.u32 %v3851_v10, 16  ;;  %v412_v25 = vld [vmem:[%s2897_s13 + $0xa8] sm:$0xf] }
 0x174   : > { %2178 = vst.msk [vmem:[%s3035_s24 + $0x5c] sm:$0xf] %vm2154_vm6, %v2145_v53  ;;  %v1077_v35 = vsel %vm2956_vm5, %v1075_v44, %v1076_v29  ;;  %v2001_v16 = vor.u32 %v2000_v17, %v1997_v11  ;;  %v763_v7 = vshrl.u32 %v3854_v58, 16  ;;  %v1078_v60 = vrot.slane %v746_v43, 4 }
 0x175   : > { %v1184_v4 = vmax.bf16 %v1077_v35, %v490_v19  ;;  %v1490_v6 = vrot.slane %v1489_v33, 4  ;;  %v2006_v2 = vrot.slane %v2004_v39, 5  ;;  %v1082_v47 = vshll.u32 %v456_v21, 16  ;;  %v375_v19 = vld [vmem:[%s2890_s5 + $0xa8] sm:$0xf] }
 0x176   : > { %v2002_v50 = vrot.slane %v2001_v16, 4  ;;  %v765_v0 = vrot.slane %v763_v7, 7  ;;  %v1079_v24 = vor.u32 %v1078_v60, %v1076_v29  ;;  %v1496_v48 = vshrl.u32 %v890_v1, 16 }
 0x177   : > { %v1495_v54 = vsel %vm2956_vm5, %v1490_v6, %v1494_v13  ;;  %v1666_v36 = vmax.bf16 %v1184_v4, %v3822_v38  ;;  %v1084_v43 = vrot.slane %v1082_v47, 5  ;;  %v2008_v52 = vshrl.u32 %v3851_v10, 16  ;;  %v3922_v4 = vld [vmem:[%s2890_s5 + $0xac] sm:$0xf] }
 0x178   : > { %v1634_v14 = vmax.bf16 %v1495_v54, %v3749_v63  ;;  %v3879_v5 = vmax.bf16 %v411_v20, %v3851_v10  ;;  %v770_v18 = vrot.slane %v765_v0, 4  ;;  %v1080_v31 = vrot.slane %v1079_v24, 4  ;;  %v492_v24 = vld [vmem:[%s2906_s7 + $0x9c] sm:$0xf] }
 0x179   : > { %v2007_v9 = vsel %vm2956_vm5, %v2002_v50, %v2006_v2  ;;  %v1498_v59 = vrot.slane %v1496_v48, 4  ;;  %v2010_v51 = vrot.slane %v2008_v52, 4  ;;  %v2014_v23 = vshll.u32 %v374_v32, 16 }
 0x17a   : > { %v1698_v28 = vmax.bf16 %v1666_v36, %v1634_v14  ;;  %v894_v30 = vmax.bf16 %v770_v18, %v374_v32  ;;  %v1085_v63 = vsel %vm2956_vm5, %v1080_v31, %v1084_v43  ;;  %v761_v1 = vrot.slane %v3835_v26, 4  ;;  %v459_v14 = vld [vmem:[%s2903_s23 + $0xa4] sm:$0x1] }
 0x17b   : > { %v1185_v27 = vmax.bf16 %v1085_v63, %v491_v55  ;;  %v1499_v49 = vor.u32 %v1498_v59, %v1494_v13  ;;  %v2011_v57 = vor.u32 %v2010_v51, %v2006_v2  ;;  %v2016_v8 = vrot.slane %v2014_v23, 5  ;;  %v413_v63 = vld [vmem:[%s2897_s13 + $0xac] sm:$0xf] }
 0x17c   : > { %v2146_v56 = vmax.bf16 %v2007_v9, %v1698_v28  ;;  %v1526_v40 = vshll.u32 %v894_v30, 16  ;;  %v766_v29 = vshll.u32 %v3854_v58, 16  ;;  %v772_v46 = vshrl.u32 %v3884_v61, 16 }
 0x17d   : > { %v1500_v45 = vrot.slane %v1499_v49, 4  ;;  %v2012_v41 = vrot.slane %v2011_v57, 4  ;;  %v3893_v53 = vmax.bf16 %v412_v25, %v375_v19  ;;  %v775_v44 = vshll.u32 %v3884_v61, 16 }
 0x17e   : > { %2179 = vst.msk [vmem:[%s3035_s24 + $0x60] sm:$0xf] %vm2154_vm6, %v2146_v56  ;;  %v1667_v26 = vmax.bf16 %v1185_v27, %v3879_v5  ;;  %v768_v11 = vor.u32 %v766_v29, %v765_v0  ;;  %v3901_v17 = vrot.slane %v772_v46, 7  ;;  %v1086_v21 = vrot.slane %v755_v42, 4  ;;  %v3927_v0 = vld [vmem:[%s2903_s23 + $0xac] sm:$0xf] }
 0x17f   : > { %v1505_v33 = vsel %vm2956_vm5, %v1500_v45, %v3830_v62  ;;  %v3908_v13 = vrot.slane %v1526_v40, 5  ;;  %v2017_v39 = vsel %vm2956_vm5, %v2012_v41, %v2016_v8  ;;  %v1087_v35 = vrot.slane %v758_v37, 5  ;;  %v377_v8 = vld [vmem:[%s2890_s5 + $0xb0] sm:$0x1]  ;;  %v493_v41 = vld [vmem:[%s2906_s7 + $0xa0] sm:$0xf] }
 0x180   : > { %v1635_v16 = vmax.bf16 %v1505_v33, %v3808_v15  ;;  %v769_v60 = vsel %vm2936_vm4, %v761_v1, %v768_v11  ;;  %v777_v42 = vor.u32 %v775_v44, %v3901_v17  ;;  %v1507_v62 = vshrl.u32 %v3858_v3, 16 }
 0x181   : > { %v893_v6 = vmax.bf16 %v769_v60, %v3851_v10  ;;  %v1088_v2 = vor.u32 %v1087_v35, %v1086_v21  ;;  %v1510_v12 = vshll.u32 %v3858_v3, 16  ;;  %v2019_v37 = vshrl.u32 %v375_v19, 16  ;;  %v3957_v60 = vld [vmem:[%s2903_s23 + $0xb4] sm:$0xf] }
 0x182   : > { %v1699_v20 = vmax.bf16 %v1667_v26, %v1635_v16  ;;  %v1090_v15 = vrot.slane %v766_v29, 5  ;;  %v1509_v47 = vrot.slane %v1507_v62, 4  ;;  %v2022_v50 = vshll.u32 %v375_v19, 16 }
 0x183   : > { %v1089_v48 = vrot.slane %v1088_v2, 4  ;;  %v1512_v54 = vrot.slane %v1510_v12, 5  ;;  %v1516_v36 = vshll.u32 %v893_v6, 16  ;;  %v2021_v32 = vrot.slane %v2019_v37, 4 }
 0x184   : > { %v2147_v43 = vmax.bf16 %v2017_v39, %v1699_v20  ;;  %v3930_v10 = vmax.bf16 %v777_v42, %v375_v19  ;;  %v2024_v52 = vrot.slane %v2022_v50, 5  ;;  %v2028_v3 = vshll.u32 %v3922_v4, 16 }
 0x185   : > { %v1091_v55 = vsel %vm2956_vm5, %v1089_v48, %v1090_v15  ;;  %v1513_v18 = vor.u32 %v1512_v54, %v1509_v47  ;;  %v1518_v31 = vrot.slane %v1516_v36, 5  ;;  %v780_v9 = vshrl.u32 %v3927_v0, 16 }
 0x186   : > { %2180 = vst.msk [vmem:[%s3035_s24 + $0x64] sm:$0xf] %vm2154_vm6, %v2147_v43  ;;  %v1186_v59 = vmax.bf16 %v1091_v55, %v492_v24  ;;  %v2025_v51 = vor.u32 %v2024_v52, %v2021_v32  ;;  %v2030_v23 = vrot.slane %v2028_v3, 5  ;;  %v1092_v28 = vrot.slane %v763_v7, 4  ;;  %v3964_v24 = vld [vmem:[%s2890_s5 + $0xb4] sm:$0xf] }
 0x187   : > { %v1514_v30 = vrot.slane %v1513_v18, 4  ;;  %v782_v25 = vrot.slane %v780_v9, 7  ;;  %v1096_v1 = vshll.u32 %v459_v14, 16  ;;  %v1520_v27 = vshrl.u32 %v893_v6, 16  ;;  %v414_v6 = vld [vmem:[%s2897_s13 + $0xb4] sm:$0xf] }
 0x188   : > { %v1668_v49 = vmax.bf16 %v1186_v59, %v3893_v53  ;;  %v2026_v57 = vrot.slane %v2025_v51, 4  ;;  %v1093_v56 = vor.u32 %v1092_v28, %v1090_v15  ;;  %v2032_v40 = vshrl.u32 %v3922_v4, 16  ;;  %v3996_v28 = vld [vmem:[%s2890_s5 + $0xb8] sm:$0xf] }
 0x189   : > { %v1519_v58 = vsel %vm2956_vm5, %v1514_v30, %v1518_v31  ;;  %v787_v7 = vrot.slane %v782_v25, 4  ;;  %v1098_v19 = vrot.slane %v1096_v1, 5  ;;  %v1522_v29 = vrot.slane %v1520_v27, 4 }
 0x18a   : > { %v1636_v45 = vmax.bf16 %v1519_v58, %v3822_v38  ;;  %v3952_v26 = vmax.bf16 %v413_v63, %v3922_v4  ;;  %v1094_v11 = vrot.slane %v1093_v56, 4  ;;  %v2034_v21 = vrot.slane %v2032_v40, 4  ;;  %v4001_v63 = vld [vmem:[%s2903_s23 + $0xb8] sm:$0xf] }
 0x18b   : > { %v2031_v33 = vsel %vm2956_vm5, %v2026_v57, %v2030_v23  ;;  %v897_v39 = vmax.bf16 %v787_v7, %v377_v8  ;;  %v1523_v35 = vor.u32 %v1522_v29, %v1518_v31  ;;  %v2038_v16 = vshll.u32 %v377_v8, 16  ;;  %v415_v57 = vld [vmem:[%s2897_s13 + $0xb8] sm:$0xf]  ;;  %v462_v29 = vld [vmem:[%s2903_s23 + $0xb0] sm:$0x1] }
 0x18c   : > { %v1700_v42 = vmax.bf16 %v1668_v49, %v1636_v45  ;;  %v1099_v62 = vsel %vm2956_vm5, %v1094_v11, %v1098_v19  ;;  %v2035_v38 = vor.u32 %v2034_v21, %v2030_v23  ;;  %v778_v2 = vrot.slane %v3901_v17, 4  ;;  %v494_v8 = vld [vmem:[%s2906_s7 + $0xa8] sm:$0xf] }
 0x18d   : > { %v1187_v12 = vmax.bf16 %v1099_v62, %v493_v41  ;;  %v1524_v37 = vrot.slane %v1523_v35, 4  ;;  %v1550_v20 = vshll.u32 %v897_v39, 16  ;;  %v2040_v15 = vrot.slane %v2038_v16, 5 }
 0x18e   : > { %v2148_v47 = vmax.bf16 %v2031_v33, %v1700_v42  ;;  %v2036_v50 = vrot.slane %v2035_v38, 4  ;;  %v783_v48 = vshll.u32 %v3927_v0, 16  ;;  %v789_v54 = vshrl.u32 %v3957_v60, 16 }
 0x18f   : > { %v1529_v36 = vsel %vm2956_vm5, %v1524_v37, %v3908_v13  ;;  %v1669_v32 = vmax.bf16 %v1187_v12, %v3952_v26  ;;  %v3973_v17 = vmax.bf16 %v414_v6, %v3964_v24  ;;  %v3977_v43 = vrot.slane %v1550_v20, 5 }
 0x190   : > { %2181 = vst.msk [vmem:[%s3035_s24 + $0x68] sm:$0xf] %vm2154_vm6, %v2148_v47  ;;  %v1637_v52 = vmax.bf16 %v1529_v36, %v3879_v5  ;;  %v785_v3 = vor.u32 %v783_v48, %v782_v25  ;;  %v792_v14 = vshll.u32 %v3957_v60, 16  ;;  %v2041_v55 = vsel %vm2956_vm5, %v2036_v50, %v2040_v15  ;;  %v380_v15 = vld [vmem:[%s2890_s5 + $0xbc] sm:$0x1] }
 0x191   : > { %v1100_v13 = vrot.slane %v772_v46, 4  ;;  %v1101_v18 = vrot.slane %v775_v44, 5  ;;  %v1531_v31 = vshrl.u32 %v3930_v10, 16  ;;  %v3992_v51 = vrot.slane %v789_v54, 7  ;;  %v495_v47 = vld [vmem:[%s2906_s7 + $0xac] sm:$0xf] }
 0x192   : > { %v1701_v59 = vmax.bf16 %v1669_v32, %v1637_v52  ;;  %v786_v5 = vsel %vm2936_vm4, %v778_v2, %v785_v3  ;;  %v1534_v23 = vshll.u32 %v3930_v10, 16  ;;  %v2043_v30 = vshrl.u32 %v3964_v24, 16 }
 0x193   : > { %v896_v61 = vmax.bf16 %v786_v5, %v3922_v4  ;;  %v1102_v46 = vor.u32 %v1101_v18, %v1100_v13  ;;  %v1533_v44 = vrot.slane %v1531_v31, 4  ;;  %v1104_v1 = vrot.slane %v783_v48, 5 }
 0x194   : > { %v2149_v25 = vmax.bf16 %v2041_v55, %v1701_v59  ;;  %v1536_v27 = vrot.slane %v1534_v23, 5  ;;  %v2046_v49 = vshll.u32 %v3964_v24, 16  ;;  %v2045_v40 = vrot.slane %v2043_v30, 4 }
 0x195   : > { %v1103_v10 = vrot.slane %v1102_v46, 4  ;;  %v1540_v56 = vshll.u32 %v896_v61, 16  ;;  %v2052_v58 = vshll.u32 %v3996_v28, 16  ;;  %v794_v4 = vor.u32 %v792_v14, %v3992_v51 }
 0x196   : > { %2182 = vst.msk [vmem:[%s3035_s24 + $0x6c] sm:$0xf] %vm2154_vm6, %v2149_v25  ;;  %v1537_v7 = vor.u32 %v1536_v27, %v1533_v44  ;;  %v2048_v19 = vrot.slane %v2046_v49, 5  ;;  %v797_v45 = vshrl.u32 %v4001_v63, 16  ;;  %v4017_v21 = vmax.bf16 %v415_v57, %v3996_v28  ;;  %v381_v57 = vld [vmem:[%s2890_s5 + $0xc0] sm:$0xf] }
 0x197   : > { %v1105_v41 = vsel %vm2956_vm5, %v1103_v10, %v1104_v1  ;;  %v1542_v11 = vrot.slane %v1540_v56, 5  ;;  %v1106_v33 = vrot.slane %v780_v9, 4  ;;  %v2054_v42 = vrot.slane %v2052_v58, 5 }
 0x198   : > { %v1188_v39 = vmax.bf16 %v1105_v41, %v494_v8  ;;  %v1538_v35 = vrot.slane %v1537_v7, 4  ;;  %v2049_v16 = vor.u32 %v2048_v19, %v2045_v40  ;;  %v1110_v38 = vshll.u32 %v462_v29, 16 }
 0x199   : > { %v1107_v62 = vor.u32 %v1106_v33, %v1104_v1  ;;  %v1544_v6 = vshrl.u32 %v896_v61, 16  ;;  %v2056_v2 = vshrl.u32 %v3996_v28, 16  ;;  %v799_v0 = vrot.slane %v797_v45, 7  ;;  %v416_v61 = vld [vmem:[%s2897_s13 + $0xc0] sm:$0xf] }
 0x19a   : > { %v1543_v12 = vsel %vm2956_vm5, %v1538_v35, %v1542_v11  ;;  %v1670_v37 = vmax.bf16 %v1188_v39, %v3973_v17  ;;  %v2050_v20 = vrot.slane %v2049_v16, 4  ;;  %v1112_v48 = vrot.slane %v1110_v38, 5  ;;  %v465_v38 = vld [vmem:[%s2903_s23 + $0xbc] sm:$0x1] }
 0x19b   : > { %v1638_v9 = vmax.bf16 %v1543_v12, %v3893_v53  ;;  %v1108_v50 = vrot.slane %v1107_v62, 4  ;;  %v1546_v36 = vrot.slane %v1544_v6, 4  ;;  %v804_v52 = vrot.slane %v799_v0, 4 }
 0x19c   : > { %v2055_v32 = vsel %vm2956_vm5, %v2050_v20, %v2054_v42  ;;  %v2058_v3 = vrot.slane %v2056_v2, 4  ;;  %v2062_v55 = vshll.u32 %v380_v15, 16  ;;  %v898_v13 = vmax.bf16 %v794_v4, %v3964_v24  ;;  %v382_v4 = vld [vmem:[%s2890_s5 + $0xc4] sm:$0xf] }
 0x19d   : > { %v1702_v18 = vmax.bf16 %v1670_v37, %v1638_v9  ;;  %v1113_v31 = vsel %vm2956_vm5, %v1108_v50, %v1112_v48  ;;  %v1547_v53 = vor.u32 %v1546_v36, %v1542_v11  ;;  %v795_v46 = vrot.slane %v3992_v51, 4  ;;  %v383_v9 = vld [vmem:[%s2890_s5 + $0xc8] sm:$0x1] }
 0x19e   : > { %v1189_v59 = vmax.bf16 %v1113_v31, %v495_v47  ;;  %v2059_v5 = vor.u32 %v2058_v3, %v2054_v42  ;;  %v2064_v23 = vrot.slane %v2062_v55, 5  ;;  %v800_v25 = vshll.u32 %v4001_v63, 16 }
 0x19f   : > { %v2150_v44 = vmax.bf16 %v2055_v32, %v1702_v18  ;;  %v1548_v30 = vrot.slane %v1547_v53, 4  ;;  %v1114_v24 = vrot.slane %v789_v54, 4  ;;  %v900_v1 = vmax.bf16 %v804_v52, %v380_v15  ;;  %v417_v52 = vld [vmem:[%s2897_s13 + $0xc4] sm:$0xf] }
 0x1a0   : > { %v1671_v27 = vmax.bf16 %v1189_v59, %v4017_v21  ;;  %v2060_v49 = vrot.slane %v2059_v5, 4  ;;  %v1115_v8 = vrot.slane %v792_v14, 5  ;;  %v802_v10 = vor.u32 %v800_v25, %v799_v0 }
 0x1a1   : > { %2183 = vst.msk [vmem:[%s3035_s24 + $0x70] sm:$0xf] %vm2154_vm6, %v2150_v44  ;;  %v1553_v51 = vsel %vm2956_vm5, %v1548_v30, %v3977_v43  ;;  %v1118_v56 = vrot.slane %v800_v25, 5  ;;  %v1192_v40 = vmax.bf16 %v416_v61, %v381_v57  ;;  %v1555_v60 = vshrl.u32 %v898_v13, 16  ;;  %v496_v43 = vld [vmem:[%s2906_s7 + $0xb4] sm:$0xf] }
 0x1a2   : > { %v1639_v54 = vmax.bf16 %v1553_v51, %v3952_v26  ;;  %v2065_v58 = vsel %vm2956_vm5, %v2060_v49, %v2064_v23  ;;  %v1116_v7 = vor.u32 %v1115_v8, %v1114_v24  ;;  %v803_v14 = vsel %vm2936_vm4, %v795_v46, %v802_v10 }
 0x1a3   : > { %v1558_v19 = vshll.u32 %v898_v13, 16  ;;  %v2067_v29 = vshrl.u32 %v381_v57, 16  ;;  %v2070_v41 = vshll.u32 %v381_v57, 16  ;;  %v899_v33 = vmax.bf16 %v803_v14, %v3996_v28  ;;  %v497_v13 = vld [vmem:[%s2906_s7 + $0xb8] sm:$0xf] }
 0x1a4   : > { %v1703_v11 = vmax.bf16 %v1671_v27, %v1639_v54  ;;  %v1117_v39 = vrot.slane %v1116_v7, 4  ;;  %v1557_v26 = vrot.slane %v1555_v60, 4  ;;  %v2076_v62 = vshll.u32 %v382_v4, 16 }
 0x1a5   : > { %v1560_v35 = vrot.slane %v1558_v19, 5  ;;  %v2069_v16 = vrot.slane %v2067_v29, 4  ;;  %v2072_v42 = vrot.slane %v2070_v41, 5  ;;  %v1564_v2 = vshll.u32 %v899_v33, 16 }
 0x1a6   : > { %v2151_v6 = vmax.bf16 %v2065_v58, %v1703_v11  ;;  %v1119_v22 = vsel %vm2956_vm5, %v1117_v39, %v1118_v56  ;;  %v1120_v12 = vrot.slane %v797_v45, 4  ;;  %v1574_v15 = vshll.u32 %v900_v1, 16 }
 0x1a7   : > { %v1190_v28 = vmax.bf16 %v1119_v22, %v496_v43  ;;  %v1561_v37 = vor.u32 %v1560_v35, %v1557_v26  ;;  %v2073_v20 = vor.u32 %v2072_v42, %v2069_v16  ;;  %v2078_v0 = vrot.slane %v2076_v62, 5 }
 0x1a8   : > { %2184 = vst.msk [vmem:[%s3035_s24 + $0x74] sm:$0xf] %vm2154_vm6, %v2151_v6  ;;  %v1121_v47 = vor.u32 %v1120_v12, %v1118_v56  ;;  %v1124_v50 = vshll.u32 %v465_v38, 16  ;;  %v1566_v36 = vrot.slane %v1564_v2, 5  ;;  %v1568_v3 = vshrl.u32 %v899_v33, 16 }
 0x1a9   : > { %v1562_v48 = vrot.slane %v1561_v37, 4  ;;  %v2074_v32 = vrot.slane %v2073_v20, 4  ;;  %v1672_v55 = vmax.bf16 %v1192_v40, %v1190_v28  ;;  %v2080_v18 = vshrl.u32 %v382_v4, 16 }
 0x1aa   : > { %v1122_v63 = vrot.slane %v1121_v47, 4  ;;  %v1126_v45 = vrot.slane %v1124_v50, 5  ;;  %v1570_v53 = vrot.slane %v1568_v3, 4  ;;  %v2086_v59 = vshll.u32 %v383_v9, 16 }
 0x1ab   : > { %v1567_v31 = vsel %vm2956_vm5, %v1562_v48, %v1566_v36  ;;  %v1193_v61 = vmax.bf16 %v417_v52, %v382_v4  ;;  %v2082_v46 = vrot.slane %v2080_v18, 4  ;;  %v1576_v44 = vrot.slane %v1574_v15, 5 }
 0x1ac   : > { %v1640_v5 = vmax.bf16 %v1567_v31, %v3973_v17  ;;  %v1127_v23 = vsel %vm2956_vm5, %v1122_v63, %v1126_v45  ;;  %v2079_v30 = vsel %vm2956_vm5, %v2074_v32, %v2078_v0  ;;  %v1571_v24 = vor.u32 %v1570_v53, %v1566_v36 }
 0x1ad   : > { %v1191_v25 = vmax.bf16 %v1127_v23, %v497_v13  ;;  %v2083_v27 = vor.u32 %v2082_v46, %v2078_v0  ;;  %v2088_v17 = vrot.slane %v2086_v59, 5 }
 0x1ae   : > { %v1704_v1 = vmax.bf16 %v1672_v55, %v1640_v5  ;;  %v1572_v49 = vrot.slane %v1571_v24, 4 }
 0x1af   : > { %v1673_v8 = vmax.bf16 %v1193_v61, %v1191_v25  ;;  %v2084_v51 = vrot.slane %v2083_v27, 4 }
 0x1b0   : > { %v2152_v57 = vmax.bf16 %v2079_v30, %v1704_v1  ;;  %v1577_v10 = vsel %vm2956_vm5, %v1572_v49, %v1576_v44 }
 0x1b1   : > { %v1641_v56 = vmax.bf16 %v1577_v10, %v4017_v21  ;;  %v2089_v40 = vsel %vm2956_vm5, %v2084_v51, %v2088_v17 }
 0x1b2   : > { %2185 = vst.msk [vmem:[%s3035_s24 + $0x78] sm:$0xf] %vm2154_vm6, %v2152_v57 }
 0x1b3   : > { %v1705_v54 = vmax.bf16 %v1673_v8, %v1641_v56 }
 0x1b5   : > { %v2153_v58 = vmax.bf16 %v2089_v40, %v1705_v54 }
 0x1b7   : > { %2186 = vst.msk [vmem:[%s3035_s24 + $0x7c] sm:$0xf] %vm2154_vm6, %v2153_v58 }
 0x1b8   : > { %2562 = shalt.err (!%p2559_p5)
}
 0x1b9   : > { %s2563_s12 = scalar_lea.hbm %s4086_s30, 2048  ;;  %s2567_s10 = scalar_lea.hbm %s4138_s4, 4096 }
 0x1ba   : > { %p2564_p1 = scmp.ne.s32.totalorder %s4086_s30, %s2563_s12  ;;  %p2568_p12 = scmp.lt.u32.totalorder %s4086_s30, %s4138_s4 }
 0x1bb   : > { %p2569_p2 = scmp.lt.u32.totalorder %s2567_s10, %s2563_s12  ;;  %p2571_p13 = scmp.lt.u32.totalorder %s2563_s12, %s4086_s30 }
 0x1bc   : > { %p2565_p7 = pnand %p2564_p1, %p4165_p0 }
 0x1bd   : > { %p2570_p6 = por %p2569_p2, %p2568_p12 }
 0x1be   : > { %p2566_p9 = pneg %p2565_p7 }
 0x1bf   : > { %p2572_p8 = por %p2571_p13, %p2570_p6 }
 0x1c1   : > { %p2573_p10 = pnand %p2572_p8, %p2566_p9 }
 0x1c3   : > { %2576 = shalt.err (!%p2573_p10)
}
 0x1c4   : > { %s2632_s9 = smov 64   ;;  %s2633_s7 = smov 4  }
 0x1c5   : > { %2372 = dma.vmem_to_hbm [thread:$0]  (%p4165_p0), %s4088_s1, 2048, %s4086_s30, %s2188_s0, %s2632_s9, %s2632_s9, %s2633_s7  }
 0x1c6 PF: > { %s2216_s25 = sand.u32 1, %s2611_s15   ;;  %p4166_p11 = scmp.ne.s32.totalorder %s4150_s27, 0 }
 0x1c7   : > { %p4167_p4 = scmp.ge.s32.totalorder %s2623_s18, 2  ;;  %s2217_s24 = scalar_lea.sflag [#allocation4], %s2216_s25 }
 0x1c9   : > { %p2388_p3 = pnand %p4167_p4, %p4166_p11 }
 0x1cb   : > { %2606 = dma.done.wait (!%p2388_p3), %s2217_s24, 2048  }
 0x1cc   : > { %2608 = vsyncadd (!%p2388_p3), %s2217_s24, 4294965248  ;;  %s4168_s20 = sld [smem:[#allocation15_spill]]  ;;  %p23_p5 = scmp.ge.s32.totalorder %s2684_s21, 4  }
 0x1cd   : > { %s4169_s15 = smov %s2615_s16  ;;  %s4170_s16 = smov %s2619_s17 }
 0x1ce   : > { %s4172_s18 = smov %s2684_s21  ;;  %25 = sbr.rel (!%p23_p5) target bundleno = 12 (0xc), region = 118 }
 0x1d2   : > { %s4171_s17 = smov %s4168_s20 }
 0x1d5   :  { %2222 = vsyncpa [#allocation3], 1 }
 0x1d6   :  { %2224 = vsyncpa [#allocation3 + $0x1], 1 }
 0x1d7   :  { %2225 = vsyncpa [#allocation6], 1 }
 0x1d8   :  { %2227 = vsyncpa [#allocation6 + $0x1], 1 }
 0x1d9   :  { %2228 = vsyncpa [#allocation9], 1 }
 0x1da   :  { %2230 = vsyncpa [#allocation9 + $0x1], 1 }
 0x1db   :  { %2231 = vsyncpa [#allocation4], 1 }
 0x1dc   :  { %2233 = vsyncpa [#allocation4 + $0x1], 1 }

// kernel: _lambda_.15
= control target key start
LH: loop header
LB: loop body
LE: loop exit
PB: predicated region body
PF: predicated region fallthrough
CT: control target
= control target key end

     0   :  { %8 = vsyncpa [#allocation3], 0  ;;  %s1742_s0 = inlined_call_operand.hbm [shape: bf16[512,72], index: 0, kind: input, shape index: {}]   ;;  %s1743_s1 = inlined_call_operand.hbm [shape: bf16[72,8], index: 1, kind: input, shape index: {}]   ;;  %s1744_s2 = inlined_call_operand.hbm [shape: f32[1,8], index: 2, kind: input, shape index: {}]   ;;  %s1745_s3 = inlined_call_operand.hbm [shape: bf16[512,8], index: 3, kind: output, shape index: {}]  }
   0x1   :  { %10 = vsyncpa [#allocation3 + $0x1], 0 }
   0x2   :  { %11 = vsyncpa [#allocation6], 0 }
   0x3   :  { %12 = vsyncpa [#allocation4], 0 }
   0x4   :  { %14 = vsyncpa [#allocation4 + $0x1], 0  ;;  %s1362_s12 = smov 0   ;;  %s1364_s13 = smov 0  }
   0x5   :  { %s1366_s14 = smov 0   ;;  %s1368_s15 = smov 0  }
   0x6 LB: > { %s1383_s16 = sadd.s32 4294967295, %s1332_s15   ;;  %s887_s17 = sadd.s32 4294967294, %s1332_s15   ;;  %s1332_s15 = sphi %s1368_s15, %s1765_s15   ;;  %s1328_s14 = sphi %s1366_s14, %s1764_s14   ;;  %s1324_s13 = sphi %s1364_s13, %s1763_s13   ;;  %s1320_s12 = sphi %s1362_s12, %s1762_s12  }
   0x7   : > { %p40_p0 = scmp.ne.s32.totalorder %s1324_s13, %s1320_s12  ;;  %p1746_p1 = scmp.eq.s32.totalorder %s1383_s16, 0 }
   0x8   : > { %p112_p3 = scmp.eq.s32.totalorder %s887_s17, 1  ;;  %p888_p5 = scmp.ge.s32.totalorder %s1332_s15, 1 }
   0x9   : > { %p1392_p4 = por %p1746_p1, %p40_p0  ;;  %p119_p7 = scmp.lt.s32.totalorder %s1332_s15, 3 }
   0xa   : > { %p1397_p6 = por %p112_p3, %p40_p0  ;;  %s1334_s21 = smov [#allocation5]  }
   0xb   : > { %s1749_s18 = scalar_select %p1392_p4, 1, 0 }
   0xc   : > { %s1750_s19 = scalar_select %p1397_p6, 1, 0 }
   0xd   : > { %p1402_p8 = pnand %p888_p5, %p119_p7  ;;  %s131_s22 = sshll.u32 %s1334_s21, 4  ;;  %s1406_s22 = int_to_ptr.vmem [resolvable:$true] %s131_s22 }
   0xe   : > { %s1335_s24 = smov [#allocation7]   ;;  %s1176_s28 = scalar_lea.hbm %s1743_s1, 576 }
   0xf   : > { %p1096_p9 = pneg %p1402_p8  ;;  %s145_s25 = sshll.u32 %s1335_s24, 4  ;;  %s1417_s25 = int_to_ptr.vmem [resolvable:$true] %s145_s25 }
  0x10   : > { %p1177_p12 = scmp.ne.s32.totalorder %s1743_s1, %s1176_s28  ;;  %p1183_p5 = scmp.lt.u32.totalorder %s1176_s28, %s1743_s1 }
  0x11   : > { %p1413_p11 = pnand %p1096_p9, %p1746_p1 }
  0x13   : > { %p1178_p13 = pneg %p1413_p11 }
  0x15   : > { %p1179_p0 = pnand %p1178_p13, %p1177_p12 }
  0x17   : > { %p1180_p3 = pneg %p1179_p0 }
  0x19   : > { %p1185_p7 = pnand %p1183_p5, %p1180_p3 }
  0x1b   : > { %1188 = shalt.err (!%p1185_p7)
}
  0x1c   : > { %s1189_s6 = scalar_lea.vmem %s1406_s22, 576  ;;  %p1197_p2 = scmp.lt.s32.totalorder %s1406_s22, %s1406_s22 }
  0x1d   : > { %p1190_p9 = scmp.ne.s32.totalorder %s1406_s22, %s1189_s6  ;;  %p1198_p12 = scmp.lt.s32.totalorder %s1189_s6, %s1189_s6 }
  0x1f   : > { %p1192_p10 = pnand %p1190_p9, %p1178_p13  ;;  %p1199_p0 = por %p1198_p12, %p1197_p2 }
  0x21   : > { %p1193_p1 = pneg %p1192_p10 }
  0x23   : > { %p1200_p6 = pnand %p1199_p0, %p1193_p1 }
  0x25   : > { %1203 = shalt.err (!%p1200_p6)
}
  0x26   : > { %s1336_s7 = smov 64   ;;  %s1337_s8 = smov 4  }
  0x27   : > { %1099 = dma.hbm_to_vmem [thread:$0]  (!%p1413_p11), %s1743_s1, 576, %s1406_s22, [#allocation6], %s1336_s7, %s1336_s7, %s1337_s8  }
  0x28   : > { %s1204_s21 = scalar_lea.hbm %s1744_s2, 16 }
  0x29   : > { %p1205_p1 = scmp.ne.s32.totalorder %s1744_s2, %s1204_s21  ;;  %p1211_p10 = scmp.lt.u32.totalorder %s1204_s21, %s1744_s2 }
  0x2b   : > { %p1207_p2 = pnand %p1205_p1, %p1178_p13 }
  0x2d   : > { %p1208_p6 = pneg %p1207_p2 }
  0x2f   : > { %p1213_p3 = pnand %p1211_p10, %p1208_p6 }
  0x31   : > { %1216 = shalt.err (!%p1213_p3)
}
  0x32   : > { %s1217_s22 = scalar_lea.vmem %s1417_s25, 16  ;;  %s1224_s29 = scalar_lea.vmem %s1417_s25, 32 }
  0x33   : > { %p1218_p5 = scmp.ne.s32.totalorder %s1417_s25, %s1217_s22  ;;  %p1225_p12 = scmp.lt.s32.totalorder %s1417_s25, %s1417_s25 }
  0x34   : > { %p1226_p0 = scmp.lt.s32.totalorder %s1224_s29, %s1217_s22 }
  0x35   : > { %p1220_p7 = pnand %p1218_p5, %p1178_p13 }
  0x36   : > { %p1227_p1 = por %p1226_p0, %p1225_p12 }
  0x37   : > { %p1221_p9 = pneg %p1220_p7 }
  0x39   : > { %p1228_p2 = pnand %p1227_p1, %p1221_p9 }
  0x3b   : > { %1231 = shalt.err (!%p1228_p2)
}
  0x3c   : > { %1102 = dma.hbm_to_vmem [thread:$0]  (!%p1413_p11), %s1744_s2, 16, %s1417_s25, [#allocation6]  }
  0x3d   : > { %s1476_s5 = sadd.s32 1, %s1332_s15   ;;  %s27_s23 = sadd.s32 1, %s1328_s14 }
  0x3e   : > { %s24_s6 = ssub.s32 %s1332_s15, %s1476_s5  ;;  %p34_p13 = scmp.ne.s32.totalorder %s1328_s14, %s1324_s13 }
  0x3f   : > { %p25_p6 = scmp.eq.s32.totalorder %s24_s6, 0  ;;  %p35_p10 = scmp.eq.s32.totalorder %s1332_s15, 0 }
  0x40   : > { %p1753_p3 = scmp.eq.s32.totalorder %s1383_s16, 1  ;;  %p1113_p7 = scmp.lt.s32.totalorder %s1332_s15, 2 }
  0x41   : > { %s1492_s10 = scalar_select %p25_p6, %s1328_s14, %s27_s23  }
  0x42   : > { %p1486_p5 = por %p1753_p3, %p34_p13  ;;  %p36_p9 = por %p35_p10, %p34_p13 }
  0x43   : > { %s156_s11 = sand.u32 1, %s1328_s14   ;;  %s975_s25 = sshll.u32 %s1332_s15, 11 }
  0x44   : > { %s1754_s9 = scalar_select %p1486_p5, 1, 0 }
  0x45   : > { %s892_s17 = sshll.u32 %s156_s11, 7  ;;  %s1499_s26 = scalar_lea.hbm %s1742_s0, %s975_s25 }
  0x46   : > { %s160_s27 = scalar_lea.vmem [#allocation2], %s892_s17  ;;  %p1503_p11 = pnand %p1113_p7, %p36_p9 }
  0x47   : > { %s167_s28 = sshll.u32 %s160_s27, 4  ;;  %s1507_s29 = scalar_lea.sflag [#allocation3], %s156_s11  ;;  %s1501_s28 = int_to_ptr.vmem [resolvable:$true] %s167_s28 }
  0x48   : > { %s1232_s30 = scalar_lea.hbm %s1499_s26, 2048  ;;  %p1234_p0 = pneg %p1503_p11 }
  0x49   : > { %p1233_p12 = scmp.ne.s32.totalorder %s1499_s26, %s1232_s30  ;;  %s1237_s6 = scalar_lea.hbm %s1742_s0, 4096 }
  0x4a   : > { %p1238_p13 = scmp.lt.u32.totalorder %s1499_s26, %s1742_s0  ;;  %p1239_p6 = scmp.lt.u32.totalorder %s1237_s6, %s1232_s30 }
  0x4b   : > { %p1235_p1 = pnand %p1234_p0, %p1233_p12  ;;  %p1241_p3 = scmp.lt.u32.totalorder %s1232_s30, %s1499_s26 }
  0x4c   : > { %p1240_p10 = por %p1239_p6, %p1238_p13 }
  0x4d   : > { %p1236_p2 = pneg %p1235_p1 }
  0x4e   : > { %p1242_p7 = por %p1241_p3, %p1240_p10 }
  0x50   : > { %p1243_p9 = pnand %p1242_p7, %p1236_p2 }
  0x52   : > { %1246 = shalt.err (!%p1243_p9)
}
  0x53   : > { %s1247_s11 = scalar_lea.vmem %s1501_s28, 2048  ;;  %s1338_s21 = smov [#allocation2]  }
  0x54   : > { %p1248_p12 = scmp.ne.s32.totalorder %s1501_s28, %s1247_s11  ;;  %s1252_s24 = sshll.u32 %s1338_s21, 4  ;;  %s1253_s24 = int_to_ptr.vmem [resolvable:$false] %s1252_s24 }
  0x55   : > { %s1254_s27 = scalar_lea.vmem %s1253_s24, 4096  ;;  %p1255_p4 = scmp.lt.s32.totalorder %s1501_s28, %s1253_s24 }
  0x56   : > { %p1250_p1 = pnand %p1248_p12, %p1234_p0  ;;  %p1256_p13 = scmp.lt.s32.totalorder %s1254_s27, %s1247_s11 }
  0x58   : > { %p1251_p5 = pneg %p1250_p1  ;;  %p1257_p6 = por %p1256_p13, %p1255_p4 }
  0x5a   : > { %p1258_p10 = pnand %p1257_p6, %p1251_p5 }
  0x5c   : > { %1261 = shalt.err (!%p1258_p10)
}
  0x5d   : > { %1106 = dma.hbm_to_vmem [thread:$0]  (!%p1503_p11), %s1499_s26, 2048, %s1501_s28, %s1507_s29, %s1336_s7, %s1336_s7, %s1337_s8  }
  0x5e   : > { %179 = sbr.rel (%p1402_p8) target bundleno = 386 (0x182), region = 32  ;;  %s1541_s30 = sand.u32 (!%p1402_p8), 1, %s1324_s13  }
  0x5f   : > { %s896_s4 = sshll.u32 (!%p1402_p8), %s1541_s30, 7  ;;  %s182_s23 = scalar_lea.sflag (!%p1402_p8), [#allocation3], %s1541_s30 }
  0x60   : > { %s1547_s22 = scalar_lea.vmem (!%p1402_p8), [#allocation2], %s896_s4  ;;  %p1756_p4 = scmp.ne.s32.totalorder (!%p1402_p8), %s1749_s18, 0 }
  0x65   : > { %1307 = dma.done.wait (%p1756_p4), %s182_s23, 2048  }
  0x66   : > { %1309 = vsyncadd (%p1756_p4), %s182_s23, 4294965248  ;;  %p1757_p5 = scmp.eq.s32.totalorder %s1383_s16, 0 }
  0x68   : > { %1311 = dma.done.wait (%p1757_p5), [#allocation6], 592   ;;  %p1758_p8 = pmov %p1757_p5 }
  0x69   : > { %v1155_v0 = vld [vmem:[#allocation5] sm:$0xff]   ;;  %v1156_v1 = vld [vmem:[#allocation5 + $0x8] sm:$0xff]   ;;  %v1157_v2 = vld [vmem:[#allocation5 + $0x10] sm:$0xff]   ;;  %vm374_vm0 = vcmask 588800   ;;  %vm423_vm1 = vcmask 1043456   ;;  %vm748_vm2 = vcmask 60416  }
  0x6a   : > { %1313 = vsyncadd (%p1758_p8), [#allocation6], 4294966704  ;;  %1030 = vmatprep.subr.bf16.mxu0 %v1155_v0  ;;  %1072 = vmatprep.subr.bf16.mxu1 %v1155_v0  ;;  %v1160_v3 = vld [vmem:[%s1547_s22] sm:$0xff]   ;;  %v1158_v5 = vld [vmem:[#allocation5 + $0x18] sm:$0xff]   ;;  %s1601_s18 = scalar_lea.vmem [#allocation8], %s896_s4  ;;  %s1008_s20 = sshll.u32 %s1383_s16, 11 }
  0x6b   : > { %1031 = vmatpush3.bf16.msra.mxu0 %v1155_v0  ;;  %1077 = vmatpush3.bf16.msra.mxu1 %v1155_v0  ;;  %v1161_v4 = vld [vmem:[%s1547_s22 + $0x40] sm:$0xff]   ;;  %v1162_v8 = vld [vmem:[%s1547_s22 + $0x8] sm:$0xff]   ;;  %v1164_v10 = vld [vmem:[%s1547_s22 + $0x10] sm:$0xff]   ;;  %s795_s7 = sshll.u32 %s1601_s18, 4  ;;  %s1684_s26 = scalar_lea.hbm %s1745_s3, %s1008_s20  ;;  %s1686_s7 = int_to_ptr.vmem [resolvable:$true] %s795_s7 }
  0x6c   : > { %1032 = vmatprep.subr.bf16.mxu0 %v1156_v1  ;;  %1073 = vmatprep.subr.bf16.mxu1 %v1156_v1  ;;  %v1159_v6 = vld [vmem:[#allocation5 + $0x20] ss:$0 sps:$4 sm:$0xff]   ;;  %v1163_v9 = vld [vmem:[%s1547_s22 + $0x48] sm:$0xff]   ;;  %v1165_v11 = vld [vmem:[%s1547_s22 + $0x50] sm:$0xff]   ;;  %s782_s28 = scalar_lea.sflag [#allocation4], %s1541_s30  ;;  %s1262_s29 = scalar_lea.vmem %s1686_s7, 2048 }
  0x6d   : > { %1040 = vmatprep.mubr.msk.bf16.mxu0 %vm374_vm0, %v1160_v3  ;;  %1056 = vmatprep.mubr.msk.bf16.mxu1 %vm374_vm0, %v1161_v4  ;;  %v425_v7 = vsel %vm423_vm1, %v1159_v6, 0  ;;  %v1166_v12 = vld [vmem:[%s1547_s22 + $0x18] sm:$0xff]   ;;  %v1168_v14 = vld [vmem:[%s1547_s22 + $0x20] sm:$0xff]   ;;  %v1170_v16 = vld [vmem:[%s1547_s22 + $0x28] sm:$0xff]   ;;  %p1263_p11 = scmp.ne.s32.totalorder %s1686_s7, %s1262_s29  ;;  %p1759_p0 = scmp.ne.s32.totalorder %s1754_s9, 0 }
  0x6e   : > { %v1167_v13 = vld [vmem:[%s1547_s22 + $0x58] sm:$0xff]   ;;  %v1169_v15 = vld [vmem:[%s1547_s22 + $0x60] sm:$0xff]   ;;  %v1171_v17 = vld [vmem:[%s1547_s22 + $0x68] sm:$0xff]   ;;  %s1339_s6 = smov [#allocation8]  }
  0x6f   : > { %1033 = vmatpush3.bf16.msra.mxu0 %v1156_v1  ;;  %1078 = vmatpush3.bf16.msra.mxu1 %v1156_v1  ;;  %v1172_v18 = vld [vmem:[%s1547_s22 + $0x30] sm:$0xff]   ;;  %v1174_v20 = vld [vmem:[%s1547_s22 + $0x38] sm:$0xff]   ;;  %v1589_v22 = vld [vmem:[#allocation7] ss:$0 sm:$0xff]  ;;  %p1264_p2 = pnand %p1263_p11, %p1759_p0  ;;  %s1266_s17 = sshll.u32 %s1339_s6, 4  ;;  %s1267_s17 = int_to_ptr.vmem [resolvable:$false] %s1266_s17 }
  0x70   : > { %1034 = vmatprep.subr.bf16.mxu0 %v1157_v2  ;;  %1074 = vmatprep.subr.bf16.mxu1 %v1157_v2  ;;  %v1173_v19 = vld [vmem:[%s1547_s22 + $0x70] sm:$0xff]   ;;  %v1175_v21 = vld [vmem:[%s1547_s22 + $0x78] sm:$0xff]   ;;  %s1268_s25 = scalar_lea.vmem %s1267_s17, 4096  ;;  %p1269_p7 = scmp.lt.s32.totalorder %s1686_s7, %s1267_s17 }
  0x71   : > { %p1265_p3 = pneg %p1264_p2  ;;  %p1270_p9 = scmp.lt.s32.totalorder %s1268_s25, %s1262_s29 }
  0x73   : > { %1035 = vmatpush3.bf16.msra.mxu0 %v1157_v2  ;;  %1079 = vmatpush3.bf16.msra.mxu1 %v1157_v2  ;;  %p1271_p12 = por %p1270_p9, %p1269_p7 }
  0x74   : > { %1036 = vmatprep.subr.bf16.mxu0 %v1158_v5  ;;  %1075 = vmatprep.subr.bf16.mxu1 %v1158_v5 }
  0x75   : > { %p1272_p1 = pnand %p1271_p12, %p1265_p3 }
  0x77   : > { %1037 = vmatpush3.bf16.msra.mxu0 %v1158_v5  ;;  %1080 = vmatpush3.bf16.msra.mxu1 %v1158_v5 }
  0x78   : > { %1082 = vmatprep.subr.msk.bf16.mxu0 %vm423_vm1, %v1159_v6  ;;  %1083 = vmatprep.subr.msk.bf16.mxu1 %vm423_vm1, %v1159_v6 }
  0x7b   : > { %1039 = vmatpush3.bf16.msra.mxu0 %v425_v7  ;;  %1081 = vmatpush3.bf16.msra.mxu1 %v425_v7 }
  0x7e   : > { %1041 = vmatmul.mubr.msk.bf16.vlgmr.msra.gmra.mrb[0].mxu0 %vm374_vm0, %v1162_v8  ;;  %1057 = vmatmul.mubr.msk.bf16.vlgmr.msra.gmra.mrb[0].mxu1 %vm374_vm0, %v1163_v9 }
  0x7f   : > { %1044 = vmatprep.mubr.msk.bf16.mxu0 %vm374_vm0, %v1164_v10  ;;  %1060 = vmatprep.mubr.msk.bf16.mxu1 %vm374_vm0, %v1165_v11 }
  0x86   : > { %1045 = vmatmul.mubr.msk.bf16.gmra.mrb[4].mxu0 %vm374_vm0, %v1166_v12  ;;  %1061 = vmatmul.mubr.msk.bf16.gmra.mrb[4].mxu1 %vm374_vm0, %v1167_v13 }
  0x87   : > { %1048 = vmatprep.mubr.msk.bf16.mxu0 %vm374_vm0, %v1168_v14  ;;  %1064 = vmatprep.mubr.msk.bf16.mxu1 %vm374_vm0, %v1169_v15 }
  0x8e   : > { %1049 = vmatmul.mubr.msk.bf16.gmra.mrb[8].mxu0 %vm374_vm0, %v1170_v16  ;;  %1065 = vmatmul.mubr.msk.bf16.gmra.mrb[8].mxu1 %vm374_vm0, %v1171_v17 }
  0x8f   : > { %1052 = vmatprep.mubr.msk.bf16.mxu0 %vm374_vm0, %v1172_v18  ;;  %1068 = vmatprep.mubr.msk.bf16.mxu1 %vm374_vm0, %v1173_v19 }
  0x96   : > { %1053 = vmatmul.mubr.msk.bf16.gmra.mrb[12].mxu0 %vm374_vm0, %v1174_v20  ;;  %1069 = vmatmul.mubr.msk.bf16.gmra.mrb[12].mxu1 %vm374_vm0, %v1175_v21 }
 0x151   : > { %v1042_v23 = vpop.f32.mrb[0].mxu0  ;;  %v1058_v24 = vpop.f32.mrb[0].mxu1 }
 0x152   : > { %v470_v25 = vadd.f32 %v1042_v23, %v1589_v22  ;;  %v534_v26 = vadd.f32 %v1058_v24, %v1589_v22  ;;  %v461_v27 = vpop.f32.mrb[1].mxu0  ;;  %v525_v28 = vpop.f32.mrb[1].mxu1 }
 0x153   : > { %v462_v29 = vadd.f32 %v1589_v22, %v461_v27  ;;  %v526_v30 = vadd.f32 %v1589_v22, %v525_v28  ;;  %v1043_v31 = vpop.f32.mrb[2].mxu0  ;;  %v1059_v32 = vpop.f32.mrb[2].mxu1 }
 0x154   : > { %v590_v33 = vmax.f32 %v470_v25, 0.0  ;;  %v606_v34 = vmax.f32 %v534_v26, 0.0  ;;  %v473_v35 = vadd.f32 %v1043_v31, %v1589_v22  ;;  %v537_v36 = vadd.f32 %v1059_v32, %v1589_v22  ;;  %v464_v37 = vpop.f32.mrb[3].mxu0  ;;  %v528_v38 = vpop.f32.mrb[3].mxu1 }
 0x155   : > { %v588_v39 = vmax.f32 %v462_v29, 0.0  ;;  %v604_v40 = vmax.f32 %v526_v30, 0.0  ;;  %v465_v41 = vadd.f32 %v1589_v22, %v464_v37  ;;  %v529_v42 = vadd.f32 %v1589_v22, %v528_v38 }
 0x156   : > { %v978_v43 = vpack.c.bf16 %v590_v33, %v590_v33  ;;  %v994_v44 = vpack.c.bf16 %v606_v34, %v606_v34  ;;  %v591_v45 = vmax.f32 %v473_v35, 0.0  ;;  %v607_v46 = vmax.f32 %v537_v36, 0.0 }
 0x157   : > { %v976_v47 = vpack.c.bf16 %v588_v39, %v588_v39  ;;  %v992_v48 = vpack.c.bf16 %v604_v40, %v604_v40  ;;  %v589_v49 = vmax.f32 %v465_v41, 0.0  ;;  %v605_v50 = vmax.f32 %v529_v42, 0.0 }
 0x158   : > { %751 = vst.msk [vmem:[%s1601_s18 + $0x8] sm:$0xf] %vm748_vm2, %v978_v43  ;;  %767 = vst.msk [vmem:[%s1601_s18 + $0x48] sm:$0xf] %vm748_vm2, %v994_v44  ;;  %v979_v51 = vpack.c.bf16 %v591_v45, %v591_v45  ;;  %v995_v52 = vpack.c.bf16 %v607_v46, %v607_v46 }
 0x159   : > { %749 = vst.msk [vmem:[%s1601_s18] sm:$0xf] %vm748_vm2, %v976_v47  ;;  %765 = vst.msk [vmem:[%s1601_s18 + $0x40] sm:$0xf] %vm748_vm2, %v992_v48  ;;  %v977_v53 = vpack.c.bf16 %v589_v49, %v589_v49  ;;  %v993_v54 = vpack.c.bf16 %v605_v50, %v605_v50  ;;  %v1046_v55 = vpop.f32.mrb[4].mxu0  ;;  %v1062_v56 = vpop.f32.mrb[4].mxu1 }
 0x15a   : > { %752 = vst.msk [vmem:[%s1601_s18 + $0xc] sm:$0xf] %vm748_vm2, %v979_v51  ;;  %768 = vst.msk [vmem:[%s1601_s18 + $0x4c] sm:$0xf] %vm748_vm2, %v995_v52  ;;  %v486_v57 = vadd.f32 %v1046_v55, %v1589_v22  ;;  %v550_v58 = vadd.f32 %v1062_v56, %v1589_v22  ;;  %v477_v59 = vpop.f32.mrb[5].mxu0  ;;  %v541_v60 = vpop.f32.mrb[5].mxu1 }
 0x15b   : > { %750 = vst.msk [vmem:[%s1601_s18 + $0x4] sm:$0xf] %vm748_vm2, %v977_v53  ;;  %766 = vst.msk [vmem:[%s1601_s18 + $0x44] sm:$0xf] %vm748_vm2, %v993_v54  ;;  %v478_v61 = vadd.f32 %v1589_v22, %v477_v59  ;;  %v542_v62 = vadd.f32 %v1589_v22, %v541_v60  ;;  %v1047_v63 = vpop.f32.mrb[6].mxu0  ;;  %v1063_v0 = vpop.f32.mrb[6].mxu1 }
 0x15c   : > { %v594_v1 = vmax.f32 %v486_v57, 0.0  ;;  %v610_v2 = vmax.f32 %v550_v58, 0.0  ;;  %v489_v3 = vadd.f32 %v1047_v63, %v1589_v22  ;;  %v553_v4 = vadd.f32 %v1063_v0, %v1589_v22  ;;  %v480_v5 = vpop.f32.mrb[7].mxu0  ;;  %v544_v6 = vpop.f32.mrb[7].mxu1 }
 0x15d   : > { %v592_v7 = vmax.f32 %v478_v61, 0.0  ;;  %v608_v8 = vmax.f32 %v542_v62, 0.0  ;;  %v481_v9 = vadd.f32 %v1589_v22, %v480_v5  ;;  %v545_v10 = vadd.f32 %v1589_v22, %v544_v6 }
 0x15e   : > { %v982_v11 = vpack.c.bf16 %v594_v1, %v594_v1  ;;  %v998_v12 = vpack.c.bf16 %v610_v2, %v610_v2  ;;  %v595_v13 = vmax.f32 %v489_v3, 0.0  ;;  %v611_v14 = vmax.f32 %v553_v4, 0.0 }
 0x15f   : > { %v980_v15 = vpack.c.bf16 %v592_v7, %v592_v7  ;;  %v996_v16 = vpack.c.bf16 %v608_v8, %v608_v8  ;;  %v593_v17 = vmax.f32 %v481_v9, 0.0  ;;  %v609_v18 = vmax.f32 %v545_v10, 0.0 }
 0x160   : > { %755 = vst.msk [vmem:[%s1601_s18 + $0x18] sm:$0xf] %vm748_vm2, %v982_v11  ;;  %771 = vst.msk [vmem:[%s1601_s18 + $0x58] sm:$0xf] %vm748_vm2, %v998_v12  ;;  %v983_v19 = vpack.c.bf16 %v595_v13, %v595_v13  ;;  %v999_v20 = vpack.c.bf16 %v611_v14, %v611_v14 }
 0x161   : > { %753 = vst.msk [vmem:[%s1601_s18 + $0x10] sm:$0xf] %vm748_vm2, %v980_v15  ;;  %769 = vst.msk [vmem:[%s1601_s18 + $0x50] sm:$0xf] %vm748_vm2, %v996_v16  ;;  %v981_v21 = vpack.c.bf16 %v593_v17, %v593_v17  ;;  %v997_v23 = vpack.c.bf16 %v609_v18, %v609_v18  ;;  %v1050_v24 = vpop.f32.mrb[8].mxu0  ;;  %v1066_v25 = vpop.f32.mrb[8].mxu1 }
 0x162   : > { %756 = vst.msk [vmem:[%s1601_s18 + $0x1c] sm:$0xf] %vm748_vm2, %v983_v19  ;;  %772 = vst.msk [vmem:[%s1601_s18 + $0x5c] sm:$0xf] %vm748_vm2, %v999_v20  ;;  %v502_v26 = vadd.f32 %v1050_v24, %v1589_v22  ;;  %v566_v27 = vadd.f32 %v1066_v25, %v1589_v22  ;;  %v493_v28 = vpop.f32.mrb[9].mxu0  ;;  %v557_v29 = vpop.f32.mrb[9].mxu1 }
 0x163   : > { %754 = vst.msk [vmem:[%s1601_s18 + $0x14] sm:$0xf] %vm748_vm2, %v981_v21  ;;  %770 = vst.msk [vmem:[%s1601_s18 + $0x54] sm:$0xf] %vm748_vm2, %v997_v23  ;;  %v494_v30 = vadd.f32 %v1589_v22, %v493_v28  ;;  %v558_v31 = vadd.f32 %v1589_v22, %v557_v29  ;;  %v1051_v32 = vpop.f32.mrb[10].mxu0  ;;  %v1067_v33 = vpop.f32.mrb[10].mxu1 }
 0x164   : > { %v598_v34 = vmax.f32 %v502_v26, 0.0  ;;  %v614_v35 = vmax.f32 %v566_v27, 0.0  ;;  %v505_v36 = vadd.f32 %v1051_v32, %v1589_v22  ;;  %v569_v37 = vadd.f32 %v1067_v33, %v1589_v22  ;;  %v496_v38 = vpop.f32.mrb[11].mxu0  ;;  %v560_v39 = vpop.f32.mrb[11].mxu1 }
 0x165   : > { %v596_v40 = vmax.f32 %v494_v30, 0.0  ;;  %v612_v41 = vmax.f32 %v558_v31, 0.0  ;;  %v497_v42 = vadd.f32 %v1589_v22, %v496_v38  ;;  %v561_v43 = vadd.f32 %v1589_v22, %v560_v39 }
 0x166   : > { %v986_v44 = vpack.c.bf16 %v598_v34, %v598_v34  ;;  %v1002_v45 = vpack.c.bf16 %v614_v35, %v614_v35  ;;  %v599_v46 = vmax.f32 %v505_v36, 0.0  ;;  %v615_v47 = vmax.f32 %v569_v37, 0.0 }
 0x167   : > { %v984_v48 = vpack.c.bf16 %v596_v40, %v596_v40  ;;  %v1000_v49 = vpack.c.bf16 %v612_v41, %v612_v41  ;;  %v597_v50 = vmax.f32 %v497_v42, 0.0  ;;  %v613_v51 = vmax.f32 %v561_v43, 0.0 }
 0x168   : > { %759 = vst.msk [vmem:[%s1601_s18 + $0x28] sm:$0xf] %vm748_vm2, %v986_v44  ;;  %775 = vst.msk [vmem:[%s1601_s18 + $0x68] sm:$0xf] %vm748_vm2, %v1002_v45  ;;  %v987_v52 = vpack.c.bf16 %v599_v46, %v599_v46  ;;  %v1003_v53 = vpack.c.bf16 %v615_v47, %v615_v47 }
 0x169   : > { %757 = vst.msk [vmem:[%s1601_s18 + $0x20] sm:$0xf] %vm748_vm2, %v984_v48  ;;  %773 = vst.msk [vmem:[%s1601_s18 + $0x60] sm:$0xf] %vm748_vm2, %v1000_v49  ;;  %v985_v54 = vpack.c.bf16 %v597_v50, %v597_v50  ;;  %v1001_v55 = vpack.c.bf16 %v613_v51, %v613_v51  ;;  %v1054_v56 = vpop.f32.mrb[12].mxu0  ;;  %v1070_v57 = vpop.f32.mrb[12].mxu1 }
 0x16a   : > { %760 = vst.msk [vmem:[%s1601_s18 + $0x2c] sm:$0xf] %vm748_vm2, %v987_v52  ;;  %776 = vst.msk [vmem:[%s1601_s18 + $0x6c] sm:$0xf] %vm748_vm2, %v1003_v53  ;;  %v518_v58 = vadd.f32 %v1054_v56, %v1589_v22  ;;  %v582_v59 = vadd.f32 %v1070_v57, %v1589_v22  ;;  %v509_v60 = vpop.f32.mrb[13].mxu0  ;;  %v573_v61 = vpop.f32.mrb[13].mxu1 }
 0x16b   : > { %758 = vst.msk [vmem:[%s1601_s18 + $0x24] sm:$0xf] %vm748_vm2, %v985_v54  ;;  %774 = vst.msk [vmem:[%s1601_s18 + $0x64] sm:$0xf] %vm748_vm2, %v1001_v55  ;;  %v510_v62 = vadd.f32 %v1589_v22, %v509_v60  ;;  %v574_v63 = vadd.f32 %v1589_v22, %v573_v61  ;;  %v1055_v0 = vpop.f32.mrb[14].mxu0  ;;  %v1071_v1 = vpop.f32.mrb[14].mxu1 }
 0x16c   : > { %v602_v2 = vmax.f32 %v518_v58, 0.0  ;;  %v618_v3 = vmax.f32 %v582_v59, 0.0  ;;  %v521_v4 = vadd.f32 %v1055_v0, %v1589_v22  ;;  %v585_v5 = vadd.f32 %v1071_v1, %v1589_v22  ;;  %v512_v6 = vpop.f32.mrb[15].mxu0  ;;  %v576_v7 = vpop.f32.mrb[15].mxu1 }
 0x16d   : > { %v600_v8 = vmax.f32 %v510_v62, 0.0  ;;  %v616_v9 = vmax.f32 %v574_v63, 0.0  ;;  %v513_v10 = vadd.f32 %v1589_v22, %v512_v6  ;;  %v577_v11 = vadd.f32 %v1589_v22, %v576_v7 }
 0x16e   : > { %v990_v12 = vpack.c.bf16 %v602_v2, %v602_v2  ;;  %v1006_v13 = vpack.c.bf16 %v618_v3, %v618_v3  ;;  %v603_v14 = vmax.f32 %v521_v4, 0.0  ;;  %v619_v15 = vmax.f32 %v585_v5, 0.0 }
 0x16f   : > { %v988_v16 = vpack.c.bf16 %v600_v8, %v600_v8  ;;  %v1004_v17 = vpack.c.bf16 %v616_v9, %v616_v9  ;;  %v601_v18 = vmax.f32 %v513_v10, 0.0  ;;  %v617_v19 = vmax.f32 %v577_v11, 0.0 }
 0x170   : > { %763 = vst.msk [vmem:[%s1601_s18 + $0x38] sm:$0xf] %vm748_vm2, %v990_v12  ;;  %779 = vst.msk [vmem:[%s1601_s18 + $0x78] sm:$0xf] %vm748_vm2, %v1006_v13  ;;  %v991_v22 = vpack.c.bf16 %v603_v14, %v603_v14  ;;  %v1007_v20 = vpack.c.bf16 %v619_v15, %v619_v15 }
 0x171   : > { %761 = vst.msk [vmem:[%s1601_s18 + $0x30] sm:$0xf] %vm748_vm2, %v988_v16  ;;  %777 = vst.msk [vmem:[%s1601_s18 + $0x70] sm:$0xf] %vm748_vm2, %v1004_v17  ;;  %v989_v21 = vpack.c.bf16 %v601_v18, %v601_v18  ;;  %v1005_v23 = vpack.c.bf16 %v617_v19, %v617_v19 }
 0x172   : > { %764 = vst.msk [vmem:[%s1601_s18 + $0x3c] sm:$0xf] %vm748_vm2, %v991_v22  ;;  %780 = vst.msk [vmem:[%s1601_s18 + $0x7c] sm:$0xf] %vm748_vm2, %v1007_v20 }
 0x173   : > { %762 = vst.msk [vmem:[%s1601_s18 + $0x34] sm:$0xf] %vm748_vm2, %v989_v21  ;;  %778 = vst.msk [vmem:[%s1601_s18 + $0x74] sm:$0xf] %vm748_vm2, %v1005_v23 }
 0x174   : > { %1275 = shalt.err (!%p1272_p1)
}
 0x175   : > { %s1276_s11 = scalar_lea.hbm %s1684_s26, 2048  ;;  %s1280_s27 = scalar_lea.hbm %s1745_s3, 4096 }
 0x176   : > { %p1277_p13 = scmp.ne.s32.totalorder %s1684_s26, %s1276_s11  ;;  %p1281_p4 = scmp.lt.u32.totalorder %s1684_s26, %s1745_s3 }
 0x177   : > { %p1282_p5 = scmp.lt.u32.totalorder %s1280_s27, %s1276_s11  ;;  %p1284_p11 = scmp.lt.u32.totalorder %s1276_s11, %s1684_s26 }
 0x178   : > { %p1278_p6 = pnand %p1277_p13, %p1759_p0 }
 0x179   : > { %p1283_p8 = por %p1282_p5, %p1281_p4 }
 0x17a   : > { %p1279_p10 = pneg %p1278_p6 }
 0x17b   : > { %p1285_p2 = por %p1284_p11, %p1283_p8 }
 0x17d   : > { %p1286_p3 = pnand %p1285_p2, %p1279_p10 }
 0x17f   : > { %1289 = shalt.err (!%p1286_p3)
}
 0x180   : > { %s1340_s22 = smov 64   ;;  %s1341_s18 = smov 4  }
 0x181   : > { %1094 = dma.vmem_to_hbm [thread:$0]  (%p1759_p0), %s1686_s7, 2048, %s1684_s26, %s782_s28, %s1340_s22, %s1340_s22, %s1341_s18  }
 0x182 PF: > { %s810_s20 = sand.u32 1, %s1320_s12   ;;  %p1760_p7 = scmp.ne.s32.totalorder %s1750_s19, 0 }
 0x183   : > { %p1761_p9 = scmp.ge.s32.totalorder %s1332_s15, 2  ;;  %s811_s16 = scalar_lea.sflag [#allocation4], %s810_s20 }
 0x185   : > { %p1108_p12 = pnand %p1761_p9, %p1760_p7 }
 0x187   : > { %1315 = dma.done.wait (!%p1108_p12), %s811_s16, 2048  }
 0x188   : > { %1317 = vsyncadd (!%p1108_p12), %s811_s16, 4294965248  ;;  %p17_p1 = scmp.ge.s32.totalorder %s1476_s5, 4   ;;  %s1762_s12 = smov %s1324_s13 }
 0x189   : > { %s1763_s13 = smov %s1328_s14  ;;  %s1764_s14 = smov %s1492_s10 }
 0x18a   : > { %s1765_s15 = smov %s1476_s5  ;;  %19 = sbr.rel (!%p17_p1) target bundleno = 6 (0x6), region = 85 }
 0x191   :  { %816 = vsyncpa [#allocation3], 1 }
 0x192   :  { %818 = vsyncpa [#allocation3 + $0x1], 1 }
 0x193   :  { %819 = vsyncpa [#allocation6], 1 }
 0x194   :  { %820 = vsyncpa [#allocation4], 1 }
 0x195   :  { %822 = vsyncpa [#allocation4 + $0x1], 1 }

// kernel: _lambda_.16
= control target key start
LH: loop header
LB: loop body
LE: loop exit
PB: predicated region body
PF: predicated region fallthrough
CT: control target
= control target key end

     0   :  { %s2237_s0 = inlined_call_operand.hbm [shape: bf16[512,72], index: 0, kind: input, shape index: {}]   ;;  %s2238_s1 = inlined_call_operand.hbm [shape: bf16[72,8], index: 1, kind: input, shape index: {}]   ;;  %s2239_s2 = inlined_call_operand.hbm [shape: f32[1,8], index: 2, kind: input, shape index: {}]   ;;  %s2240_s3 = inlined_call_operand.hbm [shape: bf16[512,8], index: 3, kind: input, shape index: {}]   ;;  %s2241_s4 = inlined_call_operand.hbm [shape: bf16[512,8], index: 4, kind: output, shape index: {}]  }
   0x1   :  { %2250 = sst [smem:[#allocation15_spill]] %s2237_s0 }
   0x2   :  { %2251 = sst [smem:[#allocation16_spill]] %s2238_s1 }
   0x3   :  { %2252 = sst [smem:[#allocation17_spill]] %s2239_s2 }
   0x4   :  { %9 = vsyncpa [#allocation3], 0 }
   0x5   :  { %11 = vsyncpa [#allocation3 + $0x1], 0 }
   0x6   :  { %12 = vsyncpa [#allocation6], 0 }
   0x7   :  { %13 = vsyncpa [#allocation9], 0 }
   0x8   :  { %15 = vsyncpa [#allocation9 + $0x1], 0 }
   0x9   :  { %16 = vsyncpa [#allocation4], 0 }
   0xa   :  { %18 = vsyncpa [#allocation4 + $0x1], 0  ;;  %s1678_s15 = smov 0   ;;  %s1680_s16 = smov 0  }
   0xb   :  { %s1682_s17 = smov 0   ;;  %s1684_s18 = smov 0  }
   0xc LB: > { %s1699_s19 = sadd.s32 4294967295, %s1642_s18   ;;  %s1074_s20 = sadd.s32 4294967294, %s1642_s18   ;;  %s1642_s18 = sphi %s1684_s18, %s2279_s18   ;;  %s1638_s17 = sphi %s1682_s17, %s2278_s17   ;;  %s1634_s16 = sphi %s1680_s16, %s2277_s16   ;;  %s1630_s15 = sphi %s1678_s15, %s2276_s15  }
   0xd   : > { %p44_p0 = scmp.ne.s32.totalorder %s1634_s16, %s1630_s15  ;;  %p2242_p1 = scmp.eq.s32.totalorder %s1699_s19, 0 }
   0xe   : > { %p142_p3 = scmp.eq.s32.totalorder %s1074_s20, 1  ;;  %p1075_p5 = scmp.ge.s32.totalorder %s1642_s18, 1 }
   0xf   : > { %p1708_p4 = por %p2242_p1, %p44_p0  ;;  %p149_p7 = scmp.lt.s32.totalorder %s1642_s18, 3 }
  0x10   : > { %p1713_p6 = por %p142_p3, %p44_p0  ;;  %s1644_s24 = smov [#allocation5]  }
  0x11   : > { %s2253_s21 = scalar_select %p1708_p4, 1, 0 }
  0x12   : > { %s2254_s22 = scalar_select %p1713_p6, 1, 0 }
  0x13   : > { %p1718_p8 = pnand %p1075_p5, %p149_p7  ;;  %s161_s25 = sshll.u32 %s1644_s24, 4  ;;  %s1722_s25 = int_to_ptr.vmem [resolvable:$true] %s161_s25 }
  0x14   : > { %s1645_s27 = smov [#allocation7]   ;;  %s2257_s1 = sld [smem:[#allocation16_spill]] }
  0x15   : > { %p1369_p9 = pneg %p1718_p8  ;;  %s175_s28 = sshll.u32 %s1645_s27, 4  ;;  %s1733_s28 = int_to_ptr.vmem [resolvable:$true] %s175_s28 }
  0x17   : > { %p1729_p11 = pnand %p1369_p9, %p2242_p1 }
  0x19   : > { %p1454_p13 = pneg %p1729_p11 }
  0x1a   : > { %s1452_s5 = scalar_lea.hbm %s2257_s1, 576 }
  0x1b   : > { %p1453_p12 = scmp.ne.s32.totalorder %s2257_s1, %s1452_s5  ;;  %p1459_p5 = scmp.lt.u32.totalorder %s1452_s5, %s2257_s1 }
  0x1d   : > { %p1455_p0 = pnand %p1454_p13, %p1453_p12 }
  0x1f   : > { %p1456_p3 = pneg %p1455_p0 }
  0x21   : > { %p1461_p7 = pnand %p1459_p5, %p1456_p3 }
  0x23   : > { %1464 = shalt.err (!%p1461_p7)
}
  0x24   : > { %s1465_s10 = scalar_lea.vmem %s1722_s25, 576  ;;  %p1473_p2 = scmp.lt.s32.totalorder %s1722_s25, %s1722_s25 }
  0x25   : > { %p1466_p9 = scmp.ne.s32.totalorder %s1722_s25, %s1465_s10  ;;  %p1474_p12 = scmp.lt.s32.totalorder %s1465_s10, %s1465_s10 }
  0x27   : > { %p1468_p10 = pnand %p1466_p9, %p1454_p13  ;;  %p1475_p0 = por %p1474_p12, %p1473_p2 }
  0x29   : > { %p1469_p1 = pneg %p1468_p10 }
  0x2b   : > { %p1476_p6 = pnand %p1475_p0, %p1469_p1 }
  0x2d   : > { %1479 = shalt.err (!%p1476_p6)
}
  0x2e   : > { %s2244_s11 = smov 64   ;;  %s2246_s12 = smov 4  }
  0x2f   : > { %1372 = dma.hbm_to_vmem [thread:$0]  (!%p1729_p11), %s2257_s1, 576, %s1722_s25, [#allocation6], %s2244_s11, %s2244_s11, %s2246_s12  }
  0x30   : > { %s2258_s2 = sld [smem:[#allocation17_spill]] }
  0x36   : > { %s1480_s27 = scalar_lea.hbm %s2258_s2, 16 }
  0x37   : > { %p1481_p1 = scmp.ne.s32.totalorder %s2258_s2, %s1480_s27  ;;  %p1487_p10 = scmp.lt.u32.totalorder %s1480_s27, %s2258_s2 }
  0x39   : > { %p1483_p2 = pnand %p1481_p1, %p1454_p13 }
  0x3b   : > { %p1484_p6 = pneg %p1483_p2 }
  0x3d   : > { %p1489_p3 = pnand %p1487_p10, %p1484_p6 }
  0x3f   : > { %1492 = shalt.err (!%p1489_p3)
}
  0x40   : > { %s1493_s25 = scalar_lea.vmem %s1733_s28, 16  ;;  %s1500_s7 = scalar_lea.vmem %s1733_s28, 32 }
  0x41   : > { %p1494_p5 = scmp.ne.s32.totalorder %s1733_s28, %s1493_s25  ;;  %p1501_p12 = scmp.lt.s32.totalorder %s1733_s28, %s1733_s28 }
  0x42   : > { %p1502_p0 = scmp.lt.s32.totalorder %s1500_s7, %s1493_s25 }
  0x43   : > { %p1496_p7 = pnand %p1494_p5, %p1454_p13 }
  0x44   : > { %p1503_p1 = por %p1502_p0, %p1501_p12 }
  0x45   : > { %p1497_p9 = pneg %p1496_p7 }
  0x47   : > { %p1504_p2 = pnand %p1503_p1, %p1497_p9 }
  0x49   : > { %1507 = shalt.err (!%p1504_p2)
}
  0x4a   : > { %1375 = dma.hbm_to_vmem [thread:$0]  (!%p1729_p11), %s2258_s2, 16, %s1733_s28, [#allocation6]  }
  0x4b   : > { %s1792_s10 = sadd.s32 1, %s1642_s18   ;;  %s31_s26 = sadd.s32 1, %s1638_s17 }
  0x4c   : > { %s28_s13 = ssub.s32 %s1642_s18, %s1792_s10  ;;  %p38_p13 = scmp.ne.s32.totalorder %s1638_s17, %s1634_s16 }
  0x4d   : > { %p29_p6 = scmp.eq.s32.totalorder %s28_s13, 0  ;;  %p39_p10 = scmp.eq.s32.totalorder %s1642_s18, 0 }
  0x4e   : > { %p2259_p3 = scmp.eq.s32.totalorder %s1699_s19, 1  ;;  %p1389_p7 = scmp.lt.s32.totalorder %s1642_s18, 2 }
  0x4f   : > { %s1808_s20 = scalar_select %p29_p6, %s1638_s17, %s31_s26  }
  0x50   : > { %p1802_p5 = por %p2259_p3, %p38_p13  ;;  %p40_p9 = por %p39_p10, %p38_p13 }
  0x51   : > { %s1811_s24 = sand.u32 1, %s1638_s17   ;;  %s1166_s27 = sshll.u32 %s1642_s18, 11 }
  0x52   : > { %s2260_s14 = scalar_select %p1802_p5, 1, 0 }
  0x53   : > { %s2243_s28 = sshll.u32 %s1811_s24, 7  ;;  %s2261_s0 = sld [smem:[#allocation15_spill]] }
  0x54   : > { %s190_s6 = scalar_lea.vmem [#allocation2], %s2243_s28  ;;  %p1824_p11 = pnand %p1389_p7, %p40_p9 }
  0x55   : > { %s197_s25 = sshll.u32 %s190_s6, 4  ;;  %s1831_s26 = scalar_lea.hbm %s2240_s3, %s1166_s27  ;;  %s1822_s25 = int_to_ptr.vmem [resolvable:$true] %s197_s25 }
  0x56   : > { %s187_s13 = scalar_lea.sflag [#allocation3], %s1811_s24  ;;  %p1510_p0 = pneg %p1824_p11 }
  0x59   : > { %s1818_s5 = scalar_lea.hbm %s2261_s0, %s1166_s27  ;;  %s1513_s28 = scalar_lea.hbm %s2261_s0, 4096 }
  0x5a   : > { %s1508_s29 = scalar_lea.hbm %s1818_s5, 2048  ;;  %p1514_p13 = scmp.lt.u32.totalorder %s1818_s5, %s2261_s0 }
  0x5b   : > { %p1509_p12 = scmp.ne.s32.totalorder %s1818_s5, %s1508_s29  ;;  %p1515_p6 = scmp.lt.u32.totalorder %s1513_s28, %s1508_s29 }
  0x5c   : > { %p1517_p3 = scmp.lt.u32.totalorder %s1508_s29, %s1818_s5 }
  0x5d   : > { %p1511_p1 = pnand %p1510_p0, %p1509_p12  ;;  %p1516_p10 = por %p1515_p6, %p1514_p13 }
  0x5f   : > { %p1512_p2 = pneg %p1511_p1  ;;  %p1518_p7 = por %p1517_p3, %p1516_p10 }
  0x61   : > { %p1519_p9 = pnand %p1518_p7, %p1512_p2 }
  0x63   : > { %1522 = shalt.err (!%p1519_p9)
}
  0x64   : > { %s1523_s27 = scalar_lea.vmem %s1822_s25, 2048  ;;  %s1648_s8 = smov [#allocation2]  }
  0x65   : > { %p1524_p12 = scmp.ne.s32.totalorder %s1822_s25, %s1523_s27  ;;  %s1528_s9 = sshll.u32 %s1648_s8, 4  ;;  %s1529_s9 = int_to_ptr.vmem [resolvable:$false] %s1528_s9 }
  0x66   : > { %s1530_s11 = scalar_lea.vmem %s1529_s9, 4096  ;;  %p1531_p4 = scmp.lt.s32.totalorder %s1822_s25, %s1529_s9 }
  0x67   : > { %p1526_p1 = pnand %p1524_p12, %p1510_p0  ;;  %p1532_p13 = scmp.lt.s32.totalorder %s1530_s11, %s1523_s27 }
  0x69   : > { %p1527_p5 = pneg %p1526_p1  ;;  %p1533_p6 = por %p1532_p13, %p1531_p4 }
  0x6b   : > { %p1534_p10 = pnand %p1533_p6, %p1527_p5 }
  0x6d   : > { %1537 = shalt.err (!%p1534_p10)
}
  0x6e   : > { %s2263_s12 = smov 4   ;;  %s2264_s28 = smov 64  }
  0x6f   : > { %1379 = dma.hbm_to_vmem [thread:$0]  (!%p1824_p11), %s1818_s5, 2048, %s1822_s25, %s187_s13, %s2264_s28, %s2264_s28, %s2263_s12  }
  0x70   : > { %s2265_s29 = sshll.u32 %s1811_s24, 7  ;;  %s208_s27 = scalar_lea.sflag [#allocation9], %s1811_s24 }
  0x71   : > { %s211_s30 = scalar_lea.vmem [#allocation8], %s2265_s29  ;;  %s1538_s8 = scalar_lea.hbm %s1831_s26, 2048 }
  0x72   : > { %s218_s6 = sshll.u32 %s211_s30, 4  ;;  %p1539_p4 = scmp.ne.s32.totalorder %s1831_s26, %s1538_s8  ;;  %s1866_s6 = int_to_ptr.vmem [resolvable:$true] %s218_s6 }
  0x73   : > { %s1543_s0 = scalar_lea.hbm %s2240_s3, 4096  ;;  %p1544_p3 = scmp.lt.u32.totalorder %s1831_s26, %s2240_s3 }
  0x74   : > { %p1541_p5 = pnand %p1539_p4, %p1510_p0  ;;  %p1545_p7 = scmp.lt.u32.totalorder %s1543_s0, %s1538_s8 }
  0x75   : > { %p1547_p12 = scmp.lt.u32.totalorder %s1538_s8, %s1831_s26 }
  0x76   : > { %p1542_p2 = pneg %p1541_p5  ;;  %p1546_p9 = por %p1545_p7, %p1544_p3 }
  0x78   : > { %p1548_p1 = por %p1547_p12, %p1546_p9 }
  0x7a   : > { %p1549_p13 = pnand %p1548_p1, %p1542_p2 }
  0x7c   : > { %1552 = shalt.err (!%p1549_p13)
}
  0x7d   : > { %s1553_s5 = scalar_lea.vmem %s1866_s6, 2048  ;;  %s1649_s25 = smov [#allocation8]  }
  0x7e   : > { %p1554_p6 = scmp.ne.s32.totalorder %s1866_s6, %s1553_s5  ;;  %s1558_s13 = sshll.u32 %s1649_s25, 4  ;;  %s1559_s13 = int_to_ptr.vmem [resolvable:$false] %s1558_s13 }
  0x7f   : > { %s1560_s1 = scalar_lea.vmem %s1559_s13, 4096  ;;  %p1561_p5 = scmp.lt.s32.totalorder %s1866_s6, %s1559_s13 }
  0x80   : > { %p1556_p10 = pnand %p1554_p6, %p1510_p0  ;;  %p1562_p3 = scmp.lt.s32.totalorder %s1560_s1, %s1553_s5 }
  0x82   : > { %p1557_p4 = pneg %p1556_p10  ;;  %p1563_p7 = por %p1562_p3, %p1561_p5 }
  0x84   : > { %p1564_p9 = pnand %p1563_p7, %p1557_p4 }
  0x86   : > { %1567 = shalt.err (!%p1564_p9)
}
  0x87   : > { %1382 = dma.hbm_to_vmem [thread:$0]  (!%p1824_p11), %s1831_s26, 2048, %s1866_s6, %s208_s27, %s2264_s28, %s2264_s28, %s2263_s12  }
  0x88   : > { %230 = sbr.rel (%p1718_p8) target bundleno = 438 (0x1b6), region = 36  ;;  %s1900_s0 = sand.u32 (!%p1718_p8), 1, %s1634_s16  }
  0x89   : > { %s1903_s2 = sshll.u32 (!%p1718_p8), %s1900_s0, 7  ;;  %s233_s7 = scalar_lea.sflag (!%p1718_p8), [#allocation3], %s1900_s0 }
  0x8a   : > { %s1907_s29 = scalar_lea.vmem (!%p1718_p8), [#allocation2], %s1903_s2  ;;  %p2266_p0 = scmp.ne.s32.totalorder (!%p1718_p8), %s2253_s21, 0 }
  0x8f   : > { %1613 = dma.done.wait (%p2266_p0), %s233_s7, 2048  }
  0x90   : > { %1615 = vsyncadd (%p2266_p0), %s233_s7, 4294965248  ;;  %p2267_p11 = scmp.eq.s32.totalorder %s1699_s19, 0 }
  0x92   : > { %1617 = dma.done.wait (%p2267_p11), [#allocation6], 592   ;;  %p2268_p8 = pmov %p2267_p11 }
  0x93   : > { %s250_s23 = scalar_lea.sflag [#allocation9], %s1900_s0  ;;  %s1919_s24 = scalar_lea.vmem [#allocation8], %s1903_s2 }
  0x94   : > { %1619 = vsyncadd (%p2268_p8), [#allocation6], 4294966704 }
  0x95   : > { %1621 = dma.done.wait (%p2266_p0), %s250_s23, 2048  }
  0x96   : > { %1623 = vsyncadd (%p2266_p0), %s250_s23, 4294965248  ;;  %v1431_v0 = vld [vmem:[#allocation5] sm:$0xff]   ;;  %v1432_v1 = vld [vmem:[#allocation5 + $0x8] sm:$0xff]   ;;  %vm442_vm0 = vcmask 588800   ;;  %vm491_vm1 = vcmask 1043456   ;;  %vm912_vm2 = vcmask 60416  }
  0x97   : > { %1301 = vmatprep.subr.bf16.mxu0 %v1431_v0  ;;  %1343 = vmatprep.subr.bf16.mxu1 %v1431_v0  ;;  %v1433_v2 = vld [vmem:[#allocation5 + $0x10] sm:$0xff]   ;;  %v1436_v3 = vld [vmem:[%s1907_s29] sm:$0xff]   ;;  %v1434_v5 = vld [vmem:[#allocation5 + $0x18] sm:$0xff]   ;;  %s2048_s21 = scalar_lea.vmem [#allocation10], %s1903_s2  ;;  %s1200_s26 = sshll.u32 %s1699_s19, 11 }
  0x98   : > { %1302 = vmatpush3.bf16.msra.mxu0 %v1431_v0  ;;  %1348 = vmatpush3.bf16.msra.mxu1 %v1431_v0  ;;  %v1437_v4 = vld [vmem:[%s1907_s29 + $0x40] sm:$0xff]   ;;  %v1438_v8 = vld [vmem:[%s1907_s29 + $0x8] sm:$0xff]   ;;  %v1440_v10 = vld [vmem:[%s1907_s29 + $0x10] sm:$0xff]   ;;  %s959_s12 = sshll.u32 %s2048_s21, 4  ;;  %s2179_s30 = scalar_lea.hbm %s2241_s4, %s1200_s26  ;;  %s2181_s12 = int_to_ptr.vmem [resolvable:$true] %s959_s12 }
  0x99   : > { %1303 = vmatprep.subr.bf16.mxu0 %v1432_v1  ;;  %1344 = vmatprep.subr.bf16.mxu1 %v1432_v1  ;;  %v1435_v6 = vld [vmem:[#allocation5 + $0x20] ss:$0 sps:$4 sm:$0xff]   ;;  %v1439_v9 = vld [vmem:[%s1907_s29 + $0x48] sm:$0xff]   ;;  %v1441_v11 = vld [vmem:[%s1907_s29 + $0x50] sm:$0xff]   ;;  %s946_s6 = scalar_lea.sflag [#allocation4], %s1900_s0  ;;  %s1568_s27 = scalar_lea.vmem %s2181_s12, 2048 }
  0x9a   : > { %1311 = vmatprep.mubr.msk.bf16.mxu0 %vm442_vm0, %v1436_v3  ;;  %1327 = vmatprep.mubr.msk.bf16.mxu1 %vm442_vm0, %v1437_v4  ;;  %v493_v7 = vsel %vm491_vm1, %v1435_v6, 0  ;;  %v1442_v12 = vld [vmem:[%s1907_s29 + $0x18] sm:$0xff]   ;;  %v1444_v14 = vld [vmem:[%s1907_s29 + $0x20] sm:$0xff]   ;;  %v1446_v16 = vld [vmem:[%s1907_s29 + $0x28] sm:$0xff]   ;;  %p1569_p2 = scmp.ne.s32.totalorder %s2181_s12, %s1568_s27  ;;  %p2273_p12 = scmp.ne.s32.totalorder %s2260_s14, 0 }
  0x9b   : > { %v1443_v13 = vld [vmem:[%s1907_s29 + $0x58] sm:$0xff]   ;;  %v1445_v15 = vld [vmem:[%s1907_s29 + $0x60] sm:$0xff]   ;;  %v1447_v17 = vld [vmem:[%s1907_s29 + $0x68] sm:$0xff]   ;;  %s1650_s8 = smov [#allocation10]  }
  0x9c   : > { %1304 = vmatpush3.bf16.msra.mxu0 %v1432_v1  ;;  %1349 = vmatpush3.bf16.msra.mxu1 %v1432_v1  ;;  %v1448_v18 = vld [vmem:[%s1907_s29 + $0x30] sm:$0xff]   ;;  %v1450_v20 = vld [vmem:[%s1907_s29 + $0x38] sm:$0xff]   ;;  %v1964_v24 = vld [vmem:[%s1919_s24] sm:$0xff]   ;;  %p1570_p1 = pnand %p1569_p2, %p2273_p12  ;;  %s1572_s9 = sshll.u32 %s1650_s8, 4  ;;  %s1573_s9 = int_to_ptr.vmem [resolvable:$false] %s1572_s9 }
  0x9d   : > { %1305 = vmatprep.subr.bf16.mxu0 %v1433_v2  ;;  %1345 = vmatprep.subr.bf16.mxu1 %v1433_v2  ;;  %v1449_v19 = vld [vmem:[%s1907_s29 + $0x70] sm:$0xff]   ;;  %v1451_v21 = vld [vmem:[%s1907_s29 + $0x78] sm:$0xff]   ;;  %v1967_v25 = vld [vmem:[%s1919_s24 + $0x40] sm:$0xff]   ;;  %v1203_v32 = vunpack.c.l.bf16 %v1964_v24  ;;  %v1204_v37 = vunpack.c.h.bf16 %v1964_v24  ;;  %s1574_s11 = scalar_lea.vmem %s1573_s9, 4096  ;;  %p1575_p6 = scmp.lt.s32.totalorder %s2181_s12, %s1573_s9 }
  0x9e   : > { %v1958_v22 = vld [vmem:[%s1919_s24 + $0x8] sm:$0xff]   ;;  %v1970_v26 = vld [vmem:[%s1919_s24 + $0x18] sm:$0xff]   ;;  %v1976_v28 = vld [vmem:[%s1919_s24 + $0x10] sm:$0xff]   ;;  %v1235_v33 = vunpack.c.l.bf16 %v1967_v25  ;;  %v1236_v38 = vunpack.c.h.bf16 %v1967_v25  ;;  %p1571_p13 = pneg %p1570_p1  ;;  %p1576_p10 = scmp.lt.s32.totalorder %s1574_s11, %s1568_s27 }
  0x9f   : > { %v1961_v23 = vld [vmem:[%s1919_s24 + $0x48] sm:$0xff]   ;;  %v1973_v27 = vld [vmem:[%s1919_s24 + $0x58] sm:$0xff]   ;;  %v1979_v29 = vld [vmem:[%s1919_s24 + $0x50] sm:$0xff]   ;;  %v1207_v30 = vunpack.c.l.bf16 %v1958_v22  ;;  %v1208_v35 = vunpack.c.h.bf16 %v1958_v22  ;;  %v1215_v42 = vunpack.c.l.bf16 %v1970_v26  ;;  %v1211_v44 = vunpack.c.l.bf16 %v1976_v28 }
  0xa0   : > { %1306 = vmatpush3.bf16.msra.mxu0 %v1433_v2  ;;  %1350 = vmatpush3.bf16.msra.mxu1 %v1433_v2  ;;  %v1239_v31 = vunpack.c.l.bf16 %v1961_v23  ;;  %v1986_v34 = vld [vmem:[%s1919_s24 + $0x28] sm:$0xff]   ;;  %v1240_v36 = vunpack.c.h.bf16 %v1961_v23  ;;  %v1996_v40 = vld [vmem:[%s1919_s24 + $0x20] sm:$0xff]   ;;  %v1247_v43 = vunpack.c.l.bf16 %v1973_v27  ;;  %v1243_v45 = vunpack.c.l.bf16 %v1979_v29  ;;  %v2006_v46 = vld [vmem:[%s1919_s24 + $0x38] sm:$0xff]   ;;  %p1577_p4 = por %p1576_p10, %p1575_p6 }
  0xa1   : > { %1307 = vmatprep.subr.bf16.mxu0 %v1434_v5  ;;  %1346 = vmatprep.subr.bf16.mxu1 %v1434_v5  ;;  %v1993_v39 = vld [vmem:[%s1919_s24 + $0x68] sm:$0xff]   ;;  %v1999_v41 = vld [vmem:[%s1919_s24 + $0x60] sm:$0xff]   ;;  %v1216_v47 = vunpack.c.h.bf16 %v1970_v26  ;;  %v1248_v48 = vunpack.c.h.bf16 %v1973_v27  ;;  %v1212_v49 = vunpack.c.h.bf16 %v1976_v28  ;;  %v1244_v50 = vunpack.c.h.bf16 %v1979_v29  ;;  %v2013_v51 = vld [vmem:[%s1919_s24 + $0x78] sm:$0xff]  }
  0xa2   : > { %v2016_v52 = vld [vmem:[%s1919_s24 + $0x30] sm:$0xff]   ;;  %v2021_v54 = vld [vmem:[#allocation7] ss:$0 sm:$0xff]  ;;  %v1223_v55 = vunpack.c.l.bf16 %v1986_v34  ;;  %v1255_v56 = vunpack.c.l.bf16 %v1993_v39  ;;  %v1219_v57 = vunpack.c.l.bf16 %v1996_v40  ;;  %v1251_v58 = vunpack.c.l.bf16 %v1999_v41  ;;  %p1578_p5 = pnand %p1577_p4, %p1571_p13 }
  0xa3   : > { %v2019_v53 = vld [vmem:[%s1919_s24 + $0x70] sm:$0xff]   ;;  %v1224_v59 = vunpack.c.h.bf16 %v1986_v34  ;;  %v1256_v60 = vunpack.c.h.bf16 %v1993_v39  ;;  %v1220_v61 = vunpack.c.h.bf16 %v1996_v40  ;;  %v1252_v62 = vunpack.c.h.bf16 %v1999_v41 }
  0xa4   : > { %1308 = vmatpush3.bf16.msra.mxu0 %v1434_v5  ;;  %1351 = vmatpush3.bf16.msra.mxu1 %v1434_v5  ;;  %v1231_v1 = vunpack.c.l.bf16 %v2006_v46  ;;  %v1263_v2 = vunpack.c.l.bf16 %v2013_v51  ;;  %v1227_v3 = vunpack.c.l.bf16 %v2016_v52  ;;  %v1259_v4 = vunpack.c.l.bf16 %v2019_v53 }
  0xa5   : > { %1353 = vmatprep.subr.msk.bf16.mxu0 %vm491_vm1, %v1435_v6  ;;  %1354 = vmatprep.subr.msk.bf16.mxu1 %vm491_vm1, %v1435_v6 }
  0xa8   : > { %1310 = vmatpush3.bf16.msra.mxu0 %v493_v7  ;;  %1352 = vmatpush3.bf16.msra.mxu1 %v493_v7 }
  0xab   : > { %1312 = vmatmul.mubr.msk.bf16.vlgmr.msra.gmra.mrb[0].mxu0 %vm442_vm0, %v1438_v8  ;;  %1328 = vmatmul.mubr.msk.bf16.vlgmr.msra.gmra.mrb[0].mxu1 %vm442_vm0, %v1439_v9 }
  0xac   : > { %1315 = vmatprep.mubr.msk.bf16.mxu0 %vm442_vm0, %v1440_v10  ;;  %1331 = vmatprep.mubr.msk.bf16.mxu1 %vm442_vm0, %v1441_v11 }
  0xb3   : > { %1316 = vmatmul.mubr.msk.bf16.gmra.mrb[4].mxu0 %vm442_vm0, %v1442_v12  ;;  %1332 = vmatmul.mubr.msk.bf16.gmra.mrb[4].mxu1 %vm442_vm0, %v1443_v13 }
  0xb4   : > { %1319 = vmatprep.mubr.msk.bf16.mxu0 %vm442_vm0, %v1444_v14  ;;  %1335 = vmatprep.mubr.msk.bf16.mxu1 %vm442_vm0, %v1445_v15 }
  0xbb   : > { %1320 = vmatmul.mubr.msk.bf16.gmra.mrb[8].mxu0 %vm442_vm0, %v1446_v16  ;;  %1336 = vmatmul.mubr.msk.bf16.gmra.mrb[8].mxu1 %vm442_vm0, %v1447_v17 }
  0xbc   : > { %1323 = vmatprep.mubr.msk.bf16.mxu0 %vm442_vm0, %v1448_v18  ;;  %1339 = vmatprep.mubr.msk.bf16.mxu1 %vm442_vm0, %v1449_v19 }
  0xc3   : > { %1324 = vmatmul.mubr.msk.bf16.gmra.mrb[12].mxu0 %vm442_vm0, %v1450_v20  ;;  %1340 = vmatmul.mubr.msk.bf16.gmra.mrb[12].mxu1 %vm442_vm0, %v1451_v21 }
 0x17e   : > { %v1313_v63 = vpop.f32.mrb[0].mxu0  ;;  %v1329_v0 = vpop.f32.mrb[0].mxu1 }
 0x17f   : > { %v538_v5 = vadd.f32 %v1313_v63, %v2021_v54  ;;  %v602_v6 = vadd.f32 %v1329_v0, %v2021_v54  ;;  %v529_v7 = vpop.f32.mrb[1].mxu0  ;;  %v593_v8 = vpop.f32.mrb[1].mxu1 }
 0x180   : > { %v530_v11 = vadd.f32 %v2021_v54, %v529_v7  ;;  %v594_v12 = vadd.f32 %v2021_v54, %v593_v8  ;;  %v1314_v13 = vpop.f32.mrb[2].mxu0  ;;  %v1330_v14 = vpop.f32.mrb[2].mxu1 }
 0x181   : > { %v722_v17 = vadd.f32 %v1207_v30, %v538_v5  ;;  %v738_v18 = vadd.f32 %v1239_v31, %v602_v6  ;;  %v541_v19 = vadd.f32 %v1314_v13, %v2021_v54  ;;  %v605_v20 = vadd.f32 %v1330_v14, %v2021_v54  ;;  %v532_v21 = vpop.f32.mrb[3].mxu0  ;;  %v596_v22 = vpop.f32.mrb[3].mxu1 }
 0x182   : > { %v720_v23 = vadd.f32 %v1203_v32, %v530_v11  ;;  %v736_v24 = vadd.f32 %v1235_v33, %v594_v12  ;;  %v533_v25 = vadd.f32 %v2021_v54, %v532_v21  ;;  %v597_v63 = vadd.f32 %v2021_v54, %v596_v22 }
 0x183   : > { %v754_v0 = vmax.f32 %v722_v17, 0.0  ;;  %v770_v7 = vmax.f32 %v738_v18, 0.0  ;;  %v723_v8 = vadd.f32 %v1208_v35, %v541_v19  ;;  %v739_v15 = vadd.f32 %v1240_v36, %v605_v20 }
 0x184   : > { %v752_v16 = vmax.f32 %v720_v23, 0.0  ;;  %v768_v30 = vmax.f32 %v736_v24, 0.0  ;;  %v721_v31 = vadd.f32 %v1204_v37, %v533_v25  ;;  %v737_v5 = vadd.f32 %v1236_v38, %v597_v63 }
 0x185   : > { %v1170_v6 = vpack.c.bf16 %v754_v0, %v754_v0  ;;  %v1186_v13 = vpack.c.bf16 %v770_v7, %v770_v7  ;;  %v755_v14 = vmax.f32 %v723_v8, 0.0  ;;  %v771_v10 = vmax.f32 %v739_v15, 0.0 }
 0x186   : > { %v1168_v9 = vpack.c.bf16 %v752_v16, %v752_v16  ;;  %v1184_v32 = vpack.c.bf16 %v768_v30, %v768_v30  ;;  %v753_v33 = vmax.f32 %v721_v31, 0.0  ;;  %v769_v11 = vmax.f32 %v737_v5, 0.0  ;;  %v1317_v12 = vpop.f32.mrb[4].mxu0  ;;  %v1333_v21 = vpop.f32.mrb[4].mxu1 }
 0x187   : > { %915 = vst.msk [vmem:[%s2048_s21 + $0x8] sm:$0xf] %vm912_vm2, %v1170_v6  ;;  %931 = vst.msk [vmem:[%s2048_s21 + $0x48] sm:$0xf] %vm912_vm2, %v1186_v13  ;;  %v1171_v35 = vpack.c.bf16 %v755_v14, %v755_v14  ;;  %v1187_v36 = vpack.c.bf16 %v771_v10, %v771_v10  ;;  %v554_v37 = vadd.f32 %v1317_v12, %v2021_v54  ;;  %v545_v15 = vpop.f32.mrb[5].mxu0  ;;  %v609_v16 = vpop.f32.mrb[5].mxu1 }
 0x188   : > { %v618_v38 = vadd.f32 %v1333_v21, %v2021_v54  ;;  %913 = vst.msk [vmem:[%s2048_s21] sm:$0xf] %vm912_vm2, %v1168_v9  ;;  %929 = vst.msk [vmem:[%s2048_s21 + $0x40] sm:$0xf] %vm912_vm2, %v1184_v32  ;;  %v1169_v17 = vpack.c.bf16 %v753_v33, %v753_v33  ;;  %v1185_v18 = vpack.c.bf16 %v769_v11, %v769_v11  ;;  %v1318_v22 = vpop.f32.mrb[6].mxu0  ;;  %v1334_v10 = vpop.f32.mrb[6].mxu1 }
 0x189   : > { %v546_v19 = vadd.f32 %v2021_v54, %v545_v15  ;;  %v610_v20 = vadd.f32 %v2021_v54, %v609_v16  ;;  %916 = vst.msk [vmem:[%s2048_s21 + $0xc] sm:$0xf] %vm912_vm2, %v1171_v35  ;;  %932 = vst.msk [vmem:[%s2048_s21 + $0x4c] sm:$0xf] %vm912_vm2, %v1187_v36  ;;  %v726_v23 = vadd.f32 %v1215_v42, %v554_v37  ;;  %v548_v63 = vpop.f32.mrb[7].mxu0  ;;  %v612_v0 = vpop.f32.mrb[7].mxu1 }
 0x18a   : > { %v742_v9 = vadd.f32 %v1247_v43, %v618_v38  ;;  %v557_v24 = vadd.f32 %v1318_v22, %v2021_v54  ;;  %v621_v25 = vadd.f32 %v1334_v10, %v2021_v54  ;;  %914 = vst.msk [vmem:[%s2048_s21 + $0x4] sm:$0xf] %vm912_vm2, %v1169_v17  ;;  %930 = vst.msk [vmem:[%s2048_s21 + $0x44] sm:$0xf] %vm912_vm2, %v1185_v18 }
 0x18b   : > { %v724_v7 = vadd.f32 %v1211_v44, %v546_v19  ;;  %v740_v8 = vadd.f32 %v1243_v45, %v610_v20  ;;  %v549_v42 = vadd.f32 %v2021_v54, %v548_v63  ;;  %v613_v43 = vadd.f32 %v2021_v54, %v612_v0 }
 0x18c   : > { %v758_v30 = vmax.f32 %v726_v23, 0.0  ;;  %v774_v31 = vmax.f32 %v742_v9, 0.0  ;;  %v727_v5 = vadd.f32 %v1216_v47, %v557_v24  ;;  %v743_v6 = vadd.f32 %v1248_v48, %v621_v25 }
 0x18d   : > { %v756_v13 = vmax.f32 %v724_v7, 0.0  ;;  %v772_v14 = vmax.f32 %v740_v8, 0.0  ;;  %v725_v44 = vadd.f32 %v1212_v49, %v549_v42  ;;  %v741_v45 = vadd.f32 %v1244_v50, %v613_v43 }
 0x18e   : > { %v1174_v32 = vpack.c.bf16 %v758_v30, %v758_v30  ;;  %v1190_v33 = vpack.c.bf16 %v774_v31, %v774_v31  ;;  %v759_v11 = vmax.f32 %v727_v5, 0.0  ;;  %v775_v12 = vmax.f32 %v743_v6, 0.0  ;;  %v1321_v48 = vpop.f32.mrb[8].mxu0  ;;  %v1337_v35 = vpop.f32.mrb[8].mxu1 }
 0x18f   : > { %v1172_v26 = vpack.c.bf16 %v756_v13, %v756_v13  ;;  %v1188_v47 = vpack.c.bf16 %v772_v14, %v772_v14  ;;  %v757_v27 = vmax.f32 %v725_v44, 0.0  ;;  %v773_v21 = vmax.f32 %v741_v45, 0.0  ;;  %v561_v36 = vpop.f32.mrb[9].mxu0  ;;  %v625_v37 = vpop.f32.mrb[9].mxu1 }
 0x190   : > { %919 = vst.msk [vmem:[%s2048_s21 + $0x18] sm:$0xf] %vm912_vm2, %v1174_v32  ;;  %935 = vst.msk [vmem:[%s2048_s21 + $0x58] sm:$0xf] %vm912_vm2, %v1190_v33  ;;  %v1175_v28 = vpack.c.bf16 %v759_v11, %v759_v11  ;;  %v1191_v29 = vpack.c.bf16 %v775_v12, %v775_v12  ;;  %v570_v49 = vadd.f32 %v1321_v48, %v2021_v54  ;;  %v1322_v18 = vpop.f32.mrb[10].mxu0  ;;  %v1338_v19 = vpop.f32.mrb[10].mxu1 }
 0x191   : > { %v634_v50 = vadd.f32 %v1337_v35, %v2021_v54  ;;  %917 = vst.msk [vmem:[%s2048_s21 + $0x10] sm:$0xf] %vm912_vm2, %v1172_v26  ;;  %933 = vst.msk [vmem:[%s2048_s21 + $0x50] sm:$0xf] %vm912_vm2, %v1188_v47  ;;  %v1173_v38 = vpack.c.bf16 %v757_v27, %v757_v27  ;;  %v1189_v15 = vpack.c.bf16 %v773_v21, %v773_v21  ;;  %v564_v9 = vpop.f32.mrb[11].mxu0  ;;  %v628_v24 = vpop.f32.mrb[11].mxu1 }
 0x192   : > { %v562_v16 = vadd.f32 %v2021_v54, %v561_v36  ;;  %v626_v17 = vadd.f32 %v2021_v54, %v625_v37  ;;  %920 = vst.msk [vmem:[%s2048_s21 + $0x1c] sm:$0xf] %vm912_vm2, %v1175_v28  ;;  %936 = vst.msk [vmem:[%s2048_s21 + $0x5c] sm:$0xf] %vm912_vm2, %v1191_v29  ;;  %v730_v20 = vadd.f32 %v1223_v55, %v570_v49 }
 0x193   : > { %v746_v22 = vadd.f32 %v1255_v56, %v634_v50  ;;  %v573_v10 = vadd.f32 %v1322_v18, %v2021_v54  ;;  %v637_v23 = vadd.f32 %v1338_v19, %v2021_v54  ;;  %918 = vst.msk [vmem:[%s2048_s21 + $0x14] sm:$0xf] %vm912_vm2, %v1173_v38  ;;  %934 = vst.msk [vmem:[%s2048_s21 + $0x54] sm:$0xf] %vm912_vm2, %v1189_v15  ;;  %v2269_v15 = vunpack.c.h.bf16 %v2006_v46 }
 0x194   : > { %v728_v25 = vadd.f32 %v1219_v57, %v562_v16  ;;  %v744_v63 = vadd.f32 %v1251_v58, %v626_v17  ;;  %v565_v55 = vadd.f32 %v2021_v54, %v564_v9  ;;  %v629_v56 = vadd.f32 %v2021_v54, %v628_v24 }
 0x195   : > { %v762_v0 = vmax.f32 %v730_v20, 0.0  ;;  %v778_v7 = vmax.f32 %v746_v22, 0.0  ;;  %v731_v8 = vadd.f32 %v1224_v59, %v573_v10  ;;  %v747_v42 = vadd.f32 %v1256_v60, %v637_v23 }
 0x196   : > { %v760_v43 = vmax.f32 %v728_v25, 0.0  ;;  %v776_v30 = vmax.f32 %v744_v63, 0.0  ;;  %v729_v57 = vadd.f32 %v1220_v61, %v565_v55  ;;  %v745_v58 = vadd.f32 %v1252_v62, %v629_v56  ;;  %v1325_v60 = vpop.f32.mrb[12].mxu0  ;;  %v1341_v44 = vpop.f32.mrb[12].mxu1 }
 0x197   : > { %v1178_v31 = vpack.c.bf16 %v762_v0, %v762_v0  ;;  %v1194_v5 = vpack.c.bf16 %v778_v7, %v778_v7  ;;  %v763_v6 = vmax.f32 %v731_v8, 0.0  ;;  %v779_v13 = vmax.f32 %v747_v42, 0.0  ;;  %v577_v45 = vpop.f32.mrb[13].mxu0  ;;  %v641_v32 = vpop.f32.mrb[13].mxu1 }
 0x198   : > { %v1176_v34 = vpack.c.bf16 %v760_v43, %v760_v43  ;;  %v1192_v59 = vpack.c.bf16 %v776_v30, %v776_v30  ;;  %v761_v39 = vmax.f32 %v729_v57, 0.0  ;;  %v777_v14 = vmax.f32 %v745_v58, 0.0  ;;  %v1326_v47 = vpop.f32.mrb[14].mxu0  ;;  %v1342_v27 = vpop.f32.mrb[14].mxu1 }
 0x199   : > { %923 = vst.msk [vmem:[%s2048_s21 + $0x28] sm:$0xf] %vm912_vm2, %v1178_v31  ;;  %939 = vst.msk [vmem:[%s2048_s21 + $0x68] sm:$0xf] %vm912_vm2, %v1194_v5  ;;  %v1179_v40 = vpack.c.bf16 %v763_v6, %v763_v6  ;;  %v1195_v41 = vpack.c.bf16 %v779_v13, %v779_v13  ;;  %v586_v61 = vadd.f32 %v1325_v60, %v2021_v54  ;;  %v580_v29 = vpop.f32.mrb[15].mxu0  ;;  %v644_v49 = vpop.f32.mrb[15].mxu1  ;;  %v2270_v17 = vunpack.c.h.bf16 %v2013_v51 }
 0x19a   : > { %v650_v62 = vadd.f32 %v1341_v44, %v2021_v54  ;;  %921 = vst.msk [vmem:[%s2048_s21 + $0x20] sm:$0xf] %vm912_vm2, %v1176_v34  ;;  %937 = vst.msk [vmem:[%s2048_s21 + $0x60] sm:$0xf] %vm912_vm2, %v1192_v59  ;;  %v1177_v33 = vpack.c.bf16 %v761_v39, %v761_v39  ;;  %v1193_v11 = vpack.c.bf16 %v777_v14, %v777_v14 }
 0x19b   : > { %v578_v12 = vadd.f32 %v2021_v54, %v577_v45  ;;  %v642_v26 = vadd.f32 %v2021_v54, %v641_v32  ;;  %924 = vst.msk [vmem:[%s2048_s21 + $0x2c] sm:$0xf] %vm912_vm2, %v1179_v40  ;;  %940 = vst.msk [vmem:[%s2048_s21 + $0x6c] sm:$0xf] %vm912_vm2, %v1195_v41  ;;  %v734_v21 = vadd.f32 %v1231_v1, %v586_v61 }
 0x19c   : > { %v750_v48 = vadd.f32 %v1263_v2, %v650_v62  ;;  %v589_v35 = vadd.f32 %v1326_v47, %v2021_v54  ;;  %v653_v28 = vadd.f32 %v1342_v27, %v2021_v54  ;;  %922 = vst.msk [vmem:[%s2048_s21 + $0x24] sm:$0xf] %vm912_vm2, %v1177_v33  ;;  %938 = vst.msk [vmem:[%s2048_s21 + $0x64] sm:$0xf] %vm912_vm2, %v1193_v11 }
 0x19d   : > { %v732_v50 = vadd.f32 %v1227_v3, %v578_v12  ;;  %v748_v1 = vadd.f32 %v1259_v4, %v642_v26  ;;  %v581_v2 = vadd.f32 %v2021_v54, %v580_v29  ;;  %v645_v36 = vadd.f32 %v2021_v54, %v644_v49 }
 0x19e   : > { %v766_v37 = vmax.f32 %v734_v21, 0.0  ;;  %v782_v38 = vmax.f32 %v750_v48, 0.0  ;;  %v735_v16 = vadd.f32 %v2269_v15, %v589_v35  ;;  %v751_v18 = vadd.f32 %v2270_v17, %v653_v28 }
 0x19f   : > { %v764_v19 = vmax.f32 %v732_v50, 0.0  ;;  %v780_v20 = vmax.f32 %v748_v1, 0.0  ;;  %v2271_v3 = vunpack.c.h.bf16 %v2016_v52  ;;  %v2272_v4 = vunpack.c.h.bf16 %v2019_v53 }
 0x1a0   : > { %v1182_v54 = vpack.c.bf16 %v766_v37, %v766_v37  ;;  %v1198_v46 = vpack.c.bf16 %v782_v38, %v782_v38  ;;  %v767_v23 = vmax.f32 %v735_v16, 0.0  ;;  %v783_v51 = vmax.f32 %v751_v18, 0.0 }
 0x1a1   : > { %v733_v22 = vadd.f32 %v2271_v3, %v581_v2  ;;  %v749_v10 = vadd.f32 %v2272_v4, %v645_v36  ;;  %v1180_v9 = vpack.c.bf16 %v764_v19, %v764_v19  ;;  %v1196_v24 = vpack.c.bf16 %v780_v20, %v780_v20 }
 0x1a2   : > { %927 = vst.msk [vmem:[%s2048_s21 + $0x38] sm:$0xf] %vm912_vm2, %v1182_v54  ;;  %943 = vst.msk [vmem:[%s2048_s21 + $0x78] sm:$0xf] %vm912_vm2, %v1198_v46  ;;  %v1183_v53 = vpack.c.bf16 %v767_v23, %v767_v23  ;;  %v1199_v63 = vpack.c.bf16 %v783_v51, %v783_v51 }
 0x1a3   : > { %v765_v25 = vmax.f32 %v733_v22, 0.0  ;;  %v781_v52 = vmax.f32 %v749_v10, 0.0  ;;  %925 = vst.msk [vmem:[%s2048_s21 + $0x30] sm:$0xf] %vm912_vm2, %v1180_v9  ;;  %941 = vst.msk [vmem:[%s2048_s21 + $0x70] sm:$0xf] %vm912_vm2, %v1196_v24 }
 0x1a4   : > { %928 = vst.msk [vmem:[%s2048_s21 + $0x3c] sm:$0xf] %vm912_vm2, %v1183_v53  ;;  %944 = vst.msk [vmem:[%s2048_s21 + $0x7c] sm:$0xf] %vm912_vm2, %v1199_v63 }
 0x1a5   : > { %v1181_v55 = vpack.c.bf16 %v765_v25, %v765_v25  ;;  %v1197_v56 = vpack.c.bf16 %v781_v52, %v781_v52 }
 0x1a7   : > { %926 = vst.msk [vmem:[%s2048_s21 + $0x34] sm:$0xf] %vm912_vm2, %v1181_v55  ;;  %942 = vst.msk [vmem:[%s2048_s21 + $0x74] sm:$0xf] %vm912_vm2, %v1197_v56 }
 0x1a8   : > { %1581 = shalt.err (!%p1578_p5)
}
 0x1a9   : > { %s1582_s5 = scalar_lea.hbm %s2179_s30, 2048  ;;  %s1586_s1 = scalar_lea.hbm %s2241_s4, 4096 }
 0x1aa   : > { %p1583_p3 = scmp.ne.s32.totalorder %s2179_s30, %s1582_s5  ;;  %p1587_p0 = scmp.lt.u32.totalorder %s2179_s30, %s2241_s4 }
 0x1ab   : > { %p1588_p11 = scmp.lt.u32.totalorder %s1586_s1, %s1582_s5  ;;  %p1590_p2 = scmp.lt.u32.totalorder %s1582_s5, %s2179_s30 }
 0x1ac   : > { %p1584_p7 = pnand %p1583_p3, %p2273_p12 }
 0x1ad   : > { %p1589_p8 = por %p1588_p11, %p1587_p0 }
 0x1ae   : > { %p1585_p9 = pneg %p1584_p7 }
 0x1af   : > { %p1591_p1 = por %p1590_p2, %p1589_p8 }
 0x1b1   : > { %p1592_p13 = pnand %p1591_p1, %p1585_p9 }
 0x1b3   : > { %1595 = shalt.err (!%p1592_p13)
}
 0x1b4   : > { %s1651_s29 = smov 64   ;;  %s1652_s23 = smov 4  }
 0x1b5   : > { %1367 = dma.vmem_to_hbm [thread:$0]  (%p2273_p12), %s2181_s12, 2048, %s2179_s30, %s946_s6, %s1651_s29, %s1651_s29, %s1652_s23  }
 0x1b6 PF: > { %s974_s24 = sand.u32 1, %s1630_s15   ;;  %p2274_p6 = scmp.ne.s32.totalorder %s2254_s22, 0 }
 0x1b7   : > { %p2275_p10 = scmp.ge.s32.totalorder %s1642_s18, 2  ;;  %s975_s21 = scalar_lea.sflag [#allocation4], %s974_s24 }
 0x1b9   : > { %p1384_p4 = pnand %p2275_p10, %p2274_p6 }
 0x1bb   : > { %1625 = dma.done.wait (!%p1384_p4), %s975_s21, 2048  }
 0x1bc   : > { %1627 = vsyncadd (!%p1384_p4), %s975_s21, 4294965248  ;;  %p21_p5 = scmp.ge.s32.totalorder %s1792_s10, 4   ;;  %s2276_s15 = smov %s1634_s16 }
 0x1bd   : > { %s2277_s16 = smov %s1638_s17  ;;  %s2278_s17 = smov %s1808_s20 }
 0x1be   : > { %s2279_s18 = smov %s1792_s10  ;;  %23 = sbr.rel (!%p21_p5) target bundleno = 12 (0xc), region = 102 }
 0x1c5   :  { %980 = vsyncpa [#allocation3], 1 }
 0x1c6   :  { %982 = vsyncpa [#allocation3 + $0x1], 1 }
 0x1c7   :  { %983 = vsyncpa [#allocation6], 1 }
 0x1c8   :  { %984 = vsyncpa [#allocation9], 1 }
 0x1c9   :  { %986 = vsyncpa [#allocation9 + $0x1], 1 }
 0x1ca   :  { %987 = vsyncpa [#allocation4], 1 }
 0x1cb   :  { %989 = vsyncpa [#allocation4 + $0x1], 1 }

// kernel: _lambda_.17
= control target key start
LH: loop header
LB: loop body
LE: loop exit
PB: predicated region body
PF: predicated region fallthrough
CT: control target
= control target key end

     0   :  { %8 = vsyncpa [#allocation3], 0  ;;  %s1145_s0 = inlined_call_operand.hbm [shape: bf16[128,72], index: 0, kind: input, shape index: {}]   ;;  %s1146_s1 = inlined_call_operand.hbm [shape: bf16[72,16], index: 1, kind: input, shape index: {}]   ;;  %s1147_s2 = inlined_call_operand.hbm [shape: f32[1,16], index: 2, kind: input, shape index: {}]   ;;  %s1148_s3 = inlined_call_operand.hbm [shape: bf16[128,16], index: 3, kind: output, shape index: {}]  }
   0x1   :  { %10 = vsyncpa [#allocation3 + $0x1], 0 }
   0x2   :  { %11 = vsyncpa [#allocation6], 0 }
   0x3   :  { %12 = vsyncpa [#allocation4], 0 }
   0x4   :  { %14 = vsyncpa [#allocation4 + $0x1], 0  ;;  %s882_s12 = smov 0   ;;  %s884_s13 = smov 0  }
   0x5   :  { %s886_s14 = smov 0   ;;  %s888_s15 = smov 0  }
   0x6 LB: > { %s903_s16 = sadd.s32 4294967295, %s852_s15   ;;  %s527_s17 = sadd.s32 4294967294, %s852_s15   ;;  %s852_s15 = sphi %s888_s15, %s1168_s15   ;;  %s848_s14 = sphi %s886_s14, %s1167_s14   ;;  %s844_s13 = sphi %s884_s13, %s1166_s13   ;;  %s840_s12 = sphi %s882_s12, %s1165_s12  }
   0x7   : > { %p40_p0 = scmp.ne.s32.totalorder %s844_s13, %s840_s12  ;;  %p1149_p1 = scmp.eq.s32.totalorder %s903_s16, 0 }
   0x8   : > { %p112_p3 = scmp.eq.s32.totalorder %s527_s17, 1  ;;  %p528_p5 = scmp.ge.s32.totalorder %s852_s15, 1 }
   0x9   : > { %p912_p4 = por %p1149_p1, %p40_p0  ;;  %p119_p7 = scmp.lt.s32.totalorder %s852_s15, 3 }
   0xa   : > { %p917_p6 = por %p112_p3, %p40_p0  ;;  %s854_s21 = smov [#allocation5]  }
   0xb   : > { %s1152_s18 = scalar_select %p912_p4, 1, 0 }
   0xc   : > { %s1153_s19 = scalar_select %p917_p6, 1, 0 }
   0xd   : > { %p922_p8 = pnand %p528_p5, %p119_p7  ;;  %s131_s22 = sshll.u32 %s854_s21, 4  ;;  %s926_s22 = int_to_ptr.vmem [resolvable:$true] %s131_s22 }
   0xe   : > { %s855_s24 = smov [#allocation7]   ;;  %s696_s28 = scalar_lea.hbm %s1146_s1, 576 }
   0xf   : > { %p628_p9 = pneg %p922_p8  ;;  %s145_s25 = sshll.u32 %s855_s24, 4  ;;  %s937_s25 = int_to_ptr.vmem [resolvable:$true] %s145_s25 }
  0x10   : > { %p697_p12 = scmp.ne.s32.totalorder %s1146_s1, %s696_s28  ;;  %p703_p5 = scmp.lt.u32.totalorder %s696_s28, %s1146_s1 }
  0x11   : > { %p933_p11 = pnand %p628_p9, %p1149_p1 }
  0x13   : > { %p698_p13 = pneg %p933_p11 }
  0x15   : > { %p699_p0 = pnand %p698_p13, %p697_p12 }
  0x17   : > { %p700_p3 = pneg %p699_p0 }
  0x19   : > { %p705_p7 = pnand %p703_p5, %p700_p3 }
  0x1b   : > { %708 = shalt.err (!%p705_p7)
}
  0x1c   : > { %s709_s6 = scalar_lea.vmem %s926_s22, 576  ;;  %p717_p2 = scmp.lt.s32.totalorder %s926_s22, %s926_s22 }
  0x1d   : > { %p710_p9 = scmp.ne.s32.totalorder %s926_s22, %s709_s6  ;;  %p718_p12 = scmp.lt.s32.totalorder %s709_s6, %s709_s6 }
  0x1f   : > { %p712_p10 = pnand %p710_p9, %p698_p13  ;;  %p719_p0 = por %p718_p12, %p717_p2 }
  0x21   : > { %p713_p1 = pneg %p712_p10 }
  0x23   : > { %p720_p6 = pnand %p719_p0, %p713_p1 }
  0x25   : > { %723 = shalt.err (!%p720_p6)
}
  0x26   : > { %s856_s7 = smov 64   ;;  %s857_s8 = smov 4  }
  0x27   : > { %631 = dma.hbm_to_vmem [thread:$0]  (!%p933_p11), %s1146_s1, 576, %s926_s22, [#allocation6], %s856_s7, %s856_s7, %s857_s8  }
  0x28   : > { %s724_s21 = scalar_lea.hbm %s1147_s2, 16 }
  0x29   : > { %p725_p1 = scmp.ne.s32.totalorder %s1147_s2, %s724_s21  ;;  %p731_p10 = scmp.lt.u32.totalorder %s724_s21, %s1147_s2 }
  0x2b   : > { %p727_p2 = pnand %p725_p1, %p698_p13 }
  0x2d   : > { %p728_p6 = pneg %p727_p2 }
  0x2f   : > { %p733_p3 = pnand %p731_p10, %p728_p6 }
  0x31   : > { %736 = shalt.err (!%p733_p3)
}
  0x32   : > { %s737_s22 = scalar_lea.vmem %s937_s25, 16  ;;  %s744_s29 = scalar_lea.vmem %s937_s25, 32 }
  0x33   : > { %p738_p5 = scmp.ne.s32.totalorder %s937_s25, %s737_s22  ;;  %p745_p12 = scmp.lt.s32.totalorder %s937_s25, %s937_s25 }
  0x34   : > { %p746_p0 = scmp.lt.s32.totalorder %s744_s29, %s737_s22 }
  0x35   : > { %p740_p7 = pnand %p738_p5, %p698_p13 }
  0x36   : > { %p747_p1 = por %p746_p0, %p745_p12 }
  0x37   : > { %p741_p9 = pneg %p740_p7 }
  0x39   : > { %p748_p2 = pnand %p747_p1, %p741_p9 }
  0x3b   : > { %751 = shalt.err (!%p748_p2)
}
  0x3c   : > { %634 = dma.hbm_to_vmem [thread:$0]  (!%p933_p11), %s1147_s2, 16, %s937_s25, [#allocation6]  }
  0x3d   : > { %s996_s5 = sadd.s32 1, %s852_s15   ;;  %s27_s23 = sadd.s32 1, %s848_s14 }
  0x3e   : > { %s24_s6 = ssub.s32 %s852_s15, %s996_s5  ;;  %p34_p13 = scmp.ne.s32.totalorder %s848_s14, %s844_s13 }
  0x3f   : > { %p25_p6 = scmp.eq.s32.totalorder %s24_s6, 0  ;;  %p35_p10 = scmp.eq.s32.totalorder %s852_s15, 0 }
  0x40   : > { %p1156_p3 = scmp.eq.s32.totalorder %s903_s16, 1  ;;  %p645_p7 = scmp.lt.s32.totalorder %s852_s15, 2 }
  0x41   : > { %s1012_s10 = scalar_select %p25_p6, %s848_s14, %s27_s23  }
  0x42   : > { %p1006_p5 = por %p1156_p3, %p34_p13  ;;  %p36_p9 = por %p35_p10, %p34_p13 }
  0x43   : > { %s156_s11 = sand.u32 1, %s848_s14   ;;  %s567_s25 = sshll.u32 %s852_s15, 9 }
  0x44   : > { %s1157_s9 = scalar_select %p1006_p5, 1, 0 }
  0x45   : > { %s532_s17 = sshll.u32 %s156_s11, 5  ;;  %s1019_s26 = scalar_lea.hbm %s1145_s0, %s567_s25 }
  0x46   : > { %s160_s27 = scalar_lea.vmem [#allocation2], %s532_s17  ;;  %p1023_p11 = pnand %p645_p7, %p36_p9 }
  0x47   : > { %s167_s28 = sshll.u32 %s160_s27, 4  ;;  %s1027_s29 = scalar_lea.sflag [#allocation3], %s156_s11  ;;  %s1021_s28 = int_to_ptr.vmem [resolvable:$true] %s167_s28 }
  0x48   : > { %s752_s30 = scalar_lea.hbm %s1019_s26, 512  ;;  %p754_p0 = pneg %p1023_p11 }
  0x49   : > { %p753_p12 = scmp.ne.s32.totalorder %s1019_s26, %s752_s30  ;;  %s757_s6 = scalar_lea.hbm %s1145_s0, 1024 }
  0x4a   : > { %p758_p13 = scmp.lt.u32.totalorder %s1019_s26, %s1145_s0  ;;  %p759_p6 = scmp.lt.u32.totalorder %s757_s6, %s752_s30 }
  0x4b   : > { %p755_p1 = pnand %p754_p0, %p753_p12  ;;  %p761_p3 = scmp.lt.u32.totalorder %s752_s30, %s1019_s26 }
  0x4c   : > { %p760_p10 = por %p759_p6, %p758_p13 }
  0x4d   : > { %p756_p2 = pneg %p755_p1 }
  0x4e   : > { %p762_p7 = por %p761_p3, %p760_p10 }
  0x50   : > { %p763_p9 = pnand %p762_p7, %p756_p2 }
  0x52   : > { %766 = shalt.err (!%p763_p9)
}
  0x53   : > { %s767_s11 = scalar_lea.vmem %s1021_s28, 512  ;;  %s858_s21 = smov [#allocation2]  }
  0x54   : > { %p768_p12 = scmp.ne.s32.totalorder %s1021_s28, %s767_s11  ;;  %s772_s24 = sshll.u32 %s858_s21, 4  ;;  %s773_s24 = int_to_ptr.vmem [resolvable:$false] %s772_s24 }
  0x55   : > { %s774_s27 = scalar_lea.vmem %s773_s24, 1024  ;;  %p775_p4 = scmp.lt.s32.totalorder %s1021_s28, %s773_s24 }
  0x56   : > { %p770_p1 = pnand %p768_p12, %p754_p0  ;;  %p776_p13 = scmp.lt.s32.totalorder %s774_s27, %s767_s11 }
  0x58   : > { %p771_p5 = pneg %p770_p1  ;;  %p777_p6 = por %p776_p13, %p775_p4 }
  0x5a   : > { %p778_p10 = pnand %p777_p6, %p771_p5 }
  0x5c   : > { %781 = shalt.err (!%p778_p10)
}
  0x5d   : > { %638 = dma.hbm_to_vmem [thread:$0]  (!%p1023_p11), %s1019_s26, 512, %s1021_s28, %s1027_s29, %s856_s7, %s856_s7, %s857_s8  }
  0x5e   : > { %179 = sbr.rel (%p922_p8) target bundleno = 362 (0x16a), region = 32  ;;  %s1061_s30 = sand.u32 (!%p922_p8), 1, %s844_s13  }
  0x5f   : > { %s536_s4 = sshll.u32 (!%p922_p8), %s1061_s30, 5  ;;  %s182_s23 = scalar_lea.sflag (!%p922_p8), [#allocation3], %s1061_s30 }
  0x60   : > { %s1067_s22 = scalar_lea.vmem (!%p922_p8), [#allocation2], %s536_s4  ;;  %p1159_p4 = scmp.ne.s32.totalorder (!%p922_p8), %s1152_s18, 0 }
  0x65   : > { %827 = dma.done.wait (%p1159_p4), %s182_s23, 512  }
  0x66   : > { %829 = vsyncadd (%p1159_p4), %s182_s23, 4294966784  ;;  %p1160_p5 = scmp.eq.s32.totalorder %s903_s16, 0 }
  0x68   : > { %831 = dma.done.wait (%p1160_p5), [#allocation6], 592   ;;  %p1161_p8 = pmov %p1160_p5 }
  0x69   : > { %v687_v0 = vld [vmem:[#allocation5] sm:$0xff]   ;;  %v688_v1 = vld [vmem:[#allocation5 + $0x8] sm:$0xff]   ;;  %v689_v2 = vld [vmem:[#allocation5 + $0x10] sm:$0xff]   ;;  %vm290_vm0 = vcmask 588800   ;;  %vm303_vm1 = vcmask 1043456   ;;  %vm412_vm2 = vcmask 125952  }
  0x6a   : > { %833 = vsyncadd (%p1161_p8), [#allocation6], 4294966704  ;;  %586 = vmatprep.subr.bf16.mxu0 %v687_v0  ;;  %604 = vmatprep.subr.bf16.mxu1 %v687_v0  ;;  %v692_v3 = vld [vmem:[%s1067_s22] sm:$0xff]   ;;  %v693_v4 = vld [vmem:[%s1067_s22 + $0x10] sm:$0xff]   ;;  %s576_s18 = sshll.u32 %s903_s16, 9  ;;  %s215_s20 = scalar_lea.vmem [#allocation8], %s536_s4 }
  0x6b   : > { %587 = vmatpush3.bf16.msra.mxu0 %v687_v0  ;;  %609 = vmatpush3.bf16.msra.mxu1 %v687_v0  ;;  %v690_v5 = vld [vmem:[#allocation5 + $0x18] sm:$0xff]   ;;  %v691_v6 = vld [vmem:[#allocation5 + $0x20] ss:$0 sps:$4 sm:$0xff]   ;;  %v694_v8 = vld [vmem:[%s1067_s22 + $0x8] sm:$0xff]   ;;  %s435_s7 = sshll.u32 %s215_s20, 4  ;;  %s1093_s26 = scalar_lea.hbm %s1148_s3, %s576_s18  ;;  %s1095_s7 = int_to_ptr.vmem [resolvable:$true] %s435_s7 }
  0x6c   : > { %588 = vmatprep.subr.bf16.mxu0 %v688_v1  ;;  %605 = vmatprep.subr.bf16.mxu1 %v688_v1  ;;  %v305_v7 = vsel %vm303_vm1, %v691_v6, 0  ;;  %v695_v9 = vld [vmem:[%s1067_s22 + $0x18] sm:$0xff]   ;;  %v540_v10 = vld [vmem:[#allocation7] ss:$0 sm:$0xff]  ;;  %s422_s28 = scalar_lea.sflag [#allocation4], %s1061_s30  ;;  %s782_s29 = scalar_lea.vmem %s1095_s7, 512 }
  0x6d   : > { %596 = vmatprep.mubr.msk.bf16.mxu0 %vm290_vm0, %v692_v3  ;;  %600 = vmatprep.mubr.msk.bf16.mxu1 %vm290_vm0, %v693_v4  ;;  %p783_p11 = scmp.ne.s32.totalorder %s1095_s7, %s782_s29  ;;  %p1162_p0 = scmp.ne.s32.totalorder %s1157_s9, 0 }
  0x6e   : > { %s859_s6 = smov [#allocation8]  }
  0x6f   : > { %589 = vmatpush3.bf16.msra.mxu0 %v688_v1  ;;  %610 = vmatpush3.bf16.msra.mxu1 %v688_v1  ;;  %p784_p2 = pnand %p783_p11, %p1162_p0  ;;  %s786_s17 = sshll.u32 %s859_s6, 4  ;;  %s787_s17 = int_to_ptr.vmem [resolvable:$false] %s786_s17 }
  0x70   : > { %590 = vmatprep.subr.bf16.mxu0 %v689_v2  ;;  %606 = vmatprep.subr.bf16.mxu1 %v689_v2  ;;  %s788_s25 = scalar_lea.vmem %s787_s17, 1024  ;;  %p789_p7 = scmp.lt.s32.totalorder %s1095_s7, %s787_s17 }
  0x71   : > { %p785_p3 = pneg %p784_p2  ;;  %p790_p9 = scmp.lt.s32.totalorder %s788_s25, %s782_s29 }
  0x73   : > { %591 = vmatpush3.bf16.msra.mxu0 %v689_v2  ;;  %611 = vmatpush3.bf16.msra.mxu1 %v689_v2  ;;  %p791_p12 = por %p790_p9, %p789_p7 }
  0x74   : > { %592 = vmatprep.subr.bf16.mxu0 %v690_v5  ;;  %607 = vmatprep.subr.bf16.mxu1 %v690_v5 }
  0x75   : > { %p792_p1 = pnand %p791_p12, %p785_p3 }
  0x77   : > { %593 = vmatpush3.bf16.msra.mxu0 %v690_v5  ;;  %612 = vmatpush3.bf16.msra.mxu1 %v690_v5 }
  0x78   : > { %614 = vmatprep.subr.msk.bf16.mxu0 %vm303_vm1, %v691_v6  ;;  %615 = vmatprep.subr.msk.bf16.mxu1 %vm303_vm1, %v691_v6 }
  0x7b   : > { %595 = vmatpush3.bf16.msra.mxu0 %v305_v7  ;;  %613 = vmatpush3.bf16.msra.mxu1 %v305_v7 }
  0x7e   : > { %597 = vmatmul.mubr.msk.bf16.vlgmr.msra.gmra.mrb[0].mxu0 %vm290_vm0, %v694_v8  ;;  %601 = vmatmul.mubr.msk.bf16.vlgmr.msra.gmra.mrb[0].mxu1 %vm290_vm0, %v695_v9 }
 0x151   : > { %v598_v11 = vpop.f32.mrb[0].mxu0  ;;  %v602_v12 = vpop.f32.mrb[0].mxu1 }
 0x152   : > { %v350_v13 = vadd.f32 %v598_v11, %v540_v10  ;;  %v366_v14 = vadd.f32 %v602_v12, %v540_v10  ;;  %v341_v15 = vpop.f32.mrb[1].mxu0  ;;  %v357_v16 = vpop.f32.mrb[1].mxu1 }
 0x153   : > { %v342_v17 = vadd.f32 %v540_v10, %v341_v15  ;;  %v358_v18 = vadd.f32 %v540_v10, %v357_v16  ;;  %v599_v19 = vpop.f32.mrb[2].mxu0  ;;  %v603_v20 = vpop.f32.mrb[2].mxu1 }
 0x154   : > { %v374_v21 = vmax.f32 %v350_v13, 0.0  ;;  %v378_v22 = vmax.f32 %v366_v14, 0.0  ;;  %v353_v23 = vadd.f32 %v599_v19, %v540_v10  ;;  %v369_v24 = vadd.f32 %v603_v20, %v540_v10  ;;  %v344_v25 = vpop.f32.mrb[3].mxu0  ;;  %v360_v26 = vpop.f32.mrb[3].mxu1 }
 0x155   : > { %v372_v27 = vmax.f32 %v342_v17, 0.0  ;;  %v376_v28 = vmax.f32 %v358_v18, 0.0  ;;  %v345_v29 = vadd.f32 %v540_v10, %v344_v25  ;;  %v361_v30 = vadd.f32 %v540_v10, %v360_v26 }
 0x156   : > { %v570_v31 = vpack.c.bf16 %v374_v21, %v374_v21  ;;  %v574_v32 = vpack.c.bf16 %v378_v22, %v378_v22  ;;  %v375_v33 = vmax.f32 %v353_v23, 0.0  ;;  %v379_v34 = vmax.f32 %v369_v24, 0.0 }
 0x157   : > { %v568_v35 = vpack.c.bf16 %v372_v27, %v372_v27  ;;  %v572_v36 = vpack.c.bf16 %v376_v28, %v376_v28  ;;  %v373_v37 = vmax.f32 %v345_v29, 0.0  ;;  %v377_v38 = vmax.f32 %v361_v30, 0.0 }
 0x158   : > { %415 = vst.msk [vmem:[%s215_s20 + $0x8] sm:$0xf] %vm412_vm2, %v570_v31  ;;  %419 = vst.msk [vmem:[%s215_s20 + $0x18] sm:$0xf] %vm412_vm2, %v574_v32  ;;  %v571_v39 = vpack.c.bf16 %v375_v33, %v375_v33  ;;  %v575_v40 = vpack.c.bf16 %v379_v34, %v379_v34 }
 0x159   : > { %413 = vst.msk [vmem:[%s215_s20] sm:$0xf] %vm412_vm2, %v568_v35  ;;  %417 = vst.msk [vmem:[%s215_s20 + $0x10] sm:$0xf] %vm412_vm2, %v572_v36  ;;  %v569_v41 = vpack.c.bf16 %v373_v37, %v373_v37  ;;  %v573_v42 = vpack.c.bf16 %v377_v38, %v377_v38 }
 0x15a   : > { %416 = vst.msk [vmem:[%s215_s20 + $0xc] sm:$0xf] %vm412_vm2, %v571_v39  ;;  %420 = vst.msk [vmem:[%s215_s20 + $0x1c] sm:$0xf] %vm412_vm2, %v575_v40 }
 0x15b   : > { %414 = vst.msk [vmem:[%s215_s20 + $0x4] sm:$0xf] %vm412_vm2, %v569_v41  ;;  %418 = vst.msk [vmem:[%s215_s20 + $0x14] sm:$0xf] %vm412_vm2, %v573_v42 }
 0x15c   : > { %795 = shalt.err (!%p792_p1)
}
 0x15d   : > { %s796_s11 = scalar_lea.hbm %s1093_s26, 512  ;;  %s800_s27 = scalar_lea.hbm %s1148_s3, 1024 }
 0x15e   : > { %p797_p13 = scmp.ne.s32.totalorder %s1093_s26, %s796_s11  ;;  %p801_p4 = scmp.lt.u32.totalorder %s1093_s26, %s1148_s3 }
 0x15f   : > { %p802_p5 = scmp.lt.u32.totalorder %s800_s27, %s796_s11  ;;  %p804_p11 = scmp.lt.u32.totalorder %s796_s11, %s1093_s26 }
 0x160   : > { %p798_p6 = pnand %p797_p13, %p1162_p0 }
 0x161   : > { %p803_p8 = por %p802_p5, %p801_p4 }
 0x162   : > { %p799_p10 = pneg %p798_p6 }
 0x163   : > { %p805_p2 = por %p804_p11, %p803_p8 }
 0x165   : > { %p806_p3 = pnand %p805_p2, %p799_p10 }
 0x167   : > { %809 = shalt.err (!%p806_p3)
}
 0x168   : > { %s860_s22 = smov 64   ;;  %s861_s18 = smov 4  }
 0x169   : > { %626 = dma.vmem_to_hbm [thread:$0]  (%p1162_p0), %s1095_s7, 512, %s1093_s26, %s422_s28, %s860_s22, %s860_s22, %s861_s18  }
 0x16a PF: > { %s450_s20 = sand.u32 1, %s840_s12   ;;  %p1163_p7 = scmp.ne.s32.totalorder %s1153_s19, 0 }
 0x16b   : > { %p1164_p9 = scmp.ge.s32.totalorder %s852_s15, 2  ;;  %s451_s16 = scalar_lea.sflag [#allocation4], %s450_s20 }
 0x16d   : > { %p640_p12 = pnand %p1164_p9, %p1163_p7 }
 0x16f   : > { %835 = dma.done.wait (!%p640_p12), %s451_s16, 512  }
 0x170   : > { %837 = vsyncadd (!%p640_p12), %s451_s16, 4294966784  ;;  %p17_p1 = scmp.ge.s32.totalorder %s996_s5, 4   ;;  %s1165_s12 = smov %s844_s13 }
 0x171   : > { %s1166_s13 = smov %s848_s14  ;;  %s1167_s14 = smov %s1012_s10 }
 0x172   : > { %s1168_s15 = smov %s996_s5  ;;  %19 = sbr.rel (!%p17_p1) target bundleno = 6 (0x6), region = 85 }
 0x179   :  { %456 = vsyncpa [#allocation3], 1 }
 0x17a   :  { %458 = vsyncpa [#allocation3 + $0x1], 1 }
 0x17b   :  { %459 = vsyncpa [#allocation6], 1 }
 0x17c   :  { %460 = vsyncpa [#allocation4], 1 }
 0x17d   :  { %462 = vsyncpa [#allocation4 + $0x1], 1 }

// kernel: _lambda_.18
= control target key start
LH: loop header
LB: loop body
LE: loop exit
PB: predicated region body
PF: predicated region fallthrough
CT: control target
= control target key end

     0   :  { %8 = vsyncpa [#allocation3], 0  ;;  %s1051_s0 = inlined_call_operand.hbm [shape: bf16[128,8], index: 0, kind: input, shape index: {}]   ;;  %s1052_s1 = inlined_call_operand.hbm [shape: bf16[8,16], index: 1, kind: input, shape index: {}]   ;;  %s1053_s2 = inlined_call_operand.hbm [shape: f32[1,16], index: 2, kind: input, shape index: {}]   ;;  %s1054_s3 = inlined_call_operand.hbm [shape: bf16[128,16], index: 3, kind: output, shape index: {}]  }
   0x1   :  { %10 = vsyncpa [#allocation3 + $0x1], 0 }
   0x2   :  { %11 = vsyncpa [#allocation6], 0 }
   0x3   :  { %12 = vsyncpa [#allocation4], 0 }
   0x4   :  { %14 = vsyncpa [#allocation4 + $0x1], 0  ;;  %s807_s12 = smov 0   ;;  %s809_s13 = smov 0  }
   0x5   :  { %s811_s14 = smov 0   ;;  %s813_s15 = smov 0  }
   0x6 LB: > { %s828_s16 = sadd.s32 4294967295, %s777_s15   ;;  %s482_s17 = sadd.s32 4294967294, %s777_s15   ;;  %s777_s15 = sphi %s813_s15, %s1079_s15   ;;  %s773_s14 = sphi %s811_s14, %s1078_s14   ;;  %s769_s13 = sphi %s809_s13, %s1077_s13   ;;  %s765_s12 = sphi %s807_s12, %s1076_s12  }
   0x7   : > { %s832_s18 = sadd.s32 1, %s777_s15   ;;  %s27_s19 = sadd.s32 1, %s773_s14 }
   0x8   : > { %s24_s20 = ssub.s32 %s777_s15, %s832_s18  ;;  %p34_p0 = scmp.ne.s32.totalorder %s773_s14, %s769_s13 }
   0x9   : > { %p25_p1 = scmp.eq.s32.totalorder %s24_s20, 0  ;;  %p35_p2 = scmp.eq.s32.totalorder %s777_s15, 0 }
   0xa   : > { %p40_p3 = scmp.ne.s32.totalorder %s769_s13, %s765_s12  ;;  %p1055_p4 = scmp.eq.s32.totalorder %s828_s16, 0 }
   0xb   : > { %s844_s21 = scalar_select %p25_p1, %s773_s14, %s27_s19  }
   0xc   : > { %p846_p5 = por %p35_p2, %p34_p0  ;;  %p852_p6 = por %p1055_p4, %p40_p3 }
   0xd   : > { %p106_p7 = scmp.eq.s32.totalorder %s828_s16, 1  ;;  %p112_p8 = scmp.eq.s32.totalorder %s482_s17, 1 }
   0xe   : > { %s1061_s23 = scalar_select %p852_p6, 1, 0 }
   0xf   : > { %p483_p9 = scmp.ge.s32.totalorder %s777_s15, 1  ;;  %p119_p10 = scmp.lt.s32.totalorder %s777_s15, 3 }
  0x10   : > { %p859_p11 = por %p106_p7, %p34_p0  ;;  %p863_p12 = por %p112_p8, %p40_p3 }
  0x11   : > { %p867_p13 = pnand %p483_p9, %p119_p10  ;;  %s779_s27 = smov [#allocation5]  }
  0x12   : > { %s1062_s24 = scalar_select %p859_p11, 1, 0 }
  0x13   : > { %s1063_s25 = scalar_select %p863_p12, 1, 0 }
  0x14   : > { %s1064_s26 = scalar_select %p867_p13, 1, 0 }
  0x15   : > { %p558_p2 = pneg %p867_p13  ;;  %s132_s28 = sshll.u32 %s779_s27, 4  ;;  %s133_s28 = int_to_ptr.vmem [resolvable:$true] %s132_s28 }
  0x16   : > { %p575_p4 = scmp.lt.s32.totalorder %s777_s15, 2  ;;  %p1065_p0 = scmp.eq.s32.totalorder %s828_s16, 0 }
  0x17   : > { %s780_s4 = smov [#allocation7]   ;;  %s621_s8 = scalar_lea.hbm %s1052_s1, 64 }
  0x18   : > { %p877_p7 = pnand %p558_p2, %p1065_p0  ;;  %p883_p3 = pnand %p575_p4, %p846_p5 }
  0x19   : > { %s143_s5 = sshll.u32 %s780_s4, 4  ;;  %p622_p8 = scmp.ne.s32.totalorder %s1052_s1, %s621_s8  ;;  %s887_s5 = int_to_ptr.vmem [resolvable:$true] %s143_s5 }
  0x1a   : > { %s1067_s30 = scalar_select %p883_p3, 1, 0 }
  0x1b   : > { %p623_p9 = pneg %p877_p7  ;;  %p628_p10 = scmp.lt.u32.totalorder %s621_s8, %s1052_s1 }
  0x1d   : > { %p624_p4 = pnand %p623_p9, %p622_p8 }
  0x1f   : > { %p625_p5 = pneg %p624_p4 }
  0x21   : > { %p630_p2 = pnand %p628_p10, %p625_p5 }
  0x23   : > { %633 = shalt.err (!%p630_p2)
}
  0x24   : > { %s634_s19 = scalar_lea.vmem %s133_s28, 64  ;;  %p642_p11 = scmp.lt.s32.totalorder %s133_s28, %s133_s28 }
  0x25   : > { %p635_p0 = scmp.ne.s32.totalorder %s133_s28, %s634_s19  ;;  %p643_p6 = scmp.lt.s32.totalorder %s634_s19, %s634_s19 }
  0x27   : > { %p637_p1 = pnand %p635_p0, %p623_p9  ;;  %p644_p13 = por %p643_p6, %p642_p11 }
  0x29   : > { %p638_p12 = pneg %p637_p1 }
  0x2b   : > { %p645_p3 = pnand %p644_p13, %p638_p12 }
  0x2d   : > { %648 = shalt.err (!%p645_p3)
}
  0x2e   : > { %561 = dma.hbm_to_vmem [thread:$0]  (!%p877_p7), %s1052_s1, 64, %s133_s28, [#allocation6]  }
  0x2f   : > { %s154_s27 = sand.u32 1, %s773_s14   ;;  %s649_s7 = scalar_lea.hbm %s1053_s2, 16 }
  0x30   : > { %p650_p1 = scmp.ne.s32.totalorder %s1053_s2, %s649_s7  ;;  %p656_p12 = scmp.lt.u32.totalorder %s649_s7, %s1053_s2 }
  0x32   : > { %p652_p6 = pnand %p650_p1, %p623_p9 }
  0x34   : > { %p653_p11 = pneg %p652_p6 }
  0x36   : > { %p658_p13 = pnand %p656_p12, %p653_p11 }
  0x38   : > { %661 = shalt.err (!%p658_p13)
}
  0x39   : > { %s662_s28 = scalar_lea.vmem %s887_s5, 16  ;;  %s669_s17 = scalar_lea.vmem %s887_s5, 32 }
  0x3a   : > { %p663_p3 = scmp.ne.s32.totalorder %s887_s5, %s662_s28  ;;  %p670_p5 = scmp.lt.s32.totalorder %s887_s5, %s887_s5 }
  0x3b   : > { %p671_p10 = scmp.lt.s32.totalorder %s669_s17, %s662_s28 }
  0x3c   : > { %p665_p8 = pnand %p663_p3, %p623_p9 }
  0x3d   : > { %p672_p2 = por %p671_p10, %p670_p5 }
  0x3e   : > { %p666_p4 = pneg %p665_p8 }
  0x40   : > { %p673_p0 = pnand %p672_p2, %p666_p4 }
  0x42   : > { %676 = shalt.err (!%p673_p0)
}
  0x43   : > { %564 = dma.hbm_to_vmem [thread:$0]  (!%p877_p7), %s1053_s2, 16, %s887_s5, [#allocation6]  }
  0x44   : > { %s487_s22 = sshll.u32 %s154_s27, 5  ;;  %s517_s4 = sshll.u32 %s777_s15, 9 }
  0x45   : > { %s942_s8 = scalar_lea.hbm %s1051_s0, %s517_s4  ;;  %s158_s29 = scalar_lea.vmem [#allocation2], %s487_s22 }
  0x46   : > { %s165_s9 = sshll.u32 %s158_s29, 4  ;;  %s946_s10 = scalar_lea.sflag [#allocation3], %s154_s27  ;;  %s944_s9 = int_to_ptr.vmem [resolvable:$true] %s165_s9 }
  0x47   : > { %s677_s11 = scalar_lea.hbm %s942_s8, 512  ;;  %p1068_p7 = scmp.ne.s32.totalorder %s1067_s30, 0 }
  0x48   : > { %p678_p9 = scmp.ne.s32.totalorder %s942_s8, %s677_s11  ;;  %s682_s17 = scalar_lea.hbm %s1051_s0, 1024 }
  0x49   : > { %p679_p1 = pneg %p1068_p7  ;;  %p683_p12 = scmp.lt.u32.totalorder %s942_s8, %s1051_s0 }
  0x4a   : > { %p684_p13 = scmp.lt.u32.totalorder %s682_s17, %s677_s11  ;;  %p686_p8 = scmp.lt.u32.totalorder %s677_s11, %s942_s8 }
  0x4b   : > { %p680_p6 = pnand %p679_p1, %p678_p9 }
  0x4c   : > { %p685_p3 = por %p684_p13, %p683_p12 }
  0x4d   : > { %p681_p11 = pneg %p680_p6 }
  0x4e   : > { %p687_p4 = por %p686_p8, %p685_p3 }
  0x50   : > { %p688_p5 = pnand %p687_p4, %p681_p11 }
  0x52   : > { %691 = shalt.err (!%p688_p5)
}
  0x53   : > { %s692_s27 = scalar_lea.vmem %s944_s9, 512  ;;  %s781_s22 = smov [#allocation2]  }
  0x54   : > { %p693_p10 = scmp.ne.s32.totalorder %s944_s9, %s692_s27  ;;  %s697_s4 = sshll.u32 %s781_s22, 4  ;;  %s698_s4 = int_to_ptr.vmem [resolvable:$false] %s697_s4 }
  0x55   : > { %s699_s6 = scalar_lea.vmem %s698_s4, 1024  ;;  %p700_p9 = scmp.lt.s32.totalorder %s944_s9, %s698_s4 }
  0x56   : > { %p695_p2 = pnand %p693_p10, %p679_p1  ;;  %p701_p6 = scmp.lt.s32.totalorder %s699_s6, %s692_s27 }
  0x58   : > { %p696_p0 = pneg %p695_p2  ;;  %p702_p12 = por %p701_p6, %p700_p9 }
  0x5a   : > { %p703_p13 = pnand %p702_p12, %p696_p0 }
  0x5c   : > { %706 = shalt.err (!%p703_p13)
}
  0x5d   : > { %s782_s7 = smov 64   ;;  %s783_s29 = smov 4  }
  0x5e   : > { %568 = dma.hbm_to_vmem [thread:$0]  (!%p1068_p7), %s942_s8, 512, %s944_s9, %s946_s10, %s782_s7, %s782_s7, %s783_s29  }
  0x5f   : > { %p1069_p1 = scmp.ne.s32.totalorder %s1064_s26, 0 }
  0x60   : > { %s977_s11 = sand.u32 (!%p1069_p1), 1, %s769_s13   ;;  %p1070_p11 = scmp.ne.s32.totalorder (!%p1069_p1), %s1061_s23, 0 }
  0x61   : > { %177 = sbr.rel (%p1069_p1) target bundleno = 347 (0x15b), region = 32  ;;  %s491_s5 = sshll.u32 (!%p1069_p1), %s977_s11, 5 }
  0x62   : > { %s180_s28 = scalar_lea.sflag (!%p1069_p1), [#allocation3], %s977_s11  ;;  %s183_s17 = scalar_lea.vmem (!%p1069_p1), [#allocation2], %s491_s5 }
  0x68   : > { %752 = dma.done.wait (%p1070_p11), %s180_s28, 512  }
  0x69   : > { %754 = vsyncadd (%p1070_p11), %s180_s28, 4294966784  ;;  %p1071_p7 = scmp.eq.s32.totalorder %s828_s16, 0 }
  0x6b   : > { %756 = dma.done.wait (%p1071_p7), [#allocation6], 80   ;;  %p1072_p3 = pmov %p1071_p7 }
  0x6c   : > { %vm266_vm0 = vcmask 1043456   ;;  %vm253_vm1 = vcmask 64512   ;;  %v225_v0 = vld [vmem:[#allocation5] sm:$0xf]  ;;  %v618_v3 = vld [vmem:[%s183_s17 + $0x10] sm:$0xff]   ;;  %v619_v4 = vld [vmem:[%s183_s17 + $0x8] sm:$0xff]  }
  0x6d   : > { %758 = vsyncadd (%p1072_p3), [#allocation6], 4294967216  ;;  %544 = vmatprep.subr.msk.bf16.mxu0 %vm266_vm0, %v225_v0  ;;  %545 = vmatprep.subr.msk.bf16.mxu1 %vm266_vm0, %v225_v0  ;;  %v268_v1 = vsel %vm266_vm0, %v225_v0, 0  ;;  %v617_v2 = vld [vmem:[%s183_s17] sm:$0xff]   ;;  %v620_v5 = vld [vmem:[%s183_s17 + $0x18] sm:$0xff]   ;;  %vm367_vm2 = vcmask 125952  }
  0x6e   : > { %533 = vmatpush3.bf16.msra.mxu0 %v268_v1  ;;  %543 = vmatpush3.bf16.msra.mxu1 %v268_v1  ;;  %v495_v6 = vld [vmem:[#allocation7] ss:$0 sm:$0xff]  ;;  %s526_s23 = sshll.u32 %s828_s16, 9  ;;  %s213_s26 = scalar_lea.vmem [#allocation8], %s491_s5 }
  0x6f   : > { %534 = vmatprep.mubr.msk.bf16.mxu0 %vm253_vm1, %v617_v2  ;;  %538 = vmatprep.mubr.msk.bf16.mxu1 %vm253_vm1, %v618_v3  ;;  %s390_s30 = sshll.u32 %s213_s26, 4  ;;  %s1000_s9 = scalar_lea.hbm %s1054_s3, %s526_s23  ;;  %s1002_s30 = int_to_ptr.vmem [resolvable:$true] %s390_s30 }
  0x70   : > { %s377_s10 = scalar_lea.sflag [#allocation4], %s977_s11  ;;  %s707_s19 = scalar_lea.vmem %s1002_s30, 512 }
  0x71   : > { %535 = vmatmul.mubr.msk.bf16.vlgmr.msra.gmra.mrb[0].mxu0 %vm253_vm1, %v619_v4  ;;  %539 = vmatmul.mubr.msk.bf16.vlgmr.msra.gmra.mrb[0].mxu1 %vm253_vm1, %v620_v5  ;;  %p708_p8 = scmp.ne.s32.totalorder %s1002_s30, %s707_s19  ;;  %p1073_p4 = scmp.ne.s32.totalorder %s1062_s24, 0 }
  0x72   : > { %s784_s20 = smov [#allocation8]  }
  0x73   : > { %p709_p5 = pnand %p708_p8, %p1073_p4  ;;  %s711_s27 = sshll.u32 %s784_s20, 4  ;;  %s712_s27 = int_to_ptr.vmem [resolvable:$false] %s711_s27 }
  0x74   : > { %s713_s22 = scalar_lea.vmem %s712_s27, 1024  ;;  %p714_p2 = scmp.lt.s32.totalorder %s1002_s30, %s712_s27 }
  0x75   : > { %p710_p10 = pneg %p709_p5  ;;  %p715_p0 = scmp.lt.s32.totalorder %s713_s22, %s707_s19 }
  0x77   : > { %p716_p9 = por %p715_p0, %p714_p2 }
  0x79   : > { %p717_p6 = pnand %p716_p9, %p710_p10 }
 0x144   : > { %v536_v7 = vpop.f32.mrb[0].mxu0  ;;  %v540_v9 = vpop.f32.mrb[0].mxu1 }
 0x145   : > { %v313_v8 = vadd.f32 %v536_v7, %v495_v6  ;;  %v304_v10 = vpop.f32.mrb[1].mxu0  ;;  %v329_v11 = vadd.f32 %v540_v9, %v495_v6  ;;  %v320_v13 = vpop.f32.mrb[1].mxu1 }
 0x146   : > { %v305_v12 = vadd.f32 %v495_v6, %v304_v10  ;;  %v537_v14 = vpop.f32.mrb[2].mxu0  ;;  %v321_v16 = vadd.f32 %v495_v6, %v320_v13  ;;  %v541_v18 = vpop.f32.mrb[2].mxu1 }
 0x147   : > { %v520_v15 = vpack.c.bf16 %v313_v8, %v313_v8  ;;  %v316_v17 = vadd.f32 %v537_v14, %v495_v6  ;;  %v307_v19 = vpop.f32.mrb[3].mxu0  ;;  %v524_v20 = vpack.c.bf16 %v329_v11, %v329_v11  ;;  %v332_v22 = vadd.f32 %v541_v18, %v495_v6  ;;  %v323_v24 = vpop.f32.mrb[3].mxu1 }
 0x148   : > { %v518_v21 = vpack.c.bf16 %v305_v12, %v305_v12  ;;  %v308_v23 = vadd.f32 %v495_v6, %v307_v19  ;;  %v522_v25 = vpack.c.bf16 %v321_v16, %v321_v16  ;;  %v324_v27 = vadd.f32 %v495_v6, %v323_v24 }
 0x149   : > { %370 = vst.msk [vmem:[%s213_s26 + $0x8] sm:$0xf] %vm367_vm2, %v520_v15  ;;  %v521_v26 = vpack.c.bf16 %v316_v17, %v316_v17  ;;  %374 = vst.msk [vmem:[%s213_s26 + $0x18] sm:$0xf] %vm367_vm2, %v524_v20  ;;  %v525_v28 = vpack.c.bf16 %v332_v22, %v332_v22 }
 0x14a   : > { %368 = vst.msk [vmem:[%s213_s26] sm:$0xf] %vm367_vm2, %v518_v21  ;;  %v519_v29 = vpack.c.bf16 %v308_v23, %v308_v23  ;;  %372 = vst.msk [vmem:[%s213_s26 + $0x10] sm:$0xf] %vm367_vm2, %v522_v25  ;;  %v523_v30 = vpack.c.bf16 %v324_v27, %v324_v27 }
 0x14b   : > { %371 = vst.msk [vmem:[%s213_s26 + $0xc] sm:$0xf] %vm367_vm2, %v521_v26  ;;  %375 = vst.msk [vmem:[%s213_s26 + $0x1c] sm:$0xf] %vm367_vm2, %v525_v28 }
 0x14c   : > { %369 = vst.msk [vmem:[%s213_s26 + $0x4] sm:$0xf] %vm367_vm2, %v519_v29  ;;  %373 = vst.msk [vmem:[%s213_s26 + $0x14] sm:$0xf] %vm367_vm2, %v523_v30 }
 0x14d   : > { %720 = shalt.err (!%p717_p6)
}
 0x14e   : > { %s721_s4 = scalar_lea.hbm %s1000_s9, 512  ;;  %s725_s29 = scalar_lea.hbm %s1054_s3, 1024 }
 0x14f   : > { %p722_p12 = scmp.ne.s32.totalorder %s1000_s9, %s721_s4  ;;  %p726_p11 = scmp.lt.u32.totalorder %s1000_s9, %s1054_s3 }
 0x150   : > { %p727_p7 = scmp.lt.u32.totalorder %s725_s29, %s721_s4  ;;  %p729_p8 = scmp.lt.u32.totalorder %s721_s4, %s1000_s9 }
 0x151   : > { %p723_p13 = pnand %p722_p12, %p1073_p4 }
 0x152   : > { %p728_p3 = por %p727_p7, %p726_p11 }
 0x153   : > { %p724_p1 = pneg %p723_p13 }
 0x154   : > { %p730_p5 = por %p729_p8, %p728_p3 }
 0x156   : > { %p731_p10 = pnand %p730_p5, %p724_p1 }
 0x158   : > { %734 = shalt.err (!%p731_p10)
}
 0x159   : > { %s785_s17 = smov 64   ;;  %s786_s23 = smov 4  }
 0x15a   : > { %556 = dma.vmem_to_hbm [thread:$0]  (%p1073_p4), %s1002_s30, 512, %s1000_s9, %s377_s10, %s785_s17, %s785_s17, %s786_s23  }
 0x15b PF: > { %s405_s26 = sand.u32 1, %s765_s12   ;;  %p1074_p2 = scmp.ne.s32.totalorder %s1063_s25, 0 }
 0x15c   : > { %p1075_p0 = scmp.ge.s32.totalorder %s777_s15, 2  ;;  %s406_s16 = scalar_lea.sflag [#allocation4], %s405_s26 }
 0x15e   : > { %p570_p9 = pnand %p1075_p0, %p1074_p2 }
 0x160   : > { %760 = dma.done.wait (!%p570_p9), %s406_s16, 512  }
 0x161   : > { %762 = vsyncadd (!%p570_p9), %s406_s16, 4294966784  ;;  %p17_p6 = scmp.ge.s32.totalorder %s832_s18, 4   ;;  %s1076_s12 = smov %s769_s13 }
 0x162   : > { %s1077_s13 = smov %s773_s14  ;;  %s1078_s14 = smov %s844_s21 }
 0x163   : > { %s1079_s15 = smov %s832_s18  ;;  %19 = sbr.rel (!%p17_p6) target bundleno = 6 (0x6), region = 85 }
 0x16a   :  { %411 = vsyncpa [#allocation3], 1 }
 0x16b   :  { %413 = vsyncpa [#allocation3 + $0x1], 1 }
 0x16c   :  { %414 = vsyncpa [#allocation6], 1 }
 0x16d   :  { %415 = vsyncpa [#allocation4], 1 }
 0x16e   :  { %417 = vsyncpa [#allocation4 + $0x1], 1 }

// kernel: _lambda_.19
= control target key start
LH: loop header
LB: loop body
LE: loop exit
PB: predicated region body
PF: predicated region fallthrough
CT: control target
= control target key end

     0   :  { %9 = vsyncpa [#allocation3], 0  ;;  %s1441_s0 = inlined_call_operand.hbm [shape: bf16[128,144], index: 0, kind: input, shape index: {}]   ;;  %s1442_s1 = inlined_call_operand.hbm [shape: bf16[144,16], index: 1, kind: input, shape index: {}]   ;;  %s1443_s2 = inlined_call_operand.hbm [shape: f32[1,16], index: 2, kind: input, shape index: {}]   ;;  %s1444_s3 = inlined_call_operand.hbm [shape: bf16[128,16], index: 3, kind: input, shape index: {}]   ;;  %s1445_s4 = inlined_call_operand.hbm [shape: bf16[128,16], index: 4, kind: output, shape index: {}]  }
   0x1   :  { %11 = vsyncpa [#allocation3 + $0x1], 0 }
   0x2   :  { %12 = vsyncpa [#allocation6], 0 }
   0x3   :  { %13 = vsyncpa [#allocation9], 0 }
   0x4   :  { %15 = vsyncpa [#allocation9 + $0x1], 0 }
   0x5   :  { %16 = vsyncpa [#allocation4], 0 }
   0x6   :  { %18 = vsyncpa [#allocation4 + $0x1], 0  ;;  %s1122_s15 = smov 0   ;;  %s1124_s16 = smov 0  }
   0x7   :  { %s1126_s17 = smov 0   ;;  %s1128_s18 = smov 0  }
   0x8 LB: > { %s1143_s19 = sadd.s32 4294967295, %s1083_s18   ;;  %s691_s20 = sadd.s32 4294967294, %s1083_s18   ;;  %s1083_s18 = sphi %s1128_s18, %s1475_s18   ;;  %s1079_s17 = sphi %s1126_s17, %s1474_s17   ;;  %s1075_s16 = sphi %s1124_s16, %s1473_s16   ;;  %s1071_s15 = sphi %s1122_s15, %s1472_s15  }
   0x9   : > { %s1147_s21 = sadd.s32 1, %s1083_s18   ;;  %s31_s22 = sadd.s32 1, %s1079_s17 }
   0xa   : > { %s28_s23 = ssub.s32 %s1083_s18, %s1147_s21  ;;  %p38_p0 = scmp.ne.s32.totalorder %s1079_s17, %s1075_s16 }
   0xb   : > { %p29_p1 = scmp.eq.s32.totalorder %s28_s23, 0  ;;  %p39_p2 = scmp.eq.s32.totalorder %s1083_s18, 0 }
   0xc   : > { %p44_p3 = scmp.ne.s32.totalorder %s1075_s16, %s1071_s15  ;;  %p1446_p4 = scmp.eq.s32.totalorder %s1143_s19, 0 }
   0xd   : > { %s1159_s24 = scalar_select %p29_p1, %s1079_s17, %s31_s22  }
   0xe   : > { %p1161_p5 = por %p39_p2, %p38_p0  ;;  %p1167_p6 = por %p1446_p4, %p44_p3 }
   0xf   : > { %1452 = sst [smem:[#allocation15_spill]] %s1159_s24  ;;  %p136_p7 = scmp.eq.s32.totalorder %s1143_s19, 1 }
  0x10   : > { %s1453_s25 = scalar_select %p1161_p5, 1, 0 }
  0x11   : > { %s1454_s26 = scalar_select %p1167_p6, 1, 0 }
  0x12   : > { %p142_p8 = scmp.eq.s32.totalorder %s691_s20, 1  ;;  %p692_p9 = scmp.ge.s32.totalorder %s1083_s18, 1 }
  0x13   : > { %p149_p10 = scmp.lt.s32.totalorder %s1083_s18, 3  ;;  %p1174_p11 = por %p136_p7, %p38_p0 }
  0x14   : > { %p1178_p12 = por %p142_p8, %p44_p3  ;;  %s1085_s30 = smov [#allocation5]  }
  0x15   : > { %s1455_s27 = scalar_select %p1174_p11, 1, 0 }
  0x16   : > { %s1456_s28 = scalar_select %p1178_p12, 1, 0 }
  0x17   : > { %p1182_p13 = pnand %p692_p9, %p149_p10  ;;  %s161_s5 = sshll.u32 %s1085_s30, 4  ;;  %s162_s5 = int_to_ptr.vmem [resolvable:$true] %s161_s5 }
  0x18   : > { %s1086_s7 = smov [#allocation7]   ;;  %s893_s11 = scalar_lea.hbm %s1442_s1, 1152 }
  0x19   : > { %s1457_s29 = scalar_select %p1182_p13, 1, 0 }
  0x1a   : > { %p807_p1 = pneg %p1182_p13  ;;  %s175_s8 = sshll.u32 %s1086_s7, 4  ;;  %s176_s8 = int_to_ptr.vmem [resolvable:$true] %s175_s8 }
  0x1b   : > { %p894_p7 = scmp.ne.s32.totalorder %s1442_s1, %s893_s11 }
  0x1c   : > { %p1190_p2 = pnand %p807_p1, %p1446_p4  ;;  %p900_p1 = scmp.lt.u32.totalorder %s893_s11, %s1442_s1 }
  0x1e   : > { %p895_p8 = pneg %p1190_p2 }
  0x20   : > { %p896_p9 = pnand %p895_p8, %p894_p7 }
  0x22   : > { %p897_p10 = pneg %p896_p9 }
  0x24   : > { %p902_p0 = pnand %p900_p1, %p897_p10 }
  0x26   : > { %905 = shalt.err (!%p902_p0)
}
  0x27   : > { %s906_s22 = scalar_lea.vmem %s162_s5, 1152  ;;  %p914_p11 = scmp.lt.s32.totalorder %s162_s5, %s162_s5 }
  0x28   : > { %p907_p4 = scmp.ne.s32.totalorder %s162_s5, %s906_s22  ;;  %p915_p6 = scmp.lt.s32.totalorder %s906_s22, %s906_s22 }
  0x2a   : > { %p909_p3 = pnand %p907_p4, %p895_p8  ;;  %p916_p13 = por %p915_p6, %p914_p11 }
  0x2c   : > { %p910_p12 = pneg %p909_p3 }
  0x2e   : > { %p917_p5 = pnand %p916_p13, %p910_p12 }
  0x30   : > { %920 = shalt.err (!%p917_p5)
}
  0x31   : > { %s1450_s23 = smov 64   ;;  %s1451_s30 = smov 4  }
  0x32   : > { %810 = dma.hbm_to_vmem [thread:$0]  (!%p1190_p2), %s1442_s1, 1152, %s162_s5, [#allocation6], %s1450_s23, %s1450_s23, %s1451_s30  }
  0x33   : > { %s1222_s10 = sand.u32 1, %s1079_s17   ;;  %s921_s13 = scalar_lea.hbm %s1443_s2, 16 }
  0x34   : > { %p922_p4 = scmp.ne.s32.totalorder %s1443_s2, %s921_s13  ;;  %p928_p11 = scmp.lt.u32.totalorder %s921_s13, %s1443_s2 }
  0x36   : > { %p924_p5 = pnand %p922_p4, %p895_p8 }
  0x38   : > { %p925_p6 = pneg %p924_p5 }
  0x3a   : > { %p930_p12 = pnand %p928_p11, %p925_p6 }
  0x3c   : > { %933 = shalt.err (!%p930_p12)
}
  0x3d   : > { %s934_s5 = scalar_lea.vmem %s176_s8, 16  ;;  %s941_s7 = scalar_lea.vmem %s176_s8, 32 }
  0x3e   : > { %p935_p13 = scmp.ne.s32.totalorder %s176_s8, %s934_s5  ;;  %p942_p7 = scmp.lt.s32.totalorder %s176_s8, %s176_s8 }
  0x3f   : > { %p943_p9 = scmp.lt.s32.totalorder %s941_s7, %s934_s5 }
  0x40   : > { %p937_p0 = pnand %p935_p13, %p895_p8 }
  0x41   : > { %p944_p10 = por %p943_p9, %p942_p7 }
  0x42   : > { %p938_p3 = pneg %p937_p0 }
  0x44   : > { %p945_p1 = pnand %p944_p10, %p938_p3 }
  0x46   : > { %948 = shalt.err (!%p945_p1)
}
  0x47   : > { %813 = dma.hbm_to_vmem [thread:$0]  (!%p1190_p2), %s1443_s2, 16, %s176_s8, [#allocation6]  }
  0x48   : > { %s696_s11 = sshll.u32 %s1222_s10, 6  ;;  %s745_s12 = sshll.u32 %s1083_s18, 10 }
  0x49   : > { %s1249_s20 = scalar_lea.hbm %s1441_s0, %s745_s12  ;;  %s190_s6 = scalar_lea.vmem [#allocation2], %s696_s11 }
  0x4a   : > { %s198_s22 = sshll.u32 %s190_s6, 4  ;;  %p1459_p8 = scmp.ne.s32.totalorder %s1453_s25, 0  ;;  %s1251_s22 = int_to_ptr.vmem [resolvable:$true] %s198_s22 }
  0x4b   : > { %p1460_p4 = scmp.lt.s32.totalorder %s1083_s18, 2  ;;  %s187_s8 = scalar_lea.sflag [#allocation3], %s1222_s10 }
  0x4c   : > { %s949_s7 = scalar_lea.hbm %s1249_s20, 1024  ;;  %s954_s25 = scalar_lea.hbm %s1441_s0, 2048 }
  0x4d   : > { %p1257_p5 = pnand %p1460_p4, %p1459_p8  ;;  %p950_p2 = scmp.ne.s32.totalorder %s1249_s20, %s949_s7 }
  0x4e   : > { %p955_p13 = scmp.lt.u32.totalorder %s1249_s20, %s1441_s0  ;;  %p956_p0 = scmp.lt.u32.totalorder %s954_s25, %s949_s7 }
  0x4f   : > { %p951_p6 = pneg %p1257_p5  ;;  %p958_p7 = scmp.lt.u32.totalorder %s949_s7, %s1249_s20 }
  0x50   : > { %p957_p3 = por %p956_p0, %p955_p13 }
  0x51   : > { %p952_p11 = pnand %p951_p6, %p950_p2 }
  0x52   : > { %p959_p9 = por %p958_p7, %p957_p3 }
  0x53   : > { %p953_p12 = pneg %p952_p11 }
  0x55   : > { %p960_p10 = pnand %p959_p9, %p953_p12 }
  0x57   : > { %963 = shalt.err (!%p960_p10)
}
  0x58   : > { %s964_s13 = scalar_lea.vmem %s1251_s22, 1024  ;;  %s1089_s14 = smov [#allocation2]  }
  0x59   : > { %p965_p1 = scmp.ne.s32.totalorder %s1251_s22, %s964_s13  ;;  %s969_s6 = sshll.u32 %s1089_s14, 4  ;;  %s970_s6 = int_to_ptr.vmem [resolvable:$false] %s969_s6 }
  0x5a   : > { %s971_s9 = scalar_lea.vmem %s970_s6, 2048  ;;  %p972_p2 = scmp.lt.s32.totalorder %s1251_s22, %s970_s6 }
  0x5b   : > { %p967_p8 = pnand %p965_p1, %p951_p6  ;;  %p973_p11 = scmp.lt.s32.totalorder %s971_s9, %s964_s13 }
  0x5d   : > { %p968_p4 = pneg %p967_p8  ;;  %p974_p13 = por %p973_p11, %p972_p2 }
  0x5f   : > { %p975_p0 = pnand %p974_p13, %p968_p4 }
  0x61   : > { %978 = shalt.err (!%p975_p0)
}
  0x62   : > { %s1090_s7 = smov 128   ;;  %s1091_s24 = smov 8  }
  0x63   : > { %817 = dma.hbm_to_vmem [thread:$0]  (!%p1257_p5), %s1249_s20, 1024, %s1251_s22, %s187_s8, %s1090_s7, %s1090_s7, %s1091_s24  }
  0x64   : > { %s700_s25 = sshll.u32 %s1222_s10, 5  ;;  %s746_s11 = sshll.u32 %s1083_s18, 9 }
  0x65   : > { %s1294_s14 = scalar_lea.hbm %s1444_s3, %s746_s11  ;;  %s212_s6 = scalar_lea.vmem [#allocation8], %s700_s25 }
  0x66   : > { %s219_s9 = sshll.u32 %s212_s6, 4  ;;  %s209_s23 = scalar_lea.sflag [#allocation9], %s1222_s10  ;;  %s1296_s9 = int_to_ptr.vmem [resolvable:$true] %s219_s9 }
  0x67   : > { %s979_s30 = scalar_lea.hbm %s1294_s14, 512  ;;  %s984_s8 = scalar_lea.hbm %s1444_s3, 1024 }
  0x68   : > { %p980_p12 = scmp.ne.s32.totalorder %s1294_s14, %s979_s30  ;;  %p985_p9 = scmp.lt.u32.totalorder %s1294_s14, %s1444_s3 }
  0x69   : > { %p986_p10 = scmp.lt.u32.totalorder %s984_s8, %s979_s30  ;;  %p988_p8 = scmp.lt.u32.totalorder %s979_s30, %s1294_s14 }
  0x6a   : > { %p982_p3 = pnand %p980_p12, %p951_p6 }
  0x6b   : > { %p987_p1 = por %p986_p10, %p985_p9 }
  0x6c   : > { %p983_p7 = pneg %p982_p3 }
  0x6d   : > { %p989_p4 = por %p988_p8, %p987_p1 }
  0x6f   : > { %p990_p2 = pnand %p989_p4, %p983_p7 }
  0x71   : > { %993 = shalt.err (!%p990_p2)
}
  0x72   : > { %s994_s25 = scalar_lea.vmem %s1296_s9, 512  ;;  %s1092_s11 = smov [#allocation8]  }
  0x73   : > { %p995_p11 = scmp.ne.s32.totalorder %s1296_s9, %s994_s25  ;;  %s999_s12 = sshll.u32 %s1092_s11, 4  ;;  %s1000_s12 = int_to_ptr.vmem [resolvable:$false] %s999_s12 }
  0x74   : > { %s1001_s13 = scalar_lea.vmem %s1000_s12, 1024  ;;  %p1002_p12 = scmp.lt.s32.totalorder %s1296_s9, %s1000_s12 }
  0x75   : > { %p997_p13 = pnand %p995_p11, %p951_p6  ;;  %p1003_p3 = scmp.lt.s32.totalorder %s1001_s13, %s994_s25 }
  0x77   : > { %p998_p0 = pneg %p997_p13  ;;  %p1004_p9 = por %p1003_p3, %p1002_p12 }
  0x79   : > { %p1005_p10 = pnand %p1004_p9, %p998_p0 }
  0x7b   : > { %1008 = shalt.err (!%p1005_p10)
}
  0x7c   : > { %s1462_s30 = smov 4   ;;  %s1463_s6 = smov 64  }
  0x7d   : > { %820 = dma.hbm_to_vmem [thread:$0]  (!%p1257_p5), %s1294_s14, 512, %s1296_s9, %s209_s23, %s1463_s6, %s1463_s6, %s1462_s30  }
  0x7e   : > { %p1464_p6 = scmp.ne.s32.totalorder %s1457_s29, 0 }
  0x7f   : > { %s1330_s20 = sand.u32 (!%p1464_p6), 1, %s1075_s16   ;;  %p1465_p7 = scmp.ne.s32.totalorder (!%p1464_p6), %s1454_s26, 0 }
  0x80   : > { %231 = sbr.rel (%p1464_p6) target bundleno = 424 (0x1a8), region = 36  ;;  %s704_s22 = sshll.u32 (!%p1464_p6), %s1330_s20, 6 }
  0x81   : > { %s234_s8 = scalar_lea.sflag (!%p1464_p6), [#allocation3], %s1330_s20  ;;  %s1334_s5 = scalar_lea.vmem (!%p1464_p6), [#allocation2], %s704_s22 }
  0x87   : > { %1054 = dma.done.wait (%p1465_p7), %s234_s8, 1024  }
  0x88   : > { %1056 = vsyncadd (%p1465_p7), %s234_s8, 4294966272  ;;  %p1466_p5 = scmp.eq.s32.totalorder %s1143_s19, 0 }
  0x8a   : > { %1058 = dma.done.wait (%p1466_p5), [#allocation6], 1168   ;;  %p1467_p1 = pmov %p1466_p5 }
  0x8b   : > { %s707_s29 = sshll.u32 %s1330_s20, 5  ;;  %s251_s23 = scalar_lea.sflag [#allocation9], %s1330_s20 }
  0x8c   : > { %1060 = vsyncadd (%p1467_p1), [#allocation6], 4294966128  ;;  %s1348_s10 = scalar_lea.vmem [#allocation8], %s707_s29 }
  0x8d   : > { %1062 = dma.done.wait (%p1465_p7), %s251_s23, 512  }
  0x8e   : > { %1064 = vsyncadd (%p1465_p7), %s251_s23, 4294966784  ;;  %v1093_v0 = vmov 0   ;;  %v872_v1 = vld [vmem:[#allocation5] sm:$0xff]   ;;  %v873_v2 = vld [vmem:[#allocation5 + $0x8] sm:$0xff]   ;;  %vm411_vm0 = vcmask 130048   ;;  %vm553_vm1 = vcmask 125952  }
  0x8f   : > { %424 = vmatprep.subr.bf16.mxu0 %v1093_v0  ;;  %775 = vmatprep.subr.bf16.mxu1 %v1093_v0  ;;  %v874_v3 = vld [vmem:[#allocation5 + $0x10] sm:$0xff]   ;;  %v875_v4 = vld [vmem:[#allocation5 + $0x18] sm:$0xff]   ;;  %v883_v5 = vld [vmem:[%s1334_s5 + $0x4] ss:$8 sps:$4 sm:$0xff]   ;;  %s1372_s26 = scalar_lea.vmem [#allocation10], %s707_s29  ;;  %s755_s14 = sshll.u32 %s1143_s19, 9 }
  0x90   : > { %425 = vmatpush1.bf16.msra.mxu0 %v872_v1  ;;  %784 = vmatpush1.bf16.msra.mxu1 %v872_v1  ;;  %v886_v6 = vld [vmem:[%s1334_s5 + $0x24] ss:$8 sps:$4 sm:$0xff]   ;;  %v878_v9 = vld [vmem:[#allocation5 + $0x30] sm:$0xff]   ;;  %v879_v10 = vld [vmem:[#allocation5 + $0x38] sm:$0xff]   ;;  %s576_s9 = sshll.u32 %s1372_s26, 4  ;;  %s1387_s25 = scalar_lea.hbm %s1445_s4, %s755_s14  ;;  %s1389_s9 = int_to_ptr.vmem [resolvable:$true] %s576_s9 }
  0x91   : > { %426 = vmatprep.subr.bf16.mxu0 %v1093_v0  ;;  %776 = vmatprep.subr.bf16.mxu1 %v1093_v0  ;;  %v876_v7 = vld [vmem:[#allocation5 + $0x20] sm:$0xff]   ;;  %v877_v8 = vld [vmem:[#allocation5 + $0x28] sm:$0xff]   ;;  %v887_v14 = vld [vmem:[%s1334_s5 + $0x14] ss:$8 sps:$4 sm:$0xff]   ;;  %s563_s19 = scalar_lea.sflag [#allocation4], %s1330_s20  ;;  %s1009_s11 = scalar_lea.vmem %s1389_s9, 512 }
  0x92   : > { %727 = vmatprep.mubr.msk.bf16.mxu0 %vm411_vm0, %v883_v5  ;;  %729 = vmatprep.mubr.msk.bf16.mxu1 %vm411_vm0, %v886_v6  ;;  %v880_v11 = vld [vmem:[#allocation5 + $0x40] sm:$0xff]   ;;  %v889_v15 = vld [vmem:[%s1334_s5 + $0x34] ss:$8 sps:$4 sm:$0xff]   ;;  %v891_v16 = vld [vmem:[%s1334_s5 + $0x10] ss:$8 sps:$4 sm:$0xff]   ;;  %p1010_p8 = scmp.ne.s32.totalorder %s1389_s9, %s1009_s11  ;;  %p1468_p4 = scmp.ne.s32.totalorder %s1455_s27, 0 }
  0x93   : > { %v881_v12 = vld [vmem:[%s1334_s5] ss:$8 sps:$4 sm:$0xff]   ;;  %v892_v17 = vld [vmem:[%s1334_s5 + $0x30] ss:$8 sps:$4 sm:$0xff]   ;;  %s1094_s12 = smov [#allocation10]  }
  0x94   : > { %427 = vmatpush1.bf16.msra.mxu0 %v873_v2  ;;  %785 = vmatpush1.bf16.msra.mxu1 %v873_v2  ;;  %v884_v13 = vld [vmem:[%s1334_s5 + $0x20] ss:$8 sps:$4 sm:$0xff]   ;;  %v772_v39 = vld [vmem:[%s1348_s10 + $0x8] sm:$0xff]   ;;  %p1011_p2 = pnand %p1010_p8, %p1468_p4  ;;  %s1013_s13 = sshll.u32 %s1094_s12, 4  ;;  %s1014_s13 = int_to_ptr.vmem [resolvable:$false] %s1013_s13 }
  0x95   : > { %428 = vmatprep.subr.bf16.mxu0 %v1093_v0  ;;  %777 = vmatprep.subr.bf16.mxu1 %v1093_v0  ;;  %v757_v18 = vld [vmem:[%s1348_s10] sm:$0xff]   ;;  %v773_v19 = vld [vmem:[%s1348_s10 + $0x10] sm:$0xff]   ;;  %v709_v20 = vld [vmem:[#allocation7] ss:$0 sm:$0xff]  ;;  %v762_v45 = vunpack.c.l.bf16 %v772_v39  ;;  %v763_v53 = vunpack.c.h.bf16 %v772_v39  ;;  %s1015_s30 = scalar_lea.vmem %s1014_s13, 1024  ;;  %p1016_p13 = scmp.lt.s32.totalorder %s1389_s9, %s1014_s13 }
  0x96   : > { %v758_v21 = vunpack.c.l.bf16 %v757_v18  ;;  %v766_v22 = vunpack.c.l.bf16 %v773_v19  ;;  %v759_v29 = vunpack.c.h.bf16 %v757_v18  ;;  %v767_v30 = vunpack.c.h.bf16 %v773_v19  ;;  %v774_v40 = vld [vmem:[%s1348_s10 + $0x18] sm:$0xff]   ;;  %p1012_p11 = pneg %p1011_p2  ;;  %p1017_p0 = scmp.lt.s32.totalorder %s1015_s30, %s1009_s11 }
  0x97   : > { %v770_v46 = vunpack.c.l.bf16 %v774_v40  ;;  %v771_v54 = vunpack.c.h.bf16 %v774_v40 }
  0x98   : > { %429 = vmatpush1.bf16.msra.mxu0 %v874_v3  ;;  %786 = vmatpush1.bf16.msra.mxu1 %v874_v3  ;;  %p1018_p12 = por %p1017_p0, %p1016_p13 }
  0x99   : > { %430 = vmatprep.subr.bf16.mxu0 %v1093_v0  ;;  %778 = vmatprep.subr.bf16.mxu1 %v1093_v0 }
  0x9a   : > { %p1019_p3 = pnand %p1018_p12, %p1012_p11 }
  0x9c   : > { %431 = vmatpush1.bf16.msra.mxu0 %v875_v4  ;;  %787 = vmatpush1.bf16.msra.mxu1 %v875_v4 }
  0x9d   : > { %432 = vmatprep.subr.bf16.mxu0 %v1093_v0  ;;  %779 = vmatprep.subr.bf16.mxu1 %v1093_v0 }
  0xa0   : > { %433 = vmatpush1.bf16.msra.mxu0 %v876_v7  ;;  %788 = vmatpush1.bf16.msra.mxu1 %v876_v7 }
  0xa1   : > { %434 = vmatprep.subr.bf16.mxu0 %v1093_v0  ;;  %780 = vmatprep.subr.bf16.mxu1 %v1093_v0 }
  0xa4   : > { %435 = vmatpush1.bf16.msra.mxu0 %v877_v8  ;;  %789 = vmatpush1.bf16.msra.mxu1 %v877_v8 }
  0xa5   : > { %436 = vmatprep.subr.bf16.mxu0 %v1093_v0  ;;  %781 = vmatprep.subr.bf16.mxu1 %v1093_v0 }
  0xa8   : > { %437 = vmatpush1.bf16.msra.mxu0 %v878_v9  ;;  %790 = vmatpush1.bf16.msra.mxu1 %v878_v9 }
  0xa9   : > { %438 = vmatprep.subr.bf16.mxu0 %v1093_v0  ;;  %782 = vmatprep.subr.bf16.mxu1 %v1093_v0 }
  0xac   : > { %439 = vmatpush1.bf16.msra.mxu0 %v879_v10  ;;  %791 = vmatpush1.bf16.msra.mxu1 %v879_v10 }
  0xad   : > { %440 = vmatprep.subr.bf16.mxu0 %v1093_v0  ;;  %783 = vmatprep.subr.bf16.mxu1 %v1093_v0 }
  0xb0   : > { %441 = vmatpush1.bf16.msra.mxu0 %v880_v11  ;;  %792 = vmatpush1.bf16.msra.mxu1 %v880_v11 }
  0xb3   : > { %457 = vmatmul.mubr.bf16.vlgmr.msra.gmra.mrb[0].mxu0 %v881_v12  ;;  %473 = vmatmul.mubr.bf16.vlgmr.msra.gmra.mrb[0].mxu1 %v884_v13 }
  0xb4   : > { %728 = vmatprep.mubr.msk.bf16.mxu0 %vm411_vm0, %v887_v14  ;;  %730 = vmatprep.mubr.msk.bf16.mxu1 %vm411_vm0, %v889_v15 }
  0xbb   : > { %465 = vmatmul.mubr.bf16.gmra.mrb[4].mxu0 %v891_v16  ;;  %481 = vmatmul.mubr.bf16.gmra.mrb[4].mxu1 %v892_v17 }
 0x186   : > { %v458_v23 = vpop.f32.mrb[0].mxu0  ;;  %v474_v24 = vpop.f32.mrb[0].mxu1 }
 0x187   : > { %v459_v25 = vadd.f32 %v709_v20, %v458_v23  ;;  %v475_v26 = vadd.f32 %v709_v20, %v474_v24  ;;  %v460_v27 = vpop.f32.mrb[1].mxu0  ;;  %v476_v28 = vpop.f32.mrb[1].mxu1 }
 0x188   : > { %v461_v31 = vpop.f32.mrb[2].mxu0  ;;  %v477_v32 = vpop.f32.mrb[2].mxu1 }
 0x189   : > { %v505_v33 = vadd.f32 %v758_v21, %v459_v25  ;;  %v509_v34 = vadd.f32 %v766_v22, %v475_v26  ;;  %v462_v35 = vadd.f32 %v709_v20, %v461_v31  ;;  %v478_v36 = vadd.f32 %v709_v20, %v477_v32  ;;  %v463_v37 = vpop.f32.mrb[3].mxu0  ;;  %v479_v38 = vpop.f32.mrb[3].mxu1 }
 0x18b   : > { %v513_v41 = vmax.f32 %v505_v33, 0.0  ;;  %v517_v42 = vmax.f32 %v509_v34, 0.0  ;;  %v506_v43 = vadd.f32 %v759_v29, %v462_v35  ;;  %v510_v44 = vadd.f32 %v767_v30, %v478_v36 }
 0x18d   : > { %v747_v47 = vpack.c.bf16 %v513_v41, %v513_v41  ;;  %v751_v48 = vpack.c.bf16 %v517_v42, %v517_v42  ;;  %v514_v49 = vmax.f32 %v506_v43, 0.0  ;;  %v518_v50 = vmax.f32 %v510_v44, 0.0 }
 0x18e   : > { %v466_v51 = vpop.f32.mrb[4].mxu0  ;;  %v482_v52 = vpop.f32.mrb[4].mxu1 }
 0x18f   : > { %554 = vst.msk [vmem:[%s1372_s26] sm:$0xf] %vm553_vm1, %v747_v47  ;;  %558 = vst.msk [vmem:[%s1372_s26 + $0x10] sm:$0xf] %vm553_vm1, %v751_v48  ;;  %v748_v55 = vpack.c.bf16 %v514_v49, %v514_v49  ;;  %v752_v56 = vpack.c.bf16 %v518_v50, %v518_v50  ;;  %v467_v57 = vadd.f32 %v709_v20, %v466_v51  ;;  %v468_v59 = vpop.f32.mrb[5].mxu0  ;;  %v484_v60 = vpop.f32.mrb[5].mxu1 }
 0x190   : > { %v483_v58 = vadd.f32 %v709_v20, %v482_v52  ;;  %v469_v61 = vpop.f32.mrb[6].mxu0  ;;  %v485_v62 = vpop.f32.mrb[6].mxu1 }
 0x191   : > { %555 = vst.msk [vmem:[%s1372_s26 + $0x4] sm:$0xf] %vm553_vm1, %v748_v55  ;;  %559 = vst.msk [vmem:[%s1372_s26 + $0x14] sm:$0xf] %vm553_vm1, %v752_v56  ;;  %v507_v63 = vadd.f32 %v762_v45, %v467_v57  ;;  %v470_v1 = vadd.f32 %v709_v20, %v469_v61  ;;  %v486_v2 = vadd.f32 %v709_v20, %v485_v62  ;;  %v471_v3 = vpop.f32.mrb[7].mxu0  ;;  %v487_v4 = vpop.f32.mrb[7].mxu1 }
 0x192   : > { %v511_v0 = vadd.f32 %v770_v46, %v483_v58 }
 0x193   : > { %v515_v5 = vmax.f32 %v507_v63, 0.0  ;;  %v508_v7 = vadd.f32 %v763_v53, %v470_v1  ;;  %v512_v8 = vadd.f32 %v771_v54, %v486_v2 }
 0x194   : > { %v519_v6 = vmax.f32 %v511_v0, 0.0 }
 0x195   : > { %v749_v9 = vpack.c.bf16 %v515_v5, %v515_v5  ;;  %v516_v11 = vmax.f32 %v508_v7, 0.0  ;;  %v520_v12 = vmax.f32 %v512_v8, 0.0 }
 0x196   : > { %v753_v10 = vpack.c.bf16 %v519_v6, %v519_v6 }
 0x197   : > { %556 = vst.msk [vmem:[%s1372_s26 + $0x8] sm:$0xf] %vm553_vm1, %v749_v9  ;;  %v750_v13 = vpack.c.bf16 %v516_v11, %v516_v11  ;;  %v754_v14 = vpack.c.bf16 %v520_v12, %v520_v12 }
 0x198   : > { %560 = vst.msk [vmem:[%s1372_s26 + $0x18] sm:$0xf] %vm553_vm1, %v753_v10 }
 0x199   : > { %557 = vst.msk [vmem:[%s1372_s26 + $0xc] sm:$0xf] %vm553_vm1, %v750_v13  ;;  %561 = vst.msk [vmem:[%s1372_s26 + $0x1c] sm:$0xf] %vm553_vm1, %v754_v14 }
 0x19a   : > { %1022 = shalt.err (!%p1019_p3)
}
 0x19b   : > { %s1023_s6 = scalar_lea.hbm %s1387_s25, 512  ;;  %s1027_s5 = scalar_lea.hbm %s1445_s4, 1024 }
 0x19c   : > { %p1024_p9 = scmp.ne.s32.totalorder %s1387_s25, %s1023_s6  ;;  %p1028_p7 = scmp.lt.u32.totalorder %s1387_s25, %s1445_s4 }
 0x19d   : > { %p1029_p5 = scmp.lt.u32.totalorder %s1027_s5, %s1023_s6  ;;  %p1031_p8 = scmp.lt.u32.totalorder %s1023_s6, %s1387_s25 }
 0x19e   : > { %p1025_p10 = pnand %p1024_p9, %p1468_p4 }
 0x19f   : > { %p1030_p1 = por %p1029_p5, %p1028_p7 }
 0x1a0   : > { %p1026_p6 = pneg %p1025_p10 }
 0x1a1   : > { %p1032_p2 = por %p1031_p8, %p1030_p1 }
 0x1a3   : > { %p1033_p11 = pnand %p1032_p2, %p1026_p6 }
 0x1a5   : > { %1036 = shalt.err (!%p1033_p11)
}
 0x1a6   : > { %s1095_s10 = smov 64   ;;  %s1096_s26 = smov 4  }
 0x1a7   : > { %805 = dma.vmem_to_hbm [thread:$0]  (%p1468_p4), %s1389_s9, 512, %s1387_s25, %s563_s19, %s1095_s10, %s1095_s10, %s1096_s26  }
 0x1a8 PF: > { %s591_s14 = sand.u32 1, %s1071_s15   ;;  %p1469_p13 = scmp.ne.s32.totalorder %s1456_s28, 0 }
 0x1a9   : > { %p1470_p0 = scmp.ge.s32.totalorder %s1083_s18, 2  ;;  %s592_s7 = scalar_lea.sflag [#allocation4], %s591_s14 }
 0x1ab   : > { %p822_p12 = pnand %p1470_p0, %p1469_p13 }
 0x1ad   : > { %1066 = dma.done.wait (!%p822_p12), %s592_s7, 512  }
 0x1ae   : > { %1068 = vsyncadd (!%p822_p12), %s592_s7, 4294966784  ;;  %s1471_s24 = sld [smem:[#allocation15_spill]]  ;;  %p21_p3 = scmp.ge.s32.totalorder %s1147_s21, 4  }
 0x1af   : > { %s1472_s15 = smov %s1075_s16  ;;  %s1473_s16 = smov %s1079_s17 }
 0x1b0   : > { %s1475_s18 = smov %s1147_s21  ;;  %23 = sbr.rel (!%p21_p3) target bundleno = 8 (0x8), region = 102 }
 0x1b4   : > { %s1474_s17 = smov %s1471_s24 }
 0x1b7   :  { %597 = vsyncpa [#allocation3], 1 }
 0x1b8   :  { %599 = vsyncpa [#allocation3 + $0x1], 1 }
 0x1b9   :  { %600 = vsyncpa [#allocation6], 1 }
 0x1ba   :  { %601 = vsyncpa [#allocation9], 1 }
 0x1bb   :  { %603 = vsyncpa [#allocation9 + $0x1], 1 }
 0x1bc   :  { %604 = vsyncpa [#allocation4], 1 }
 0x1bd   :  { %606 = vsyncpa [#allocation4 + $0x1], 1 }

// kernel: _lambda_.20
= control target key start
LH: loop header
LB: loop body
LE: loop exit
PB: predicated region body
PF: predicated region fallthrough
CT: control target
= control target key end

     0   :  { %8 = vsyncpa [#allocation3], 0  ;;  %s1028_s0 = inlined_call_operand.hbm [shape: bf16[32,144], index: 0, kind: input, shape index: {}]   ;;  %s1029_s1 = inlined_call_operand.hbm [shape: bf16[144,32], index: 1, kind: input, shape index: {}]   ;;  %s1030_s2 = inlined_call_operand.hbm [shape: f32[1,32], index: 2, kind: input, shape index: {}]   ;;  %s1031_s3 = inlined_call_operand.hbm [shape: bf16[32,32], index: 3, kind: output, shape index: {}]  }
   0x1   :  { %10 = vsyncpa [#allocation3 + $0x1], 0 }
   0x2   :  { %11 = vsyncpa [#allocation6], 0 }
   0x3   :  { %12 = vsyncpa [#allocation4], 0 }
   0x4   :  { %14 = vsyncpa [#allocation4 + $0x1], 0  ;;  %s788_s12 = smov 0   ;;  %s790_s13 = smov 0  }
   0x5   :  { %s792_s14 = smov 0   ;;  %s794_s15 = smov 0  }
   0x6 LB: > { %s809_s16 = sadd.s32 4294967295, %s755_s15   ;;  %s474_s17 = sadd.s32 4294967294, %s755_s15   ;;  %s755_s15 = sphi %s794_s15, %s1051_s15   ;;  %s751_s14 = sphi %s792_s14, %s1050_s14   ;;  %s747_s13 = sphi %s790_s13, %s1049_s13   ;;  %s743_s12 = sphi %s788_s12, %s1048_s12  }
   0x7   : > { %p40_p0 = scmp.ne.s32.totalorder %s747_s13, %s743_s12  ;;  %p1032_p1 = scmp.eq.s32.totalorder %s809_s16, 0 }
   0x8   : > { %p112_p3 = scmp.eq.s32.totalorder %s474_s17, 1  ;;  %p475_p5 = scmp.ge.s32.totalorder %s755_s15, 1 }
   0x9   : > { %p818_p4 = por %p1032_p1, %p40_p0  ;;  %p119_p7 = scmp.lt.s32.totalorder %s755_s15, 3 }
   0xa   : > { %p823_p6 = por %p112_p3, %p40_p0  ;;  %s757_s21 = smov [#allocation5]  }
   0xb   : > { %s1035_s18 = scalar_select %p818_p4, 1, 0 }
   0xc   : > { %s1036_s19 = scalar_select %p823_p6, 1, 0 }
   0xd   : > { %p828_p8 = pnand %p475_p5, %p119_p7  ;;  %s131_s22 = sshll.u32 %s757_s21, 4  ;;  %s832_s22 = int_to_ptr.vmem [resolvable:$true] %s131_s22 }
   0xe   : > { %s758_s24 = smov [#allocation7]   ;;  %s599_s28 = scalar_lea.hbm %s1029_s1, 1152 }
   0xf   : > { %p525_p9 = pneg %p828_p8  ;;  %s145_s25 = sshll.u32 %s758_s24, 4  ;;  %s843_s25 = int_to_ptr.vmem [resolvable:$true] %s145_s25 }
  0x10   : > { %p600_p12 = scmp.ne.s32.totalorder %s1029_s1, %s599_s28  ;;  %p606_p5 = scmp.lt.u32.totalorder %s599_s28, %s1029_s1 }
  0x11   : > { %p839_p11 = pnand %p525_p9, %p1032_p1 }
  0x13   : > { %p601_p13 = pneg %p839_p11 }
  0x15   : > { %p602_p0 = pnand %p601_p13, %p600_p12 }
  0x17   : > { %p603_p3 = pneg %p602_p0 }
  0x19   : > { %p608_p7 = pnand %p606_p5, %p603_p3 }
  0x1b   : > { %611 = shalt.err (!%p608_p7)
}
  0x1c   : > { %s612_s6 = scalar_lea.vmem %s832_s22, 1152  ;;  %p620_p2 = scmp.lt.s32.totalorder %s832_s22, %s832_s22 }
  0x1d   : > { %p613_p9 = scmp.ne.s32.totalorder %s832_s22, %s612_s6  ;;  %p621_p12 = scmp.lt.s32.totalorder %s612_s6, %s612_s6 }
  0x1f   : > { %p615_p10 = pnand %p613_p9, %p601_p13  ;;  %p622_p0 = por %p621_p12, %p620_p2 }
  0x21   : > { %p616_p1 = pneg %p615_p10 }
  0x23   : > { %p623_p6 = pnand %p622_p0, %p616_p1 }
  0x25   : > { %626 = shalt.err (!%p623_p6)
}
  0x26   : > { %s759_s7 = smov 64   ;;  %s760_s8 = smov 4  }
  0x27   : > { %528 = dma.hbm_to_vmem [thread:$0]  (!%p839_p11), %s1029_s1, 1152, %s832_s22, [#allocation6], %s759_s7, %s759_s7, %s760_s8  }
  0x28   : > { %s627_s21 = scalar_lea.hbm %s1030_s2, 16 }
  0x29   : > { %p628_p2 = scmp.ne.s32.totalorder %s1030_s2, %s627_s21  ;;  %p634_p10 = scmp.lt.u32.totalorder %s627_s21, %s1030_s2 }
  0x2b   : > { %p630_p1 = pnand %p628_p2, %p601_p13 }
  0x2d   : > { %p631_p6 = pneg %p630_p1 }
  0x2f   : > { %p636_p3 = pnand %p634_p10, %p631_p6 }
  0x31   : > { %639 = shalt.err (!%p636_p3)
}
  0x32   : > { %s640_s22 = scalar_lea.vmem %s843_s25, 16  ;;  %s647_s29 = scalar_lea.vmem %s843_s25, 32 }
  0x33   : > { %p641_p5 = scmp.ne.s32.totalorder %s843_s25, %s640_s22  ;;  %p648_p12 = scmp.lt.s32.totalorder %s843_s25, %s843_s25 }
  0x34   : > { %p649_p0 = scmp.lt.s32.totalorder %s647_s29, %s640_s22 }
  0x35   : > { %p643_p7 = pnand %p641_p5, %p601_p13 }
  0x36   : > { %p650_p2 = por %p649_p0, %p648_p12 }
  0x37   : > { %p644_p9 = pneg %p643_p7 }
  0x39   : > { %p651_p1 = pnand %p650_p2, %p644_p9 }
  0x3b   : > { %654 = shalt.err (!%p651_p1)
}
  0x3c   : > { %531 = dma.hbm_to_vmem [thread:$0]  (!%p839_p11), %s1030_s2, 16, %s843_s25, [#allocation6]  }
  0x3d   : > { %s899_s5 = sadd.s32 1, %s755_s15   ;;  %s27_s23 = sadd.s32 1, %s751_s14 }
  0x3e   : > { %s24_s6 = ssub.s32 %s755_s15, %s899_s5  ;;  %p34_p13 = scmp.ne.s32.totalorder %s751_s14, %s747_s13 }
  0x3f   : > { %p25_p6 = scmp.eq.s32.totalorder %s24_s6, 0  ;;  %p35_p10 = scmp.eq.s32.totalorder %s755_s15, 0 }
  0x40   : > { %p1039_p3 = scmp.eq.s32.totalorder %s809_s16, 1  ;;  %p542_p7 = scmp.lt.s32.totalorder %s755_s15, 2 }
  0x41   : > { %s915_s8 = scalar_select %p25_p6, %s751_s14, %s27_s23  }
  0x42   : > { %p909_p5 = por %p1039_p3, %p34_p13  ;;  %p36_p9 = por %p35_p10, %p34_p13 }
  0x43   : > { %s156_s9 = sand.u32 1, %s751_s14   ;;  %s509_s25 = sshll.u32 %s755_s15, 8 }
  0x44   : > { %s1040_s7 = scalar_select %p909_p5, 1, 0 }
  0x45   : > { %s479_s10 = sshll.u32 %s156_s9, 4  ;;  %s922_s21 = scalar_lea.hbm %s1028_s0, %s509_s25 }
  0x46   : > { %s160_s24 = scalar_lea.vmem [#allocation2], %s479_s10  ;;  %p926_p11 = pnand %p542_p7, %p36_p9 }
  0x47   : > { %s168_s26 = sshll.u32 %s160_s24, 4  ;;  %s930_s28 = scalar_lea.sflag [#allocation3], %s156_s9  ;;  %s924_s26 = int_to_ptr.vmem [resolvable:$true] %s168_s26 }
  0x48   : > { %s655_s22 = scalar_lea.hbm %s922_s21, 256  ;;  %p657_p0 = pneg %p926_p11 }
  0x49   : > { %p656_p12 = scmp.ne.s32.totalorder %s922_s21, %s655_s22  ;;  %s660_s4 = scalar_lea.hbm %s1028_s0, 512 }
  0x4a   : > { %p661_p13 = scmp.lt.u32.totalorder %s922_s21, %s1028_s0  ;;  %p662_p6 = scmp.lt.u32.totalorder %s660_s4, %s655_s22 }
  0x4b   : > { %p658_p2 = pnand %p657_p0, %p656_p12  ;;  %p664_p3 = scmp.lt.u32.totalorder %s655_s22, %s922_s21 }
  0x4c   : > { %p663_p10 = por %p662_p6, %p661_p13 }
  0x4d   : > { %p659_p1 = pneg %p658_p2 }
  0x4e   : > { %p665_p7 = por %p664_p3, %p663_p10 }
  0x50   : > { %p666_p9 = pnand %p665_p7, %p659_p1 }
  0x52   : > { %669 = shalt.err (!%p666_p9)
}
  0x53   : > { %s670_s9 = scalar_lea.vmem %s924_s26, 256  ;;  %s761_s10 = smov [#allocation2]  }
  0x54   : > { %p671_p12 = scmp.ne.s32.totalorder %s924_s26, %s670_s9  ;;  %s675_s25 = sshll.u32 %s761_s10, 4  ;;  %s676_s25 = int_to_ptr.vmem [resolvable:$false] %s675_s25 }
  0x55   : > { %s677_s11 = scalar_lea.vmem %s676_s25, 512  ;;  %p678_p4 = scmp.lt.s32.totalorder %s924_s26, %s676_s25 }
  0x56   : > { %p673_p2 = pnand %p671_p12, %p657_p0  ;;  %p679_p13 = scmp.lt.s32.totalorder %s677_s11, %s670_s9 }
  0x58   : > { %p674_p5 = pneg %p673_p2  ;;  %p680_p6 = por %p679_p13, %p678_p4 }
  0x5a   : > { %p681_p10 = pnand %p680_p6, %p674_p5 }
  0x5c   : > { %684 = shalt.err (!%p681_p10)
}
  0x5d   : > { %s762_s17 = smov 128   ;;  %s763_s24 = smov 8  }
  0x5e   : > { %535 = dma.hbm_to_vmem [thread:$0]  (!%p926_p11), %s922_s21, 256, %s924_s26, %s930_s28, %s762_s17, %s762_s17, %s763_s24  }
  0x5f   : > { %180 = sbr.rel (%p828_p8) target bundleno = 378 (0x17a), region = 32  ;;  %s961_s22 = sand.u32 (!%p828_p8), 1, %s747_s13  }
  0x60   : > { %s484_s29 = sshll.u32 (!%p828_p8), %s961_s22, 4  ;;  %s183_s30 = scalar_lea.sflag (!%p828_p8), [#allocation3], %s961_s22 }
  0x61   : > { %s965_s4 = scalar_lea.vmem (!%p828_p8), [#allocation2], %s484_s29  ;;  %p1042_p4 = scmp.ne.s32.totalorder (!%p828_p8), %s1035_s18, 0 }
  0x66   : > { %730 = dma.done.wait (%p1042_p4), %s183_s30, 256  }
  0x67   : > { %732 = vsyncadd (%p1042_p4), %s183_s30, 4294967040  ;;  %p1043_p5 = scmp.eq.s32.totalorder %s809_s16, 0 }
  0x69   : > { %734 = dma.done.wait (%p1043_p5), [#allocation6], 1168   ;;  %p1044_p8 = pmov %p1043_p5 }
  0x6a   : > { %v764_v0 = vmov 0   ;;  %v587_v1 = vld [vmem:[#allocation5] sm:$0xff]   ;;  %v588_v2 = vld [vmem:[#allocation5 + $0x8] sm:$0xff]   ;;  %v589_v3 = vld [vmem:[#allocation5 + $0x10] sm:$0xff]   ;;  %vm310_vm0 = vcmask 130048   ;;  %s487_s18 = sshll.u32 %s961_s22, 3 }
  0x6b   : > { %736 = vsyncadd (%p1044_p8), [#allocation6], 4294966128  ;;  %314 = vmatprep.subr.bf16.mxu0 %v764_v0  ;;  %v590_v4 = vld [vmem:[#allocation5 + $0x18] sm:$0xff]   ;;  %v591_v6 = vld [vmem:[#allocation5 + $0x20] sm:$0xff]   ;;  %s512_s20 = sshll.u32 %s809_s16, 7  ;;  %s216_s21 = scalar_lea.vmem [#allocation8], %s487_s18 }
  0x6c   : > { %315 = vmatpush1.bf16.msra.mxu0 %v587_v1  ;;  %v598_v5 = vld [vmem:[%s965_s4 + $0x4] ss:$8 sps:$4 sm:$0xff]   ;;  %v596_v11 = vld [vmem:[%s965_s4] ss:$8 sps:$4 sm:$0xff]   ;;  %s382_s26 = sshll.u32 %s216_s21, 4  ;;  %vm365_vm1 = vcmask 257024   ;;  %s982_s23 = scalar_lea.hbm %s1031_s3, %s512_s20  ;;  %s984_s26 = int_to_ptr.vmem [resolvable:$true] %s382_s26 }
  0x6d   : > { %316 = vmatprep.subr.bf16.mxu0 %v764_v0  ;;  %500 = vmatprep.mubr.msk.bf16.mxu0 %vm310_vm0, %v598_v5  ;;  %v592_v7 = vld [vmem:[#allocation5 + $0x28] sm:$0xff]   ;;  %v593_v8 = vld [vmem:[#allocation5 + $0x30] sm:$0xff]   ;;  %v594_v9 = vld [vmem:[#allocation5 + $0x38] sm:$0xff]   ;;  %s369_s6 = scalar_lea.sflag [#allocation4], %s961_s22  ;;  %s685_s16 = scalar_lea.vmem %s984_s26, 128 }
  0x6e   : > { %v595_v10 = vld [vmem:[#allocation5 + $0x40] sm:$0xff]   ;;  %v488_v12 = vld [vmem:[#allocation7] ss:$0 sm:$0xff]  ;;  %p686_p11 = scmp.ne.s32.totalorder %s984_s26, %s685_s16  ;;  %p1045_p0 = scmp.ne.s32.totalorder %s1040_s7, 0 }
  0x6f   : > { %s765_s9 = smov [#allocation8]  }
  0x70   : > { %317 = vmatpush1.bf16.msra.mxu0 %v588_v2  ;;  %p687_p1 = pnand %p686_p11, %p1045_p0  ;;  %s689_s10 = sshll.u32 %s765_s9, 4  ;;  %s690_s10 = int_to_ptr.vmem [resolvable:$false] %s689_s10 }
  0x71   : > { %318 = vmatprep.subr.bf16.mxu0 %v764_v0  ;;  %s691_s25 = scalar_lea.vmem %s690_s10, 256  ;;  %p692_p7 = scmp.lt.s32.totalorder %s984_s26, %s690_s10 }
  0x72   : > { %p688_p3 = pneg %p687_p1  ;;  %p693_p9 = scmp.lt.s32.totalorder %s691_s25, %s685_s16 }
  0x74   : > { %319 = vmatpush1.bf16.msra.mxu0 %v589_v3  ;;  %p694_p12 = por %p693_p9, %p692_p7 }
  0x75   : > { %320 = vmatprep.subr.bf16.mxu0 %v764_v0 }
  0x76   : > { %p695_p2 = pnand %p694_p12, %p688_p3 }
  0x78   : > { %321 = vmatpush1.bf16.msra.mxu0 %v590_v4 }
  0x79   : > { %322 = vmatprep.subr.bf16.mxu0 %v764_v0 }
  0x7c   : > { %323 = vmatpush1.bf16.msra.mxu0 %v591_v6 }
  0x7d   : > { %324 = vmatprep.subr.bf16.mxu0 %v764_v0 }
  0x80   : > { %325 = vmatpush1.bf16.msra.mxu0 %v592_v7 }
  0x81   : > { %326 = vmatprep.subr.bf16.mxu0 %v764_v0 }
  0x84   : > { %327 = vmatpush1.bf16.msra.mxu0 %v593_v8 }
  0x85   : > { %328 = vmatprep.subr.bf16.mxu0 %v764_v0 }
  0x88   : > { %329 = vmatpush1.bf16.msra.mxu0 %v594_v9 }
  0x89   : > { %330 = vmatprep.subr.bf16.mxu0 %v764_v0 }
  0x8c   : > { %331 = vmatpush1.bf16.msra.mxu0 %v595_v10 }
  0x8f   : > { %347 = vmatmul.mubr.bf16.vlgmr.msra.gmra.mrb[0].mxu0 %v596_v11 }
 0x162   : > { %v348_v13 = vpop.f32.mrb[0].mxu0 }
 0x163   : > { %v349_v14 = vadd.f32 %v488_v12, %v348_v13  ;;  %v350_v15 = vpop.f32.mrb[1].mxu0 }
 0x164   : > { %v351_v16 = vpop.f32.mrb[2].mxu0 }
 0x165   : > { %v355_v17 = vmax.f32 %v349_v14, 0.0  ;;  %v352_v18 = vadd.f32 %v488_v12, %v351_v16  ;;  %v353_v19 = vpop.f32.mrb[3].mxu0 }
 0x167   : > { %v510_v20 = vpack.c.bf16 %v355_v17, %v355_v17  ;;  %v356_v21 = vmax.f32 %v352_v18, 0.0 }
 0x169   : > { %366 = vst.msk [vmem:[%s216_s21] sm:$0xf] %vm365_vm1, %v510_v20  ;;  %v511_v22 = vpack.c.bf16 %v356_v21, %v356_v21 }
 0x16b   : > { %367 = vst.msk [vmem:[%s216_s21 + $0x4] sm:$0xf] %vm365_vm1, %v511_v22 }
 0x16c   : > { %698 = shalt.err (!%p695_p2)
}
 0x16d   : > { %s699_s11 = scalar_lea.hbm %s982_s23, 128  ;;  %s703_s29 = scalar_lea.hbm %s1031_s3, 256 }
 0x16e   : > { %p700_p13 = scmp.ne.s32.totalorder %s982_s23, %s699_s11  ;;  %p704_p4 = scmp.lt.u32.totalorder %s982_s23, %s1031_s3 }
 0x16f   : > { %p705_p5 = scmp.lt.u32.totalorder %s703_s29, %s699_s11  ;;  %p707_p11 = scmp.lt.u32.totalorder %s699_s11, %s982_s23 }
 0x170   : > { %p701_p6 = pnand %p700_p13, %p1045_p0 }
 0x171   : > { %p706_p8 = por %p705_p5, %p704_p4 }
 0x172   : > { %p702_p10 = pneg %p701_p6 }
 0x173   : > { %p708_p1 = por %p707_p11, %p706_p8 }
 0x175   : > { %p709_p3 = pnand %p708_p1, %p702_p10 }
 0x177   : > { %712 = shalt.err (!%p709_p3)
}
 0x178   : > { %s766_s18 = smov 64   ;;  %s767_s20 = smov 4  }
 0x179   : > { %523 = dma.vmem_to_hbm [thread:$0]  (%p1045_p0), %s984_s26, 128, %s982_s23, %s369_s6, %s766_s18, %s766_s18, %s767_s20  }
 0x17a PF: > { %s397_s21 = sand.u32 1, %s743_s12   ;;  %p1046_p7 = scmp.ne.s32.totalorder %s1036_s19, 0 }
 0x17b   : > { %p1047_p9 = scmp.ge.s32.totalorder %s755_s15, 2  ;;  %s398_s27 = scalar_lea.sflag [#allocation4], %s397_s21 }
 0x17d   : > { %p537_p12 = pnand %p1047_p9, %p1046_p7 }
 0x17f   : > { %738 = dma.done.wait (!%p537_p12), %s398_s27, 128  }
 0x180   : > { %740 = vsyncadd (!%p537_p12), %s398_s27, 4294967168  ;;  %p17_p2 = scmp.ge.s32.totalorder %s899_s5, 4   ;;  %s1048_s12 = smov %s747_s13 }
 0x181   : > { %s1049_s13 = smov %s751_s14  ;;  %s1050_s14 = smov %s915_s8 }
 0x182   : > { %s1051_s15 = smov %s899_s5  ;;  %19 = sbr.rel (!%p17_p2) target bundleno = 6 (0x6), region = 85 }
 0x189   :  { %403 = vsyncpa [#allocation3], 1 }
 0x18a   :  { %405 = vsyncpa [#allocation3 + $0x1], 1 }
 0x18b   :  { %406 = vsyncpa [#allocation6], 1 }
 0x18c   :  { %407 = vsyncpa [#allocation4], 1 }
 0x18d   :  { %409 = vsyncpa [#allocation4 + $0x1], 1 }

// kernel: _lambda_.21
= control target key start
LH: loop header
LB: loop body
LE: loop exit
PB: predicated region body
PF: predicated region fallthrough
CT: control target
= control target key end

     0   :  { %8 = vsyncpa [#allocation3], 0  ;;  %s943_s0 = inlined_call_operand.hbm [shape: bf16[32,16], index: 0, kind: input, shape index: {}]   ;;  %s944_s1 = inlined_call_operand.hbm [shape: bf16[16,32], index: 1, kind: input, shape index: {}]   ;;  %s945_s2 = inlined_call_operand.hbm [shape: f32[1,32], index: 2, kind: input, shape index: {}]   ;;  %s946_s3 = inlined_call_operand.hbm [shape: bf16[32,32], index: 3, kind: output, shape index: {}]  }
   0x1   :  { %10 = vsyncpa [#allocation3 + $0x1], 0 }
   0x2   :  { %11 = vsyncpa [#allocation6], 0 }
   0x3   :  { %12 = vsyncpa [#allocation4], 0 }
   0x4   :  { %14 = vsyncpa [#allocation4 + $0x1], 0  ;;  %s702_s12 = smov 0   ;;  %s704_s13 = smov 0  }
   0x5   :  { %s706_s14 = smov 0   ;;  %s708_s15 = smov 0  }
   0x6 LB: > { %s723_s16 = sadd.s32 4294967295, %s670_s15   ;;  %s403_s17 = sadd.s32 4294967294, %s670_s15   ;;  %s670_s15 = sphi %s708_s15, %s966_s15   ;;  %s666_s14 = sphi %s706_s14, %s965_s14   ;;  %s662_s13 = sphi %s704_s13, %s964_s13   ;;  %s658_s12 = sphi %s702_s12, %s963_s12  }
   0x7   : > { %p40_p0 = scmp.ne.s32.totalorder %s662_s13, %s658_s12  ;;  %p947_p1 = scmp.eq.s32.totalorder %s723_s16, 0 }
   0x8   : > { %p112_p3 = scmp.eq.s32.totalorder %s403_s17, 1  ;;  %p404_p5 = scmp.ge.s32.totalorder %s670_s15, 1 }
   0x9   : > { %p732_p4 = por %p947_p1, %p40_p0  ;;  %p119_p7 = scmp.lt.s32.totalorder %s670_s15, 3 }
   0xa   : > { %p737_p6 = por %p112_p3, %p40_p0  ;;  %s672_s21 = smov [#allocation5]  }
   0xb   : > { %s950_s18 = scalar_select %p732_p4, 1, 0 }
   0xc   : > { %s951_s19 = scalar_select %p737_p6, 1, 0 }
   0xd   : > { %p742_p8 = pnand %p404_p5, %p119_p7  ;;  %s131_s22 = sshll.u32 %s672_s21, 4  ;;  %s746_s22 = int_to_ptr.vmem [resolvable:$true] %s131_s22 }
   0xe   : > { %s673_s24 = smov [#allocation7]   ;;  %s514_s28 = scalar_lea.hbm %s944_s1, 128 }
   0xf   : > { %p451_p9 = pneg %p742_p8  ;;  %s145_s25 = sshll.u32 %s673_s24, 4  ;;  %s757_s25 = int_to_ptr.vmem [resolvable:$true] %s145_s25 }
  0x10   : > { %p515_p12 = scmp.ne.s32.totalorder %s944_s1, %s514_s28  ;;  %p521_p5 = scmp.lt.u32.totalorder %s514_s28, %s944_s1 }
  0x11   : > { %p753_p11 = pnand %p451_p9, %p947_p1 }
  0x13   : > { %p516_p13 = pneg %p753_p11 }
  0x15   : > { %p517_p0 = pnand %p516_p13, %p515_p12 }
  0x17   : > { %p518_p3 = pneg %p517_p0 }
  0x19   : > { %p523_p7 = pnand %p521_p5, %p518_p3 }
  0x1b   : > { %526 = shalt.err (!%p523_p7)
}
  0x1c   : > { %s527_s6 = scalar_lea.vmem %s746_s22, 128  ;;  %p535_p2 = scmp.lt.s32.totalorder %s746_s22, %s746_s22 }
  0x1d   : > { %p528_p9 = scmp.ne.s32.totalorder %s746_s22, %s527_s6  ;;  %p536_p12 = scmp.lt.s32.totalorder %s527_s6, %s527_s6 }
  0x1f   : > { %p530_p10 = pnand %p528_p9, %p516_p13  ;;  %p537_p0 = por %p536_p12, %p535_p2 }
  0x21   : > { %p531_p1 = pneg %p530_p10 }
  0x23   : > { %p538_p6 = pnand %p537_p0, %p531_p1 }
  0x25   : > { %541 = shalt.err (!%p538_p6)
}
  0x26   : > { %s674_s7 = smov 64   ;;  %s675_s8 = smov 4  }
  0x27   : > { %454 = dma.hbm_to_vmem [thread:$0]  (!%p753_p11), %s944_s1, 128, %s746_s22, [#allocation6], %s674_s7, %s674_s7, %s675_s8  }
  0x28   : > { %s542_s21 = scalar_lea.hbm %s945_s2, 16 }
  0x29   : > { %p543_p1 = scmp.ne.s32.totalorder %s945_s2, %s542_s21  ;;  %p549_p10 = scmp.lt.u32.totalorder %s542_s21, %s945_s2 }
  0x2b   : > { %p545_p2 = pnand %p543_p1, %p516_p13 }
  0x2d   : > { %p546_p6 = pneg %p545_p2 }
  0x2f   : > { %p551_p3 = pnand %p549_p10, %p546_p6 }
  0x31   : > { %554 = shalt.err (!%p551_p3)
}
  0x32   : > { %s555_s22 = scalar_lea.vmem %s757_s25, 16  ;;  %s562_s29 = scalar_lea.vmem %s757_s25, 32 }
  0x33   : > { %p556_p5 = scmp.ne.s32.totalorder %s757_s25, %s555_s22  ;;  %p563_p12 = scmp.lt.s32.totalorder %s757_s25, %s757_s25 }
  0x34   : > { %p564_p0 = scmp.lt.s32.totalorder %s562_s29, %s555_s22 }
  0x35   : > { %p558_p7 = pnand %p556_p5, %p516_p13 }
  0x36   : > { %p565_p1 = por %p564_p0, %p563_p12 }
  0x37   : > { %p559_p9 = pneg %p558_p7 }
  0x39   : > { %p566_p2 = pnand %p565_p1, %p559_p9 }
  0x3b   : > { %569 = shalt.err (!%p566_p2)
}
  0x3c   : > { %457 = dma.hbm_to_vmem [thread:$0]  (!%p753_p11), %s945_s2, 16, %s757_s25, [#allocation6]  }
  0x3d   : > { %s816_s5 = sadd.s32 1, %s670_s15   ;;  %s27_s23 = sadd.s32 1, %s666_s14 }
  0x3e   : > { %s24_s6 = ssub.s32 %s670_s15, %s816_s5  ;;  %p34_p13 = scmp.ne.s32.totalorder %s666_s14, %s662_s13 }
  0x3f   : > { %p25_p6 = scmp.eq.s32.totalorder %s24_s6, 0  ;;  %p35_p10 = scmp.eq.s32.totalorder %s670_s15, 0 }
  0x40   : > { %p954_p3 = scmp.eq.s32.totalorder %s723_s16, 1  ;;  %p468_p7 = scmp.lt.s32.totalorder %s670_s15, 2 }
  0x41   : > { %s832_s10 = scalar_select %p25_p6, %s666_s14, %s27_s23  }
  0x42   : > { %p826_p5 = por %p954_p3, %p34_p13  ;;  %p36_p9 = por %p35_p10, %p34_p13 }
  0x43   : > { %s156_s11 = sand.u32 1, %s666_s14   ;;  %s427_s25 = sshll.u32 %s670_s15, 7 }
  0x44   : > { %s955_s9 = scalar_select %p826_p5, 1, 0 }
  0x45   : > { %s408_s17 = sshll.u32 %s156_s11, 3  ;;  %s839_s26 = scalar_lea.hbm %s943_s0, %s427_s25 }
  0x46   : > { %s160_s27 = scalar_lea.vmem [#allocation2], %s408_s17  ;;  %p843_p11 = pnand %p468_p7, %p36_p9 }
  0x47   : > { %s167_s28 = sshll.u32 %s160_s27, 4  ;;  %s847_s29 = scalar_lea.sflag [#allocation3], %s156_s11  ;;  %s841_s28 = int_to_ptr.vmem [resolvable:$true] %s167_s28 }
  0x48   : > { %s570_s30 = scalar_lea.hbm %s839_s26, 128  ;;  %p572_p0 = pneg %p843_p11 }
  0x49   : > { %p571_p12 = scmp.ne.s32.totalorder %s839_s26, %s570_s30  ;;  %s575_s6 = scalar_lea.hbm %s943_s0, 256 }
  0x4a   : > { %p576_p13 = scmp.lt.u32.totalorder %s839_s26, %s943_s0  ;;  %p577_p6 = scmp.lt.u32.totalorder %s575_s6, %s570_s30 }
  0x4b   : > { %p573_p1 = pnand %p572_p0, %p571_p12  ;;  %p579_p3 = scmp.lt.u32.totalorder %s570_s30, %s839_s26 }
  0x4c   : > { %p578_p10 = por %p577_p6, %p576_p13 }
  0x4d   : > { %p574_p2 = pneg %p573_p1 }
  0x4e   : > { %p580_p7 = por %p579_p3, %p578_p10 }
  0x50   : > { %p581_p9 = pnand %p580_p7, %p574_p2 }
  0x52   : > { %584 = shalt.err (!%p581_p9)
}
  0x53   : > { %s585_s11 = scalar_lea.vmem %s841_s28, 128  ;;  %s676_s21 = smov [#allocation2]  }
  0x54   : > { %p586_p12 = scmp.ne.s32.totalorder %s841_s28, %s585_s11  ;;  %s590_s24 = sshll.u32 %s676_s21, 4  ;;  %s591_s24 = int_to_ptr.vmem [resolvable:$false] %s590_s24 }
  0x55   : > { %s592_s27 = scalar_lea.vmem %s591_s24, 256  ;;  %p593_p4 = scmp.lt.s32.totalorder %s841_s28, %s591_s24 }
  0x56   : > { %p588_p1 = pnand %p586_p12, %p572_p0  ;;  %p594_p13 = scmp.lt.s32.totalorder %s592_s27, %s585_s11 }
  0x58   : > { %p589_p5 = pneg %p588_p1  ;;  %p595_p6 = por %p594_p13, %p593_p4 }
  0x5a   : > { %p596_p10 = pnand %p595_p6, %p589_p5 }
  0x5c   : > { %599 = shalt.err (!%p596_p10)
}
  0x5d   : > { %461 = dma.hbm_to_vmem [thread:$0]  (!%p843_p11), %s839_s26, 128, %s841_s28, %s847_s29, %s674_s7, %s674_s7, %s675_s8  }
  0x5e   : > { %179 = sbr.rel (%p742_p8) target bundleno = 343 (0x157), region = 32  ;;  %s881_s30 = sand.u32 (!%p742_p8), 1, %s662_s13  }
  0x5f   : > { %s412_s4 = sshll.u32 (!%p742_p8), %s881_s30, 3  ;;  %s182_s23 = scalar_lea.sflag (!%p742_p8), [#allocation3], %s881_s30 }
  0x60   : > { %s185_s6 = scalar_lea.vmem (!%p742_p8), [#allocation2], %s412_s4  ;;  %p957_p4 = scmp.ne.s32.totalorder (!%p742_p8), %s950_s18, 0 }
  0x65   : > { %645 = dma.done.wait (%p957_p4), %s182_s23, 128  }
  0x66   : > { %647 = vsyncadd (%p957_p4), %s182_s23, 4294967168  ;;  %p958_p5 = scmp.eq.s32.totalorder %s723_s16, 0 }
  0x68   : > { %649 = dma.done.wait (%p958_p5), [#allocation6], 144   ;;  %p959_p11 = pmov %p958_p5 }
  0x69   : > { %v677_v0 = vmov 0.0   ;;  %vm678_vm0 = vmmov 0   ;;  %v512_v1 = vld [vmem:[#allocation5] sm:$0xff]   ;;  %v513_v2 = vld [vmem:[%s185_s6] sm:$0xff]   ;;  %vm241_vm1 = vcmask 130048   ;;  %s215_s18 = scalar_lea.vmem [#allocation8], %s412_s4 }
  0x6a   : > { %651 = vsyncadd (%p959_p11), [#allocation6], 4294967152  ;;  %433 = vmatprep.subr.bf16.mxu0 %v677_v0  ;;  %435 = vmatprep.mubr.msk.bf16.mxu0 %vm678_vm0, %v677_v0  ;;  %v416_v3 = vld [vmem:[#allocation7] ss:$0 sm:$0xff]  ;;  %s311_s20 = sshll.u32 %s215_s18, 4  ;;  %s430_s7 = sshll.u32 %s723_s16, 7  ;;  %s899_s20 = int_to_ptr.vmem [resolvable:$true] %s311_s20 }
  0x6b   : > { %434 = vmatpush3.bf16.msra.mxu0 %v512_v1  ;;  %vm294_vm2 = vcmask 257024   ;;  %s897_s28 = scalar_lea.hbm %s946_s3, %s430_s7  ;;  %s298_s22 = scalar_lea.sflag [#allocation4], %s881_s30 }
  0x6c   : > { %s600_s16 = scalar_lea.vmem %s899_s20, 128  ;;  %p960_p0 = scmp.ne.s32.totalorder %s955_s9, 0 }
  0x6d   : > { %p601_p8 = scmp.ne.s32.totalorder %s899_s20, %s600_s16  ;;  %s679_s29 = smov [#allocation8]  }
  0x6e   : > { %436 = vmatmul.mubr.msk.bf16.vlgmr.msra.gmra.mrb[0].mxu0 %vm241_vm1, %v513_v2  ;;  %s604_s17 = sshll.u32 %s679_s29, 4  ;;  %s605_s17 = int_to_ptr.vmem [resolvable:$false] %s604_s17 }
  0x6f   : > { %p602_p2 = pnand %p601_p8, %p960_p0  ;;  %s606_s25 = scalar_lea.vmem %s605_s17, 256 }
  0x70   : > { %p607_p7 = scmp.lt.s32.totalorder %s899_s20, %s605_s17  ;;  %p608_p9 = scmp.lt.s32.totalorder %s606_s25, %s600_s16 }
  0x71   : > { %p603_p3 = pneg %p602_p2 }
  0x72   : > { %p609_p12 = por %p608_p9, %p607_p7 }
  0x74   : > { %p610_p1 = pnand %p609_p12, %p603_p3 }
 0x141   : > { %v279_v4 = vpop.f32.mrb[0].mxu0 }
 0x142   : > { %v280_v5 = vadd.f32 %v416_v3, %v279_v4  ;;  %v437_v6 = vpop.f32.mrb[1].mxu0 }
 0x143   : > { %v282_v7 = vpop.f32.mrb[2].mxu0 }
 0x144   : > { %v428_v8 = vpack.c.bf16 %v280_v5, %v280_v5  ;;  %v283_v9 = vadd.f32 %v416_v3, %v282_v7  ;;  %v438_v10 = vpop.f32.mrb[3].mxu0 }
 0x146   : > { %295 = vst.msk [vmem:[%s215_s18] sm:$0xf] %vm294_vm2, %v428_v8  ;;  %v429_v11 = vpack.c.bf16 %v283_v9, %v283_v9 }
 0x148   : > { %296 = vst.msk [vmem:[%s215_s18 + $0x4] sm:$0xf] %vm294_vm2, %v429_v11 }
 0x149   : > { %613 = shalt.err (!%p610_p1)
}
 0x14a   : > { %s614_s11 = scalar_lea.hbm %s897_s28, 128  ;;  %s618_s27 = scalar_lea.hbm %s946_s3, 256 }
 0x14b   : > { %p615_p13 = scmp.ne.s32.totalorder %s897_s28, %s614_s11  ;;  %p619_p4 = scmp.lt.u32.totalorder %s897_s28, %s946_s3 }
 0x14c   : > { %p620_p5 = scmp.lt.u32.totalorder %s618_s27, %s614_s11  ;;  %p622_p8 = scmp.lt.u32.totalorder %s614_s11, %s897_s28 }
 0x14d   : > { %p616_p6 = pnand %p615_p13, %p960_p0 }
 0x14e   : > { %p621_p11 = por %p620_p5, %p619_p4 }
 0x14f   : > { %p617_p10 = pneg %p616_p6 }
 0x150   : > { %p623_p2 = por %p622_p8, %p621_p11 }
 0x152   : > { %p624_p3 = pnand %p623_p2, %p617_p10 }
 0x154   : > { %627 = shalt.err (!%p624_p3)
}
 0x155   : > { %s680_s6 = smov 64   ;;  %s681_s18 = smov 4  }
 0x156   : > { %449 = dma.vmem_to_hbm [thread:$0]  (%p960_p0), %s899_s20, 128, %s897_s28, %s298_s22, %s680_s6, %s680_s6, %s681_s18  }
 0x157 PF: > { %s326_s7 = sand.u32 1, %s658_s12   ;;  %p961_p7 = scmp.ne.s32.totalorder %s951_s19, 0 }
 0x158   : > { %p962_p9 = scmp.ge.s32.totalorder %s670_s15, 2  ;;  %s327_s8 = scalar_lea.sflag [#allocation4], %s326_s7 }
 0x15a   : > { %p463_p12 = pnand %p962_p9, %p961_p7 }
 0x15c   : > { %653 = dma.done.wait (!%p463_p12), %s327_s8, 128  }
 0x15d   : > { %655 = vsyncadd (!%p463_p12), %s327_s8, 4294967168  ;;  %p17_p1 = scmp.ge.s32.totalorder %s816_s5, 4   ;;  %s963_s12 = smov %s662_s13 }
 0x15e   : > { %s964_s13 = smov %s666_s14  ;;  %s965_s14 = smov %s832_s10 }
 0x15f   : > { %s966_s15 = smov %s816_s5  ;;  %19 = sbr.rel (!%p17_p1) target bundleno = 6 (0x6), region = 85 }
 0x166   :  { %332 = vsyncpa [#allocation3], 1 }
 0x167   :  { %334 = vsyncpa [#allocation3 + $0x1], 1 }
 0x168   :  { %335 = vsyncpa [#allocation6], 1 }
 0x169   :  { %336 = vsyncpa [#allocation4], 1 }
 0x16a   :  { %338 = vsyncpa [#allocation4 + $0x1], 1 }

// kernel: _lambda_.22
= control target key start
LH: loop header
LB: loop body
LE: loop exit
PB: predicated region body
PF: predicated region fallthrough
CT: control target
= control target key end

     0   :  { %9 = vsyncpa [#allocation3], 0  ;;  %s1402_s0 = inlined_call_operand.hbm [shape: bf16[32,288], index: 0, kind: input, shape index: {}]   ;;  %s1403_s1 = inlined_call_operand.hbm [shape: bf16[288,32], index: 1, kind: input, shape index: {}]   ;;  %s1404_s2 = inlined_call_operand.hbm [shape: f32[1,32], index: 2, kind: input, shape index: {}]   ;;  %s1405_s3 = inlined_call_operand.hbm [shape: bf16[32,32], index: 3, kind: input, shape index: {}]   ;;  %s1406_s4 = inlined_call_operand.hbm [shape: bf16[32,32], index: 4, kind: output, shape index: {}]  }
   0x1   :  { %11 = vsyncpa [#allocation3 + $0x1], 0 }
   0x2   :  { %12 = vsyncpa [#allocation6], 0 }
   0x3   :  { %13 = vsyncpa [#allocation9], 0 }
   0x4   :  { %15 = vsyncpa [#allocation9 + $0x1], 0 }
   0x5   :  { %16 = vsyncpa [#allocation4], 0 }
   0x6   :  { %18 = vsyncpa [#allocation4 + $0x1], 0  ;;  %s1114_s15 = smov 0   ;;  %s1116_s16 = smov 0  }
   0x7   :  { %s1118_s17 = smov 0   ;;  %s1120_s18 = smov 0  }
   0x8 LB: > { %s1135_s19 = sadd.s32 4294967295, %s1074_s18   ;;  %s692_s20 = sadd.s32 4294967294, %s1074_s18   ;;  %s1074_s18 = sphi %s1120_s18, %s1436_s18   ;;  %s1070_s17 = sphi %s1118_s17, %s1435_s17   ;;  %s1066_s16 = sphi %s1116_s16, %s1434_s16   ;;  %s1062_s15 = sphi %s1114_s15, %s1433_s15  }
   0x9   : > { %s1139_s21 = sadd.s32 1, %s1074_s18   ;;  %s31_s22 = sadd.s32 1, %s1070_s17 }
   0xa   : > { %s28_s23 = ssub.s32 %s1074_s18, %s1139_s21  ;;  %p38_p0 = scmp.ne.s32.totalorder %s1070_s17, %s1066_s16 }
   0xb   : > { %p29_p1 = scmp.eq.s32.totalorder %s28_s23, 0  ;;  %p39_p2 = scmp.eq.s32.totalorder %s1074_s18, 0 }
   0xc   : > { %p44_p3 = scmp.ne.s32.totalorder %s1066_s16, %s1062_s15  ;;  %p1407_p4 = scmp.eq.s32.totalorder %s1135_s19, 0 }
   0xd   : > { %s1151_s24 = scalar_select %p29_p1, %s1070_s17, %s31_s22  }
   0xe   : > { %p1153_p5 = por %p39_p2, %p38_p0  ;;  %p1159_p6 = por %p1407_p4, %p44_p3 }
   0xf   : > { %1413 = sst [smem:[#allocation15_spill]] %s1151_s24  ;;  %p136_p7 = scmp.eq.s32.totalorder %s1135_s19, 1 }
  0x10   : > { %s1414_s25 = scalar_select %p1153_p5, 1, 0 }
  0x11   : > { %s1415_s26 = scalar_select %p1159_p6, 1, 0 }
  0x12   : > { %p142_p8 = scmp.eq.s32.totalorder %s692_s20, 1  ;;  %p693_p9 = scmp.ge.s32.totalorder %s1074_s18, 1 }
  0x13   : > { %p149_p10 = scmp.lt.s32.totalorder %s1074_s18, 3  ;;  %p1166_p11 = por %p136_p7, %p38_p0 }
  0x14   : > { %p1170_p12 = por %p142_p8, %p44_p3  ;;  %s1076_s30 = smov [#allocation5]  }
  0x15   : > { %s1416_s27 = scalar_select %p1166_p11, 1, 0 }
  0x16   : > { %s1417_s28 = scalar_select %p1170_p12, 1, 0 }
  0x17   : > { %p1174_p13 = pnand %p693_p9, %p149_p10  ;;  %s161_s5 = sshll.u32 %s1076_s30, 4  ;;  %s162_s5 = int_to_ptr.vmem [resolvable:$true] %s161_s5 }
  0x18   : > { %s1077_s7 = smov [#allocation7]   ;;  %s884_s11 = scalar_lea.hbm %s1403_s1, 2304 }
  0x19   : > { %s1418_s29 = scalar_select %p1174_p13, 1, 0 }
  0x1a   : > { %p796_p1 = pneg %p1174_p13  ;;  %s175_s8 = sshll.u32 %s1077_s7, 4  ;;  %s176_s8 = int_to_ptr.vmem [resolvable:$true] %s175_s8 }
  0x1b   : > { %p885_p7 = scmp.ne.s32.totalorder %s1403_s1, %s884_s11 }
  0x1c   : > { %p1182_p2 = pnand %p796_p1, %p1407_p4  ;;  %p891_p1 = scmp.lt.u32.totalorder %s884_s11, %s1403_s1 }
  0x1e   : > { %p886_p8 = pneg %p1182_p2 }
  0x20   : > { %p887_p9 = pnand %p886_p8, %p885_p7 }
  0x22   : > { %p888_p10 = pneg %p887_p9 }
  0x24   : > { %p893_p0 = pnand %p891_p1, %p888_p10 }
  0x26   : > { %896 = shalt.err (!%p893_p0)
}
  0x27   : > { %s897_s22 = scalar_lea.vmem %s162_s5, 2304  ;;  %p905_p11 = scmp.lt.s32.totalorder %s162_s5, %s162_s5 }
  0x28   : > { %p898_p4 = scmp.ne.s32.totalorder %s162_s5, %s897_s22  ;;  %p906_p6 = scmp.lt.s32.totalorder %s897_s22, %s897_s22 }
  0x2a   : > { %p900_p3 = pnand %p898_p4, %p886_p8  ;;  %p907_p13 = por %p906_p6, %p905_p11 }
  0x2c   : > { %p901_p12 = pneg %p900_p3 }
  0x2e   : > { %p908_p5 = pnand %p907_p13, %p901_p12 }
  0x30   : > { %911 = shalt.err (!%p908_p5)
}
  0x31   : > { %s1411_s23 = smov 64   ;;  %s1412_s30 = smov 4  }
  0x32   : > { %799 = dma.hbm_to_vmem [thread:$0]  (!%p1182_p2), %s1403_s1, 2304, %s162_s5, [#allocation6], %s1411_s23, %s1411_s23, %s1412_s30  }
  0x33   : > { %s1214_s10 = sand.u32 1, %s1070_s17   ;;  %s912_s13 = scalar_lea.hbm %s1404_s2, 16 }
  0x34   : > { %p913_p4 = scmp.ne.s32.totalorder %s1404_s2, %s912_s13  ;;  %p919_p11 = scmp.lt.u32.totalorder %s912_s13, %s1404_s2 }
  0x36   : > { %p915_p5 = pnand %p913_p4, %p886_p8 }
  0x38   : > { %p916_p6 = pneg %p915_p5 }
  0x3a   : > { %p921_p12 = pnand %p919_p11, %p916_p6 }
  0x3c   : > { %924 = shalt.err (!%p921_p12)
}
  0x3d   : > { %s925_s5 = scalar_lea.vmem %s176_s8, 16  ;;  %s932_s7 = scalar_lea.vmem %s176_s8, 32 }
  0x3e   : > { %p926_p13 = scmp.ne.s32.totalorder %s176_s8, %s925_s5  ;;  %p933_p7 = scmp.lt.s32.totalorder %s176_s8, %s176_s8 }
  0x3f   : > { %p934_p9 = scmp.lt.s32.totalorder %s932_s7, %s925_s5 }
  0x40   : > { %p928_p0 = pnand %p926_p13, %p886_p8 }
  0x41   : > { %p935_p10 = por %p934_p9, %p933_p7 }
  0x42   : > { %p929_p3 = pneg %p928_p0 }
  0x44   : > { %p936_p1 = pnand %p935_p10, %p929_p3 }
  0x46   : > { %939 = shalt.err (!%p936_p1)
}
  0x47   : > { %802 = dma.hbm_to_vmem [thread:$0]  (!%p1182_p2), %s1404_s2, 16, %s176_s8, [#allocation6]  }
  0x48   : > { %s779_s11 = smul.u32 24, %s1214_s10  ;;  %p1420_p8 = scmp.ne.s32.totalorder %s1414_s25, 0 }
  0x49   : > { %s780_s12 = smul.u32 384, %s1074_s18  ;;  %p1421_p4 = scmp.lt.s32.totalorder %s1074_s18, 2 }
  0x4a   : > { %s190_s8 = scalar_lea.vmem [#allocation2], %s779_s11  ;;  %s187_s25 = scalar_lea.sflag [#allocation3], %s1214_s10 }
  0x4b   : > { %p1242_p5 = pnand %p1421_p4, %p1420_p8  ;;  %s1249_s6 = scalar_lea.hbm %s1402_s0, %s780_s12 }
  0x4c   : > { %s198_s22 = sshll.u32 %s190_s8, 4  ;;  %s940_s5 = scalar_lea.hbm %s1249_s6, 384  ;;  %s1251_s22 = int_to_ptr.vmem [resolvable:$true] %s198_s22 }
  0x4d   : > { %p941_p2 = scmp.ne.s32.totalorder %s1249_s6, %s940_s5  ;;  %p942_p6 = pneg %p1242_p5 }
  0x4e   : > { %s945_s24 = scalar_lea.hbm %s1402_s0, 768  ;;  %p946_p13 = scmp.lt.u32.totalorder %s1249_s6, %s1402_s0 }
  0x4f   : > { %p943_p11 = pnand %p942_p6, %p941_p2  ;;  %p947_p0 = scmp.lt.u32.totalorder %s945_s24, %s940_s5 }
  0x50   : > { %p949_p7 = scmp.lt.u32.totalorder %s940_s5, %s1249_s6 }
  0x51   : > { %p944_p12 = pneg %p943_p11  ;;  %p948_p3 = por %p947_p0, %p946_p13 }
  0x53   : > { %p950_p9 = por %p949_p7, %p948_p3 }
  0x55   : > { %p951_p10 = pnand %p950_p9, %p944_p12 }
  0x57   : > { %954 = shalt.err (!%p951_p10)
}
  0x58   : > { %s955_s11 = scalar_lea.vmem %s1251_s22, 384  ;;  %s1080_s20 = smov [#allocation2]  }
  0x59   : > { %p956_p1 = scmp.ne.s32.totalorder %s1251_s22, %s955_s11  ;;  %s960_s8 = sshll.u32 %s1080_s20, 4  ;;  %s961_s8 = int_to_ptr.vmem [resolvable:$false] %s960_s8 }
  0x5a   : > { %s962_s7 = scalar_lea.vmem %s961_s8, 768  ;;  %p963_p2 = scmp.lt.s32.totalorder %s1251_s22, %s961_s8 }
  0x5b   : > { %p958_p8 = pnand %p956_p1, %p942_p6  ;;  %p964_p11 = scmp.lt.s32.totalorder %s962_s7, %s955_s11 }
  0x5d   : > { %p959_p4 = pneg %p958_p8  ;;  %p965_p13 = por %p964_p11, %p963_p2 }
  0x5f   : > { %p966_p0 = pnand %p965_p13, %p959_p4 }
  0x61   : > { %969 = shalt.err (!%p966_p0)
}
  0x62   : > { %s1081_s5 = smov 192   ;;  %s1082_s9 = smov 12  }
  0x63   : > { %806 = dma.hbm_to_vmem [thread:$0]  (!%p1242_p5), %s1249_s6, 384, %s1251_s22, %s187_s25, %s1081_s5, %s1081_s5, %s1082_s9  }
  0x64   : > { %s700_s24 = sshll.u32 %s1214_s10, 3  ;;  %s738_s12 = sshll.u32 %s1074_s18, 7 }
  0x65   : > { %s1286_s20 = scalar_lea.hbm %s1405_s3, %s738_s12  ;;  %s212_s8 = scalar_lea.vmem [#allocation8], %s700_s24 }
  0x66   : > { %s219_s7 = sshll.u32 %s212_s8, 4  ;;  %s209_s23 = scalar_lea.sflag [#allocation9], %s1214_s10  ;;  %s1288_s7 = int_to_ptr.vmem [resolvable:$true] %s219_s7 }
  0x67   : > { %s970_s30 = scalar_lea.hbm %s1286_s20, 128  ;;  %s975_s25 = scalar_lea.hbm %s1405_s3, 256 }
  0x68   : > { %p971_p12 = scmp.ne.s32.totalorder %s1286_s20, %s970_s30  ;;  %p976_p9 = scmp.lt.u32.totalorder %s1286_s20, %s1405_s3 }
  0x69   : > { %p977_p10 = scmp.lt.u32.totalorder %s975_s25, %s970_s30  ;;  %p979_p8 = scmp.lt.u32.totalorder %s970_s30, %s1286_s20 }
  0x6a   : > { %p973_p3 = pnand %p971_p12, %p942_p6 }
  0x6b   : > { %p978_p1 = por %p977_p10, %p976_p9 }
  0x6c   : > { %p974_p7 = pneg %p973_p3 }
  0x6d   : > { %p980_p4 = por %p979_p8, %p978_p1 }
  0x6f   : > { %p981_p2 = pnand %p980_p4, %p974_p7 }
  0x71   : > { %984 = shalt.err (!%p981_p2)
}
  0x72   : > { %s985_s24 = scalar_lea.vmem %s1288_s7, 128  ;;  %s1083_s12 = smov [#allocation8]  }
  0x73   : > { %p986_p11 = scmp.ne.s32.totalorder %s1288_s7, %s985_s24  ;;  %s990_s14 = sshll.u32 %s1083_s12, 4  ;;  %s991_s14 = int_to_ptr.vmem [resolvable:$false] %s990_s14 }
  0x74   : > { %s992_s11 = scalar_lea.vmem %s991_s14, 256  ;;  %p993_p12 = scmp.lt.s32.totalorder %s1288_s7, %s991_s14 }
  0x75   : > { %p988_p13 = pnand %p986_p11, %p942_p6  ;;  %p994_p3 = scmp.lt.s32.totalorder %s992_s11, %s985_s24 }
  0x77   : > { %p989_p0 = pneg %p988_p13  ;;  %p995_p9 = por %p994_p3, %p993_p12 }
  0x79   : > { %p996_p10 = pnand %p995_p9, %p989_p0 }
  0x7b   : > { %999 = shalt.err (!%p996_p10)
}
  0x7c   : > { %s1423_s30 = smov 4   ;;  %s1424_s8 = smov 64  }
  0x7d   : > { %809 = dma.hbm_to_vmem [thread:$0]  (!%p1242_p5), %s1286_s20, 128, %s1288_s7, %s209_s23, %s1424_s8, %s1424_s8, %s1423_s30  }
  0x7e   : > { %p1425_p6 = scmp.ne.s32.totalorder %s1418_s29, 0 }
  0x7f   : > { %s1322_s6 = sand.u32 (!%p1425_p6), 1, %s1066_s16   ;;  %p1426_p7 = scmp.ne.s32.totalorder (!%p1425_p6), %s1415_s26, 0 }
  0x80   : > { %231 = sbr.rel (%p1425_p6) target bundleno = 418 (0x1a2), region = 36  ;;  %s234_s25 = scalar_lea.sflag (!%p1425_p6), [#allocation3], %s1322_s6 }
  0x81   : > { %s781_s22 = smul.u32 (!%p1425_p6), 24, %s1322_s6 }
  0x83   : > { %s1326_s13 = scalar_lea.vmem (!%p1425_p6), [#allocation2], %s781_s22 }
  0x87   : > { %1045 = dma.done.wait (%p1426_p7), %s234_s25, 384  }
  0x88   : > { %1047 = vsyncadd (%p1426_p7), %s234_s25, 4294966912  ;;  %p1427_p5 = scmp.eq.s32.totalorder %s1135_s19, 0 }
  0x8a   : > { %1049 = dma.done.wait (%p1427_p5), [#allocation6], 2320   ;;  %p1428_p1 = pmov %p1427_p5 }
  0x8b   : > { %s706_s29 = sshll.u32 %s1322_s6, 3  ;;  %s251_s23 = scalar_lea.sflag [#allocation9], %s1322_s6 }
  0x8c   : > { %1051 = vsyncadd (%p1428_p1), [#allocation6], 4294964976  ;;  %s1340_s10 = scalar_lea.vmem [#allocation8], %s706_s29 }
  0x8d   : > { %1053 = dma.done.wait (%p1426_p7), %s251_s23, 128  }
  0x8e   : > { %1055 = vsyncadd (%p1426_p7), %s251_s23, 4294967168  ;;  %v1084_v0 = vmov 0.0   ;;  %vm1085_vm0 = vmmov 0   ;;  %v862_v1 = vld [vmem:[#allocation5 + $0x40] sm:$0xff]   ;;  %v864_v3 = vld [vmem:[#allocation5 + $0x48] sm:$0xff]   ;;  %vm458_vm1 = vcmask 261120  }
  0x8f   : > { %771 = vmatprep.subr.bf16.mxu1 %v1084_v0  ;;  %775 = vmatprep.mubr.msk.bf16.mxu1 %vm1085_vm0, %v1084_v0  ;;  %v863_v2 = vld [vmem:[#allocation5] sm:$0xff]   ;;  %v865_v4 = vld [vmem:[#allocation5 + $0x8] sm:$0xff]   ;;  %v866_v5 = vld [vmem:[#allocation5 + $0x50] sm:$0xff]   ;;  %s741_s26 = sshll.u32 %s1135_s19, 7  ;;  %s283_s20 = scalar_lea.vmem [#allocation10], %s706_s29  ;;  %vm560_vm2 = vcmask 257024  }
  0x90   : > { %746 = vmatprep.subr.bf16.mxu0 %v862_v1  ;;  %v867_v6 = vld [vmem:[#allocation5 + $0x10] sm:$0xff]   ;;  %v868_v7 = vld [vmem:[#allocation5 + $0x58] sm:$0xff]   ;;  %v870_v9 = vld [vmem:[#allocation5 + $0x60] sm:$0xff]   ;;  %s577_s7 = sshll.u32 %s283_s20, 4  ;;  %s1356_s24 = scalar_lea.hbm %s1406_s4, %s741_s26  ;;  %s1358_s7 = int_to_ptr.vmem [resolvable:$true] %s577_s7 }
  0x91   : > { %747 = vmatpush3.bf16.msra.mxu0 %v863_v2  ;;  %v869_v8 = vld [vmem:[#allocation5 + $0x18] sm:$0xff]   ;;  %v876_v10 = vld [vmem:[#allocation5 + $0x80] sm:$0xff]   ;;  %v872_v12 = vld [vmem:[#allocation5 + $0x68] sm:$0xff]   ;;  %s564_s19 = scalar_lea.sflag [#allocation4], %s1322_s6  ;;  %s1000_s12 = scalar_lea.vmem %s1358_s7, 128 }
  0x92   : > { %748 = vmatprep.subr.bf16.mxu0 %v864_v3  ;;  %v871_v11 = vld [vmem:[#allocation5 + $0x20] sm:$0xff]   ;;  %772 = vmatpush3.bf16.msra.mxu1 %v876_v10  ;;  %v873_v13 = vld [vmem:[#allocation5 + $0x28] sm:$0xff]   ;;  %v874_v16 = vld [vmem:[#allocation5 + $0x70] sm:$0xff]   ;;  %p1001_p8 = scmp.ne.s32.totalorder %s1358_s7, %s1000_s12  ;;  %p1429_p4 = scmp.ne.s32.totalorder %s1416_s27, 0 }
  0x93   : > { %773 = vmatprep.subr.bf16.mxu1 %v1084_v0  ;;  %v881_v14 = vld [vmem:[%s1326_s13 + $0x4] ss:$12 sps:$4 sm:$0xff]   ;;  %v883_v17 = vld [vmem:[%s1326_s13 + $0x8] ss:$12 sps:$4 sm:$0xff]   ;;  %v879_v21 = vld [vmem:[%s1326_s13] ss:$12 sps:$4 sm:$0xff]  }
  0x94   : > { %v882_v15 = vld [vmem:[#allocation5 + $0x88] sm:$0xff]   ;;  %494 = vmatprep.mubr.bf16.mxu0 %v881_v14  ;;  %v875_v18 = vld [vmem:[#allocation5 + $0x30] sm:$0xff]   ;;  %v877_v19 = vld [vmem:[#allocation5 + $0x78] sm:$0xff]   ;;  %p1002_p2 = pnand %p1001_p8, %p1429_p4  ;;  %s1086_s14 = smov [#allocation10]  }
  0x95   : > { %749 = vmatpush3.bf16.msra.mxu0 %v865_v4  ;;  %v878_v20 = vld [vmem:[#allocation5 + $0x38] sm:$0xff]   ;;  %v708_v28 = vld [vmem:[#allocation7] ss:$0 sm:$0xff]  ;;  %s1004_s11 = sshll.u32 %s1086_s14, 4  ;;  %s1005_s11 = int_to_ptr.vmem [resolvable:$false] %s1004_s11 }
  0x96   : > { %750 = vmatprep.subr.bf16.mxu0 %v866_v5  ;;  %774 = vmatpush3.bf16.msra.mxu1 %v882_v15  ;;  %v743_v29 = vld [vmem:[%s1340_s10] sm:$0xff]   ;;  %p1003_p11 = pneg %p1002_p2  ;;  %s1006_s30 = scalar_lea.vmem %s1005_s11, 256 }
  0x97   : > { %v744_v34 = vunpack.c.l.bf16 %v743_v29  ;;  %v745_v38 = vunpack.c.h.bf16 %v743_v29  ;;  %p1007_p13 = scmp.lt.s32.totalorder %s1358_s7, %s1005_s11  ;;  %p1008_p0 = scmp.lt.s32.totalorder %s1006_s30, %s1000_s12 }
  0x99   : > { %751 = vmatpush3.bf16.msra.mxu0 %v867_v6  ;;  %776 = vmatmul.mubr.msk.bf16.vlgmr.msra.gmra.mrb[0].mxu1 %vm458_vm1, %v883_v17  ;;  %p1009_p12 = por %p1008_p0, %p1007_p13 }
  0x9a   : > { %752 = vmatprep.subr.bf16.mxu0 %v868_v7 }
  0x9b   : > { %p1010_p3 = pnand %p1009_p12, %p1003_p11 }
  0x9d   : > { %753 = vmatpush3.bf16.msra.mxu0 %v869_v8 }
  0x9e   : > { %754 = vmatprep.subr.bf16.mxu0 %v870_v9 }
  0xa1   : > { %755 = vmatpush3.bf16.msra.mxu0 %v871_v11 }
  0xa2   : > { %756 = vmatprep.subr.bf16.mxu0 %v872_v12 }
  0xa5   : > { %757 = vmatpush3.bf16.msra.mxu0 %v873_v13 }
  0xa6   : > { %758 = vmatprep.subr.bf16.mxu0 %v874_v16 }
  0xa9   : > { %759 = vmatpush3.bf16.msra.mxu0 %v875_v18 }
  0xaa   : > { %760 = vmatprep.subr.bf16.mxu0 %v877_v19 }
  0xad   : > { %761 = vmatpush3.bf16.msra.mxu0 %v878_v20 }
  0xb0   : > { %495 = vmatmul.mubr.bf16.vlgmr.msra.gmra.mrb[0].mxu0 %v879_v21 }
 0x16c   : > { %v537_v22 = vpop.f32.mrb[0].mxu1 }
 0x16d   : > { %v777_v23 = vpop.f32.mrb[1].mxu1 }
 0x16e   : > { %v540_v24 = vpop.f32.mrb[2].mxu1 }
 0x16f   : > { %v778_v25 = vpop.f32.mrb[3].mxu1 }
 0x183   : > { %v762_v26 = vpop.f32.mrb[0].mxu0 }
 0x184   : > { %v763_v27 = vpop.f32.mrb[1].mxu0 }
 0x185   : > { %v764_v30 = vadd.f32 %v763_v27, %v762_v26  ;;  %v765_v31 = vpop.f32.mrb[2].mxu0 }
 0x186   : > { %v766_v32 = vpop.f32.mrb[3].mxu0 }
 0x187   : > { %v497_v33 = vadd.f32 %v764_v30, %v708_v28  ;;  %v767_v35 = vadd.f32 %v766_v32, %v765_v31 }
 0x189   : > { %v538_v36 = vadd.f32 %v537_v22, %v497_v33  ;;  %v500_v37 = vadd.f32 %v767_v35, %v708_v28 }
 0x18b   : > { %v548_v39 = vadd.f32 %v744_v34, %v538_v36  ;;  %v541_v40 = vadd.f32 %v540_v24, %v500_v37 }
 0x18d   : > { %v550_v41 = vmax.f32 %v548_v39, 0.0  ;;  %v549_v42 = vadd.f32 %v745_v38, %v541_v40 }
 0x18f   : > { %v739_v43 = vpack.c.bf16 %v550_v41, %v550_v41  ;;  %v551_v44 = vmax.f32 %v549_v42, 0.0 }
 0x191   : > { %561 = vst.msk [vmem:[%s283_s20] sm:$0xf] %vm560_vm2, %v739_v43  ;;  %v740_v45 = vpack.c.bf16 %v551_v44, %v551_v44 }
 0x193   : > { %562 = vst.msk [vmem:[%s283_s20 + $0x4] sm:$0xf] %vm560_vm2, %v740_v45 }
 0x194   : > { %1013 = shalt.err (!%p1010_p3)
}
 0x195   : > { %s1014_s8 = scalar_lea.hbm %s1356_s24, 128  ;;  %s1018_s13 = scalar_lea.hbm %s1406_s4, 256 }
 0x196   : > { %p1015_p9 = scmp.ne.s32.totalorder %s1356_s24, %s1014_s8  ;;  %p1019_p7 = scmp.lt.u32.totalorder %s1356_s24, %s1406_s4 }
 0x197   : > { %p1020_p5 = scmp.lt.u32.totalorder %s1018_s13, %s1014_s8  ;;  %p1022_p8 = scmp.lt.u32.totalorder %s1014_s8, %s1356_s24 }
 0x198   : > { %p1016_p10 = pnand %p1015_p9, %p1429_p4 }
 0x199   : > { %p1021_p1 = por %p1020_p5, %p1019_p7 }
 0x19a   : > { %p1017_p6 = pneg %p1016_p10 }
 0x19b   : > { %p1023_p2 = por %p1022_p8, %p1021_p1 }
 0x19d   : > { %p1024_p11 = pnand %p1023_p2, %p1017_p6 }
 0x19f   : > { %1027 = shalt.err (!%p1024_p11)
}
 0x1a0   : > { %s1087_s10 = smov 64   ;;  %s1088_s26 = smov 4  }
 0x1a1   : > { %794 = dma.vmem_to_hbm [thread:$0]  (%p1429_p4), %s1358_s7, 128, %s1356_s24, %s564_s19, %s1087_s10, %s1087_s10, %s1088_s26  }
 0x1a2 PF: > { %s592_s20 = sand.u32 1, %s1062_s15   ;;  %p1430_p13 = scmp.ne.s32.totalorder %s1417_s28, 0 }
 0x1a3   : > { %p1431_p0 = scmp.ge.s32.totalorder %s1074_s18, 2  ;;  %s593_s5 = scalar_lea.sflag [#allocation4], %s592_s20 }
 0x1a5   : > { %p811_p12 = pnand %p1431_p0, %p1430_p13 }
 0x1a7   : > { %1057 = dma.done.wait (!%p811_p12), %s593_s5, 128  }
 0x1a8   : > { %1059 = vsyncadd (!%p811_p12), %s593_s5, 4294967168  ;;  %s1432_s9 = sld [smem:[#allocation15_spill]]  ;;  %p21_p3 = scmp.ge.s32.totalorder %s1139_s21, 4  }
 0x1a9   : > { %s1433_s15 = smov %s1066_s16  ;;  %s1434_s16 = smov %s1070_s17 }
 0x1aa   : > { %s1436_s18 = smov %s1139_s21  ;;  %23 = sbr.rel (!%p21_p3) target bundleno = 8 (0x8), region = 102 }
 0x1ae   : > { %s1435_s17 = smov %s1432_s9 }
 0x1b1   :  { %598 = vsyncpa [#allocation3], 1 }
 0x1b2   :  { %600 = vsyncpa [#allocation3 + $0x1], 1 }
 0x1b3   :  { %601 = vsyncpa [#allocation6], 1 }
 0x1b4   :  { %602 = vsyncpa [#allocation9], 1 }
 0x1b5   :  { %604 = vsyncpa [#allocation9 + $0x1], 1 }
 0x1b6   :  { %605 = vsyncpa [#allocation4], 1 }
 0x1b7   :  { %607 = vsyncpa [#allocation4 + $0x1], 1 }

// kernel: _lambda_.23
= control target key start
LH: loop header
LB: loop body
LE: loop exit
PB: predicated region body
PF: predicated region fallthrough
CT: control target
= control target key end

     0   :  { %8 = vsyncpa [#allocation3], 0  ;;  %s575_s0 = inlined_call_operand.hbm [shape: bf16[8,288], index: 0, kind: input, shape index: {}]   ;;  %s576_s1 = inlined_call_operand.hbm [shape: bf16[288,64], index: 1, kind: input, shape index: {}]   ;;  %s577_s2 = inlined_call_operand.hbm [shape: f32[1,64], index: 2, kind: input, shape index: {}]   ;;  %s578_s3 = inlined_call_operand.hbm [shape: bf16[8,64], index: 3, kind: output, shape index: {}]  }
   0x1   :  { %9 = vsyncpa [#allocation6], 0 }
   0x2   :  { %10 = vsyncpa [#allocation4], 0  ;;  %s499_s12 = smov [#allocation5]   ;;  %s405_s16 = scalar_lea.hbm %s576_s1, 2304 }
   0x3   :  { %s26_s13 = sshll.u32 %s499_s12, 4  ;;  %p406_p0 = scmp.ne.s32.totalorder %s576_s1, %s405_s16  ;;  %s27_s13 = int_to_ptr.vmem [resolvable:$true] %s26_s13 }
   0x4   :  { %p409_p1 = scmp.lt.u32.totalorder %s405_s16, %s576_s1 }
   0x6   :  { %p411_p2 = pnand %p409_p1, %p406_p0 }
   0x8   :  { %414 = shalt.err (!%p411_p2)
}
   0x9   :  { %s415_s21 = scalar_lea.vmem %s27_s13, 2304  ;;  %p420_p4 = scmp.lt.s32.totalorder %s27_s13, %s27_s13 }
   0xa   :  { %p416_p3 = scmp.ne.s32.totalorder %s27_s13, %s415_s21  ;;  %p421_p5 = scmp.lt.s32.totalorder %s415_s21, %s415_s21 }
   0xc   :  { %p422_p6 = por %p421_p5, %p420_p4 }
   0xe   :  { %p423_p7 = pnand %p422_p6, %p416_p3 }
  0x10   :  { %426 = shalt.err (!%p423_p7)
}
  0x11   :  { %s500_s22 = smov 64   ;;  %s501_s23 = smov 4  }
  0x12   :  { %32 = dma.hbm_to_vmem [thread:$0]  %s576_s1, 2304, %s27_s13, [#allocation6], %s500_s22, %s500_s22, %s501_s23  }
  0x13   :  { %s502_s26 = smov [#allocation2]   ;;  %s503_s28 = smov [#allocation7]  }
  0x14   :  { %s17_s27 = sshll.u32 %s502_s26, 4  ;;  %s39_s29 = sshll.u32 %s503_s28, 4  ;;  %s18_s27 = int_to_ptr.vmem [resolvable:$true] %s17_s27  ;;  %s40_s29 = int_to_ptr.vmem [resolvable:$true] %s39_s29 }
  0x15   :  { %s427_s5 = scalar_lea.hbm %s575_s0, 192 }
  0x16   :  { %p428_p8 = scmp.ne.s32.totalorder %s575_s0, %s427_s5  ;;  %p431_p9 = scmp.lt.u32.totalorder %s427_s5, %s575_s0 }
  0x18   :  { %p433_p10 = pnand %p431_p9, %p428_p8 }
  0x1a   :  { %436 = shalt.err (!%p433_p10)
}
  0x1b   :  { %s437_s1 = scalar_lea.vmem %s18_s27, 192  ;;  %p442_p12 = scmp.lt.s32.totalorder %s18_s27, %s18_s27 }
  0x1c   :  { %p438_p11 = scmp.ne.s32.totalorder %s18_s27, %s437_s1  ;;  %p443_p13 = scmp.lt.s32.totalorder %s437_s1, %s437_s1 }
  0x1e   :  { %p444_p0 = por %p443_p13, %p442_p12 }
  0x20   :  { %p445_p1 = pnand %p444_p0, %p438_p11 }
  0x22   :  { %448 = shalt.err (!%p445_p1)
}
  0x23   :  { %20 = dma.hbm_to_vmem [thread:$0]  %s575_s0, 192, %s18_s27, [#allocation3]  }
  0x24   :  { %s449_s14 = scalar_lea.hbm %s577_s2, 16 }
  0x25   :  { %p450_p2 = scmp.ne.s32.totalorder %s577_s2, %s449_s14  ;;  %p453_p3 = scmp.lt.u32.totalorder %s449_s14, %s577_s2 }
  0x27   :  { %p455_p4 = pnand %p453_p3, %p450_p2 }
  0x29   :  { %458 = shalt.err (!%p455_p4)
}
  0x2a   :  { %s459_s19 = scalar_lea.vmem %s40_s29, 16  ;;  %s463_s20 = scalar_lea.vmem %s40_s29, 32 }
  0x2b   :  { %p460_p5 = scmp.ne.s32.totalorder %s40_s29, %s459_s19  ;;  %p464_p6 = scmp.lt.s32.totalorder %s40_s29, %s40_s29 }
  0x2c   :  { %p465_p7 = scmp.lt.s32.totalorder %s463_s20, %s459_s19 }
  0x2e   :  { %p466_p8 = por %p465_p7, %p464_p6 }
  0x30   :  { %p467_p9 = pnand %p466_p8, %p460_p5 }
  0x32   :  { %470 = shalt.err (!%p467_p9)
}
  0x33   :  { %42 = dma.hbm_to_vmem [thread:$0]  %s577_s2, 16, %s40_s29, [#allocation6]  }
  0x34   :  { %493 = dma.done.wait [#allocation3], 192  }
  0x35   :  { %494 = vsyncadd [#allocation3], 4294967104 }
  0x36   :  { %495 = dma.done.wait [#allocation6], 2320  }
  0x37   :  { %496 = vsyncadd [#allocation6], 4294964976  ;;  %v504_v0 = vmov 0.0   ;;  %vm505_vm0 = vmmov 0   ;;  %v384_v1 = vld [vmem:[#allocation5 + $0x40] sm:$0xff]   ;;  %v386_v3 = vld [vmem:[#allocation5 + $0x48] sm:$0xff]  }
  0x38   :  { %368 = vmatprep.subr.bf16.mxu1 %v504_v0  ;;  %372 = vmatprep.mubr.msk.bf16.mxu1 %vm505_vm0, %v504_v0  ;;  %v385_v2 = vld [vmem:[#allocation5] sm:$0xff]   ;;  %v387_v4 = vld [vmem:[#allocation5 + $0x8] sm:$0xff]   ;;  %v388_v5 = vld [vmem:[#allocation5 + $0x50] sm:$0xff]   ;;  %vm216_vm1 = vcmask 261120   ;;  %s506_s2 = smov [#allocation8]   ;;  %vm302_vm2 = vcmask 519168  }
  0x39   :  { %343 = vmatprep.subr.bf16.mxu0 %v384_v1  ;;  %v389_v6 = vld [vmem:[#allocation5 + $0x10] sm:$0xff]   ;;  %v390_v7 = vld [vmem:[#allocation5 + $0x58] sm:$0xff]   ;;  %v392_v9 = vld [vmem:[#allocation5 + $0x60] sm:$0xff]   ;;  %s310_s22 = sshll.u32 %s506_s2, 4  ;;  %s311_s22 = int_to_ptr.vmem [resolvable:$true] %s310_s22 }
  0x3a   :  { %344 = vmatpush3.bf16.msra.mxu0 %v385_v2  ;;  %v391_v8 = vld [vmem:[#allocation5 + $0x18] sm:$0xff]   ;;  %v398_v10 = vld [vmem:[#allocation5 + $0x80] sm:$0xff]   ;;  %v394_v12 = vld [vmem:[#allocation5 + $0x68] sm:$0xff]   ;;  %s471_s23 = scalar_lea.vmem %s311_s22, 64  ;;  %p476_p11 = scmp.lt.s32.totalorder %s311_s22, %s311_s22 }
  0x3b   :  { %345 = vmatprep.subr.bf16.mxu0 %v386_v3  ;;  %v393_v11 = vld [vmem:[#allocation5 + $0x20] sm:$0xff]   ;;  %369 = vmatpush3.bf16.msra.mxu1 %v398_v10  ;;  %v53_v13 = vld [vmem:[#allocation2] sm:$0xff]  ;;  %v403_v15 = vld [vmem:[#allocation5 + $0x88] sm:$0xff]   ;;  %p472_p10 = scmp.ne.s32.totalorder %s311_s22, %s471_s23  ;;  %p477_p12 = scmp.lt.s32.totalorder %s471_s23, %s471_s23 }
  0x3c   :  { %370 = vmatprep.subr.bf16.mxu1 %v504_v0  ;;  %v322_v14 = vcombine.high %v53_v13, %v53_v13  ;;  %v395_v16 = vld [vmem:[#allocation5 + $0x28] sm:$0xff]   ;;  %v396_v17 = vld [vmem:[#allocation5 + $0x70] sm:$0xff]   ;;  %v404_v18 = vld [vmem:[#allocation2 + $0x8] ss:$0 sps:$4 sm:$0xff]   ;;  %v321_v22 = vcombine.low %v53_v13, %v53_v13 }
  0x3d   :  { %v397_v19 = vld [vmem:[#allocation5 + $0x30] sm:$0xff]   ;;  %v399_v20 = vld [vmem:[#allocation5 + $0x78] sm:$0xff]   ;;  %p478_p13 = por %p477_p12, %p476_p11 }
  0x3e   :  { %346 = vmatpush3.bf16.msra.mxu0 %v387_v4  ;;  %252 = vmatprep.mubr.bf16.mxu0 %v322_v14  ;;  %v400_v21 = vld [vmem:[#allocation5 + $0x38] sm:$0xff]   ;;  %v320_v29 = vld [vmem:[#allocation7] ss:$0 sm:$0xff] }
  0x3f   :  { %347 = vmatprep.subr.bf16.mxu0 %v388_v5  ;;  %371 = vmatpush3.bf16.msra.mxu1 %v403_v15  ;;  %p479_p0 = pnand %p478_p13, %p472_p10 }
  0x42   :  { %348 = vmatpush3.bf16.msra.mxu0 %v389_v6  ;;  %373 = vmatmul.mubr.msk.bf16.vlgmr.msra.gmra.mrb[0].mxu1 %vm216_vm1, %v404_v18 }
  0x43   :  { %349 = vmatprep.subr.bf16.mxu0 %v390_v7 }
  0x46   :  { %350 = vmatpush3.bf16.msra.mxu0 %v391_v8 }
  0x47   :  { %351 = vmatprep.subr.bf16.mxu0 %v392_v9 }
  0x4a   :  { %352 = vmatpush3.bf16.msra.mxu0 %v393_v11 }
  0x4b   :  { %353 = vmatprep.subr.bf16.mxu0 %v394_v12 }
  0x4e   :  { %354 = vmatpush3.bf16.msra.mxu0 %v395_v16 }
  0x4f   :  { %355 = vmatprep.subr.bf16.mxu0 %v396_v17 }
  0x52   :  { %356 = vmatpush3.bf16.msra.mxu0 %v397_v19 }
  0x53   :  { %357 = vmatprep.subr.bf16.mxu0 %v399_v20 }
  0x56   :  { %358 = vmatpush3.bf16.msra.mxu0 %v400_v21 }
  0x59   :  { %253 = vmatmul.mubr.bf16.vlgmr.msra.gmra.mrb[0].mxu0 %v321_v22 }
 0x115   :  { %v294_v23 = vpop.f32.mrb[0].mxu1 }
 0x116   :  { %v374_v24 = vpop.f32.mrb[1].mxu1 }
 0x117   :  { %v297_v25 = vpop.f32.mrb[2].mxu1 }
 0x118   :  { %v375_v26 = vpop.f32.mrb[3].mxu1 }
 0x12c   :  { %v359_v27 = vpop.f32.mrb[0].mxu0 }
 0x12d   :  { %v360_v28 = vpop.f32.mrb[1].mxu0 }
 0x12e   :  { %v361_v30 = vadd.f32 %v360_v28, %v359_v27  ;;  %v362_v31 = vpop.f32.mrb[2].mxu0 }
 0x12f   :  { %v363_v32 = vpop.f32.mrb[3].mxu0 }
 0x130   :  { %v255_v33 = vadd.f32 %v361_v30, %v320_v29 }
 0x132   :  { %v295_v34 = vadd.f32 %v294_v23, %v255_v33 }
 0x134   :  { %v300_v35 = vmax.f32 %v295_v34, 0.0 }
 0x136   :  { %v301_v36 = vpack.c.bf16 %v300_v35, %v300_v35 }
 0x138   :  { %303 = vst.msk [vmem:[#allocation8] sm:$0xf] %vm302_vm2, %v301_v36 }
 0x139   :  { %482 = shalt.err (!%p479_p0)
}
 0x13a   :  { %s483_s26 = scalar_lea.hbm %s578_s3, 64 }
 0x13b   :  { %p484_p1 = scmp.ne.s32.totalorder %s578_s3, %s483_s26  ;;  %p487_p2 = scmp.lt.u32.totalorder %s483_s26, %s578_s3 }
 0x13d   :  { %p489_p3 = pnand %p487_p2, %p484_p1 }
 0x13f   :  { %492 = shalt.err (!%p489_p3)
}
 0x140   :  { %313 = dma.vmem_to_hbm [thread:$0]  %s311_s22, 64, %s578_s3, [#allocation4]  }
 0x141   :  { %497 = dma.done.wait [#allocation4], 64  }
 0x142   :  { %498 = vsyncadd [#allocation4], 4294967232 }
 0x143   :  { %317 = vsyncpa [#allocation3], 1 }
 0x144   :  { %318 = vsyncpa [#allocation6], 1 }
 0x145   :  { %319 = vsyncpa [#allocation4], 1 }

// kernel: _lambda_.24
= control target key start
LH: loop header
LB: loop body
LE: loop exit
PB: predicated region body
PF: predicated region fallthrough
CT: control target
= control target key end

     0   :  { %8 = vsyncpa [#allocation3], 0  ;;  %s335_s0 = inlined_call_operand.hbm [shape: bf16[8,32], index: 0, kind: input, shape index: {}]   ;;  %s336_s1 = inlined_call_operand.hbm [shape: bf16[32,64], index: 1, kind: input, shape index: {}]   ;;  %s337_s2 = inlined_call_operand.hbm [shape: f32[1,64], index: 2, kind: input, shape index: {}]   ;;  %s338_s3 = inlined_call_operand.hbm [shape: bf16[8,64], index: 3, kind: output, shape index: {}]  }
   0x1   :  { %9 = vsyncpa [#allocation6], 0 }
   0x2   :  { %10 = vsyncpa [#allocation4], 0  ;;  %s259_s12 = smov [#allocation5]   ;;  %s165_s16 = scalar_lea.hbm %s336_s1, 256 }
   0x3   :  { %s26_s13 = sshll.u32 %s259_s12, 4  ;;  %p166_p0 = scmp.ne.s32.totalorder %s336_s1, %s165_s16  ;;  %s27_s13 = int_to_ptr.vmem [resolvable:$true] %s26_s13 }
   0x4   :  { %p169_p1 = scmp.lt.u32.totalorder %s165_s16, %s336_s1 }
   0x6   :  { %p171_p2 = pnand %p169_p1, %p166_p0 }
   0x8   :  { %174 = shalt.err (!%p171_p2)
}
   0x9   :  { %s175_s21 = scalar_lea.vmem %s27_s13, 256  ;;  %p180_p4 = scmp.lt.s32.totalorder %s27_s13, %s27_s13 }
   0xa   :  { %p176_p3 = scmp.ne.s32.totalorder %s27_s13, %s175_s21  ;;  %p181_p5 = scmp.lt.s32.totalorder %s175_s21, %s175_s21 }
   0xc   :  { %p182_p6 = por %p181_p5, %p180_p4 }
   0xe   :  { %p183_p7 = pnand %p182_p6, %p176_p3 }
  0x10   :  { %186 = shalt.err (!%p183_p7)
}
  0x11   :  { %s260_s22 = smov 64   ;;  %s261_s23 = smov 4  }
  0x12   :  { %32 = dma.hbm_to_vmem [thread:$0]  %s336_s1, 256, %s27_s13, [#allocation6], %s260_s22, %s260_s22, %s261_s23  }
  0x13   :  { %s262_s26 = smov [#allocation2]   ;;  %s263_s28 = smov [#allocation7]  }
  0x14   :  { %s17_s27 = sshll.u32 %s262_s26, 4  ;;  %s39_s29 = sshll.u32 %s263_s28, 4  ;;  %s18_s27 = int_to_ptr.vmem [resolvable:$true] %s17_s27  ;;  %s40_s29 = int_to_ptr.vmem [resolvable:$true] %s39_s29 }
  0x15   :  { %s187_s5 = scalar_lea.hbm %s335_s0, 64 }
  0x16   :  { %p188_p8 = scmp.ne.s32.totalorder %s335_s0, %s187_s5  ;;  %p191_p9 = scmp.lt.u32.totalorder %s187_s5, %s335_s0 }
  0x18   :  { %p193_p10 = pnand %p191_p9, %p188_p8 }
  0x1a   :  { %196 = shalt.err (!%p193_p10)
}
  0x1b   :  { %s197_s1 = scalar_lea.vmem %s18_s27, 64  ;;  %p202_p12 = scmp.lt.s32.totalorder %s18_s27, %s18_s27 }
  0x1c   :  { %p198_p11 = scmp.ne.s32.totalorder %s18_s27, %s197_s1  ;;  %p203_p13 = scmp.lt.s32.totalorder %s197_s1, %s197_s1 }
  0x1e   :  { %p204_p0 = por %p203_p13, %p202_p12 }
  0x20   :  { %p205_p1 = pnand %p204_p0, %p198_p11 }
  0x22   :  { %208 = shalt.err (!%p205_p1)
}
  0x23   :  { %20 = dma.hbm_to_vmem [thread:$0]  %s335_s0, 64, %s18_s27, [#allocation3]  }
  0x24   :  { %s209_s14 = scalar_lea.hbm %s337_s2, 16 }
  0x25   :  { %p210_p2 = scmp.ne.s32.totalorder %s337_s2, %s209_s14  ;;  %p213_p3 = scmp.lt.u32.totalorder %s209_s14, %s337_s2 }
  0x27   :  { %p215_p4 = pnand %p213_p3, %p210_p2 }
  0x29   :  { %218 = shalt.err (!%p215_p4)
}
  0x2a   :  { %s219_s19 = scalar_lea.vmem %s40_s29, 16  ;;  %s223_s20 = scalar_lea.vmem %s40_s29, 32 }
  0x2b   :  { %p220_p5 = scmp.ne.s32.totalorder %s40_s29, %s219_s19  ;;  %p224_p6 = scmp.lt.s32.totalorder %s40_s29, %s40_s29 }
  0x2c   :  { %p225_p7 = scmp.lt.s32.totalorder %s223_s20, %s219_s19 }
  0x2e   :  { %p226_p8 = por %p225_p7, %p224_p6 }
  0x30   :  { %p227_p9 = pnand %p226_p8, %p220_p5 }
  0x32   :  { %230 = shalt.err (!%p227_p9)
}
  0x33   :  { %42 = dma.hbm_to_vmem [thread:$0]  %s337_s2, 16, %s40_s29, [#allocation6]  }
  0x34   :  { %253 = dma.done.wait [#allocation3], 64  }
  0x35   :  { %254 = vsyncadd [#allocation3], 4294967232 }
  0x36   :  { %255 = dma.done.wait [#allocation6], 272  }
  0x37   :  { %256 = vsyncadd [#allocation6], 4294967024  ;;  %v264_v0 = vmov 0.0   ;;  %vm265_vm0 = vmmov 0   ;;  %v163_v1 = vld [vmem:[#allocation5] sm:$0xff]   ;;  %v164_v2 = vld [vmem:[#allocation5 + $0x8] sm:$0xff]  }
  0x38   :  { %147 = vmatprep.subr.bf16.mxu0 %v264_v0  ;;  %151 = vmatprep.mubr.msk.bf16.mxu0 %vm265_vm0, %v264_v0  ;;  %v53_v3 = vld [vmem:[#allocation2] sm:$0xf]  ;;  %vm77_vm1 = vcmask 261120   ;;  %v140_v4 = vld [vmem:[#allocation7] ss:$0 sm:$0xff]  ;;  %s266_s22 = smov [#allocation8]  }
  0x39   :  { %148 = vmatpush3.bf16.msra.mxu0 %v163_v1  ;;  %s130_s2 = sshll.u32 %s266_s22, 4  ;;  %vm122_vm2 = vcmask 519168   ;;  %s131_s2 = int_to_ptr.vmem [resolvable:$true] %s130_s2 }
  0x3a   :  { %149 = vmatprep.subr.bf16.mxu0 %v264_v0  ;;  %s231_s23 = scalar_lea.vmem %s131_s2, 64  ;;  %p236_p11 = scmp.lt.s32.totalorder %s131_s2, %s131_s2 }
  0x3b   :  { %p232_p10 = scmp.ne.s32.totalorder %s131_s2, %s231_s23  ;;  %p237_p12 = scmp.lt.s32.totalorder %s231_s23, %s231_s23 }
  0x3d   :  { %150 = vmatpush3.bf16.msra.mxu0 %v164_v2  ;;  %p238_p13 = por %p237_p12, %p236_p11 }
  0x3f   :  { %p239_p0 = pnand %p238_p13, %p232_p10 }
  0x40   :  { %152 = vmatmul.mubr.msk.bf16.vlgmr.msra.gmra.mrb[0].mxu0 %vm77_vm1, %v53_v3 }
 0x113   :  { %v115_v5 = vpop.f32.mrb[0].mxu0 }
 0x114   :  { %v116_v6 = vadd.f32 %v140_v4, %v115_v5  ;;  %v153_v7 = vpop.f32.mrb[1].mxu0 }
 0x115   :  { %v118_v8 = vpop.f32.mrb[2].mxu0 }
 0x116   :  { %v121_v9 = vpack.c.bf16 %v116_v6, %v116_v6  ;;  %v154_v10 = vpop.f32.mrb[3].mxu0 }
 0x118   :  { %123 = vst.msk [vmem:[#allocation8] sm:$0xf] %vm122_vm2, %v121_v9 }
 0x119   :  { %242 = shalt.err (!%p239_p0)
}
 0x11a   :  { %s243_s26 = scalar_lea.hbm %s338_s3, 64 }
 0x11b   :  { %p244_p1 = scmp.ne.s32.totalorder %s338_s3, %s243_s26  ;;  %p247_p2 = scmp.lt.u32.totalorder %s243_s26, %s338_s3 }
 0x11d   :  { %p249_p3 = pnand %p247_p2, %p244_p1 }
 0x11f   :  { %252 = shalt.err (!%p249_p3)
}
 0x120   :  { %133 = dma.vmem_to_hbm [thread:$0]  %s131_s2, 64, %s338_s3, [#allocation4]  }
 0x121   :  { %257 = dma.done.wait [#allocation4], 64  }
 0x122   :  { %258 = vsyncadd [#allocation4], 4294967232 }
 0x123   :  { %137 = vsyncpa [#allocation3], 1 }
 0x124   :  { %138 = vsyncpa [#allocation6], 1 }
 0x125   :  { %139 = vsyncpa [#allocation4], 1 }

// kernel: _lambda_.25
= control target key start
LH: loop header
LB: loop body
LE: loop exit
PB: predicated region body
PF: predicated region fallthrough
CT: control target
= control target key end

     0   :  { %14 = vsyncpa [#allocation3], 0  ;;  %s1177_s0 = inlined_call_operand.hbm [shape: bf16[8,576], index: 0, kind: input, shape index: {}]   ;;  %s1178_s1 = inlined_call_operand.hbm [shape: bf16[576,64], index: 1, kind: input, shape index: {}]   ;;  %s1179_s2 = inlined_call_operand.vmem [shape: f32[1,64], index: 2, kind: input, shape index: {}]   ;;  %s1180_s3 = inlined_call_operand.vmem [shape: bf16[8,64], index: 3, kind: input, shape index: {}]   ;;  %s1181_s4 = inlined_call_operand.vmem [shape: f32[2,8], index: 4, kind: input, shape index: {}]   ;;  %s1182_s5 = inlined_call_operand.hbm [shape: f32[64,16], index: 5, kind: input, shape index: {}]   ;;  %s1183_s6 = inlined_call_operand.vmem [shape: f32[1,16], index: 6, kind: input, shape index: {}]   ;;  %s1184_s7 = inlined_call_operand.hbm [shape: f32[2,16], index: 7, kind: output, shape index: {0}]   ;;  %s1185_s8 = inlined_call_operand.hbm [shape: f32[2,64], index: 8, kind: output, shape index: {1}]  }
   0x1   :  { %15 = vsyncpa [#allocation6], 0 }
   0x2   :  { %16 = vsyncpa [#allocation4], 0 }
   0x3   :  { %17 = vsyncpa [#allocation10], 0  ;;  %s1035_s27 = smov [#allocation5]   ;;  %s917_s9 = scalar_lea.hbm %s1178_s1, 4608 }
   0x4   :  { %s33_s28 = sshll.u32 %s1035_s27, 4  ;;  %p918_p0 = scmp.ne.s32.totalorder %s1178_s1, %s917_s9  ;;  %s34_s28 = int_to_ptr.vmem [resolvable:$true] %s33_s28 }
   0x5   :  { %p921_p1 = scmp.lt.u32.totalorder %s917_s9, %s1178_s1 }
   0x7   :  { %p923_p2 = pnand %p921_p1, %p918_p0 }
   0x9   :  { %926 = shalt.err (!%p923_p2)
}
   0xa   :  { %s927_s14 = scalar_lea.vmem %s34_s28, 4608  ;;  %p932_p4 = scmp.lt.s32.totalorder %s34_s28, %s34_s28 }
   0xb   :  { %p928_p3 = scmp.ne.s32.totalorder %s34_s28, %s927_s14  ;;  %p933_p5 = scmp.lt.s32.totalorder %s927_s14, %s927_s14 }
   0xd   :  { %p934_p6 = por %p933_p5, %p932_p4 }
   0xf   :  { %p935_p7 = pnand %p934_p6, %p928_p3 }
  0x11   :  { %938 = shalt.err (!%p935_p7)
}
  0x12   :  { %s1036_s15 = smov 64   ;;  %s1037_s16 = smov 4  }
  0x13   :  { %39 = dma.hbm_to_vmem [thread:$0]  %s1178_s1, 4608, %s34_s28, [#allocation6], %s1036_s15, %s1036_s15, %s1037_s16  }
  0x14   :  { %s1038_s19 = smov [#allocation2]   ;;  %s1039_s21 = smov [#allocation7]  }
  0x15   :  { %s24_s20 = sshll.u32 %s1038_s19, 4  ;;  %s51_s22 = sshll.u32 %s1039_s21, 4  ;;  %s25_s20 = int_to_ptr.vmem [resolvable:$true] %s24_s20  ;;  %s52_s22 = int_to_ptr.vmem [resolvable:$true] %s51_s22 }
  0x16   :  { %s939_s25 = scalar_lea.hbm %s1177_s0, 320 }
  0x17   :  { %p940_p8 = scmp.ne.s32.totalorder %s1177_s0, %s939_s25  ;;  %p943_p9 = scmp.lt.u32.totalorder %s939_s25, %s1177_s0 }
  0x19   :  { %p945_p10 = pnand %p943_p9, %p940_p8 }
  0x1b   :  { %948 = shalt.err (!%p945_p10)
}
  0x1c   :  { %s949_s1 = scalar_lea.vmem %s25_s20, 320  ;;  %p954_p12 = scmp.lt.s32.totalorder %s25_s20, %s25_s20 }
  0x1d   :  { %p950_p11 = scmp.ne.s32.totalorder %s25_s20, %s949_s1  ;;  %p955_p13 = scmp.lt.s32.totalorder %s949_s1, %s949_s1 }
  0x1f   :  { %p956_p0 = por %p955_p13, %p954_p12 }
  0x21   :  { %p957_p1 = pnand %p956_p0, %p950_p11 }
  0x23   :  { %960 = shalt.err (!%p957_p1)
}
  0x24   :  { %27 = dma.hbm_to_vmem [thread:$0]  %s1177_s0, 320, %s25_s20, [#allocation3]  }
  0x25   :  { %s961_s12 = scalar_lea.hbm %s1182_s5, 1024 }
  0x26   :  { %p962_p2 = scmp.ne.s32.totalorder %s1182_s5, %s961_s12  ;;  %p965_p3 = scmp.lt.u32.totalorder %s961_s12, %s1182_s5 }
  0x28   :  { %p967_p4 = pnand %p965_p3, %p962_p2 }
  0x2a   :  { %970 = shalt.err (!%p967_p4)
}
  0x2b   :  { %s971_s17 = scalar_lea.vmem %s52_s22, 1024  ;;  %p976_p6 = scmp.lt.s32.totalorder %s52_s22, %s52_s22 }
  0x2c   :  { %p972_p5 = scmp.ne.s32.totalorder %s52_s22, %s971_s17  ;;  %p977_p7 = scmp.lt.s32.totalorder %s971_s17, %s971_s17 }
  0x2e   :  { %p978_p8 = por %p977_p7, %p976_p6 }
  0x30   :  { %p979_p9 = pnand %p978_p8, %p972_p5 }
  0x32   :  { %982 = shalt.err (!%p979_p9)
}
  0x33   :  { %s1040_s0 = smov 128   ;;  %s1041_s18 = smov 8  }
  0x34   :  { %57 = dma.hbm_to_vmem [thread:$0]  %s1182_s5, 1024, %s52_s22, [#allocation6], %s1040_s0, %s1040_s0, %s1041_s18  }
  0x35   :  { %1027 = dma.done.wait [#allocation3], 320  }
  0x36   :  { %1028 = vsyncadd [#allocation3], 4294966976 }
  0x37   :  { %1029 = dma.done.wait [#allocation6], 5632  }
  0x38   :  { %1030 = vsyncadd [#allocation6], 4294961664  ;;  %v876_v0 = vld [vmem:[#allocation5 + $0x40] sm:$0xff]   ;;  %v880_v4 = vld [vmem:[#allocation5 + $0x48] sm:$0xff]   ;;  %v1042_v35 = vmov 0.0   ;;  %vm1043_vm0 = vmmov 0  }
  0x39   :  { %v877_v1 = vld [vmem:[#allocation5] sm:$0xff]   ;;  %756 = vmatprep.subr.bf16.mxu0 %v876_v0  ;;  %v881_v5 = vld [vmem:[#allocation5 + $0x8] sm:$0xff]   ;;  %v884_v8 = vld [vmem:[#allocation5 + $0x50] sm:$0xff]   ;;  %vm385_vm1 = vcmask 523264   ;;  %vm514_vm2 = vcmask 64512   ;;  %vm588_vm3 = vcmask 517120  }
  0x3a   :  { %v878_v2 = vld [vmem:[#allocation5 + $0xc0] sm:$0xff]   ;;  %757 = vmatpush3.bf16.msra.mxu0 %v877_v1  ;;  %v882_v6 = vld [vmem:[#allocation5 + $0xc8] sm:$0xff]   ;;  %v885_v9 = vld [vmem:[#allocation5 + $0x10] sm:$0xff]  }
  0x3b   :  { %v879_v3 = vld [vmem:[#allocation5 + $0x80] sm:$0xff]   ;;  %778 = vmatprep.subr.bf16.mxu1 %v878_v2  ;;  %758 = vmatprep.subr.bf16.mxu0 %v880_v4  ;;  %v883_v7 = vld [vmem:[#allocation5 + $0x88] sm:$0xff]   ;;  %v886_v10 = vld [vmem:[#allocation5 + $0xd0] sm:$0xff]  }
  0x3c   :  { %779 = vmatpush3.bf16.msra.mxu1 %v879_v3  ;;  %v887_v11 = vld [vmem:[#allocation5 + $0x90] sm:$0xff]   ;;  %v888_v12 = vld [vmem:[#allocation5 + $0x58] sm:$0xff]   ;;  %v892_v16 = vld [vmem:[#allocation5 + $0x60] sm:$0xff]  }
  0x3d   :  { %780 = vmatprep.subr.bf16.mxu1 %v882_v6  ;;  %v889_v13 = vld [vmem:[#allocation5 + $0x18] sm:$0xff]   ;;  %v893_v17 = vld [vmem:[#allocation5 + $0x20] sm:$0xff]   ;;  %v896_v20 = vld [vmem:[#allocation5 + $0x68] sm:$0xff]  }
  0x3e   :  { %759 = vmatpush3.bf16.msra.mxu0 %v881_v5  ;;  %v890_v14 = vld [vmem:[#allocation5 + $0xd8] sm:$0xff]   ;;  %v894_v18 = vld [vmem:[#allocation5 + $0xe0] sm:$0xff]   ;;  %v897_v21 = vld [vmem:[#allocation5 + $0x28] sm:$0xff]  }
  0x3f   :  { %760 = vmatprep.subr.bf16.mxu0 %v884_v8  ;;  %v891_v15 = vld [vmem:[#allocation5 + $0x98] sm:$0xff]   ;;  %v895_v19 = vld [vmem:[#allocation5 + $0xa0] sm:$0xff]   ;;  %v898_v22 = vld [vmem:[#allocation5 + $0xe8] sm:$0xff]   ;;  %v1044_v8 = vmov 0.0|0.0  }
  0x40   :  { %781 = vmatpush3.bf16.msra.mxu1 %v883_v7  ;;  %v899_v23 = vld [vmem:[#allocation5 + $0xa8] sm:$0xff]   ;;  %v900_v24 = vld [vmem:[#allocation5 + $0x70] sm:$0xff]   ;;  %v904_v28 = vld [vmem:[#allocation5 + $0x78] sm:$0xff]  }
  0x41   :  { %782 = vmatprep.subr.bf16.mxu1 %v886_v10  ;;  %v901_v25 = vld [vmem:[#allocation5 + $0x30] sm:$0xff]   ;;  %v905_v29 = vld [vmem:[#allocation5 + $0x38] sm:$0xff]   ;;  %v912_v39 = vld [vmem:[#allocation5 + $0x100] sm:$0xff]  }
  0x42   :  { %761 = vmatpush3.bf16.msra.mxu0 %v885_v9  ;;  %v902_v26 = vld [vmem:[#allocation5 + $0xf0] sm:$0xff]   ;;  %v906_v30 = vld [vmem:[#allocation5 + $0xf8] sm:$0xff]   ;;  %v913_v40 = vld [vmem:[#allocation5 + $0x108] sm:$0xff]  }
  0x43   :  { %762 = vmatprep.subr.bf16.mxu0 %v888_v12  ;;  %v903_v27 = vld [vmem:[#allocation5 + $0xb0] sm:$0xff]   ;;  %v909_v34 = vld [vmem:[#allocation5 + $0xb8] sm:$0xff]   ;;  %v710_v45 = vld [vmem:[%s1179_s2] ss:$0 sm:$0xff] }
  0x44   :  { %783 = vmatpush3.bf16.msra.mxu1 %v887_v11  ;;  %v70_v31 = vld [vmem:[#allocation2] sm:$0xff]  ;;  %v71_v36 = vld [vmem:[#allocation2 + $0x8] sm:$0xff]  ;;  %v916_v43 = vld [vmem:[#allocation2 + $0x10] ss:$0 sps:$4 sm:$0xff]  }
  0x45   :  { %784 = vmatprep.subr.bf16.mxu1 %v890_v14  ;;  %v711_v32 = vcombine.low %v70_v31, %v70_v31  ;;  %v712_v33 = vcombine.high %v70_v31, %v70_v31  ;;  %v713_v37 = vcombine.low %v71_v36, %v71_v36  ;;  %v714_v38 = vcombine.high %v71_v36, %v71_v36  ;;  %v914_v41 = vld [vmem:[#allocation5 + $0x110] sm:$0xff]   ;;  %v915_v42 = vld [vmem:[#allocation5 + $0x118] sm:$0xff]   ;;  %v509_v57 = vld [vmem:[%s1180_s3] sm:$0xf]  ;;  %s1045_s3 = smov [#allocation9]  }
  0x46   :  { %763 = vmatpush3.bf16.msra.mxu0 %v889_v13  ;;  %v510_v58 = vunpack.c.l.bf16 %v509_v57  ;;  %v590_v63 = vld [vmem:[#allocation7] sm:$0xff]  ;;  %v591_v0 = vld [vmem:[#allocation7 + $0x8] sm:$0xff]  ;;  %v592_v6 = vld [vmem:[#allocation7 + $0x10] sm:$0xff] }
  0x47   :  { %764 = vmatprep.subr.bf16.mxu0 %v892_v16  ;;  %421 = vmatprep.mubr.bf16.mxu0 %v712_v33  ;;  %v513_v4 = vld [vmem:[%s1181_s4] sm:$0x3]  ;;  %v853_v5 = vpack.c.bf16 %v591_v0, %v590_v63  ;;  %v593_v7 = vld [vmem:[#allocation7 + $0x18] sm:$0xff]  ;;  %v594_v10 = vld [vmem:[#allocation7 + $0x20] sm:$0xff]  ;;  %s696_s4 = sshll.u32 %s1045_s3, 4  ;;  %s697_s4 = int_to_ptr.vmem [resolvable:$true] %s696_s4 }
  0x48   :  { %785 = vmatpush3.bf16.msra.mxu1 %v891_v15  ;;  %461 = vmatprep.mubr.bf16.mxu1 %v714_v38  ;;  %v856_v9 = vpack.c.bf16 %v593_v7, %v592_v6  ;;  %v595_v11 = vld [vmem:[#allocation7 + $0x28] sm:$0xff]  ;;  %v596_v13 = vld [vmem:[#allocation7 + $0x30] sm:$0xff]  ;;  %v597_v14 = vld [vmem:[#allocation7 + $0x38] sm:$0xff]  ;;  %s983_s25 = scalar_lea.vmem %s697_s4, 32  ;;  %p988_p11 = scmp.lt.s32.totalorder %s697_s4, %s697_s4 }
  0x49   :  { %786 = vmatprep.subr.bf16.mxu1 %v894_v18  ;;  %v859_v12 = vpack.c.bf16 %v595_v11, %v594_v10  ;;  %v862_v15 = vpack.c.bf16 %v597_v14, %v596_v13  ;;  %p984_p10 = scmp.ne.s32.totalorder %s697_s4, %s983_s25  ;;  %p989_p12 = scmp.lt.s32.totalorder %s983_s25, %s983_s25 }
  0x4a   :  { %765 = vmatpush3.bf16.msra.mxu0 %v893_v17 }
  0x4b   :  { %766 = vmatprep.subr.bf16.mxu0 %v896_v20  ;;  %p990_p13 = por %p989_p12, %p988_p11 }
  0x4c   :  { %787 = vmatpush3.bf16.msra.mxu1 %v895_v19 }
  0x4d   :  { %788 = vmatprep.subr.bf16.mxu1 %v898_v22  ;;  %p991_p0 = pnand %p990_p13, %p984_p10 }
  0x4e   :  { %767 = vmatpush3.bf16.msra.mxu0 %v897_v21 }
  0x4f   :  { %768 = vmatprep.subr.bf16.mxu0 %v900_v24 }
  0x50   :  { %789 = vmatpush3.bf16.msra.mxu1 %v899_v23 }
  0x51   :  { %790 = vmatprep.subr.bf16.mxu1 %v902_v26 }
  0x52   :  { %769 = vmatpush3.bf16.msra.mxu0 %v901_v25 }
  0x53   :  { %770 = vmatprep.subr.bf16.mxu0 %v904_v28 }
  0x54   :  { %791 = vmatpush3.bf16.msra.mxu1 %v903_v27 }
  0x55   :  { %792 = vmatprep.subr.bf16.mxu1 %v906_v30 }
  0x56   :  { %771 = vmatpush3.bf16.msra.mxu0 %v905_v29 }
  0x57   :  { %816 = vmatprep.subr.bf16.mxu0 %v1042_v35 }
  0x58   :  { %793 = vmatpush3.bf16.msra.mxu1 %v909_v34 }
  0x59   :  { %422 = vmatmul.mubr.bf16.vlgmr.msra.gmra.mrb[0].mxu0 %v711_v32  ;;  %828 = vmatprep.subr.mxu1 %v1042_v35 }
  0x5a   :  { %817 = vmatpush3.bf16.msra.mxu0 %v912_v39  ;;  %824 = vmatprep.mubr.msk.bf16.mxu0 %vm1043_vm0, %v1042_v35 }
  0x5b   :  { %462 = vmatmul.mubr.bf16.vlgmr.msra.gmra.mrb[0].mxu1 %v713_v37  ;;  %818 = vmatprep.subr.bf16.mxu0 %v1042_v35 }
  0x5c   :  { %830 = vmatprep.mubr.msk.f32.mxu1 %vm1043_vm0, %v1042_v35 }
  0x5e   :  { %819 = vmatpush3.bf16.msra.mxu0 %v913_v40 }
  0x5f   :  { %820 = vmatprep.subr.bf16.mxu0 %v1042_v35 }
  0x62   :  { %821 = vmatpush3.bf16.msra.mxu0 %v914_v41 }
  0x63   :  { %822 = vmatprep.subr.bf16.mxu0 %v1042_v35 }
  0x66   :  { %823 = vmatpush3.bf16.msra.mxu0 %v915_v42 }
  0x69   :  { %825 = vmatmul.mubr.msk.bf16.vlgmr.msra.gmra.mrb[4].mxu0 %vm385_vm1, %v916_v43 }
 0x12c   :  { %v772_v44 = vpop.f32.mrb[0].mxu0 }
 0x12d   :  { %v773_v46 = vpop.f32.mrb[1].mxu0 }
 0x12e   :  { %v774_v47 = vadd.f32 %v773_v46, %v772_v44  ;;  %v775_v48 = vpop.f32.mrb[2].mxu0  ;;  %v794_v49 = vpop.f32.mrb[0].mxu1 }
 0x12f   :  { %v776_v50 = vpop.f32.mrb[3].mxu0  ;;  %v795_v51 = vpop.f32.mrb[1].mxu1 }
 0x130   :  { %v424_v52 = vadd.f32 %v774_v47, %v710_v45  ;;  %v796_v53 = vadd.f32 %v795_v51, %v794_v49  ;;  %v797_v54 = vpop.f32.mrb[2].mxu1 }
 0x131   :  { %v798_v55 = vpop.f32.mrb[3].mxu1 }
 0x132   :  { %v464_v56 = vadd.f32 %v796_v53, %v424_v52 }
 0x13c   :  { %v503_v59 = vpop.f32.mrb[4].mxu0 }
 0x13d   :  { %v504_v60 = vadd.f32 %v503_v59, %v464_v56  ;;  %v826_v61 = vpop.f32.mrb[5].mxu0 }
 0x13e   :  { %v506_v62 = vpop.f32.mrb[6].mxu0 }
 0x13f   :  { %v511_v1 = vadd.f32 %v510_v58, %v504_v60  ;;  %v827_v2 = vpop.f32.mrb[7].mxu0 }
 0x141   :  { %v512_v3 = vmax.f32 %v511_v1, 0.0 }
 0x143   :  { %829 = vmatpush3.msra.mxu1 %v512_v3 }
 0x144   :  { %831 = vmatmul.mubr.msk.f32.vlgmr.msra.gmra.mrb[4].mxu1 %vm514_vm2, %v513_v4  ;;  %852 = vmatprep.subr.bf16.mxu1 %v1044_v8 }
 0x145   :  { %854 = vmatpush3.bf16.msra.mxu1 %v853_v5  ;;  %849 = vmatprep.mubr.msk.f32.mxu1 %vm1043_vm0, %v1042_v35 }
 0x146   :  { %855 = vmatprep.subr.bf16.mxu1 %v1044_v8 }
 0x149   :  { %857 = vmatpush3.bf16.msra.mxu1 %v856_v9 }
 0x14a   :  { %858 = vmatprep.subr.bf16.mxu1 %v1044_v8 }
 0x14d   :  { %860 = vmatpush3.bf16.msra.mxu1 %v859_v12 }
 0x14e   :  { %861 = vmatprep.subr.bf16.mxu1 %v1044_v8 }
 0x151   :  { %863 = vmatpush3.bf16.msra.mxu1 %v862_v15 }
 0x217   :  { %v584_v16 = vpop.f32.mrb[4].mxu1 }
 0x218   :  { %v832_v17 = vpop.f32.mrb[5].mxu1  ;;  %850 = vmatmul.mubr.msk.f32.vlgmr.msra.gmra.mrb[6].mxu1 %vm385_vm1, %v584_v16  ;;  %589 = vst.msk [vmem:[#allocation9] sm:$0x3] %vm588_vm3, %v584_v16 }
 0x219   :  { %994 = shalt.err (!%p991_p0)
}
 0x21a   :  { %s995_s29 = scalar_lea.hbm %s1185_s8, 32 }
 0x21b   :  { %p996_p1 = scmp.ne.s32.totalorder %s1185_s8, %s995_s29  ;;  %p999_p2 = scmp.lt.u32.totalorder %s995_s29, %s1185_s8 }
 0x21d   :  { %p1001_p3 = pnand %p999_p2, %p996_p1 }
 0x21f   :  { %1004 = shalt.err (!%p1001_p3)
}
 0x220   :  { %699 = dma.vmem_to_hbm [thread:$0]  %s697_s4, 32, %s1185_s8, [#allocation10]   ;;  %v754_v18 = vld [vmem:[%s1183_s6] ss:$0 sm:$0xff]  ;;  %vm678_vm4 = vcmask 123904  }
 0x221   :  { %s1046_s14 = smov [#allocation8]  }
 0x222   :  { %s686_s15 = sshll.u32 %s1046_s14, 4  ;;  %s687_s15 = int_to_ptr.vmem [resolvable:$true] %s686_s15 }
 0x223   :  { %s1005_s16 = scalar_lea.vmem %s687_s15, 32  ;;  %p1010_p5 = scmp.lt.s32.totalorder %s687_s15, %s687_s15 }
 0x224   :  { %p1006_p4 = scmp.ne.s32.totalorder %s687_s15, %s1005_s16  ;;  %p1011_p6 = scmp.lt.s32.totalorder %s1005_s16, %s1005_s16 }
 0x226   :  { %p1012_p7 = por %p1011_p6, %p1010_p5 }
 0x228   :  { %p1013_p8 = pnand %p1012_p7, %p1006_p4 }
 0x2eb   :  { %v674_v19 = vpop.f32.mrb[6].mxu1 }
 0x2ec   :  { %v675_v20 = vadd.f32 %v754_v18, %v674_v19  ;;  %v851_v21 = vpop.f32.mrb[7].mxu1 }
 0x2ee   :  { %679 = vst.msk [vmem:[#allocation8] sm:$0x3] %vm678_vm4, %v675_v20 }
 0x2ef   :  { %1016 = shalt.err (!%p1013_p8)
}
 0x2f0   :  { %s1017_s0 = scalar_lea.hbm %s1184_s7, 32 }
 0x2f1   :  { %p1018_p9 = scmp.ne.s32.totalorder %s1184_s7, %s1017_s0  ;;  %p1021_p10 = scmp.lt.u32.totalorder %s1017_s0, %s1184_s7 }
 0x2f3   :  { %p1023_p11 = pnand %p1021_p10, %p1018_p9 }
 0x2f5   :  { %1026 = shalt.err (!%p1023_p11)
}
 0x2f6   :  { %689 = dma.vmem_to_hbm [thread:$0]  %s687_s15, 32, %s1184_s7, [#allocation4]  }
 0x2f7   :  { %1031 = dma.done.wait [#allocation4], 32  }
 0x2f8   :  { %1032 = vsyncadd [#allocation4], 4294967264 }
 0x2f9   :  { %1033 = dma.done.wait [#allocation10], 32  }
 0x2fa   :  { %1034 = vsyncadd [#allocation10], 4294967264 }
 0x2fb   :  { %706 = vsyncpa [#allocation3], 1 }
 0x2fc   :  { %707 = vsyncpa [#allocation6], 1 }
 0x2fd   :  { %708 = vsyncpa [#allocation4], 1 }
 0x2fe   :  { %709 = vsyncpa [#allocation10], 1 }

</bundles_post_ra>
